<compile_context>
chip_gen: v6e
topology: v6e:2x2x1
jax: 0.10.0
libtpu: 0.0.40
codegen_flags: <defaults>
</compile_context>

<pallas_src>
import jax
import jax.numpy as jnp
import numpy as np
from jax import lax
from jax.experimental import pallas as pl
from jax.experimental.pallas import tpu as pltpu

HIDDEN = 128
INPUT = 28
CLASSES = 10
NUM_LAYERS = 2          # the kernel hard-codes the 2-layer stack from the module
SUBLANE = 8
CLASSES_PAD = 128       # lane-dense FC output; sliced back to CLASSES in wrapper


def _sigmoid(x):
    # Single-EUP sigmoid: 0.5*tanh(0.5*x) + 0.5 (avoids a possible exp+divide
    # lowering; tanh is one EUP op per vreg).
    return 0.5 * jnp.tanh(0.5 * x) + 0.5


def _lstm_gates(gates, c):
    """LSTM nonlinearities on a (B, 4H) gate slab with columns pre-permuted
    to (i, f, o | g): one contiguous sigmoid stream + one tanh."""
    sig = _sigmoid(gates[:, :3 * HIDDEN])
    g = jnp.tanh(gates[:, 3 * HIDDEN:])
    i = sig[:, 0 * HIDDEN:1 * HIDDEN]
    f = sig[:, 1 * HIDDEN:2 * HIDDEN]
    o = sig[:, 2 * HIDDEN:3 * HIDDEN]
    c_new = f * c + i * g
    h_new = o * jnp.tanh(c_new)
    return h_new, c_new


def make_lstm_kernel(T, B):
    """Build the single-invocation 2-layer LSTM + FC kernel for static (T, B)."""

    def lstm_kernel(x_ref, wih0_ref, whh0_ref, b0_ref, wih1_ref, whh1_ref,
                    b1_ref, wfc_ref, bfc_ref, out_ref, xw0_ref):
        # ---- Prologue: layer-0 input projection for ALL timesteps as one
        # big MXU matmul, result kept in VMEM scratch (no HBM round-trip).
        #   x_ref  : (T*B, INPUT)  time-major, batch padded to sublane multiple
        #   xw0_ref: (T*B, 4H)     scratch
        xw0_ref[...] = (
            jnp.dot(x_ref[...], wih0_ref[...], preferred_element_type=jnp.float32)
            + b0_ref[...]
        )

        # Load weights once; pre-broadcast layer-1 bias so no broadcast sits
        # in the (unrolled) loop body.
        whh0 = whh0_ref[...]
        wih1 = wih1_ref[...]
        whh1 = whh1_ref[...]
        b1 = jnp.broadcast_to(b1_ref[...], (B, 4 * HIDDEN))

        zeros = jnp.zeros((B, HIDDEN), jnp.float32)   # h0 = c0 = 0 (torch.zeros)

        def step(t, carry):
            h0, c0, h1, c1 = carry
            # Layer-1 recurrent matmul depends only on h1_prev -> can overlap
            # with all of layer-0's work below.
            r1 = jnp.dot(h1, whh1, preferred_element_type=jnp.float32)

            # Layer 0: input projection was hoisted to the prologue.
            row = pl.multiple_of(t * B, SUBLANE)
            g0 = (xw0_ref[pl.ds(row, B), :]
                  + jnp.dot(h0, whh0, preferred_element_type=jnp.float32))
            h0, c0 = _lstm_gates(g0, c0)

            # Layer 1: two K=128 matmuls (no per-step concatenate).
            g1 = jnp.dot(h0, wih1, preferred_element_type=jnp.float32) + r1 + b1
            h1, c1 = _lstm_gates(g1, c1)
            return h0, c0, h1, c1

        unroll = True if T <= 32 else 8
        _, _, h1, _ = lax.fori_loop(0, T, step, (zeros, zeros, zeros, zeros),
                                    unroll=unroll)

        # out[:, -1, :] -> fc (lane-dense padded output, single full-width store).
        out_ref[...] = (
            jnp.dot(h1, wfc_ref[...], preferred_element_type=jnp.float32)
            + bfc_ref[...]
        )

    return lstm_kernel


def _permute_gate_cols(w):
    """Reorder gate column blocks (PyTorch i,f,g,o) -> (i,f,o | g).

    Works for both (K, 4H) weights and (1, 4H) biases."""
    return jnp.concatenate(
        [w[:, :2 * HIDDEN], w[:, 3 * HIDDEN:4 * HIDDEN], w[:, 2 * HIDDEN:3 * HIDDEN]],
        axis=1)


def rnn_forward(x, params):
    """x: (B, T, INPUT) float32, batch_first like PyTorch. Returns (B, CLASSES)."""
    wih0, whh0, b0, wih1, whh1, b1, wfc, bfc = params
    B, T, _ = x.shape
    b_pad = -(-B // SUBLANE) * SUBLANE           # pad batch to a sublane multiple

    # One-time gate-column permutation (free on the wrapper side).
    wih0p, whh0p, b0p = (_permute_gate_cols(a) for a in (wih0, whh0, b0))
    wih1p, whh1p, b1p = (_permute_gate_cols(a) for a in (wih1, whh1, b1))

    # Time-major, batch-padded, flattened input (tiny: T*B*28 f32).
    x_p = jnp.pad(x, ((0, b_pad - B), (0, 0), (0, 0)))
    x_tm = jnp.transpose(x_p, (1, 0, 2)).reshape(T * b_pad, INPUT)

    # Pad FC weight/bias so the final matmul + store are lane-dense.
    wfc_p = jnp.pad(wfc, ((0, 0), (0, CLASSES_PAD - CLASSES)))
    bfc_p = jnp.pad(bfc, ((0, 0), (0, CLASSES_PAD - CLASSES)))

    # No grid: whole working set (~1.5 MB incl. the xw0 scratch) stays resident
    # in VMEM for a single invocation -> no per-step pipeline overhead.
    vmem = pl.BlockSpec(memory_space=pltpu.MemorySpace.VMEM)
    out = pl.pallas_call(
        make_lstm_kernel(T, b_pad),
        out_shape=jax.ShapeDtypeStruct((b_pad, CLASSES_PAD), jnp.float32),
        in_specs=[vmem] * 9,
        out_specs=vmem,
        scratch_shapes=[pltpu.VMEM((T * b_pad, 4 * HIDDEN), jnp.float32)],
    )(x_tm, wih0p, whh0p, b0p, wih1p, whh1p, b1p, wfc_p, bfc_p)

    return out[:B, :CLASSES]


def init_params(key):
    """Deterministic init mirroring PyTorch default shapes (weights pre-transposed)."""
    ks = jax.random.split(key, 12)
    k_lstm = 1.0 / np.sqrt(HIDDEN)
    k_fc = 1.0 / np.sqrt(HIDDEN)

    def u(k, shape, bound):
        return jax.random.uniform(k, shape, jnp.float32, -bound, bound)

    # layer 0: W_ih (4H, INPUT), W_hh (4H, H) -> stored transposed
    wih0 = u(ks[0], (INPUT, 4 * HIDDEN), k_lstm)
    whh0 = u(ks[1], (HIDDEN, 4 * HIDDEN), k_lstm)
    b0 = (u(ks[2], (1, 4 * HIDDEN), k_lstm) + u(ks[3], (1, 4 * HIDDEN), k_lstm))
    # layer 1: W_ih (4H, H), W_hh (4H, H) -> stored transposed
    wih1 = u(ks[4], (HIDDEN, 4 * HIDDEN), k_lstm)
    whh1 = u(ks[5], (HIDDEN, 4 * HIDDEN), k_lstm)
    b1 = (u(ks[6], (1, 4 * HIDDEN), k_lstm) + u(ks[7], (1, 4 * HIDDEN), k_lstm))
    # fc: (CLASSES, H) -> stored transposed
    wfc = u(ks[8], (HIDDEN, CLASSES), k_fc)
    bfc = u(ks[9], (1, CLASSES), k_fc)
    return (wih0, whh0, b0, wih1, whh1, b1, wfc, bfc)


def rnn_reference(x, params):
    """Pure-JAX reference of the same forward (PyTorch gate order), for checking."""
    wih0, whh0, b0, wih1, whh1, b1, wfc, bfc = params
    B, T, _ = x.shape

    def cell(x_t, h, c, w_ih, w_hh, b):
        gates = x_t @ w_ih + h @ w_hh + b
        i, f, g, o = jnp.split(gates, 4, axis=-1)
        c = jax.nn.sigmoid(f) * c + jax.nn.sigmoid(i) * jnp.tanh(g)
        h = jax.nn.sigmoid(o) * jnp.tanh(c)
        return h, c

    h0 = c0 = h1 = c1 = jnp.zeros((B, HIDDEN), jnp.float32)
    for t in range(T):
        h0, c0 = cell(x[:, t], h0, c0, wih0, whh0, b0)
        h1, c1 = cell(h0, h1, c1, wih1, whh1, b1)
    return h1 @ wfc + bfc


if __name__ == "__main__":
    key = jax.random.PRNGKey(0)
    k_x, k_p = jax.random.split(key)

    B, T = 2, 8
    x = jax.random.normal(k_x, (B, T, INPUT), jnp.float32)
    params = init_params(k_p)

    fwd = jax.jit(rnn_forward)
    out = jax.block_until_ready(fwd(x, params))

    ref = jax.block_until_ready(rnn_reference(x, params))
    assert out.shape == (B, CLASSES)
    np.testing.assert_allclose(np.asarray(out), np.asarray(ref),
                               rtol=1e-3, atol=1e-3)
    print("KERNEL_OK")
</pallas_src>

<mosaic_0001>
module attributes {stable_mosaic.version = 11 : i64} {
  func.func @lstm_kernel(%arg0: memref<64x28xf32, #tpu.memory_space<vmem>>, %arg1: memref<28x512xf32, #tpu.memory_space<vmem>>, %arg2: memref<128x512xf32, #tpu.memory_space<vmem>>, %arg3: memref<1x512xf32, #tpu.memory_space<vmem>>, %arg4: memref<128x512xf32, #tpu.memory_space<vmem>>, %arg5: memref<128x512xf32, #tpu.memory_space<vmem>>, %arg6: memref<1x512xf32, #tpu.memory_space<vmem>>, %arg7: memref<128x128xf32, #tpu.memory_space<vmem>>, %arg8: memref<1x128xf32, #tpu.memory_space<vmem>>, %arg9: memref<8x128xf32, #tpu.memory_space<vmem>>, %arg10: memref<64x512xf32, #tpu.memory_space<vmem>>) attributes {dimension_semantics = [], scalar_prefetch = 0 : i64, scratch_operands = 1 : i64, tpu.core_type = #tpu.core_type<tc>} {
    %c0 = arith.constant 0 : index
    %c0_0 = arith.constant 0 : index
    %0 = vector.load %arg0[%c0, %c0_0] : memref<64x28xf32, #tpu.memory_space<vmem>>, vector<64x28xf32>
    %c0_1 = arith.constant 0 : index
    %c0_2 = arith.constant 0 : index
    %1 = vector.load %arg1[%c0_1, %c0_2] : memref<28x512xf32, #tpu.memory_space<vmem>>, vector<28x512xf32>
    %cst = arith.constant dense<0.000000e+00> : vector<64x512xf32>
    %2 = tpu.matmul %0, %1, %cst {dimension_numbers = #tpu.dot_dimension_numbers<[1], [0], [0], [1], [0, 0, 1, 1], [], []>} : vector<64x28xf32>, vector<28x512xf32>, vector<64x512xf32> -> vector<64x512xf32>
    %c0_3 = arith.constant 0 : index
    %c0_4 = arith.constant 0 : index
    %3 = vector.load %arg3[%c0_3, %c0_4] : memref<1x512xf32, #tpu.memory_space<vmem>>, vector<1x512xf32>
    %4 = vector.broadcast %3 : vector<1x512xf32> to vector<64x512xf32>
    %5 = arith.addf %2, %4 : vector<64x512xf32>
    %c0_5 = arith.constant 0 : index
    %c0_6 = arith.constant 0 : index
    %6 = vector.load %arg10[%c0_5, %c0_6] : memref<64x512xf32, #tpu.memory_space<vmem>>, vector<64x512xf32>
    tpu.vector_store %arg10[%c0_5, %c0_6], %5 {strides = array<i32>} : memref<64x512xf32, #tpu.memory_space<vmem>>, vector<64x512xf32>,
    %c0_7 = arith.constant 0 : index
    %c0_8 = arith.constant 0 : index
    %7 = vector.load %arg2[%c0_7, %c0_8] : memref<128x512xf32, #tpu.memory_space<vmem>>, vector<128x512xf32>
    %c0_9 = arith.constant 0 : index
    %c0_10 = arith.constant 0 : index
    %8 = vector.load %arg4[%c0_9, %c0_10] : memref<128x512xf32, #tpu.memory_space<vmem>>, vector<128x512xf32>
    %c0_11 = arith.constant 0 : index
    %c0_12 = arith.constant 0 : index
    %9 = vector.load %arg5[%c0_11, %c0_12] : memref<128x512xf32, #tpu.memory_space<vmem>>, vector<128x512xf32>
    %c0_13 = arith.constant 0 : index
    %c0_14 = arith.constant 0 : index
    %10 = vector.load %arg6[%c0_13, %c0_14] : memref<1x512xf32, #tpu.memory_space<vmem>>, vector<1x512xf32>
    %11 = vector.shape_cast %10 : vector<1x512xf32> to vector<1x512xf32>
    %12 = vector.broadcast %11 : vector<1x512xf32> to vector<8x512xf32>
    %cst_15 = arith.constant 0.000000e+00 : f32
    %13 = vector.broadcast %cst_15 : f32 to vector<8x128xf32>
    %c0_i32 = arith.constant 0 : i32
    %cst_16 = arith.constant dense<0.000000e+00> : vector<8x512xf32>
    %14 = tpu.matmul %13, %9, %cst_16 {dimension_numbers = #tpu.dot_dimension_numbers<[1], [0], [0], [1], [0, 0, 1, 1], [], []>} : vector<8x128xf32>, vector<128x512xf32>, vector<8x512xf32> -> vector<8x512xf32>
    %c8_i32 = arith.constant 8 : i32
    %15 = arith.muli %c0_i32, %c8_i32 : i32
    %16 = tpu.assume_multiple %15, 8 : i32
    %17 = arith.index_cast %16 : i32 to index
    %c0_17 = arith.constant 0 : index
    %18 = vector.load %arg10[%17, %c0_17] : memref<64x512xf32, #tpu.memory_space<vmem>>, vector<8x512xf32>
    %cst_18 = arith.constant dense<0.000000e+00> : vector<8x512xf32>
    %19 = tpu.matmul %13, %7, %cst_18 {dimension_numbers = #tpu.dot_dimension_numbers<[1], [0], [0], [1], [0, 0, 1, 1], [], []>} : vector<8x128xf32>, vector<128x512xf32>, vector<8x512xf32> -> vector<8x512xf32>
    %20 = arith.addf %18, %19 : vector<8x512xf32>
    %21 = vector.extract_strided_slice %20 {offsets = [0, 0], sizes = [8, 384], strides = [1, 1]} : vector<8x512xf32> to vector<8x384xf32>
    %cst_19 = arith.constant 5.000000e-01 : f32
    %22 = vector.broadcast %cst_19 : f32 to vector<8x384xf32>
    %23 = arith.mulf %22, %21 : vector<8x384xf32>
    %24 = math.tanh %23 : vector<8x384xf32>
    %cst_20 = arith.constant 5.000000e-01 : f32
    %25 = vector.broadcast %cst_20 : f32 to vector<8x384xf32>
    %26 = arith.mulf %25, %24 : vector<8x384xf32>
    %cst_21 = arith.constant 5.000000e-01 : f32
    %27 = vector.broadcast %cst_21 : f32 to vector<8x384xf32>
    %28 = arith.addf %26, %27 : vector<8x384xf32>
    %29 = vector.extract_strided_slice %20 {offsets = [0, 384], sizes = [8, 128], strides = [1, 1]} : vector<8x512xf32> to vector<8x128xf32>
    %30 = math.tanh %29 : vector<8x128xf32>
    %31 = vector.extract_strided_slice %28 {offsets = [0, 0], sizes = [8, 128], strides = [1, 1]} : vector<8x384xf32> to vector<8x128xf32>
    %32 = vector.extract_strided_slice %28 {offsets = [0, 128], sizes = [8, 128], strides = [1, 1]} : vector<8x384xf32> to vector<8x128xf32>
    %33 = vector.extract_strided_slice %28 {offsets = [0, 256], sizes = [8, 128], strides = [1, 1]} : vector<8x384xf32> to vector<8x128xf32>
    %34 = arith.mulf %32, %13 : vector<8x128xf32>
    %35 = arith.mulf %31, %30 : vector<8x128xf32>
    %36 = arith.addf %34, %35 : vector<8x128xf32>
    %37 = math.tanh %36 : vector<8x128xf32>
    %38 = arith.mulf %33, %37 : vector<8x128xf32>
    %cst_22 = arith.constant dense<0.000000e+00> : vector<8x512xf32>
    %39 = tpu.matmul %38, %8, %cst_22 {dimension_numbers = #tpu.dot_dimension_numbers<[1], [0], [0], [1], [0, 0, 1, 1], [], []>} : vector<8x128xf32>, vector<128x512xf32>, vector<8x512xf32> -> vector<8x512xf32>
    %40 = arith.addf %39, %14 : vector<8x512xf32>
    %41 = arith.addf %40, %12 : vector<8x512xf32>
    %42 = vector.extract_strided_slice %41 {offsets = [0, 0], sizes = [8, 384], strides = [1, 1]} : vector<8x512xf32> to vector<8x384xf32>
    %cst_23 = arith.constant 5.000000e-01 : f32
    %43 = vector.broadcast %cst_23 : f32 to vector<8x384xf32>
    %44 = arith.mulf %43, %42 : vector<8x384xf32>
    %45 = math.tanh %44 : vector<8x384xf32>
    %cst_24 = arith.constant 5.000000e-01 : f32
    %46 = vector.broadcast %cst_24 : f32 to vector<8x384xf32>
    %47 = arith.mulf %46, %45 : vector<8x384xf32>
    %cst_25 = arith.constant 5.000000e-01 : f32
    %48 = vector.broadcast %cst_25 : f32 to vector<8x384xf32>
    %49 = arith.addf %47, %48 : vector<8x384xf32>
    %50 = vector.extract_strided_slice %41 {offsets = [0, 384], sizes = [8, 128], strides = [1, 1]} : vector<8x512xf32> to vector<8x128xf32>
    %51 = math.tanh %50 : vector<8x128xf32>
    %52 = vector.extract_strided_slice %49 {offsets = [0, 0], sizes = [8, 128], strides = [1, 1]} : vector<8x384xf32> to vector<8x128xf32>
    %53 = vector.extract_strided_slice %49 {offsets = [0, 128], sizes = [8, 128], strides = [1, 1]} : vector<8x384xf32> to vector<8x128xf32>
    %54 = vector.extract_strided_slice %49 {offsets = [0, 256], sizes = [8, 128], strides = [1, 1]} : vector<8x384xf32> to vector<8x128xf32>
    %55 = arith.mulf %53, %13 : vector<8x128xf32>
    %56 = arith.mulf %52, %51 : vector<8x128xf32>
    %57 = arith.addf %55, %56 : vector<8x128xf32>
    %58 = math.tanh %57 : vector<8x128xf32>
    %59 = arith.mulf %54, %58 : vector<8x128xf32>
    %c1_i32 = arith.constant 1 : i32
    %cst_26 = arith.constant dense<0.000000e+00> : vector<8x512xf32>
    %60 = tpu.matmul %59, %9, %cst_26 {dimension_numbers = #tpu.dot_dimension_numbers<[1], [0], [0], [1], [0, 0, 1, 1], [], []>} : vector<8x128xf32>, vector<128x512xf32>, vector<8x512xf32> -> vector<8x512xf32>
    %c8_i32_27 = arith.constant 8 : i32
    %61 = arith.muli %c1_i32, %c8_i32_27 : i32
    %62 = tpu.assume_multiple %61, 8 : i32
    %63 = arith.index_cast %62 : i32 to index
    %c0_28 = arith.constant 0 : index
    %64 = vector.load %arg10[%63, %c0_28] : memref<64x512xf32, #tpu.memory_space<vmem>>, vector<8x512xf32>
    %cst_29 = arith.constant dense<0.000000e+00> : vector<8x512xf32>
    %65 = tpu.matmul %38, %7, %cst_29 {dimension_numbers = #tpu.dot_dimension_numbers<[1], [0], [0], [1], [0, 0, 1, 1], [], []>} : vector<8x128xf32>, vector<128x512xf32>, vector<8x512xf32> -> vector<8x512xf32>
    %66 = arith.addf %64, %65 : vector<8x512xf32>
    %67 = vector.extract_strided_slice %66 {offsets = [0, 0], sizes = [8, 384], strides = [1, 1]} : vector<8x512xf32> to vector<8x384xf32>
    %cst_30 = arith.constant 5.000000e-01 : f32
    %68 = vector.broadcast %cst_30 : f32 to vector<8x384xf32>
    %69 = arith.mulf %68, %67 : vector<8x384xf32>
    %70 = math.tanh %69 : vector<8x384xf32>
    %cst_31 = arith.constant 5.000000e-01 : f32
    %71 = vector.broadcast %cst_31 : f32 to vector<8x384xf32>
    %72 = arith.mulf %71, %70 : vector<8x384xf32>
    %cst_32 = arith.constant 5.000000e-01 : f32
    %73 = vector.broadcast %cst_32 : f32 to vector<8x384xf32>
    %74 = arith.addf %72, %73 : vector<8x384xf32>
    %75 = vector.extract_strided_slice %66 {offsets = [0, 384], sizes = [8, 128], strides = [1, 1]} : vector<8x512xf32> to vector<8x128xf32>
    %76 = math.tanh %75 : vector<8x128xf32>
    %77 = vector.extract_strided_slice %74 {offsets = [0, 0], sizes = [8, 128], strides = [1, 1]} : vector<8x384xf32> to vector<8x128xf32>
    %78 = vector.extract_strided_slice %74 {offsets = [0, 128], sizes = [8, 128], strides = [1, 1]} : vector<8x384xf32> to vector<8x128xf32>
    %79 = vector.extract_strided_slice %74 {offsets = [0, 256], sizes = [8, 128], strides = [1, 1]} : vector<8x384xf32> to vector<8x128xf32>
    %80 = arith.mulf %78, %36 : vector<8x128xf32>
    %81 = arith.mulf %77, %76 : vector<8x128xf32>
    %82 = arith.addf %80, %81 : vector<8x128xf32>
    %83 = math.tanh %82 : vector<8x128xf32>
    %84 = arith.mulf %79, %83 : vector<8x128xf32>
    %cst_33 = arith.constant dense<0.000000e+00> : vector<8x512xf32>
    %85 = tpu.matmul %84, %8, %cst_33 {dimension_numbers = #tpu.dot_dimension_numbers<[1], [0], [0], [1], [0, 0, 1, 1], [], []>} : vector<8x128xf32>, vector<128x512xf32>, vector<8x512xf32> -> vector<8x512xf32>
    %86 = arith.addf %85, %60 : vector<8x512xf32>
    %87 = arith.addf %86, %12 : vector<8x512xf32>
    %88 = vector.extract_strided_slice %87 {offsets = [0, 0], sizes = [8, 384], strides = [1, 1]} : vector<8x512xf32> to vector<8x384xf32>
    %cst_34 = arith.constant 5.000000e-01 : f32
    %89 = vector.broadcast %cst_34 : f32 to vector<8x384xf32>
    %90 = arith.mulf %89, %88 : vector<8x384xf32>
    %91 = math.tanh %90 : vector<8x384xf32>
    %cst_35 = arith.constant 5.000000e-01 : f32
    %92 = vector.broadcast %cst_35 : f32 to vector<8x384xf32>
    %93 = arith.mulf %92, %91 : vector<8x384xf32>
    %cst_36 = arith.constant 5.000000e-01 : f32
    %94 = vector.broadcast %cst_36 : f32 to vector<8x384xf32>
    %95 = arith.addf %93, %94 : vector<8x384xf32>
    %96 = vector.extract_strided_slice %87 {offsets = [0, 384], sizes = [8, 128], strides = [1, 1]} : vector<8x512xf32> to vector<8x128xf32>
    %97 = math.tanh %96 : vector<8x128xf32>
    %98 = vector.extract_strided_slice %95 {offsets = [0, 0], sizes = [8, 128], strides = [1, 1]} : vector<8x384xf32> to vector<8x128xf32>
    %99 = vector.extract_strided_slice %95 {offsets = [0, 128], sizes = [8, 128], strides = [1, 1]} : vector<8x384xf32> to vector<8x128xf32>
    %100 = vector.extract_strided_slice %95 {offsets = [0, 256], sizes = [8, 128], strides = [1, 1]} : vector<8x384xf32> to vector<8x128xf32>
    %101 = arith.mulf %99, %57 : vector<8x128xf32>
    %102 = arith.mulf %98, %97 : vector<8x128xf32>
    %103 = arith.addf %101, %102 : vector<8x128xf32>
    %104 = math.tanh %103 : vector<8x128xf32>
    %105 = arith.mulf %100, %104 : vector<8x128xf32>
    %c2_i32 = arith.constant 2 : i32
    %cst_37 = arith.constant dense<0.000000e+00> : vector<8x512xf32>
    %106 = tpu.matmul %105, %9, %cst_37 {dimension_numbers = #tpu.dot_dimension_numbers<[1], [0], [0], [1], [0, 0, 1, 1], [], []>} : vector<8x128xf32>, vector<128x512xf32>, vector<8x512xf32> -> vector<8x512xf32>
    %c8_i32_38 = arith.constant 8 : i32
    %107 = arith.muli %c2_i32, %c8_i32_38 : i32
    %108 = tpu.assume_multiple %107, 8 : i32
    %109 = arith.index_cast %108 : i32 to index
    %c0_39 = arith.constant 0 : index
    %110 = vector.load %arg10[%109, %c0_39] : memref<64x512xf32, #tpu.memory_space<vmem>>, vector<8x512xf32>
    %cst_40 = arith.constant dense<0.000000e+00> : vector<8x512xf32>
    %111 = tpu.matmul %84, %7, %cst_40 {dimension_numbers = #tpu.dot_dimension_numbers<[1], [0], [0], [1], [0, 0, 1, 1], [], []>} : vector<8x128xf32>, vector<128x512xf32>, vector<8x512xf32> -> vector<8x512xf32>
    %112 = arith.addf %110, %111 : vector<8x512xf32>
    %113 = vector.extract_strided_slice %112 {offsets = [0, 0], sizes = [8, 384], strides = [1, 1]} : vector<8x512xf32> to vector<8x384xf32>
    %cst_41 = arith.constant 5.000000e-01 : f32
    %114 = vector.broadcast %cst_41 : f32 to vector<8x384xf32>
    %115 = arith.mulf %114, %113 : vector<8x384xf32>
    %116 = math.tanh %115 : vector<8x384xf32>
    %cst_42 = arith.constant 5.000000e-01 : f32
    %117 = vector.broadcast %cst_42 : f32 to vector<8x384xf32>
    %118 = arith.mulf %117, %116 : vector<8x384xf32>
    %cst_43 = arith.constant 5.000000e-01 : f32
    %119 = vector.broadcast %cst_43 : f32 to vector<8x384xf32>
    %120 = arith.addf %118, %119 : vector<8x384xf32>
    %121 = vector.extract_strided_slice %112 {offsets = [0, 384], sizes = [8, 128], strides = [1, 1]} : vector<8x512xf32> to vector<8x128xf32>
    %122 = math.tanh %121 : vector<8x128xf32>
    %123 = vector.extract_strided_slice %120 {offsets = [0, 0], sizes = [8, 128], strides = [1, 1]} : vector<8x384xf32> to vector<8x128xf32>
    %124 = vector.extract_strided_slice %120 {offsets = [0, 128], sizes = [8, 128], strides = [1, 1]} : vector<8x384xf32> to vector<8x128xf32>
    %125 = vector.extract_strided_slice %120 {offsets = [0, 256], sizes = [8, 128], strides = [1, 1]} : vector<8x384xf32> to vector<8x128xf32>
    %126 = arith.mulf %124, %82 : vector<8x128xf32>
    %127 = arith.mulf %123, %122 : vector<8x128xf32>
    %128 = arith.addf %126, %127 : vector<8x128xf32>
    %129 = math.tanh %128 : vector<8x128xf32>
    %130 = arith.mulf %125, %129 : vector<8x128xf32>
    %cst_44 = arith.constant dense<0.000000e+00> : vector<8x512xf32>
    %131 = tpu.matmul %130, %8, %cst_44 {dimension_numbers = #tpu.dot_dimension_numbers<[1], [0], [0], [1], [0, 0, 1, 1], [], []>} : vector<8x128xf32>, vector<128x512xf32>, vector<8x512xf32> -> vector<8x512xf32>
    %132 = arith.addf %131, %106 : vector<8x512xf32>
    %133 = arith.addf %132, %12 : vector<8x512xf32>
    %134 = vector.extract_strided_slice %133 {offsets = [0, 0], sizes = [8, 384], strides = [1, 1]} : vector<8x512xf32> to vector<8x384xf32>
    %cst_45 = arith.constant 5.000000e-01 : f32
    %135 = vector.broadcast %cst_45 : f32 to vector<8x384xf32>
    %136 = arith.mulf %135, %134 : vector<8x384xf32>
    %137 = math.tanh %136 : vector<8x384xf32>
    %cst_46 = arith.constant 5.000000e-01 : f32
    %138 = vector.broadcast %cst_46 : f32 to vector<8x384xf32>
    %139 = arith.mulf %138, %137 : vector<8x384xf32>
    %cst_47 = arith.constant 5.000000e-01 : f32
    %140 = vector.broadcast %cst_47 : f32 to vector<8x384xf32>
    %141 = arith.addf %139, %140 : vector<8x384xf32>
    %142 = vector.extract_strided_slice %133 {offsets = [0, 384], sizes = [8, 128], strides = [1, 1]} : vector<8x512xf32> to vector<8x128xf32>
    %143 = math.tanh %142 : vector<8x128xf32>
    %144 = vector.extract_strided_slice %141 {offsets = [0, 0], sizes = [8, 128], strides = [1, 1]} : vector<8x384xf32> to vector<8x128xf32>
    %145 = vector.extract_strided_slice %141 {offsets = [0, 128], sizes = [8, 128], strides = [1, 1]} : vector<8x384xf32> to vector<8x128xf32>
    %146 = vector.extract_strided_slice %141 {offsets = [0, 256], sizes = [8, 128], strides = [1, 1]} : vector<8x384xf32> to vector<8x128xf32>
    %147 = arith.mulf %145, %103 : vector<8x128xf32>
    %148 = arith.mulf %144, %143 : vector<8x128xf32>
    %149 = arith.addf %147, %148 : vector<8x128xf32>
    %150 = math.tanh %149 : vector<8x128xf32>
    %151 = arith.mulf %146, %150 : vector<8x128xf32>
    %c3_i32 = arith.constant 3 : i32
    %cst_48 = arith.constant dense<0.000000e+00> : vector<8x512xf32>
    %152 = tpu.matmul %151, %9, %cst_48 {dimension_numbers = #tpu.dot_dimension_numbers<[1], [0], [0], [1], [0, 0, 1, 1], [], []>} : vector<8x128xf32>, vector<128x512xf32>, vector<8x512xf32> -> vector<8x512xf32>
    %c8_i32_49 = arith.constant 8 : i32
    %153 = arith.muli %c3_i32, %c8_i32_49 : i32
    %154 = tpu.assume_multiple %153, 8 : i32
    %155 = arith.index_cast %154 : i32 to index
    %c0_50 = arith.constant 0 : index
    %156 = vector.load %arg10[%155, %c0_50] : memref<64x512xf32, #tpu.memory_space<vmem>>, vector<8x512xf32>
    %cst_51 = arith.constant dense<0.000000e+00> : vector<8x512xf32>
    %157 = tpu.matmul %130, %7, %cst_51 {dimension_numbers = #tpu.dot_dimension_numbers<[1], [0], [0], [1], [0, 0, 1, 1], [], []>} : vector<8x128xf32>, vector<128x512xf32>, vector<8x512xf32> -> vector<8x512xf32>
    %158 = arith.addf %156, %157 : vector<8x512xf32>
    %159 = vector.extract_strided_slice %158 {offsets = [0, 0], sizes = [8, 384], strides = [1, 1]} : vector<8x512xf32> to vector<8x384xf32>
    %cst_52 = arith.constant 5.000000e-01 : f32
    %160 = vector.broadcast %cst_52 : f32 to vector<8x384xf32>
    %161 = arith.mulf %160, %159 : vector<8x384xf32>
    %162 = math.tanh %161 : vector<8x384xf32>
    %cst_53 = arith.constant 5.000000e-01 : f32
    %163 = vector.broadcast %cst_53 : f32 to vector<8x384xf32>
    %164 = arith.mulf %163, %162 : vector<8x384xf32>
    %cst_54 = arith.constant 5.000000e-01 : f32
    %165 = vector.broadcast %cst_54 : f32 to vector<8x384xf32>
    %166 = arith.addf %164, %165 : vector<8x384xf32>
    %167 = vector.extract_strided_slice %158 {offsets = [0, 384], sizes = [8, 128], strides = [1, 1]} : vector<8x512xf32> to vector<8x128xf32>
    %168 = math.tanh %167 : vector<8x128xf32>
    %169 = vector.extract_strided_slice %166 {offsets = [0, 0], sizes = [8, 128], strides = [1, 1]} : vector<8x384xf32> to vector<8x128xf32>
    %170 = vector.extract_strided_slice %166 {offsets = [0, 128], sizes = [8, 128], strides = [1, 1]} : vector<8x384xf32> to vector<8x128xf32>
    %171 = vector.extract_strided_slice %166 {offsets = [0, 256], sizes = [8, 128], strides = [1, 1]} : vector<8x384xf32> to vector<8x128xf32>
    %172 = arith.mulf %170, %128 : vector<8x128xf32>
    %173 = arith.mulf %169, %168 : vector<8x128xf32>
    %174 = arith.addf %172, %173 : vector<8x128xf32>
    %175 = math.tanh %174 : vector<8x128xf32>
    %176 = arith.mulf %171, %175 : vector<8x128xf32>
    %cst_55 = arith.constant dense<0.000000e+00> : vector<8x512xf32>
    %177 = tpu.matmul %176, %8, %cst_55 {dimension_numbers = #tpu.dot_dimension_numbers<[1], [0], [0], [1], [0, 0, 1, 1], [], []>} : vector<8x128xf32>, vector<128x512xf32>, vector<8x512xf32> -> vector<8x512xf32>
    %178 = arith.addf %177, %152 : vector<8x512xf32>
    %179 = arith.addf %178, %12 : vector<8x512xf32>
    %180 = vector.extract_strided_slice %179 {offsets = [0, 0], sizes = [8, 384], strides = [1, 1]} : vector<8x512xf32> to vector<8x384xf32>
    %cst_56 = arith.constant 5.000000e-01 : f32
    %181 = vector.broadcast %cst_56 : f32 to vector<8x384xf32>
    %182 = arith.mulf %181, %180 : vector<8x384xf32>
    %183 = math.tanh %182 : vector<8x384xf32>
    %cst_57 = arith.constant 5.000000e-01 : f32
    %184 = vector.broadcast %cst_57 : f32 to vector<8x384xf32>
    %185 = arith.mulf %184, %183 : vector<8x384xf32>
    %cst_58 = arith.constant 5.000000e-01 : f32
    %186 = vector.broadcast %cst_58 : f32 to vector<8x384xf32>
    %187 = arith.addf %185, %186 : vector<8x384xf32>
    %188 = vector.extract_strided_slice %179 {offsets = [0, 384], sizes = [8, 128], strides = [1, 1]} : vector<8x512xf32> to vector<8x128xf32>
    %189 = math.tanh %188 : vector<8x128xf32>
    %190 = vector.extract_strided_slice %187 {offsets = [0, 0], sizes = [8, 128], strides = [1, 1]} : vector<8x384xf32> to vector<8x128xf32>
    %191 = vector.extract_strided_slice %187 {offsets = [0, 128], sizes = [8, 128], strides = [1, 1]} : vector<8x384xf32> to vector<8x128xf32>
    %192 = vector.extract_strided_slice %187 {offsets = [0, 256], sizes = [8, 128], strides = [1, 1]} : vector<8x384xf32> to vector<8x128xf32>
    %193 = arith.mulf %191, %149 : vector<8x128xf32>
    %194 = arith.mulf %190, %189 : vector<8x128xf32>
    %195 = arith.addf %193, %194 : vector<8x128xf32>
    %196 = math.tanh %195 : vector<8x128xf32>
    %197 = arith.mulf %192, %196 : vector<8x128xf32>
    %c4_i32 = arith.constant 4 : i32
    %cst_59 = arith.constant dense<0.000000e+00> : vector<8x512xf32>
    %198 = tpu.matmul %197, %9, %cst_59 {dimension_numbers = #tpu.dot_dimension_numbers<[1], [0], [0], [1], [0, 0, 1, 1], [], []>} : vector<8x128xf32>, vector<128x512xf32>, vector<8x512xf32> -> vector<8x512xf32>
    %c8_i32_60 = arith.constant 8 : i32
    %199 = arith.muli %c4_i32, %c8_i32_60 : i32
    %200 = tpu.assume_multiple %199, 8 : i32
    %201 = arith.index_cast %200 : i32 to index
    %c0_61 = arith.constant 0 : index
    %202 = vector.load %arg10[%201, %c0_61] : memref<64x512xf32, #tpu.memory_space<vmem>>, vector<8x512xf32>
    %cst_62 = arith.constant dense<0.000000e+00> : vector<8x512xf32>
    %203 = tpu.matmul %176, %7, %cst_62 {dimension_numbers = #tpu.dot_dimension_numbers<[1], [0], [0], [1], [0, 0, 1, 1], [], []>} : vector<8x128xf32>, vector<128x512xf32>, vector<8x512xf32> -> vector<8x512xf32>
    %204 = arith.addf %202, %203 : vector<8x512xf32>
    %205 = vector.extract_strided_slice %204 {offsets = [0, 0], sizes = [8, 384], strides = [1, 1]} : vector<8x512xf32> to vector<8x384xf32>
    %cst_63 = arith.constant 5.000000e-01 : f32
    %206 = vector.broadcast %cst_63 : f32 to vector<8x384xf32>
    %207 = arith.mulf %206, %205 : vector<8x384xf32>
    %208 = math.tanh %207 : vector<8x384xf32>
    %cst_64 = arith.constant 5.000000e-01 : f32
    %209 = vector.broadcast %cst_64 : f32 to vector<8x384xf32>
    %210 = arith.mulf %209, %208 : vector<8x384xf32>
    %cst_65 = arith.constant 5.000000e-01 : f32
    %211 = vector.broadcast %cst_65 : f32 to vector<8x384xf32>
    %212 = arith.addf %210, %211 : vector<8x384xf32>
    %213 = vector.extract_strided_slice %204 {offsets = [0, 384], sizes = [8, 128], strides = [1, 1]} : vector<8x512xf32> to vector<8x128xf32>
    %214 = math.tanh %213 : vector<8x128xf32>
    %215 = vector.extract_strided_slice %212 {offsets = [0, 0], sizes = [8, 128], strides = [1, 1]} : vector<8x384xf32> to vector<8x128xf32>
    %216 = vector.extract_strided_slice %212 {offsets = [0, 128], sizes = [8, 128], strides = [1, 1]} : vector<8x384xf32> to vector<8x128xf32>
    %217 = vector.extract_strided_slice %212 {offsets = [0, 256], sizes = [8, 128], strides = [1, 1]} : vector<8x384xf32> to vector<8x128xf32>
    %218 = arith.mulf %216, %174 : vector<8x128xf32>
    %219 = arith.mulf %215, %214 : vector<8x128xf32>
    %220 = arith.addf %218, %219 : vector<8x128xf32>
    %221 = math.tanh %220 : vector<8x128xf32>
    %222 = arith.mulf %217, %221 : vector<8x128xf32>
    %cst_66 = arith.constant dense<0.000000e+00> : vector<8x512xf32>
    %223 = tpu.matmul %222, %8, %cst_66 {dimension_numbers = #tpu.dot_dimension_numbers<[1], [0], [0], [1], [0, 0, 1, 1], [], []>} : vector<8x128xf32>, vector<128x512xf32>, vector<8x512xf32> -> vector<8x512xf32>
    %224 = arith.addf %223, %198 : vector<8x512xf32>
    %225 = arith.addf %224, %12 : vector<8x512xf32>
    %226 = vector.extract_strided_slice %225 {offsets = [0, 0], sizes = [8, 384], strides = [1, 1]} : vector<8x512xf32> to vector<8x384xf32>
    %cst_67 = arith.constant 5.000000e-01 : f32
    %227 = vector.broadcast %cst_67 : f32 to vector<8x384xf32>
    %228 = arith.mulf %227, %226 : vector<8x384xf32>
    %229 = math.tanh %228 : vector<8x384xf32>
    %cst_68 = arith.constant 5.000000e-01 : f32
    %230 = vector.broadcast %cst_68 : f32 to vector<8x384xf32>
    %231 = arith.mulf %230, %229 : vector<8x384xf32>
    %cst_69 = arith.constant 5.000000e-01 : f32
    %232 = vector.broadcast %cst_69 : f32 to vector<8x384xf32>
    %233 = arith.addf %231, %232 : vector<8x384xf32>
    %234 = vector.extract_strided_slice %225 {offsets = [0, 384], sizes = [8, 128], strides = [1, 1]} : vector<8x512xf32> to vector<8x128xf32>
    %235 = math.tanh %234 : vector<8x128xf32>
    %236 = vector.extract_strided_slice %233 {offsets = [0, 0], sizes = [8, 128], strides = [1, 1]} : vector<8x384xf32> to vector<8x128xf32>
    %237 = vector.extract_strided_slice %233 {offsets = [0, 128], sizes = [8, 128], strides = [1, 1]} : vector<8x384xf32> to vector<8x128xf32>
    %238 = vector.extract_strided_slice %233 {offsets = [0, 256], sizes = [8, 128], strides = [1, 1]} : vector<8x384xf32> to vector<8x128xf32>
    %239 = arith.mulf %237, %195 : vector<8x128xf32>
    %240 = arith.mulf %236, %235 : vector<8x128xf32>
    %241 = arith.addf %239, %240 : vector<8x128xf32>
    %242 = math.tanh %241 : vector<8x128xf32>
    %243 = arith.mulf %238, %242 : vector<8x128xf32>
    %c5_i32 = arith.constant 5 : i32
    %cst_70 = arith.constant dense<0.000000e+00> : vector<8x512xf32>
    %244 = tpu.matmul %243, %9, %cst_70 {dimension_numbers = #tpu.dot_dimension_numbers<[1], [0], [0], [1], [0, 0, 1, 1], [], []>} : vector<8x128xf32>, vector<128x512xf32>, vector<8x512xf32> -> vector<8x512xf32>
    %c8_i32_71 = arith.constant 8 : i32
    %245 = arith.muli %c5_i32, %c8_i32_71 : i32
    %246 = tpu.assume_multiple %245, 8 : i32
    %247 = arith.index_cast %246 : i32 to index
    %c0_72 = arith.constant 0 : index
    %248 = vector.load %arg10[%247, %c0_72] : memref<64x512xf32, #tpu.memory_space<vmem>>, vector<8x512xf32>
    %cst_73 = arith.constant dense<0.000000e+00> : vector<8x512xf32>
    %249 = tpu.matmul %222, %7, %cst_73 {dimension_numbers = #tpu.dot_dimension_numbers<[1], [0], [0], [1], [0, 0, 1, 1], [], []>} : vector<8x128xf32>, vector<128x512xf32>, vector<8x512xf32> -> vector<8x512xf32>
    %250 = arith.addf %248, %249 : vector<8x512xf32>
    %251 = vector.extract_strided_slice %250 {offsets = [0, 0], sizes = [8, 384], strides = [1, 1]} : vector<8x512xf32> to vector<8x384xf32>
    %cst_74 = arith.constant 5.000000e-01 : f32
    %252 = vector.broadcast %cst_74 : f32 to vector<8x384xf32>
    %253 = arith.mulf %252, %251 : vector<8x384xf32>
    %254 = math.tanh %253 : vector<8x384xf32>
    %cst_75 = arith.constant 5.000000e-01 : f32
    %255 = vector.broadcast %cst_75 : f32 to vector<8x384xf32>
    %256 = arith.mulf %255, %254 : vector<8x384xf32>
    %cst_76 = arith.constant 5.000000e-01 : f32
    %257 = vector.broadcast %cst_76 : f32 to vector<8x384xf32>
    %258 = arith.addf %256, %257 : vector<8x384xf32>
    %259 = vector.extract_strided_slice %250 {offsets = [0, 384], sizes = [8, 128], strides = [1, 1]} : vector<8x512xf32> to vector<8x128xf32>
    %260 = math.tanh %259 : vector<8x128xf32>
    %261 = vector.extract_strided_slice %258 {offsets = [0, 0], sizes = [8, 128], strides = [1, 1]} : vector<8x384xf32> to vector<8x128xf32>
    %262 = vector.extract_strided_slice %258 {offsets = [0, 128], sizes = [8, 128], strides = [1, 1]} : vector<8x384xf32> to vector<8x128xf32>
    %263 = vector.extract_strided_slice %258 {offsets = [0, 256], sizes = [8, 128], strides = [1, 1]} : vector<8x384xf32> to vector<8x128xf32>
    %264 = arith.mulf %262, %220 : vector<8x128xf32>
    %265 = arith.mulf %261, %260 : vector<8x128xf32>
    %266 = arith.addf %264, %265 : vector<8x128xf32>
    %267 = math.tanh %266 : vector<8x128xf32>
    %268 = arith.mulf %263, %267 : vector<8x128xf32>
    %cst_77 = arith.constant dense<0.000000e+00> : vector<8x512xf32>
    %269 = tpu.matmul %268, %8, %cst_77 {dimension_numbers = #tpu.dot_dimension_numbers<[1], [0], [0], [1], [0, 0, 1, 1], [], []>} : vector<8x128xf32>, vector<128x512xf32>, vector<8x512xf32> -> vector<8x512xf32>
    %270 = arith.addf %269, %244 : vector<8x512xf32>
    %271 = arith.addf %270, %12 : vector<8x512xf32>
    %272 = vector.extract_strided_slice %271 {offsets = [0, 0], sizes = [8, 384], strides = [1, 1]} : vector<8x512xf32> to vector<8x384xf32>
    %cst_78 = arith.constant 5.000000e-01 : f32
    %273 = vector.broadcast %cst_78 : f32 to vector<8x384xf32>
    %274 = arith.mulf %273, %272 : vector<8x384xf32>
    %275 = math.tanh %274 : vector<8x384xf32>
    %cst_79 = arith.constant 5.000000e-01 : f32
    %276 = vector.broadcast %cst_79 : f32 to vector<8x384xf32>
    %277 = arith.mulf %276, %275 : vector<8x384xf32>
    %cst_80 = arith.constant 5.000000e-01 : f32
    %278 = vector.broadcast %cst_80 : f32 to vector<8x384xf32>
    %279 = arith.addf %277, %278 : vector<8x384xf32>
    %280 = vector.extract_strided_slice %271 {offsets = [0, 384], sizes = [8, 128], strides = [1, 1]} : vector<8x512xf32> to vector<8x128xf32>
    %281 = math.tanh %280 : vector<8x128xf32>
    %282 = vector.extract_strided_slice %279 {offsets = [0, 0], sizes = [8, 128], strides = [1, 1]} : vector<8x384xf32> to vector<8x128xf32>
    %283 = vector.extract_strided_slice %279 {offsets = [0, 128], sizes = [8, 128], strides = [1, 1]} : vector<8x384xf32> to vector<8x128xf32>
    %284 = vector.extract_strided_slice %279 {offsets = [0, 256], sizes = [8, 128], strides = [1, 1]} : vector<8x384xf32> to vector<8x128xf32>
    %285 = arith.mulf %283, %241 : vector<8x128xf32>
    %286 = arith.mulf %282, %281 : vector<8x128xf32>
    %287 = arith.addf %285, %286 : vector<8x128xf32>
    %288 = math.tanh %287 : vector<8x128xf32>
    %289 = arith.mulf %284, %288 : vector<8x128xf32>
    %c6_i32 = arith.constant 6 : i32
    %cst_81 = arith.constant dense<0.000000e+00> : vector<8x512xf32>
    %290 = tpu.matmul %289, %9, %cst_81 {dimension_numbers = #tpu.dot_dimension_numbers<[1], [0], [0], [1], [0, 0, 1, 1], [], []>} : vector<8x128xf32>, vector<128x512xf32>, vector<8x512xf32> -> vector<8x512xf32>
    %c8_i32_82 = arith.constant 8 : i32
    %291 = arith.muli %c6_i32, %c8_i32_82 : i32
    %292 = tpu.assume_multiple %291, 8 : i32
    %293 = arith.index_cast %292 : i32 to index
    %c0_83 = arith.constant 0 : index
    %294 = vector.load %arg10[%293, %c0_83] : memref<64x512xf32, #tpu.memory_space<vmem>>, vector<8x512xf32>
    %cst_84 = arith.constant dense<0.000000e+00> : vector<8x512xf32>
    %295 = tpu.matmul %268, %7, %cst_84 {dimension_numbers = #tpu.dot_dimension_numbers<[1], [0], [0], [1], [0, 0, 1, 1], [], []>} : vector<8x128xf32>, vector<128x512xf32>, vector<8x512xf32> -> vector<8x512xf32>
    %296 = arith.addf %294, %295 : vector<8x512xf32>
    %297 = vector.extract_strided_slice %296 {offsets = [0, 0], sizes = [8, 384], strides = [1, 1]} : vector<8x512xf32> to vector<8x384xf32>
    %cst_85 = arith.constant 5.000000e-01 : f32
    %298 = vector.broadcast %cst_85 : f32 to vector<8x384xf32>
    %299 = arith.mulf %298, %297 : vector<8x384xf32>
    %300 = math.tanh %299 : vector<8x384xf32>
    %cst_86 = arith.constant 5.000000e-01 : f32
    %301 = vector.broadcast %cst_86 : f32 to vector<8x384xf32>
    %302 = arith.mulf %301, %300 : vector<8x384xf32>
    %cst_87 = arith.constant 5.000000e-01 : f32
    %303 = vector.broadcast %cst_87 : f32 to vector<8x384xf32>
    %304 = arith.addf %302, %303 : vector<8x384xf32>
    %305 = vector.extract_strided_slice %296 {offsets = [0, 384], sizes = [8, 128], strides = [1, 1]} : vector<8x512xf32> to vector<8x128xf32>
    %306 = math.tanh %305 : vector<8x128xf32>
    %307 = vector.extract_strided_slice %304 {offsets = [0, 0], sizes = [8, 128], strides = [1, 1]} : vector<8x384xf32> to vector<8x128xf32>
    %308 = vector.extract_strided_slice %304 {offsets = [0, 128], sizes = [8, 128], strides = [1, 1]} : vector<8x384xf32> to vector<8x128xf32>
    %309 = vector.extract_strided_slice %304 {offsets = [0, 256], sizes = [8, 128], strides = [1, 1]} : vector<8x384xf32> to vector<8x128xf32>
    %310 = arith.mulf %308, %266 : vector<8x128xf32>
    %311 = arith.mulf %307, %306 : vector<8x128xf32>
    %312 = arith.addf %310, %311 : vector<8x128xf32>
    %313 = math.tanh %312 : vector<8x128xf32>
    %314 = arith.mulf %309, %313 : vector<8x128xf32>
    %cst_88 = arith.constant dense<0.000000e+00> : vector<8x512xf32>
    %315 = tpu.matmul %314, %8, %cst_88 {dimension_numbers = #tpu.dot_dimension_numbers<[1], [0], [0], [1], [0, 0, 1, 1], [], []>} : vector<8x128xf32>, vector<128x512xf32>, vector<8x512xf32> -> vector<8x512xf32>
    %316 = arith.addf %315, %290 : vector<8x512xf32>
    %317 = arith.addf %316, %12 : vector<8x512xf32>
    %318 = vector.extract_strided_slice %317 {offsets = [0, 0], sizes = [8, 384], strides = [1, 1]} : vector<8x512xf32> to vector<8x384xf32>
    %cst_89 = arith.constant 5.000000e-01 : f32
    %319 = vector.broadcast %cst_89 : f32 to vector<8x384xf32>
    %320 = arith.mulf %319, %318 : vector<8x384xf32>
    %321 = math.tanh %320 : vector<8x384xf32>
    %cst_90 = arith.constant 5.000000e-01 : f32
    %322 = vector.broadcast %cst_90 : f32 to vector<8x384xf32>
    %323 = arith.mulf %322, %321 : vector<8x384xf32>
    %cst_91 = arith.constant 5.000000e-01 : f32
    %324 = vector.broadcast %cst_91 : f32 to vector<8x384xf32>
    %325 = arith.addf %323, %324 : vector<8x384xf32>
    %326 = vector.extract_strided_slice %317 {offsets = [0, 384], sizes = [8, 128], strides = [1, 1]} : vector<8x512xf32> to vector<8x128xf32>
    %327 = math.tanh %326 : vector<8x128xf32>
    %328 = vector.extract_strided_slice %325 {offsets = [0, 0], sizes = [8, 128], strides = [1, 1]} : vector<8x384xf32> to vector<8x128xf32>
    %329 = vector.extract_strided_slice %325 {offsets = [0, 128], sizes = [8, 128], strides = [1, 1]} : vector<8x384xf32> to vector<8x128xf32>
    %330 = vector.extract_strided_slice %325 {offsets = [0, 256], sizes = [8, 128], strides = [1, 1]} : vector<8x384xf32> to vector<8x128xf32>
    %331 = arith.mulf %329, %287 : vector<8x128xf32>
    %332 = arith.mulf %328, %327 : vector<8x128xf32>
    %333 = arith.addf %331, %332 : vector<8x128xf32>
    %334 = math.tanh %333 : vector<8x128xf32>
    %335 = arith.mulf %330, %334 : vector<8x128xf32>
    %c7_i32 = arith.constant 7 : i32
    %cst_92 = arith.constant dense<0.000000e+00> : vector<8x512xf32>
    %336 = tpu.matmul %335, %9, %cst_92 {dimension_numbers = #tpu.dot_dimension_numbers<[1], [0], [0], [1], [0, 0, 1, 1], [], []>} : vector<8x128xf32>, vector<128x512xf32>, vector<8x512xf32> -> vector<8x512xf32>
    %c8_i32_93 = arith.constant 8 : i32
    %337 = arith.muli %c7_i32, %c8_i32_93 : i32
    %338 = tpu.assume_multiple %337, 8 : i32
    %339 = arith.index_cast %338 : i32 to index
    %c0_94 = arith.constant 0 : index
    %340 = vector.load %arg10[%339, %c0_94] : memref<64x512xf32, #tpu.memory_space<vmem>>, vector<8x512xf32>
    %cst_95 = arith.constant dense<0.000000e+00> : vector<8x512xf32>
    %341 = tpu.matmul %314, %7, %cst_95 {dimension_numbers = #tpu.dot_dimension_numbers<[1], [0], [0], [1], [0, 0, 1, 1], [], []>} : vector<8x128xf32>, vector<128x512xf32>, vector<8x512xf32> -> vector<8x512xf32>
    %342 = arith.addf %340, %341 : vector<8x512xf32>
    %343 = vector.extract_strided_slice %342 {offsets = [0, 0], sizes = [8, 384], strides = [1, 1]} : vector<8x512xf32> to vector<8x384xf32>
    %cst_96 = arith.constant 5.000000e-01 : f32
    %344 = vector.broadcast %cst_96 : f32 to vector<8x384xf32>
    %345 = arith.mulf %344, %343 : vector<8x384xf32>
    %346 = math.tanh %345 : vector<8x384xf32>
    %cst_97 = arith.constant 5.000000e-01 : f32
    %347 = vector.broadcast %cst_97 : f32 to vector<8x384xf32>
    %348 = arith.mulf %347, %346 : vector<8x384xf32>
    %cst_98 = arith.constant 5.000000e-01 : f32
    %349 = vector.broadcast %cst_98 : f32 to vector<8x384xf32>
    %350 = arith.addf %348, %349 : vector<8x384xf32>
    %351 = vector.extract_strided_slice %342 {offsets = [0, 384], sizes = [8, 128], strides = [1, 1]} : vector<8x512xf32> to vector<8x128xf32>
    %352 = math.tanh %351 : vector<8x128xf32>
    %353 = vector.extract_strided_slice %350 {offsets = [0, 0], sizes = [8, 128], strides = [1, 1]} : vector<8x384xf32> to vector<8x128xf32>
    %354 = vector.extract_strided_slice %350 {offsets = [0, 128], sizes = [8, 128], strides = [1, 1]} : vector<8x384xf32> to vector<8x128xf32>
    %355 = vector.extract_strided_slice %350 {offsets = [0, 256], sizes = [8, 128], strides = [1, 1]} : vector<8x384xf32> to vector<8x128xf32>
    %356 = arith.mulf %354, %312 : vector<8x128xf32>
    %357 = arith.mulf %353, %352 : vector<8x128xf32>
    %358 = arith.addf %356, %357 : vector<8x128xf32>
    %359 = math.tanh %358 : vector<8x128xf32>
    %360 = arith.mulf %355, %359 : vector<8x128xf32>
    %cst_99 = arith.constant dense<0.000000e+00> : vector<8x512xf32>
    %361 = tpu.matmul %360, %8, %cst_99 {dimension_numbers = #tpu.dot_dimension_numbers<[1], [0], [0], [1], [0, 0, 1, 1], [], []>} : vector<8x128xf32>, vector<128x512xf32>, vector<8x512xf32> -> vector<8x512xf32>
    %362 = arith.addf %361, %336 : vector<8x512xf32>
    %363 = arith.addf %362, %12 : vector<8x512xf32>
    %364 = vector.extract_strided_slice %363 {offsets = [0, 0], sizes = [8, 384], strides = [1, 1]} : vector<8x512xf32> to vector<8x384xf32>
    %cst_100 = arith.constant 5.000000e-01 : f32
    %365 = vector.broadcast %cst_100 : f32 to vector<8x384xf32>
    %366 = arith.mulf %365, %364 : vector<8x384xf32>
    %367 = math.tanh %366 : vector<8x384xf32>
    %cst_101 = arith.constant 5.000000e-01 : f32
    %368 = vector.broadcast %cst_101 : f32 to vector<8x384xf32>
    %369 = arith.mulf %368, %367 : vector<8x384xf32>
    %cst_102 = arith.constant 5.000000e-01 : f32
    %370 = vector.broadcast %cst_102 : f32 to vector<8x384xf32>
    %371 = arith.addf %369, %370 : vector<8x384xf32>
    %372 = vector.extract_strided_slice %363 {offsets = [0, 384], sizes = [8, 128], strides = [1, 1]} : vector<8x512xf32> to vector<8x128xf32>
    %373 = math.tanh %372 : vector<8x128xf32>
    %374 = vector.extract_strided_slice %371 {offsets = [0, 0], sizes = [8, 128], strides = [1, 1]} : vector<8x384xf32> to vector<8x128xf32>
    %375 = vector.extract_strided_slice %371 {offsets = [0, 128], sizes = [8, 128], strides = [1, 1]} : vector<8x384xf32> to vector<8x128xf32>
    %376 = vector.extract_strided_slice %371 {offsets = [0, 256], sizes = [8, 128], strides = [1, 1]} : vector<8x384xf32> to vector<8x128xf32>
    %377 = arith.mulf %375, %333 : vector<8x128xf32>
    %378 = arith.mulf %374, %373 : vector<8x128xf32>
    %379 = arith.addf %377, %378 : vector<8x128xf32>
    %380 = math.tanh %379 : vector<8x128xf32>
    %381 = arith.mulf %376, %380 : vector<8x128xf32>
    %c8_i32_103 = arith.constant 8 : i32
    %c0_104 = arith.constant 0 : index
    %c0_105 = arith.constant 0 : index
    %382 = vector.load %arg7[%c0_104, %c0_105] : memref<128x128xf32, #tpu.memory_space<vmem>>, vector<128x128xf32>
    %cst_106 = arith.constant dense<0.000000e+00> : vector<8x128xf32>
    %383 = tpu.matmul %381, %382, %cst_106 {dimension_numbers = #tpu.dot_dimension_numbers<[1], [0], [0], [1], [0, 0, 1, 1], [], []>} : vector<8x128xf32>, vector<128x128xf32>, vector<8x128xf32> -> vector<8x128xf32>
    %c0_107 = arith.constant 0 : index
    %c0_108 = arith.constant 0 : index
    %384 = vector.load %arg8[%c0_107, %c0_108] : memref<1x128xf32, #tpu.memory_space<vmem>>, vector<1x128xf32>
    %385 = vector.broadcast %384 : vector<1x128xf32> to vector<8x128xf32>
    %386 = arith.addf %383, %385 : vector<8x128xf32>
    %c0_109 = arith.constant 0 : index
    %c0_110 = arith.constant 0 : index
    %387 = vector.load %arg9[%c0_109, %c0_110] : memref<8x128xf32, #tpu.memory_space<vmem>>, vector<8x128xf32>
    tpu.vector_store %arg9[%c0_109, %c0_110], %386 {strides = array<i32>} : memref<8x128xf32, #tpu.memory_space<vmem>>, vector<8x128xf32>,
    return
  }
}

</mosaic_0001>

<bundles_post_ra>
// kernel: rnn_forward.1
= control target key start
LH: loop header
LB: loop body
LE: loop exit
PB: predicated region body
PF: predicated region fallthrough
CT: control target
= control target key end

     0   :  { %vm103_vm0 = vcmask 1043456   ;;  %v11383_v3 = vmov 0.0   ;;  %vm78_vm1 = vcmask 228352   ;;  %vm5343_vm2 = vmmov 0   ;;  %s11373_s1 = inlined_call_operand.vmem [shape: f32[28,512], index: 1, kind: input, shape index: {}]   ;;  %s11374_s0 = inlined_call_operand.vmem [shape: f32[64,28], index: 0, kind: input, shape index: {}]   ;;  %s11375_s5 = inlined_call_operand.vmem [shape: f32[128,512], index: 5, kind: input, shape index: {}]   ;;  %s11376_s2 = inlined_call_operand.vmem [shape: f32[128,512], index: 2, kind: input, shape index: {}]   ;;  %s11377_s4 = inlined_call_operand.vmem [shape: f32[128,512], index: 4, kind: input, shape index: {}]   ;;  %s11378_s3 = inlined_call_operand.vmem [shape: f32[1,512], index: 3, kind: input, shape index: {}]   ;;  %s11379_s6 = inlined_call_operand.vmem [shape: f32[1,512], index: 6, kind: input, shape index: {}]   ;;  %s11380_s7 = inlined_call_operand.vmem [shape: f32[128,128], index: 7, kind: input, shape index: {}]   ;;  %s11381_s8 = inlined_call_operand.vmem [shape: f32[1,128], index: 8, kind: input, shape index: {}]   ;;  %s11382_s9 = inlined_call_operand.vmem [shape: f32[8,128], index: 9, kind: output, shape index: {}]  }
   0x1   :  { %v53_v0 = vld [vmem:[%s11373_s1 + $0x68] sm:$0xf]  ;;  %v55_v1 = vld [vmem:[%s11373_s1 + $0x78] sm:$0xf]  ;;  %v52_v2 = vld [vmem:[%s11373_s1 + $0x60] sm:$0xf]  ;;  %180 = vmatprep.mubr.f32.mxu0 %v11383_v3  ;;  %293 = vmatprep.mubr.f32.mxu1 %v11383_v3 }
   0x2   :  { %4509 = vmatprep.subr.msk.mxu0 %vm103_vm0, %v53_v0  ;;  %4519 = vmatprep.subr.msk.mxu1 %vm103_vm0, %v55_v1  ;;  %v54_v4 = vld [vmem:[%s11373_s1 + $0x70] sm:$0xf]  ;;  %v49_v5 = vld [vmem:[%s11373_s1 + $0x48] sm:$0xff]  ;;  %v51_v6 = vld [vmem:[%s11373_s1 + $0x58] sm:$0xff] }
   0x3   :  { %4510 = vmatpush1.msk.msra.mxu0 %vm103_vm0, %v52_v2  ;;  %4520 = vmatpush1.msk.msra.mxu1 %vm103_vm0, %v54_v4  ;;  %v48_v7 = vld [vmem:[%s11373_s1 + $0x40] sm:$0xff]  ;;  %v50_v8 = vld [vmem:[%s11373_s1 + $0x50] sm:$0xff]  ;;  %v45_v9 = vld [vmem:[%s11373_s1 + $0x28] sm:$0xff] }
   0x4   :  { %142 = vmatprep.subr.mxu0 %v49_v5  ;;  %255 = vmatprep.subr.mxu1 %v51_v6  ;;  %v47_v10 = vld [vmem:[%s11373_s1 + $0x38] sm:$0xff]  ;;  %v44_v11 = vld [vmem:[%s11373_s1 + $0x20] sm:$0xff]  ;;  %v46_v12 = vld [vmem:[%s11373_s1 + $0x30] sm:$0xff] }
   0x5   :  { %143 = vmatpush1.msra.mxu0 %v48_v7  ;;  %256 = vmatpush1.msra.mxu1 %v50_v8  ;;  %v41_v13 = vld [vmem:[%s11373_s1 + $0x8] sm:$0xff]  ;;  %v43_v14 = vld [vmem:[%s11373_s1 + $0x18] sm:$0xff]  ;;  %v40_v15 = vld [vmem:[%s11373_s1] sm:$0xff] }
   0x6   :  { %144 = vmatprep.subr.mxu0 %v45_v9  ;;  %257 = vmatprep.subr.mxu1 %v47_v10  ;;  %v42_v16 = vld [vmem:[%s11373_s1 + $0x10] sm:$0xff]  ;;  %v32_v17 = vld [vmem:[%s11374_s0] sm:$0xff]  ;;  %v5450_v18 = vld [vmem:[%s11375_s5 + $0x1e8] sm:$0xff] }
   0x7   :  { %145 = vmatpush1.msra.mxu0 %v44_v11  ;;  %258 = vmatpush1.msra.mxu1 %v46_v12  ;;  %v5455_v19 = vld [vmem:[%s11375_s5 + $0x1f8] sm:$0xff]  ;;  %v562_v20 = vld [vmem:[%s11375_s5 + $0x1e0] sm:$0xff]  ;;  %v564_v21 = vld [vmem:[%s11375_s5 + $0x1f0] sm:$0xff] }
   0x8   :  { %146 = vmatprep.subr.mxu0 %v41_v13  ;;  %259 = vmatprep.subr.mxu1 %v43_v14  ;;  %v559_v22 = vld [vmem:[%s11375_s5 + $0x1c8] sm:$0xff]  ;;  %v561_v23 = vld [vmem:[%s11375_s5 + $0x1d8] sm:$0xff]  ;;  %v558_v24 = vld [vmem:[%s11375_s5 + $0x1c0] sm:$0xff] }
   0x9   :  { %147 = vmatpush1.msra.mxu0 %v40_v15  ;;  %260 = vmatpush1.msra.mxu1 %v42_v16  ;;  %v560_v25 = vld [vmem:[%s11375_s5 + $0x1d0] sm:$0xff]  ;;  %v33_v26 = vld [vmem:[%s11374_s0 + $0x8] sm:$0xff]  ;;  %v557_v28 = vld [vmem:[%s11375_s5 + $0x1b8] sm:$0xff] }
   0xa   :  { %4511 = vmatmul.mubr.msk.f32.vlgmr.msra.gmra.mxu0 %vm78_vm1, %v32_v17  ;;  %588 = vmatprep.subr.mxu0 %v5450_v18  ;;  %v555_v27 = vld [vmem:[%s11375_s5 + $0x1a8] sm:$0xff]  ;;  %v554_v29 = vld [vmem:[%s11375_s5 + $0x1a0] sm:$0xff]  ;;  %v556_v30 = vld [vmem:[%s11375_s5 + $0x1b0] sm:$0xff] }
   0xb   :  { %659 = vmatprep.subr.mxu1 %v5455_v19  ;;  %4521 = vmatmul.mubr.msk.f32.vlgmr.msra.gmra.mxu1 %vm78_vm1, %v32_v17  ;;  %v551_v31 = vld [vmem:[%s11375_s5 + $0x188] sm:$0xff]  ;;  %v553_v32 = vld [vmem:[%s11375_s5 + $0x198] sm:$0xff]  ;;  %v550_v33 = vld [vmem:[%s11375_s5 + $0x180] sm:$0xff] }
   0xc   :  { %589 = vmatpush1.msra.mxu0 %v562_v20  ;;  %660 = vmatpush1.msra.mxu1 %v564_v21  ;;  %v552_v34 = vld [vmem:[%s11375_s5 + $0x190] sm:$0xff]  ;;  %v547_v36 = vld [vmem:[%s11375_s5 + $0x168] sm:$0xff]  ;;  %v549_v37 = vld [vmem:[%s11375_s5 + $0x178] sm:$0xff] }
   0xd   :  { %590 = vmatprep.subr.mxu0 %v559_v22  ;;  %661 = vmatprep.subr.mxu1 %v561_v23  ;;  %v34_v35 = vld [vmem:[%s11374_s0 + $0x10] sm:$0xff]  ;;  %v546_v38 = vld [vmem:[%s11375_s5 + $0x160] sm:$0xff]  ;;  %v543_v40 = vld [vmem:[%s11375_s5 + $0x148] sm:$0xff] }
   0xe   :  { %186 = vmatprep.mubr.f32.mxu0 %v11383_v3  ;;  %591 = vmatpush1.msra.mxu0 %v558_v24  ;;  %v548_v39 = vld [vmem:[%s11375_s5 + $0x170] sm:$0xff]  ;;  %v545_v41 = vld [vmem:[%s11375_s5 + $0x158] sm:$0xff]  ;;  %v542_v42 = vld [vmem:[%s11375_s5 + $0x140] sm:$0xff] }
   0xf   :  { %662 = vmatpush1.msra.mxu1 %v560_v25  ;;  %4512 = vmatmul.mubr.msk.f32.gmra.mxu0 %vm78_vm1, %v33_v26  ;;  %v544_v43 = vld [vmem:[%s11375_s5 + $0x150] sm:$0xff]  ;;  %v35_v44 = vld [vmem:[%s11374_s0 + $0x18] sm:$0xff]  ;;  %v5547_v45 = vld [vmem:[%s11375_s5 + $0x128] sm:$0xff] }
  0x10   :  { %299 = vmatprep.mubr.f32.mxu1 %v11383_v3  ;;  %592 = vmatprep.subr.mxu0 %v555_v27  ;;  %v5553_v46 = vld [vmem:[%s11375_s5 + $0x138] sm:$0xff]  ;;  %v5559_v47 = vld [vmem:[%s11375_s5 + $0x120] sm:$0xff]  ;;  %v5564_v48 = vld [vmem:[%s11375_s5 + $0x130] sm:$0xff] }
  0x11   :  { %663 = vmatprep.subr.mxu1 %v557_v28  ;;  %4522 = vmatmul.mubr.msk.f32.gmra.mxu1 %vm78_vm1, %v33_v26  ;;  %v5571_v49 = vld [vmem:[%s11375_s5 + $0x108] sm:$0xff]  ;;  %v5576_v50 = vld [vmem:[%s11375_s5 + $0x118] sm:$0xff]  ;;  %v5583_v51 = vld [vmem:[%s11375_s5 + $0x100] sm:$0xff] }
  0x12   :  { %593 = vmatpush1.msra.mxu0 %v554_v29  ;;  %664 = vmatpush1.msra.mxu1 %v556_v30  ;;  %v5590_v52 = vld [vmem:[%s11375_s5 + $0x110] sm:$0xff]  ;;  %v36_v53 = vld [vmem:[%s11374_s0 + $0x20] sm:$0xff]  ;;  %v5600_v54 = vld [vmem:[%s11375_s5 + $0xe8] sm:$0xff] }
  0x13   :  { %594 = vmatprep.subr.mxu0 %v551_v31  ;;  %665 = vmatprep.subr.mxu1 %v553_v32  ;;  %v5607_v55 = vld [vmem:[%s11375_s5 + $0xf8] sm:$0xff]  ;;  %v5614_v56 = vld [vmem:[%s11375_s5 + $0xe0] sm:$0xff]  ;;  %v5619_v57 = vld [vmem:[%s11375_s5 + $0xf0] sm:$0xff] }
  0x14   :  { %192 = vmatprep.mubr.f32.mxu0 %v11383_v3  ;;  %595 = vmatpush1.msra.mxu0 %v550_v33  ;;  %v5626_v58 = vld [vmem:[%s11375_s5 + $0xc8] sm:$0xff]  ;;  %v5631_v59 = vld [vmem:[%s11375_s5 + $0xd8] sm:$0xff]  ;;  %v5638_v60 = vld [vmem:[%s11375_s5 + $0xc0] sm:$0xff] }
  0x15   :  { %666 = vmatpush1.msra.mxu1 %v552_v34  ;;  %4513 = vmatmul.mubr.msk.f32.gmra.mxu0 %vm78_vm1, %v34_v35  ;;  %v5645_v61 = vld [vmem:[%s11375_s5 + $0xd0] sm:$0xff]  ;;  %v37_v62 = vld [vmem:[%s11374_s0 + $0x28] sm:$0xff]  ;;  %v5662_v0 = vld [vmem:[%s11375_s5 + $0xb8] sm:$0xff] }
  0x16   :  { %305 = vmatprep.mubr.f32.mxu1 %v11383_v3  ;;  %596 = vmatprep.subr.mxu0 %v547_v36  ;;  %v5655_v63 = vld [vmem:[%s11375_s5 + $0xa8] sm:$0xff]  ;;  %v5669_v1 = vld [vmem:[%s11375_s5 + $0xa0] sm:$0xff]  ;;  %v5674_v2 = vld [vmem:[%s11375_s5 + $0xb0] sm:$0xff] }
  0x17   :  { %667 = vmatprep.subr.mxu1 %v549_v37  ;;  %4523 = vmatmul.mubr.msk.f32.gmra.mxu1 %vm78_vm1, %v34_v35  ;;  %v5681_v4 = vld [vmem:[%s11375_s5 + $0x88] sm:$0xff]  ;;  %v5686_v5 = vld [vmem:[%s11375_s5 + $0x98] sm:$0xff]  ;;  %v5693_v6 = vld [vmem:[%s11375_s5 + $0x80] sm:$0xff] }
  0x18   :  { %597 = vmatpush1.msra.mxu0 %v546_v38  ;;  %668 = vmatpush1.msra.mxu1 %v548_v39  ;;  %v5700_v7 = vld [vmem:[%s11375_s5 + $0x90] sm:$0xff]  ;;  %v5710_v9 = vld [vmem:[%s11375_s5 + $0x68] sm:$0xff]  ;;  %v5717_v10 = vld [vmem:[%s11375_s5 + $0x78] sm:$0xff] }
  0x19   :  { %598 = vmatprep.subr.mxu0 %v543_v40  ;;  %669 = vmatprep.subr.mxu1 %v545_v41  ;;  %v38_v8 = vld [vmem:[%s11374_s0 + $0x30] sm:$0xff]  ;;  %v5724_v11 = vld [vmem:[%s11375_s5 + $0x60] sm:$0xff]  ;;  %v5736_v13 = vld [vmem:[%s11375_s5 + $0x48] sm:$0xff] }
  0x1a   :  { %198 = vmatprep.mubr.f32.mxu0 %v11383_v3  ;;  %599 = vmatpush1.msra.mxu0 %v542_v42  ;;  %v5729_v12 = vld [vmem:[%s11375_s5 + $0x70] sm:$0xff]  ;;  %v5741_v14 = vld [vmem:[%s11375_s5 + $0x58] sm:$0xff]  ;;  %v5748_v15 = vld [vmem:[%s11375_s5 + $0x40] sm:$0xff] }
  0x1b   :  { %670 = vmatpush1.msra.mxu1 %v544_v43  ;;  %4514 = vmatmul.mubr.msk.f32.gmra.mxu0 %vm78_vm1, %v35_v44  ;;  %v5755_v16 = vld [vmem:[%s11375_s5 + $0x50] sm:$0xff]  ;;  %v39_v17 = vld [vmem:[%s11374_s0 + $0x38] sm:$0xff]  ;;  %v5765_v20 = vld [vmem:[%s11375_s5 + $0x28] sm:$0xff] }
  0x1c   :  { %311 = vmatprep.mubr.f32.mxu1 %v11383_v3  ;;  %600 = vmatprep.subr.mxu0 %v5547_v45  ;;  %v5772_v21 = vld [vmem:[%s11375_s5 + $0x38] sm:$0xff]  ;;  %v5779_v22 = vld [vmem:[%s11375_s5 + $0x20] sm:$0xff]  ;;  %v5784_v23 = vld [vmem:[%s11375_s5 + $0x30] sm:$0xff] }
  0x1d   :  { %671 = vmatprep.subr.mxu1 %v5553_v46  ;;  %4524 = vmatmul.mubr.msk.f32.gmra.mxu1 %vm78_vm1, %v35_v44  ;;  %v5791_v24 = vld [vmem:[%s11375_s5 + $0x8] sm:$0xff]  ;;  %v5796_v25 = vld [vmem:[%s11375_s5 + $0x18] sm:$0xff]  ;;  %v5803_v26 = vld [vmem:[%s11375_s5] sm:$0xff] }
  0x1e   :  { %601 = vmatpush1.msra.mxu0 %v5559_v47  ;;  %672 = vmatpush1.msra.mxu1 %v5564_v48  ;;  %v5810_v27 = vld [vmem:[%s11375_s5 + $0x10] sm:$0xff]  ;;  %v5817_v28 = vld [vmem:[%s11376_s2 + $0x1e8] sm:$0xff]  ;;  %v5824_v29 = vld [vmem:[%s11376_s2 + $0x1f8] sm:$0xff] }
  0x1f   :  { %602 = vmatprep.subr.mxu0 %v5571_v49  ;;  %673 = vmatprep.subr.mxu1 %v5576_v50  ;;  %11932 = vst [vmem:[#allocation3_spill] sm:$0xff] %v5824_v29  ;;  %v5831_v30 = vld [vmem:[%s11376_s2 + $0x1e0] sm:$0xff]  ;;  %v5836_v31 = vld [vmem:[%s11376_s2 + $0x1f0] sm:$0xff]  ;;  %v5843_v32 = vld [vmem:[%s11376_s2 + $0x1c8] sm:$0xff] }
  0x20   :  { %204 = vmatprep.mubr.f32.mxu0 %v11383_v3  ;;  %603 = vmatpush1.msra.mxu0 %v5583_v51  ;;  %11933 = vst [vmem:[#allocation4_spill] sm:$0xff] %v5831_v30  ;;  %11934 = vst [vmem:[#allocation5_spill] sm:$0xff] %v5836_v31  ;;  %v5848_v33 = vld [vmem:[%s11376_s2 + $0x1d8] sm:$0xff]  ;;  %v5855_v34 = vld [vmem:[%s11376_s2 + $0x1c0] sm:$0xff] }
  0x21   :  { %674 = vmatpush1.msra.mxu1 %v5590_v52  ;;  %4515 = vmatmul.mubr.msk.f32.gmra.mxu0 %vm78_vm1, %v36_v53  ;;  %11935 = vst [vmem:[#allocation6_spill] sm:$0xff] %v5843_v32  ;;  %11936 = vst [vmem:[#allocation7_spill] sm:$0xff] %v5848_v33  ;;  %v5860_v35 = vld [vmem:[%s11376_s2 + $0x1d0] sm:$0xff]  ;;  %v5867_v36 = vld [vmem:[%s11376_s2 + $0x1a8] sm:$0xff] }
  0x22   :  { %317 = vmatprep.mubr.f32.mxu1 %v11383_v3  ;;  %604 = vmatprep.subr.mxu0 %v5600_v54  ;;  %11937 = vst [vmem:[#allocation8_spill] sm:$0xff] %v5855_v34  ;;  %11938 = vst [vmem:[#allocation9_spill] sm:$0xff] %v5860_v35  ;;  %v5872_v37 = vld [vmem:[%s11376_s2 + $0x1b8] sm:$0xff]  ;;  %v5879_v38 = vld [vmem:[%s11376_s2 + $0x1a0] sm:$0xff] }
  0x23   :  { %675 = vmatprep.subr.mxu1 %v5607_v55  ;;  %4525 = vmatmul.mubr.msk.f32.gmra.mxu1 %vm78_vm1, %v36_v53  ;;  %11939 = vst [vmem:[#allocation10_spill] sm:$0xff] %v5867_v36  ;;  %11940 = vst [vmem:[#allocation11_spill] sm:$0xff] %v5872_v37  ;;  %v5884_v39 = vld [vmem:[%s11376_s2 + $0x1b0] sm:$0xff]  ;;  %v5891_v40 = vld [vmem:[%s11376_s2 + $0x188] sm:$0xff] }
  0x24   :  { %605 = vmatpush1.msra.mxu0 %v5614_v56  ;;  %676 = vmatpush1.msra.mxu1 %v5619_v57  ;;  %11941 = vst [vmem:[#allocation12_spill] sm:$0xff] %v5879_v38  ;;  %11942 = vst [vmem:[#allocation13_spill] sm:$0xff] %v5884_v39  ;;  %v5896_v41 = vld [vmem:[%s11376_s2 + $0x198] sm:$0xff]  ;;  %v5903_v42 = vld [vmem:[%s11376_s2 + $0x180] sm:$0xff] }
  0x25   :  { %606 = vmatprep.subr.mxu0 %v5626_v58  ;;  %677 = vmatprep.subr.mxu1 %v5631_v59  ;;  %11943 = vst [vmem:[#allocation14_spill] sm:$0xff] %v5891_v40  ;;  %11944 = vst [vmem:[#allocation15_spill] sm:$0xff] %v5896_v41  ;;  %v5908_v43 = vld [vmem:[%s11376_s2 + $0x190] sm:$0xff]  ;;  %v5915_v44 = vld [vmem:[%s11376_s2 + $0x168] sm:$0xff] }
  0x26   :  { %210 = vmatprep.mubr.f32.mxu0 %v11383_v3  ;;  %607 = vmatpush1.msra.mxu0 %v5638_v60  ;;  %11945 = vst [vmem:[#allocation16_spill] sm:$0xff] %v5903_v42  ;;  %11946 = vst [vmem:[#allocation17_spill] sm:$0xff] %v5908_v43  ;;  %v5920_v53 = vld [vmem:[%s11376_s2 + $0x178] sm:$0xff] }
  0x27   :  { %678 = vmatpush1.msra.mxu1 %v5645_v61  ;;  %4516 = vmatmul.mubr.msk.f32.gmra.mxu0 %vm78_vm1, %v37_v62  ;;  %11947 = vst [vmem:[#allocation18_spill] sm:$0xff] %v5915_v44  ;;  %11948 = vst [vmem:[#allocation19_spill] sm:$0xff] %v5920_v53 }
  0x28   :  { %323 = vmatprep.mubr.f32.mxu1 %v11383_v3  ;;  %608 = vmatprep.subr.mxu0 %v5655_v63 }
  0x29   :  { %679 = vmatprep.subr.mxu1 %v5662_v0  ;;  %4526 = vmatmul.mubr.msk.f32.gmra.mxu1 %vm78_vm1, %v37_v62  ;;  %v5927_v62 = vld [vmem:[%s11376_s2 + $0x160] sm:$0xff] }
  0x2a   :  { %609 = vmatpush1.msra.mxu0 %v5669_v1  ;;  %680 = vmatpush1.msra.mxu1 %v5674_v2  ;;  %11949 = vst [vmem:[#allocation20_spill] sm:$0xff] %v5927_v62 }
  0x2b   :  { %610 = vmatprep.subr.mxu0 %v5681_v4  ;;  %681 = vmatprep.subr.mxu1 %v5686_v5 }
  0x2c   :  { %216 = vmatprep.mubr.f32.mxu0 %v11383_v3  ;;  %611 = vmatpush1.msra.mxu0 %v5693_v6 }
  0x2d   :  { %682 = vmatpush1.msra.mxu1 %v5700_v7  ;;  %4517 = vmatmul.mubr.msk.f32.gmra.mxu0 %vm78_vm1, %v38_v8 }
  0x2e   :  { %329 = vmatprep.mubr.f32.mxu1 %v11383_v3  ;;  %612 = vmatprep.subr.mxu0 %v5710_v9 }
  0x2f   :  { %683 = vmatprep.subr.mxu1 %v5717_v10  ;;  %4527 = vmatmul.mubr.msk.f32.gmra.mxu1 %vm78_vm1, %v38_v8  ;;  %v5932_v8 = vld [vmem:[%s11376_s2 + $0x170] sm:$0xff] }
  0x30   :  { %613 = vmatpush1.msra.mxu0 %v5724_v11  ;;  %684 = vmatpush1.msra.mxu1 %v5729_v12  ;;  %11950 = vst [vmem:[#allocation21_spill] sm:$0xff] %v5932_v8 }
  0x31   :  { %614 = vmatprep.subr.mxu0 %v5736_v13  ;;  %685 = vmatprep.subr.mxu1 %v5741_v14 }
  0x32   :  { %222 = vmatprep.mubr.f32.mxu0 %v11383_v3  ;;  %615 = vmatpush1.msra.mxu0 %v5748_v15 }
  0x33   :  { %686 = vmatpush1.msra.mxu1 %v5755_v16  ;;  %4518 = vmatmul.mubr.msk.f32.gmra.mxu0 %vm78_vm1, %v39_v17 }
  0x34   :  { %335 = vmatprep.mubr.f32.mxu1 %v11383_v3  ;;  %616 = vmatprep.subr.mxu0 %v5765_v20 }
  0x35   :  { %687 = vmatprep.subr.mxu1 %v5772_v21  ;;  %4528 = vmatmul.mubr.msk.f32.gmra.mxu1 %vm78_vm1, %v39_v17  ;;  %v5939_v17 = vld [vmem:[%s11376_s2 + $0x148] sm:$0xff] }
  0x36   :  { %617 = vmatpush1.msra.mxu0 %v5779_v22  ;;  %688 = vmatpush1.msra.mxu1 %v5784_v23  ;;  %11951 = vst [vmem:[#allocation22_spill] sm:$0xff] %v5939_v17 }
  0x37   :  { %618 = vmatprep.subr.mxu0 %v5791_v24  ;;  %689 = vmatprep.subr.mxu1 %v5796_v25 }
  0x38   :  { %619 = vmatpush1.msra.mxu0 %v5803_v26  ;;  %652 = vmatprep.mubr.f32.mxu0 %v11383_v3 }
  0x39   :  { %690 = vmatpush1.msra.mxu1 %v5810_v27  ;;  %653 = vmatmul.mubr.f32.vlgmr.msra.gmra.mxu0 %v11383_v3 }
  0x3a   :  { %723 = vmatprep.mubr.f32.mxu1 %v11383_v3  ;;  %737 = vmatprep.subr.mxu0 %v5817_v28 }
  0x3b   :  { %808 = vmatprep.subr.mxu1 %v5824_v29  ;;  %724 = vmatmul.mubr.f32.vlgmr.msra.gmra.mxu1 %v11383_v3  ;;  %v5944_v3 = vld [vmem:[%s11376_s2 + $0x158] sm:$0xff] }
  0x3c   :  { %738 = vmatpush1.msra.mxu0 %v5831_v30  ;;  %809 = vmatpush1.msra.mxu1 %v5836_v31  ;;  %11952 = vst [vmem:[#allocation23_spill] sm:$0xff] %v5944_v3 }
  0x3d   :  { %739 = vmatprep.subr.mxu0 %v5843_v32  ;;  %810 = vmatprep.subr.mxu1 %v5848_v33 }
  0x3e   :  { %740 = vmatpush1.msra.mxu0 %v5855_v34  ;;  %811 = vmatpush1.msra.mxu1 %v5860_v35 }
  0x3f   :  { %741 = vmatprep.subr.mxu0 %v5867_v36  ;;  %812 = vmatprep.subr.mxu1 %v5872_v37 }
  0x40   :  { %742 = vmatpush1.msra.mxu0 %v5879_v38  ;;  %813 = vmatpush1.msra.mxu1 %v5884_v39 }
  0x41   :  { %743 = vmatprep.subr.mxu0 %v5891_v40  ;;  %814 = vmatprep.subr.mxu1 %v5896_v41  ;;  %v6442_v41 = vld [vmem:[%s11377_s4 + $0xd0] sm:$0xff]  ;;  %v58_v40 = vlaneseq }
  0x42   :  { %744 = vmatpush1.msra.mxu0 %v5903_v42  ;;  %815 = vmatpush1.msra.mxu1 %v5908_v43  ;;  %v5951_v42 = vld [vmem:[%s11376_s2 + $0x140] sm:$0xff]  ;;  %v5956_v43 = vld [vmem:[%s11376_s2 + $0x150] sm:$0xff]  ;;  %12035 = vst [vmem:[#allocation105_spill] sm:$0xff] %v6442_v41 }
  0x43   :  { %745 = vmatprep.subr.mxu0 %v5915_v44  ;;  %816 = vmatprep.subr.mxu1 %v5920_v53  ;;  %11953 = vst [vmem:[#allocation24_spill] sm:$0xff] %v5951_v42  ;;  %11954 = vst [vmem:[#allocation25_spill] sm:$0xff] %v5956_v43  ;;  %v5963_v44 = vld [vmem:[%s11376_s2 + $0x128] sm:$0xff]  ;;  %v5968_v53 = vld [vmem:[%s11376_s2 + $0x138] sm:$0xff]  ;;  %v6552_v39 = vshrl.u32 %v58_v40, 7 }
  0x44   :  { %746 = vmatpush1.msra.mxu0 %v5927_v62  ;;  %817 = vmatpush1.msra.mxu1 %v5932_v8  ;;  %11955 = vst [vmem:[#allocation26_spill] sm:$0xff] %v5963_v44  ;;  %11956 = vst [vmem:[#allocation27_spill] sm:$0xff] %v5968_v53  ;;  %v5975_v62 = vld [vmem:[%s11376_s2 + $0x120] sm:$0xff]  ;;  %v5980_v8 = vld [vmem:[%s11376_s2 + $0x130] sm:$0xff] }
  0x45   :  { %747 = vmatprep.subr.mxu0 %v5939_v17  ;;  %818 = vmatprep.subr.mxu1 %v5944_v3  ;;  %11957 = vst [vmem:[#allocation28_spill] sm:$0xff] %v5975_v62  ;;  %11958 = vst [vmem:[#allocation29_spill] sm:$0xff] %v5980_v8  ;;  %v5987_v17 = vld [vmem:[%s11376_s2 + $0x108] sm:$0xff]  ;;  %v5992_v3 = vld [vmem:[%s11376_s2 + $0x118] sm:$0xff] }
  0x46   :  { %748 = vmatpush1.msra.mxu0 %v5951_v42  ;;  %819 = vmatpush1.msra.mxu1 %v5956_v43  ;;  %11959 = vst [vmem:[#allocation30_spill] sm:$0xff] %v5987_v17  ;;  %11960 = vst [vmem:[#allocation31_spill] sm:$0xff] %v5992_v3  ;;  %v5999_v42 = vld [vmem:[%s11376_s2 + $0x100] sm:$0xff]  ;;  %v6004_v43 = vld [vmem:[%s11376_s2 + $0x110] sm:$0xff] }
  0x47   :  { %749 = vmatprep.subr.mxu0 %v5963_v44  ;;  %820 = vmatprep.subr.mxu1 %v5968_v53  ;;  %11961 = vst [vmem:[#allocation32_spill] sm:$0xff] %v5999_v42  ;;  %11962 = vst [vmem:[#allocation33_spill] sm:$0xff] %v6004_v43  ;;  %v6011_v44 = vld [vmem:[%s11376_s2 + $0xe8] sm:$0xff]  ;;  %v6016_v53 = vld [vmem:[%s11376_s2 + $0xf8] sm:$0xff] }
  0x48   :  { %750 = vmatpush1.msra.mxu0 %v5975_v62  ;;  %821 = vmatpush1.msra.mxu1 %v5980_v8  ;;  %11963 = vst [vmem:[#allocation34_spill] sm:$0xff] %v6011_v44  ;;  %11964 = vst [vmem:[#allocation35_spill] sm:$0xff] %v6016_v53  ;;  %v6023_v62 = vld [vmem:[%s11376_s2 + $0xe0] sm:$0xff]  ;;  %v6028_v8 = vld [vmem:[%s11376_s2 + $0xf0] sm:$0xff] }
  0x49   :  { %751 = vmatprep.subr.mxu0 %v5987_v17  ;;  %822 = vmatprep.subr.mxu1 %v5992_v3  ;;  %11965 = vst [vmem:[#allocation36_spill] sm:$0xff] %v6023_v62  ;;  %11966 = vst [vmem:[#allocation37_spill] sm:$0xff] %v6028_v8  ;;  %v6035_v17 = vld [vmem:[%s11376_s2 + $0xc8] sm:$0xff]  ;;  %v6040_v3 = vld [vmem:[%s11376_s2 + $0xd8] sm:$0xff] }
  0x4a   :  { %752 = vmatpush1.msra.mxu0 %v5999_v42  ;;  %823 = vmatpush1.msra.mxu1 %v6004_v43  ;;  %11967 = vst [vmem:[#allocation38_spill] sm:$0xff] %v6035_v17  ;;  %11968 = vst [vmem:[#allocation39_spill] sm:$0xff] %v6040_v3  ;;  %v6047_v42 = vld [vmem:[%s11376_s2 + $0xc0] sm:$0xff]  ;;  %v6052_v43 = vld [vmem:[%s11376_s2 + $0xd0] sm:$0xff] }
  0x4b   :  { %753 = vmatprep.subr.mxu0 %v6011_v44  ;;  %824 = vmatprep.subr.mxu1 %v6016_v53  ;;  %11969 = vst [vmem:[#allocation40_spill] sm:$0xff] %v6047_v42  ;;  %11970 = vst [vmem:[#allocation41_spill] sm:$0xff] %v6052_v43  ;;  %v6059_v44 = vld [vmem:[%s11376_s2 + $0xa8] sm:$0xff]  ;;  %v6064_v53 = vld [vmem:[%s11376_s2 + $0xb8] sm:$0xff] }
  0x4c   :  { %754 = vmatpush1.msra.mxu0 %v6023_v62  ;;  %825 = vmatpush1.msra.mxu1 %v6028_v8  ;;  %11971 = vst [vmem:[#allocation42_spill] sm:$0xff] %v6059_v44  ;;  %11972 = vst [vmem:[#allocation43_spill] sm:$0xff] %v6064_v53  ;;  %v6071_v62 = vld [vmem:[%s11376_s2 + $0xa0] sm:$0xff]  ;;  %v6076_v8 = vld [vmem:[%s11376_s2 + $0xb0] sm:$0xff] }
  0x4d   :  { %755 = vmatprep.subr.mxu0 %v6035_v17  ;;  %826 = vmatprep.subr.mxu1 %v6040_v3  ;;  %11973 = vst [vmem:[#allocation44_spill] sm:$0xff] %v6071_v62  ;;  %11974 = vst [vmem:[#allocation45_spill] sm:$0xff] %v6076_v8  ;;  %v6083_v17 = vld [vmem:[%s11376_s2 + $0x88] sm:$0xff]  ;;  %v6088_v3 = vld [vmem:[%s11376_s2 + $0x98] sm:$0xff] }
  0x4e   :  { %756 = vmatpush1.msra.mxu0 %v6047_v42  ;;  %827 = vmatpush1.msra.mxu1 %v6052_v43  ;;  %11975 = vst [vmem:[#allocation46_spill] sm:$0xff] %v6083_v17  ;;  %11976 = vst [vmem:[#allocation47_spill] sm:$0xff] %v6088_v3  ;;  %v6095_v42 = vld [vmem:[%s11376_s2 + $0x80] sm:$0xff]  ;;  %v6100_v43 = vld [vmem:[%s11376_s2 + $0x90] sm:$0xff] }
  0x4f   :  { %757 = vmatprep.subr.mxu0 %v6059_v44  ;;  %828 = vmatprep.subr.mxu1 %v6064_v53  ;;  %11977 = vst [vmem:[#allocation48_spill] sm:$0xff] %v6095_v42  ;;  %11978 = vst [vmem:[#allocation49_spill] sm:$0xff] %v6100_v43  ;;  %v6107_v44 = vld [vmem:[%s11376_s2 + $0x68] sm:$0xff]  ;;  %v6112_v53 = vld [vmem:[%s11376_s2 + $0x78] sm:$0xff] }
  0x50   :  { %758 = vmatpush1.msra.mxu0 %v6071_v62  ;;  %829 = vmatpush1.msra.mxu1 %v6076_v8  ;;  %11979 = vst [vmem:[#allocation50_spill] sm:$0xff] %v6107_v44  ;;  %11980 = vst [vmem:[#allocation51_spill] sm:$0xff] %v6112_v53  ;;  %v6119_v62 = vld [vmem:[%s11376_s2 + $0x60] sm:$0xff]  ;;  %v6124_v8 = vld [vmem:[%s11376_s2 + $0x70] sm:$0xff] }
  0x51   :  { %759 = vmatprep.subr.mxu0 %v6083_v17  ;;  %830 = vmatprep.subr.mxu1 %v6088_v3  ;;  %11981 = vst [vmem:[#allocation52_spill] sm:$0xff] %v6119_v62  ;;  %11982 = vst [vmem:[#allocation53_spill] sm:$0xff] %v6124_v8  ;;  %v6131_v17 = vld [vmem:[%s11376_s2 + $0x48] sm:$0xff]  ;;  %v6136_v3 = vld [vmem:[%s11376_s2 + $0x58] sm:$0xff] }
  0x52   :  { %760 = vmatpush1.msra.mxu0 %v6095_v42  ;;  %831 = vmatpush1.msra.mxu1 %v6100_v43  ;;  %11983 = vst [vmem:[#allocation54_spill] sm:$0xff] %v6131_v17  ;;  %11984 = vst [vmem:[#allocation55_spill] sm:$0xff] %v6136_v3  ;;  %v6143_v42 = vld [vmem:[%s11376_s2 + $0x40] sm:$0xff]  ;;  %v6148_v43 = vld [vmem:[%s11376_s2 + $0x50] sm:$0xff] }
  0x53   :  { %761 = vmatprep.subr.mxu0 %v6107_v44  ;;  %832 = vmatprep.subr.mxu1 %v6112_v53  ;;  %11985 = vst [vmem:[#allocation56_spill] sm:$0xff] %v6143_v42  ;;  %11986 = vst [vmem:[#allocation57_spill] sm:$0xff] %v6148_v43  ;;  %v6155_v44 = vld [vmem:[%s11376_s2 + $0x28] sm:$0xff]  ;;  %v6160_v53 = vld [vmem:[%s11376_s2 + $0x38] sm:$0xff] }
  0x54   :  { %762 = vmatpush1.msra.mxu0 %v6119_v62  ;;  %833 = vmatpush1.msra.mxu1 %v6124_v8  ;;  %11987 = vst [vmem:[#allocation58_spill] sm:$0xff] %v6155_v44  ;;  %11988 = vst [vmem:[#allocation59_spill] sm:$0xff] %v6160_v53  ;;  %v6167_v62 = vld [vmem:[%s11376_s2 + $0x20] sm:$0xff]  ;;  %v6172_v8 = vld [vmem:[%s11376_s2 + $0x30] sm:$0xff] }
  0x55   :  { %763 = vmatprep.subr.mxu0 %v6131_v17  ;;  %834 = vmatprep.subr.mxu1 %v6136_v3  ;;  %11989 = vst [vmem:[#allocation60_spill] sm:$0xff] %v6167_v62  ;;  %11990 = vst [vmem:[#allocation61_spill] sm:$0xff] %v6172_v8  ;;  %v6179_v17 = vld [vmem:[%s11376_s2 + $0x8] sm:$0xff]  ;;  %v6184_v3 = vld [vmem:[%s11376_s2 + $0x18] sm:$0xff] }
  0x56   :  { %764 = vmatpush1.msra.mxu0 %v6143_v42  ;;  %835 = vmatpush1.msra.mxu1 %v6148_v43  ;;  %11991 = vst [vmem:[#allocation62_spill] sm:$0xff] %v6179_v17  ;;  %11992 = vst [vmem:[#allocation63_spill] sm:$0xff] %v6184_v3  ;;  %v6191_v42 = vld [vmem:[%s11376_s2] sm:$0xff]  ;;  %v6198_v43 = vld [vmem:[%s11376_s2 + $0x10] sm:$0xff] }
  0x57   :  { %765 = vmatprep.subr.mxu0 %v6155_v44  ;;  %836 = vmatprep.subr.mxu1 %v6160_v53  ;;  %11993 = vst [vmem:[#allocation64_spill] sm:$0xff] %v6191_v42  ;;  %11994 = vst [vmem:[#allocation65_spill] sm:$0xff] %v6198_v43  ;;  %v11995_v53 = vmov 0.0   ;;  %v6425_v44 = vld [vmem:[%s11377_s4 + $0xc8] sm:$0xff] }
  0x58   :  { %766 = vmatpush1.msra.mxu0 %v6167_v62  ;;  %837 = vmatpush1.msra.mxu1 %v6172_v8  ;;  %v6391_v8 = vld [vmem:[%s11377_s4 + $0x100] sm:$0xff]  ;;  %v6408_v62 = vld [vmem:[%s11377_s4 + $0xf8] sm:$0xff]  ;;  %12032 = vst [vmem:[#allocation102_spill] sm:$0xff] %v6425_v44  ;;  %12054 = vst [vmem:[#allocation124_spill] sm:$0xff] %v6552_v39 }
  0x59   :  { %767 = vmatprep.subr.mxu0 %v6179_v17  ;;  %838 = vmatprep.subr.mxu1 %v6184_v3  ;;  %v6213_v3 = vld [vmem:[%s11377_s4 + $0x1e8] sm:$0xff]  ;;  %v6230_v17 = vld [vmem:[%s11377_s4 + $0x1f0] sm:$0xff]  ;;  %12026 = vst [vmem:[#allocation96_spill] sm:$0xff] %v6391_v8  ;;  %12029 = vst [vmem:[#allocation99_spill] sm:$0xff] %v6408_v62 }
  0x5a   :  { %768 = vmatpush1.msra.mxu0 %v6191_v42  ;;  %801 = vmatprep.mubr.f32.mxu0 %v11995_v53  ;;  %11996 = vst [vmem:[#allocation66_spill] sm:$0xff] %v6213_v3  ;;  %v6218_v42 = vld [vmem:[%s11377_s4 + $0x1f8] sm:$0xff]  ;;  %11999 = vst [vmem:[#allocation69_spill] sm:$0xff] %v6230_v17  ;;  %v6571_v40 = vld [vmem:[%s11377_s4 + $0x8] sm:$0xff] }
  0x5b   :  { %839 = vmatpush1.msra.mxu1 %v6198_v43  ;;  %872 = vmatprep.mubr.f32.mxu1 %v11995_v53  ;;  %11997 = vst [vmem:[#allocation67_spill] sm:$0xff] %v6218_v42  ;;  %v6225_v43 = vld [vmem:[%s11377_s4 + $0x1e0] sm:$0xff]  ;;  %12057 = vst [vmem:[#allocation127_spill] sm:$0xff] %v6571_v40 }
  0x5c   :  { %802 = vmatmul.mubr.f32.vlgmr.msra.gmra.mxu0 %v11995_v53  ;;  %873 = vmatmul.mubr.f32.vlgmr.msra.gmra.mxu1 %v11995_v53  ;;  %11998 = vst [vmem:[#allocation68_spill] sm:$0xff] %v6225_v43 }
  0x5d   :  { %965 = vmatprep.mubr.f32.mxu0 %v11995_v53  ;;  %1036 = vmatprep.mubr.f32.mxu1 %v11995_v53 }
  0x5e   :  { %901 = vmatprep.subr.mxu0 %v6213_v3  ;;  %972 = vmatprep.subr.mxu1 %v6218_v42  ;;  %v6237_v3 = vld [vmem:[%s11377_s4 + $0x1c8] sm:$0xff]  ;;  %v6242_v42 = vld [vmem:[%s11377_s4 + $0x1d8] sm:$0xff] }
  0x5f   :  { %902 = vmatpush1.msra.mxu0 %v6225_v43  ;;  %973 = vmatpush1.msra.mxu1 %v6230_v17  ;;  %12000 = vst [vmem:[#allocation70_spill] sm:$0xff] %v6237_v3  ;;  %12001 = vst [vmem:[#allocation71_spill] sm:$0xff] %v6242_v42  ;;  %v6249_v43 = vld [vmem:[%s11377_s4 + $0x1c0] sm:$0xff]  ;;  %v6254_v17 = vld [vmem:[%s11377_s4 + $0x1d0] sm:$0xff] }
  0x60   :  { %903 = vmatprep.subr.mxu0 %v6237_v3  ;;  %974 = vmatprep.subr.mxu1 %v6242_v42  ;;  %12002 = vst [vmem:[#allocation72_spill] sm:$0xff] %v6249_v43  ;;  %12003 = vst [vmem:[#allocation73_spill] sm:$0xff] %v6254_v17  ;;  %v6261_v3 = vld [vmem:[%s11377_s4 + $0x1a8] sm:$0xff]  ;;  %v6266_v42 = vld [vmem:[%s11377_s4 + $0x1b8] sm:$0xff] }
  0x61   :  { %904 = vmatpush1.msra.mxu0 %v6249_v43  ;;  %975 = vmatpush1.msra.mxu1 %v6254_v17  ;;  %12004 = vst [vmem:[#allocation74_spill] sm:$0xff] %v6261_v3  ;;  %12005 = vst [vmem:[#allocation75_spill] sm:$0xff] %v6266_v42  ;;  %v6273_v43 = vld [vmem:[%s11377_s4 + $0x1a0] sm:$0xff]  ;;  %v6278_v17 = vld [vmem:[%s11377_s4 + $0x1b0] sm:$0xff] }
  0x62   :  { %905 = vmatprep.subr.mxu0 %v6261_v3  ;;  %976 = vmatprep.subr.mxu1 %v6266_v42  ;;  %12006 = vst [vmem:[#allocation76_spill] sm:$0xff] %v6273_v43  ;;  %12007 = vst [vmem:[#allocation77_spill] sm:$0xff] %v6278_v17  ;;  %v6285_v3 = vld [vmem:[%s11377_s4 + $0x188] sm:$0xff]  ;;  %v6290_v42 = vld [vmem:[%s11377_s4 + $0x198] sm:$0xff] }
  0x63   :  { %906 = vmatpush1.msra.mxu0 %v6273_v43  ;;  %977 = vmatpush1.msra.mxu1 %v6278_v17  ;;  %12008 = vst [vmem:[#allocation78_spill] sm:$0xff] %v6285_v3  ;;  %12009 = vst [vmem:[#allocation79_spill] sm:$0xff] %v6290_v42  ;;  %v6297_v43 = vld [vmem:[%s11377_s4 + $0x180] sm:$0xff]  ;;  %v6302_v17 = vld [vmem:[%s11377_s4 + $0x190] sm:$0xff] }
  0x64   :  { %907 = vmatprep.subr.mxu0 %v6285_v3  ;;  %978 = vmatprep.subr.mxu1 %v6290_v42  ;;  %12010 = vst [vmem:[#allocation80_spill] sm:$0xff] %v6297_v43  ;;  %12011 = vst [vmem:[#allocation81_spill] sm:$0xff] %v6302_v17  ;;  %v6309_v3 = vld [vmem:[%s11377_s4 + $0x168] sm:$0xff]  ;;  %v6314_v42 = vld [vmem:[%s11377_s4 + $0x178] sm:$0xff] }
  0x65   :  { %908 = vmatpush1.msra.mxu0 %v6297_v43  ;;  %979 = vmatpush1.msra.mxu1 %v6302_v17  ;;  %12012 = vst [vmem:[#allocation82_spill] sm:$0xff] %v6309_v3  ;;  %12013 = vst [vmem:[#allocation83_spill] sm:$0xff] %v6314_v42  ;;  %v6321_v43 = vld [vmem:[%s11377_s4 + $0x160] sm:$0xff]  ;;  %v6326_v17 = vld [vmem:[%s11377_s4 + $0x170] sm:$0xff] }
  0x66   :  { %909 = vmatprep.subr.mxu0 %v6309_v3  ;;  %980 = vmatprep.subr.mxu1 %v6314_v42  ;;  %12014 = vst [vmem:[#allocation84_spill] sm:$0xff] %v6321_v43  ;;  %12015 = vst [vmem:[#allocation85_spill] sm:$0xff] %v6326_v17  ;;  %v6333_v3 = vld [vmem:[%s11377_s4 + $0x148] sm:$0xff]  ;;  %v6338_v42 = vld [vmem:[%s11377_s4 + $0x158] sm:$0xff] }
  0x67   :  { %910 = vmatpush1.msra.mxu0 %v6321_v43  ;;  %981 = vmatpush1.msra.mxu1 %v6326_v17  ;;  %12016 = vst [vmem:[#allocation86_spill] sm:$0xff] %v6333_v3  ;;  %12017 = vst [vmem:[#allocation87_spill] sm:$0xff] %v6338_v42  ;;  %v6345_v43 = vld [vmem:[%s11377_s4 + $0x140] sm:$0xff]  ;;  %v6350_v17 = vld [vmem:[%s11377_s4 + $0x150] sm:$0xff] }
  0x68   :  { %911 = vmatprep.subr.mxu0 %v6333_v3  ;;  %982 = vmatprep.subr.mxu1 %v6338_v42  ;;  %12018 = vst [vmem:[#allocation88_spill] sm:$0xff] %v6345_v43  ;;  %12019 = vst [vmem:[#allocation89_spill] sm:$0xff] %v6350_v17  ;;  %v6357_v3 = vld [vmem:[%s11377_s4 + $0x128] sm:$0xff]  ;;  %v6362_v42 = vld [vmem:[%s11377_s4 + $0x138] sm:$0xff] }
  0x69   :  { %912 = vmatpush1.msra.mxu0 %v6345_v43  ;;  %983 = vmatpush1.msra.mxu1 %v6350_v17  ;;  %12020 = vst [vmem:[#allocation90_spill] sm:$0xff] %v6357_v3  ;;  %12021 = vst [vmem:[#allocation91_spill] sm:$0xff] %v6362_v42  ;;  %v6369_v43 = vld [vmem:[%s11377_s4 + $0x120] sm:$0xff]  ;;  %v6374_v17 = vld [vmem:[%s11377_s4 + $0x130] sm:$0xff] }
  0x6a   :  { %913 = vmatprep.subr.mxu0 %v6357_v3  ;;  %984 = vmatprep.subr.mxu1 %v6362_v42  ;;  %12022 = vst [vmem:[#allocation92_spill] sm:$0xff] %v6369_v43  ;;  %12023 = vst [vmem:[#allocation93_spill] sm:$0xff] %v6374_v17  ;;  %v6381_v3 = vld [vmem:[%s11377_s4 + $0x108] sm:$0xff]  ;;  %v6386_v42 = vld [vmem:[%s11377_s4 + $0x118] sm:$0xff] }
  0x6b   :  { %914 = vmatpush1.msra.mxu0 %v6369_v43  ;;  %985 = vmatpush1.msra.mxu1 %v6374_v17  ;;  %12024 = vst [vmem:[#allocation94_spill] sm:$0xff] %v6381_v3  ;;  %12025 = vst [vmem:[#allocation95_spill] sm:$0xff] %v6386_v42  ;;  %v6398_v17 = vld [vmem:[%s11377_s4 + $0x110] sm:$0xff]  ;;  %v6403_v43 = vld [vmem:[%s11377_s4 + $0xe8] sm:$0xff] }
  0x6c   :  { %915 = vmatprep.subr.mxu0 %v6381_v3  ;;  %986 = vmatprep.subr.mxu1 %v6386_v42  ;;  %12027 = vst [vmem:[#allocation97_spill] sm:$0xff] %v6398_v17  ;;  %12028 = vst [vmem:[#allocation98_spill] sm:$0xff] %v6403_v43  ;;  %v6415_v42 = vld [vmem:[%s11377_s4 + $0xe0] sm:$0xff]  ;;  %v6420_v3 = vld [vmem:[%s11377_s4 + $0xf0] sm:$0xff] }
  0x6d   :  { %916 = vmatpush1.msra.mxu0 %v6391_v8  ;;  %987 = vmatpush1.msra.mxu1 %v6398_v17  ;;  %12030 = vst [vmem:[#allocation100_spill] sm:$0xff] %v6415_v42  ;;  %12031 = vst [vmem:[#allocation101_spill] sm:$0xff] %v6420_v3  ;;  %v6432_v17 = vld [vmem:[%s11377_s4 + $0xd8] sm:$0xff]  ;;  %v6437_v8 = vld [vmem:[%s11377_s4 + $0xc0] sm:$0xff] }
  0x6e   :  { %917 = vmatprep.subr.mxu0 %v6403_v43  ;;  %988 = vmatprep.subr.mxu1 %v6408_v62  ;;  %12033 = vst [vmem:[#allocation103_spill] sm:$0xff] %v6432_v17  ;;  %12034 = vst [vmem:[#allocation104_spill] sm:$0xff] %v6437_v8  ;;  %v6449_v62 = vld [vmem:[%s11377_s4 + $0xa8] sm:$0xff]  ;;  %v6454_v43 = vld [vmem:[%s11377_s4 + $0xb8] sm:$0xff] }
  0x6f   :  { %918 = vmatpush1.msra.mxu0 %v6415_v42  ;;  %989 = vmatpush1.msra.mxu1 %v6420_v3  ;;  %12036 = vst [vmem:[#allocation106_spill] sm:$0xff] %v6449_v62  ;;  %12037 = vst [vmem:[#allocation107_spill] sm:$0xff] %v6454_v43  ;;  %v6461_v42 = vld [vmem:[%s11377_s4 + $0xa0] sm:$0xff]  ;;  %v6466_v3 = vld [vmem:[%s11377_s4 + $0xb0] sm:$0xff] }
  0x70   :  { %919 = vmatprep.subr.mxu0 %v6425_v44  ;;  %990 = vmatprep.subr.mxu1 %v6432_v17  ;;  %12038 = vst [vmem:[#allocation108_spill] sm:$0xff] %v6461_v42  ;;  %12039 = vst [vmem:[#allocation109_spill] sm:$0xff] %v6466_v3  ;;  %v6473_v44 = vld [vmem:[%s11377_s4 + $0x88] sm:$0xff]  ;;  %v6478_v17 = vld [vmem:[%s11377_s4 + $0x98] sm:$0xff] }
  0x71   :  { %920 = vmatpush1.msra.mxu0 %v6437_v8  ;;  %991 = vmatpush1.msra.mxu1 %v6442_v41  ;;  %12040 = vst [vmem:[#allocation110_spill] sm:$0xff] %v6473_v44  ;;  %12041 = vst [vmem:[#allocation111_spill] sm:$0xff] %v6478_v17  ;;  %v6485_v8 = vld [vmem:[%s11377_s4 + $0x80] sm:$0xff]  ;;  %v6490_v41 = vld [vmem:[%s11377_s4 + $0x90] sm:$0xff] }
  0x72   :  { %921 = vmatprep.subr.mxu0 %v6449_v62  ;;  %992 = vmatprep.subr.mxu1 %v6454_v43  ;;  %12042 = vst [vmem:[#allocation112_spill] sm:$0xff] %v6485_v8  ;;  %12043 = vst [vmem:[#allocation113_spill] sm:$0xff] %v6490_v41  ;;  %v6497_v62 = vld [vmem:[%s11377_s4 + $0x68] sm:$0xff]  ;;  %v6502_v43 = vld [vmem:[%s11377_s4 + $0x78] sm:$0xff] }
  0x73   :  { %922 = vmatpush1.msra.mxu0 %v6461_v42  ;;  %993 = vmatpush1.msra.mxu1 %v6466_v3  ;;  %12044 = vst [vmem:[#allocation114_spill] sm:$0xff] %v6497_v62  ;;  %12045 = vst [vmem:[#allocation115_spill] sm:$0xff] %v6502_v43  ;;  %v6509_v42 = vld [vmem:[%s11377_s4 + $0x60] sm:$0xff]  ;;  %v6514_v3 = vld [vmem:[%s11377_s4 + $0x70] sm:$0xff] }
  0x74   :  { %923 = vmatprep.subr.mxu0 %v6473_v44  ;;  %994 = vmatprep.subr.mxu1 %v6478_v17  ;;  %12046 = vst [vmem:[#allocation116_spill] sm:$0xff] %v6509_v42  ;;  %12047 = vst [vmem:[#allocation117_spill] sm:$0xff] %v6514_v3  ;;  %v6521_v44 = vld [vmem:[%s11377_s4 + $0x48] sm:$0xff]  ;;  %v6526_v17 = vld [vmem:[%s11377_s4 + $0x58] sm:$0xff] }
  0x75   :  { %924 = vmatpush1.msra.mxu0 %v6485_v8  ;;  %995 = vmatpush1.msra.mxu1 %v6490_v41  ;;  %12048 = vst [vmem:[#allocation118_spill] sm:$0xff] %v6521_v44  ;;  %12049 = vst [vmem:[#allocation119_spill] sm:$0xff] %v6526_v17  ;;  %v6533_v8 = vld [vmem:[%s11377_s4 + $0x40] sm:$0xff]  ;;  %v6538_v41 = vld [vmem:[%s11377_s4 + $0x50] sm:$0xff] }
  0x76   :  { %925 = vmatprep.subr.mxu0 %v6497_v62  ;;  %996 = vmatprep.subr.mxu1 %v6502_v43  ;;  %12050 = vst [vmem:[#allocation120_spill] sm:$0xff] %v6533_v8  ;;  %12051 = vst [vmem:[#allocation121_spill] sm:$0xff] %v6538_v41  ;;  %v6545_v62 = vld [vmem:[%s11377_s4 + $0x28] sm:$0xff]  ;;  %v6550_v43 = vld [vmem:[%s11377_s4 + $0x38] sm:$0xff] }
  0x77   :  { %926 = vmatpush1.msra.mxu0 %v6509_v42  ;;  %997 = vmatpush1.msra.mxu1 %v6514_v3  ;;  %12052 = vst [vmem:[#allocation122_spill] sm:$0xff] %v6545_v62  ;;  %12053 = vst [vmem:[#allocation123_spill] sm:$0xff] %v6550_v43  ;;  %v6559_v3 = vld [vmem:[%s11377_s4 + $0x20] sm:$0xff]  ;;  %v6564_v42 = vld [vmem:[%s11377_s4 + $0x30] sm:$0xff] }
  0x78   :  { %927 = vmatprep.subr.mxu0 %v6521_v44  ;;  %998 = vmatprep.subr.mxu1 %v6526_v17  ;;  %12055 = vst [vmem:[#allocation125_spill] sm:$0xff] %v6559_v3  ;;  %12056 = vst [vmem:[#allocation126_spill] sm:$0xff] %v6564_v42  ;;  %v6576_v17 = vld [vmem:[%s11377_s4 + $0x18] sm:$0xff]  ;;  %v11510_v44 = vsub.s32 2, %v6552_v39 }
  0x79   :  { %928 = vmatpush1.msra.mxu0 %v6533_v8  ;;  %999 = vmatpush1.msra.mxu1 %v6538_v41  ;;  %12058 = vst [vmem:[#allocation128_spill] sm:$0xff] %v6576_v17  ;;  %v6583_v8 = vld [vmem:[%s11377_s4] sm:$0xff]  ;;  %v6588_v41 = vld [vmem:[%s11377_s4 + $0x10] sm:$0xff] }
  0x7a   :  { %929 = vmatprep.subr.mxu0 %v6545_v62  ;;  %1000 = vmatprep.subr.mxu1 %v6550_v43  ;;  %12059 = vst [vmem:[#allocation129_spill] sm:$0xff] %v6583_v8  ;;  %12060 = vst [vmem:[#allocation130_spill] sm:$0xff] %v6588_v41  ;;  %v56_v43 = vld [vmem:[%s11378_s3] sm:$0xf] }
  0x7b   :  { %930 = vmatpush1.msra.mxu0 %v6559_v3  ;;  %1001 = vmatpush1.msra.mxu1 %v6564_v42  ;;  %v11509_v42 = vsub.s32 1, %v6552_v39 }
  0x7c   :  { %931 = vmatprep.subr.mxu0 %v6571_v40  ;;  %1002 = vmatprep.subr.mxu1 %v6576_v17  ;;  %v12061_v40 = vsub.s32 0, %v6552_v39 }
  0x7d   :  { %932 = vmatpush1.msra.mxu0 %v6583_v8  ;;  %1003 = vmatpush1.msra.mxu1 %v6588_v41  ;;  %v11513_v8 = vsub.s32 3, %v6552_v39  ;;  %v6619_v41 = vrot.slane %v56_v43, %v11509_v42 }
  0x7e   :  { %1065 = vmatprep.subr.mxu0 %v5450_v18  ;;  %1136 = vmatprep.subr.mxu1 %v5455_v19  ;;  %v6614_v37 = vrot.slane %v56_v43, %v12061_v40  ;;  %v6626_v18 = vrot.slane %v56_v43, %v11510_v44 }
  0x7f   :  { %v6633_v40 = vrot.slane %v56_v43, %v11513_v8 }
  0xca   :  { %v6593_v38 = vpop.f32.mrf.mxu0 }
  0xcb   :  { %v6600_v62 = vpop.f32.mrf.mxu1 }
  0xcc   :  { %v6605_v3 = vpop.f32.mrf.mxu0 }
  0xcd   :  { %v6610_v17 = vpop.f32.mrf.mxu1 }
  0xcf   :  { %v188_v36 = vpop.f32.mrf.mxu0 }
  0xd0   :  { %v6622_v35 = vadd.f32 %v188_v36, %v6614_v37 }
  0xd1   :  { %v190_v19 = vpop.f32.mrf.mxu0  ;;  %v301_v34 = vpop.f32.mrf.mxu1 }
  0xd2   :  { %12062 = vst [vmem:[#allocation131_spill] sm:$0xff] %v6622_v35  ;;  %v6629_v33 = vadd.f32 %v190_v19, %v6619_v41  ;;  %v6636_v32 = vadd.f32 %v301_v34, %v6626_v18 }
  0xd3   :  { %v303_v42 = vpop.f32.mrf.mxu1 }
  0xd4   :  { %12063 = vst [vmem:[#allocation132_spill] sm:$0xff] %v6629_v33  ;;  %12064 = vst [vmem:[#allocation133_spill] sm:$0xff] %v6636_v32  ;;  %v6639_v36 = vadd.f32 %v303_v42, %v6633_v40 }
  0xd5   :  { %v194_v35 = vpop.f32.mrf.mxu0 }
  0xd6   :  { %12065 = vst [vmem:[#allocation134_spill] sm:$0xff] %v6639_v36  ;;  %v6642_v44 = vadd.f32 %v194_v35, %v6614_v37 }
  0xd7   :  { %v196_v31 = vpop.f32.mrf.mxu0  ;;  %v307_v30 = vpop.f32.mrf.mxu1 }
  0xd8   :  { %12066 = vst [vmem:[#allocation135_spill] sm:$0xff] %v6642_v44  ;;  %v6645_v19 = vadd.f32 %v196_v31, %v6619_v41  ;;  %v6648_v33 = vadd.f32 %v307_v30, %v6626_v18 }
  0xd9   :  { %v309_v43 = vpop.f32.mrf.mxu1 }
  0xda   :  { %12067 = vst [vmem:[#allocation136_spill] sm:$0xff] %v6645_v19  ;;  %12068 = vst [vmem:[#allocation137_spill] sm:$0xff] %v6648_v33  ;;  %v6651_v34 = vadd.f32 %v309_v43, %v6633_v40 }
  0xdb   :  { %v200_v8 = vpop.f32.mrf.mxu0 }
  0xdc   :  { %12069 = vst [vmem:[#allocation138_spill] sm:$0xff] %v6651_v34  ;;  %v6654_v42 = vadd.f32 %v200_v8, %v6614_v37 }
  0xdd   :  { %v202_v32 = vpop.f32.mrf.mxu0  ;;  %v313_v36 = vpop.f32.mrf.mxu1 }
  0xde   :  { %12070 = vst [vmem:[#allocation139_spill] sm:$0xff] %v6654_v42  ;;  %v6657_v35 = vadd.f32 %v202_v32, %v6619_v41  ;;  %v6660_v44 = vadd.f32 %v313_v36, %v6626_v18 }
  0xdf   :  { %v315_v31 = vpop.f32.mrf.mxu1 }
  0xe0   :  { %12071 = vst [vmem:[#allocation140_spill] sm:$0xff] %v6657_v35  ;;  %12072 = vst [vmem:[#allocation141_spill] sm:$0xff] %v6660_v44  ;;  %v6663_v30 = vadd.f32 %v315_v31, %v6633_v40 }
  0xe1   :  { %v206_v33 = vpop.f32.mrf.mxu0 }
  0xe2   :  { %12073 = vst [vmem:[#allocation142_spill] sm:$0xff] %v6663_v30  ;;  %v6666_v43 = vadd.f32 %v206_v33, %v6614_v37 }
  0xe3   :  { %v208_v34 = vpop.f32.mrf.mxu0  ;;  %v319_v19 = vpop.f32.mrf.mxu1 }
  0xe4   :  { %12074 = vst [vmem:[#allocation143_spill] sm:$0xff] %v6666_v43  ;;  %v6669_v8 = vadd.f32 %v208_v34, %v6619_v41  ;;  %v6672_v42 = vadd.f32 %v319_v19, %v6626_v18 }
  0xe5   :  { %v321_v32 = vpop.f32.mrf.mxu1 }
  0xe6   :  { %12075 = vst [vmem:[#allocation144_spill] sm:$0xff] %v6669_v8  ;;  %12076 = vst [vmem:[#allocation145_spill] sm:$0xff] %v6672_v42  ;;  %v6675_v36 = vadd.f32 %v321_v32, %v6633_v40 }
  0xe7   :  { %v212_v44 = vpop.f32.mrf.mxu0 }
  0xe8   :  { %12077 = vst [vmem:[#allocation146_spill] sm:$0xff] %v6675_v36  ;;  %v6678_v31 = vadd.f32 %v212_v44, %v6614_v37 }
  0xe9   :  { %v214_v30 = vpop.f32.mrf.mxu0  ;;  %v325_v35 = vpop.f32.mrf.mxu1 }
  0xea   :  { %12078 = vst [vmem:[#allocation147_spill] sm:$0xff] %v6678_v31  ;;  %v6681_v33 = vadd.f32 %v214_v30, %v6619_v41  ;;  %v6684_v43 = vadd.f32 %v325_v35, %v6626_v18 }
  0xeb   :  { %v327_v34 = vpop.f32.mrf.mxu1 }
  0xec   :  { %12079 = vst [vmem:[#allocation148_spill] sm:$0xff] %v6681_v33  ;;  %12080 = vst [vmem:[#allocation149_spill] sm:$0xff] %v6684_v43  ;;  %v6687_v19 = vadd.f32 %v327_v34, %v6633_v40 }
  0xed   :  { %v218_v42 = vpop.f32.mrf.mxu0 }
  0xee   :  { %12081 = vst [vmem:[#allocation150_spill] sm:$0xff] %v6687_v19  ;;  %v6690_v32 = vadd.f32 %v218_v42, %v6614_v37 }
  0xef   :  { %v220_v36 = vpop.f32.mrf.mxu0  ;;  %v331_v8 = vpop.f32.mrf.mxu1 }
  0xf0   :  { %12082 = vst [vmem:[#allocation151_spill] sm:$0xff] %v6690_v32  ;;  %v6693_v44 = vadd.f32 %v220_v36, %v6619_v41  ;;  %v6696_v31 = vadd.f32 %v331_v8, %v6626_v18 }
  0xf1   :  { %v333_v30 = vpop.f32.mrf.mxu1 }
  0xf2   :  { %12083 = vst [vmem:[#allocation152_spill] sm:$0xff] %v6693_v44  ;;  %12084 = vst [vmem:[#allocation153_spill] sm:$0xff] %v6696_v31  ;;  %v6699_v35 = vadd.f32 %v333_v30, %v6633_v40 }
  0xf3   :  { %v224_v43 = vpop.f32.mrf.mxu0 }
  0xf4   :  { %12085 = vst [vmem:[#allocation154_spill] sm:$0xff] %v6699_v35  ;;  %v6702_v34 = vadd.f32 %v224_v43, %v6614_v37 }
  0xf5   :  { %v226_v19 = vpop.f32.mrf.mxu0  ;;  %v337_v33 = vpop.f32.mrf.mxu1 }
  0xf6   :  { %12086 = vst [vmem:[#allocation155_spill] sm:$0xff] %v6702_v34  ;;  %v6705_v42 = vadd.f32 %v226_v19, %v6619_v41  ;;  %v6708_v32 = vadd.f32 %v337_v33, %v6626_v18  ;;  %v183_v34 = vadd.f32 %v6593_v38, %v6614_v37  ;;  %v185_v33 = vadd.f32 %v6605_v3, %v6619_v41 }
  0xf7   :  { %v339_v36 = vpop.f32.mrf.mxu1  ;;  %v296_v37 = vadd.f32 %v6600_v62, %v6626_v18 }
  0xf8   :  { %12087 = vst [vmem:[#allocation156_spill] sm:$0xff] %v6705_v42  ;;  %12088 = vst [vmem:[#allocation157_spill] sm:$0xff] %v6708_v32  ;;  %v6711_v8 = vadd.f32 %v339_v36, %v6633_v40 }
  0xf9   :  { %v6713_v31 = vpop.f32.mrf.mxu0 }
  0xfa   :  { %12089 = vst [vmem:[#allocation158_spill] sm:$0xff] %v6711_v8  ;;  %12090 = vst [vmem:[#allocation159_spill] sm:$0xff] %v6713_v31 }
  0xfb   :  { %v6715_v30 = vpop.f32.mrf.mxu1  ;;  %v6717_v35 = vpop.f32.mrf.mxu0 }
  0xfc   :  { %12091 = vst [vmem:[#allocation160_spill] sm:$0xff] %v6715_v30  ;;  %12092 = vst [vmem:[#allocation161_spill] sm:$0xff] %v6717_v35  ;;  %v298_v30 = vadd.f32 %v6610_v17, %v6633_v40 }
  0xfd   :  { %v6719_v43 = vpop.f32.mrf.mxu1 }
  0xfe   :  { %12093 = vst [vmem:[#allocation162_spill] sm:$0xff] %v6719_v43 }
 0x11c   :  { %v803_v19 = vpop.f32.mrf.mxu0  ;;  %v874_v42 = vpop.f32.mrf.mxu1 }
 0x11d   :  { %v879_v32 = vadd.f32 %v803_v19, %v183_v34  ;;  %v881_v38 = vadd.f32 %v874_v42, %v296_v37  ;;  %v6775_v37 = vld [vmem:[%s11375_s5 + $0x1a8] sm:$0xff] }
 0x11e   :  { %v805_v44 = vpop.f32.mrf.mxu0  ;;  %v876_v39 = vpop.f32.mrf.mxu1 }
 0x11f   :  { %v883_v36 = vmul.f32 0.5, %v879_v32  ;;  %v880_v8 = vadd.f32 %v805_v44, %v185_v33  ;;  %v882_v43 = vadd.f32 %v876_v39, %v298_v30  ;;  %v885_v31 = vmul.f32 0.5, %v881_v38  ;;  %v6757_v30 = vld [vmem:[%s11375_s5 + $0x1d8] sm:$0xff] }
 0x120   :  { %v6781_v38 = vld [vmem:[%s11375_s5 + $0x1b8] sm:$0xff] }
 0x121   :  { %4584 = vtanh.f32 %v883_v36  ;;  %v884_v35 = vmul.f32 0.5, %v880_v8  ;;  %v6751_v8 = vld [vmem:[%s11375_s5 + $0x1c8] sm:$0xff]  ;;  %v6769_v36 = vld [vmem:[%s11375_s5 + $0x1d0] sm:$0xff] }
 0x123   :  { %4586 = vtanh.f32 %v884_v35 }
 0x124   :  { %4588 = vtanh.f32 %v882_v43  ;;  %v6763_v43 = vld [vmem:[%s11375_s5 + $0x1c0] sm:$0xff] }
 0x125   :  { %4590 = vtanh.f32 %v885_v31  ;;  %v6745_v31 = vld [vmem:[%s11375_s5 + $0x1f0] sm:$0xff] }
 0x12e   :  { %v4585_v29 = vpop.eup %4584 }
 0x12f   :  { %v889_v3 = vmul.f32 0.5, %v4585_v29  ;;  %v6739_v29 = vld [vmem:[%s11375_s5 + $0x1e0] sm:$0xff] }
 0x130   :  { %v4587_v41 = vpop.eup %4586 }
 0x131   :  { %v892_v34 = vadd.f32 0.5, %v889_v3  ;;  %v890_v32 = vmul.f32 0.5, %v4587_v41  ;;  %v4589_v19 = vpop.eup %4588  ;;  %v6787_v3 = vld [vmem:[%s11375_s5 + $0x1a0] sm:$0xff]  ;;  %v6793_v41 = vld [vmem:[%s11375_s5 + $0x1b0] sm:$0xff] }
 0x132   :  { %v4591_v39 = vpop.eup %4590 }
 0x133   :  { %v893_v44 = vadd.f32 0.5, %v890_v32  ;;  %v897_v17 = vmul.f32 %v4589_v19, %v892_v34  ;;  %v891_v35 = vmul.f32 0.5, %v4591_v39  ;;  %v6799_v34 = vld [vmem:[%s11375_s5 + $0x188] sm:$0xff]  ;;  %v6805_v32 = vld [vmem:[%s11375_s5 + $0x198] sm:$0xff]  ;;  %v6817_v19 = vld [vmem:[%s11375_s5 + $0x190] sm:$0xff] }
 0x134   :  { %v6835_v39 = vld [vmem:[%s11375_s5 + $0x160] sm:$0xff] }
 0x135   :  { %v896_v33 = vmul.f32 0.0, %v893_v44  ;;  %v894_v62 = vadd.f32 0.5, %v891_v35  ;;  %v6811_v44 = vld [vmem:[%s11375_s5 + $0x180] sm:$0xff]  ;;  %12094 = vst [vmem:[#allocation163_spill] sm:$0xff] %v6835_v39  ;;  %v6841_v35 = vld [vmem:[%s11375_s5 + $0x170] sm:$0xff] }
 0x136   :  { %12095 = vst [vmem:[#allocation164_spill] sm:$0xff] %v6841_v35 }
 0x137   :  { %v6729_v40 = vadd.f32 %v897_v17, %v896_v33  ;;  %v6823_v33 = vld [vmem:[%s11375_s5 + $0x168] sm:$0xff]  ;;  %v6829_v17 = vld [vmem:[%s11375_s5 + $0x178] sm:$0xff] }
 0x139   :  { %4592 = vtanh.f32 %v6729_v40 }
 0x146   :  { %v4593_v18 = vpop.eup %4592 }
 0x147   :  { %v6732_v42 = vmul.f32 %v4593_v18, %v894_v62  ;;  %v6847_v62 = vld [vmem:[%s11375_s5 + $0x148] sm:$0xff]  ;;  %v6853_v18 = vld [vmem:[%s11375_s5 + $0x158] sm:$0xff] }
 0x149   :  { %966 = vmatmul.mubr.f32.vlgmr.msra.gmra.mxu0 %v6732_v42  ;;  %1037 = vmatmul.mubr.f32.vlgmr.msra.gmra.mxu1 %v6732_v42 }
 0x14a   :  { %1066 = vmatpush1.msra.mxu0 %v6739_v29  ;;  %1137 = vmatpush1.msra.mxu1 %v6745_v31 }
 0x14b   :  { %1067 = vmatprep.subr.mxu0 %v6751_v8  ;;  %1138 = vmatprep.subr.mxu1 %v6757_v30 }
 0x14c   :  { %1068 = vmatpush1.msra.mxu0 %v6763_v43  ;;  %1139 = vmatpush1.msra.mxu1 %v6769_v36 }
 0x14d   :  { %1069 = vmatprep.subr.mxu0 %v6775_v37  ;;  %1140 = vmatprep.subr.mxu1 %v6781_v38 }
 0x14e   :  { %1070 = vmatpush1.msra.mxu0 %v6787_v3  ;;  %1141 = vmatpush1.msra.mxu1 %v6793_v41 }
 0x14f   :  { %1071 = vmatprep.subr.mxu0 %v6799_v34  ;;  %1142 = vmatprep.subr.mxu1 %v6805_v32 }
 0x150   :  { %1072 = vmatpush1.msra.mxu0 %v6811_v44  ;;  %1143 = vmatpush1.msra.mxu1 %v6817_v19 }
 0x151   :  { %1073 = vmatprep.subr.mxu0 %v6823_v33  ;;  %1144 = vmatprep.subr.mxu1 %v6829_v17 }
 0x152   :  { %1074 = vmatpush1.msra.mxu0 %v6835_v39  ;;  %1145 = vmatpush1.msra.mxu1 %v6841_v35  ;;  %v6859_v39 = vld [vmem:[%s11375_s5 + $0x140] sm:$0xff]  ;;  %v6865_v35 = vld [vmem:[%s11375_s5 + $0x150] sm:$0xff] }
 0x153   :  { %1075 = vmatprep.subr.mxu0 %v6847_v62  ;;  %1146 = vmatprep.subr.mxu1 %v6853_v18 }
 0x154   :  { %1076 = vmatpush1.msra.mxu0 %v6859_v39  ;;  %1147 = vmatpush1.msra.mxu1 %v6865_v35 }
 0x155   :  { %1077 = vmatprep.subr.mxu0 %v5547_v45  ;;  %1148 = vmatprep.subr.mxu1 %v5553_v46  ;;  %v12096_v45 = vld [vmem:[#allocation3_spill] sm:$0xff] }
 0x156   :  { %1078 = vmatpush1.msra.mxu0 %v5559_v47  ;;  %1149 = vmatpush1.msra.mxu1 %v5564_v48  ;;  %v566_v46 = vld [vmem:[%s11379_s6] sm:$0xf]  ;;  %v12097_v47 = vld [vmem:[#allocation124_spill] sm:$0xff] }
 0x157   :  { %1079 = vmatprep.subr.mxu0 %v5571_v49  ;;  %1150 = vmatprep.subr.mxu1 %v5576_v50  ;;  %v12098_v48 = vsub.s32 0, %v12097_v47 }
 0x158   :  { %1080 = vmatpush1.msra.mxu0 %v5583_v51  ;;  %1151 = vmatpush1.msra.mxu1 %v5590_v52  ;;  %v12100_v52 = vld [vmem:[#allocation159_spill] sm:$0xff] }
 0x159   :  { %1081 = vmatprep.subr.mxu0 %v5600_v54  ;;  %1152 = vmatprep.subr.mxu1 %v5607_v55  ;;  %v6917_v49 = vrot.slane %v566_v46, %v12098_v48  ;;  %v12101_v55 = vsub.s32 1, %v12097_v47 }
 0x15a   :  { %1082 = vmatpush1.msra.mxu0 %v5614_v56  ;;  %1153 = vmatpush1.msra.mxu1 %v5619_v57 }
 0x15b   :  { %1083 = vmatprep.subr.mxu0 %v5626_v58  ;;  %1154 = vmatprep.subr.mxu1 %v5631_v59  ;;  %12099 = vst [vmem:[#allocation3_spill] sm:$0xff] %v6917_v49  ;;  %v6922_v56 = vrot.slane %v566_v46, %v12101_v55  ;;  %v12112_v55 = vld [vmem:[#allocation8_spill] sm:$0xff] }
 0x15c   :  { %1084 = vmatpush1.msra.mxu0 %v5638_v60  ;;  %1155 = vmatpush1.msra.mxu1 %v5645_v61  ;;  %v12102_v60 = vld [vmem:[#allocation161_spill] sm:$0xff] }
 0x15d   :  { %1085 = vmatprep.subr.mxu0 %v5655_v63  ;;  %1156 = vmatprep.subr.mxu1 %v5662_v0 }
 0x15e   :  { %1086 = vmatpush1.msra.mxu0 %v5669_v1  ;;  %1157 = vmatpush1.msra.mxu1 %v5674_v2  ;;  %v12103_v1 = vsub.s32 3, %v12097_v47 }
 0x15f   :  { %1087 = vmatprep.subr.mxu0 %v5681_v4  ;;  %1158 = vmatprep.subr.mxu1 %v5686_v5  ;;  %v12104_v4 = vld [vmem:[#allocation162_spill] sm:$0xff] }
 0x160   :  { %1088 = vmatpush1.msra.mxu0 %v5693_v6  ;;  %1159 = vmatpush1.msra.mxu1 %v5700_v7  ;;  %v6929_v2 = vrot.slane %v566_v46, %v12103_v1  ;;  %v12120_v1 = vld [vmem:[#allocation16_spill] sm:$0xff] }
 0x161   :  { %1089 = vmatprep.subr.mxu0 %v5710_v9  ;;  %1160 = vmatprep.subr.mxu1 %v5717_v10  ;;  %v12105_v9 = vsub.s32 2, %v12097_v47 }
 0x162   :  { %1090 = vmatpush1.msra.mxu0 %v5724_v11  ;;  %1161 = vmatpush1.msra.mxu1 %v5729_v12  ;;  %v12107_v11 = vld [vmem:[#allocation160_spill] sm:$0xff] }
 0x163   :  { %1091 = vmatprep.subr.mxu0 %v5736_v13  ;;  %1162 = vmatprep.subr.mxu1 %v5741_v14  ;;  %v6935_v10 = vrot.slane %v566_v46, %v12105_v9  ;;  %v12125_v9 = vld [vmem:[#allocation21_spill] sm:$0xff] }
 0x164   :  { %1092 = vmatpush1.msra.mxu0 %v5748_v15  ;;  %1163 = vmatpush1.msra.mxu1 %v5755_v16 }
 0x165   :  { %1093 = vmatprep.subr.mxu0 %v5765_v20  ;;  %1164 = vmatprep.subr.mxu1 %v5772_v21  ;;  %12106 = vst [vmem:[#allocation124_spill] sm:$0xff] %v6935_v10 }
 0x166   :  { %1094 = vmatpush1.msra.mxu0 %v5779_v22  ;;  %1165 = vmatpush1.msra.mxu1 %v5784_v23 }
 0x167   :  { %1095 = vmatprep.subr.mxu0 %v5791_v24  ;;  %1166 = vmatprep.subr.mxu1 %v5796_v25 }
 0x168   :  { %1096 = vmatpush1.msra.mxu0 %v5803_v26  ;;  %1167 = vmatpush1.msra.mxu1 %v5810_v27 }
 0x169   :  { %1129 = vmatprep.mubr.f32.mxu0 %v11995_v53  ;;  %1200 = vmatprep.mubr.f32.mxu1 %v11995_v53 }
 0x16a   :  { %1214 = vmatprep.subr.mxu0 %v5817_v28  ;;  %1285 = vmatprep.subr.mxu1 %v12096_v45 }
 0x209   :  { %v967_v50 = vpop.f32.mrf.mxu0  ;;  %v1038_v51 = vpop.f32.mrf.mxu1 }
 0x20a   :  { %v968_v54 = vadd.f32 %v967_v50, %v12100_v52  ;;  %v1039_v12 = vadd.f32 %v1038_v51, %v12107_v11  ;;  %v12108_v50 = vld [vmem:[#allocation4_spill] sm:$0xff]  ;;  %v12109_v51 = vld [vmem:[#allocation5_spill] sm:$0xff]  ;;  %v12110_v52 = vld [vmem:[#allocation6_spill] sm:$0xff] }
 0x20b   :  { %v969_v57 = vpop.f32.mrf.mxu0  ;;  %v1040_v58 = vpop.f32.mrf.mxu1  ;;  %v12126_v11 = vld [vmem:[#allocation22_spill] sm:$0xff] }
 0x20c   :  { %v1043_v59 = vadd.f32 %v968_v54, %v6917_v49  ;;  %v970_v61 = vadd.f32 %v969_v57, %v12102_v60  ;;  %v1041_v5 = vadd.f32 %v1040_v58, %v12104_v4  ;;  %v1045_v13 = vadd.f32 %v1039_v12, %v6935_v10  ;;  %v12111_v54 = vld [vmem:[#allocation7_spill] sm:$0xff]  ;;  %v12113_v57 = vld [vmem:[#allocation9_spill] sm:$0xff]  ;;  %v12114_v58 = vld [vmem:[#allocation10_spill] sm:$0xff] }
 0x20d   :  { %v12116_v60 = vld [vmem:[#allocation12_spill] sm:$0xff]  ;;  %v12121_v4 = vld [vmem:[#allocation17_spill] sm:$0xff]  ;;  %v12127_v12 = vld [vmem:[#allocation23_spill] sm:$0xff] }
 0x20e   :  { %v1047_v63 = vmul.f32 0.5, %v1043_v59  ;;  %v1044_v0 = vadd.f32 %v970_v61, %v6922_v56  ;;  %v1046_v7 = vadd.f32 %v1041_v5, %v6929_v2  ;;  %v1049_v14 = vmul.f32 0.5, %v1045_v13  ;;  %v12115_v59 = vld [vmem:[#allocation11_spill] sm:$0xff]  ;;  %v12117_v61 = vld [vmem:[#allocation13_spill] sm:$0xff]  ;;  %v12122_v5 = vld [vmem:[#allocation18_spill] sm:$0xff] }
 0x20f   :  { %v12128_v13 = vld [vmem:[#allocation24_spill] sm:$0xff] }
 0x210   :  { %4594 = vtanh.f32 %v1047_v63  ;;  %v1048_v6 = vmul.f32 0.5, %v1044_v0  ;;  %v12118_v63 = vld [vmem:[#allocation14_spill] sm:$0xff]  ;;  %v12119_v0 = vld [vmem:[#allocation15_spill] sm:$0xff] }
 0x212   :  { %4596 = vtanh.f32 %v1048_v6  ;;  %v12123_v6 = vld [vmem:[#allocation19_spill] sm:$0xff] }
 0x213   :  { %4598 = vtanh.f32 %v1046_v7  ;;  %v12124_v7 = vld [vmem:[#allocation20_spill] sm:$0xff] }
 0x214   :  { %4600 = vtanh.f32 %v1049_v14  ;;  %v12129_v14 = vld [vmem:[#allocation25_spill] sm:$0xff] }
 0x21d   :  { %v4595_v15 = vpop.eup %4594 }
 0x21e   :  { %v1053_v16 = vmul.f32 0.5, %v4595_v15  ;;  %v12130_v15 = vld [vmem:[#allocation26_spill] sm:$0xff] }
 0x21f   :  { %v4597_v20 = vpop.eup %4596 }
 0x220   :  { %v1056_v21 = vadd.f32 0.5, %v1053_v16  ;;  %v1054_v22 = vmul.f32 0.5, %v4597_v20  ;;  %v4599_v24 = vpop.eup %4598  ;;  %v12131_v16 = vld [vmem:[#allocation27_spill] sm:$0xff]  ;;  %v12132_v20 = vld [vmem:[#allocation28_spill] sm:$0xff] }
 0x221   :  { %v4601_v28 = vpop.eup %4600 }
 0x222   :  { %v1057_v23 = vadd.f32 0.5, %v1054_v22  ;;  %v1061_v26 = vmul.f32 %v4599_v24, %v1056_v21  ;;  %v1055_v45 = vmul.f32 0.5, %v4601_v28  ;;  %v12133_v21 = vld [vmem:[#allocation29_spill] sm:$0xff]  ;;  %v12134_v22 = vld [vmem:[#allocation30_spill] sm:$0xff]  ;;  %v12136_v24 = vld [vmem:[#allocation32_spill] sm:$0xff] }
 0x223   :  { %v12139_v28 = vld [vmem:[#allocation35_spill] sm:$0xff] }
 0x224   :  { %v1060_v25 = vmul.f32 0.0, %v1057_v23  ;;  %v1058_v46 = vadd.f32 0.5, %v1055_v45  ;;  %v12135_v23 = vld [vmem:[#allocation31_spill] sm:$0xff]  ;;  %v12140_v45 = vld [vmem:[#allocation36_spill] sm:$0xff] }
 0x226   :  { %v6939_v27 = vadd.f32 %v1061_v26, %v1060_v25  ;;  %v12137_v25 = vld [vmem:[#allocation33_spill] sm:$0xff]  ;;  %v12138_v26 = vld [vmem:[#allocation34_spill] sm:$0xff] }
 0x228   :  { %4602 = vtanh.f32 %v6939_v27 }
 0x235   :  { %v4603_v47 = vpop.eup %4602 }
 0x236   :  { %v1064_v48 = vmul.f32 %v4603_v47, %v1058_v46  ;;  %v12141_v46 = vld [vmem:[#allocation37_spill] sm:$0xff]  ;;  %v12142_v47 = vld [vmem:[#allocation38_spill] sm:$0xff] }
 0x238   :  { %1130 = vmatmul.mubr.f32.vlgmr.msra.gmra.mxu0 %v1064_v48  ;;  %1201 = vmatmul.mubr.f32.vlgmr.msra.gmra.mxu1 %v1064_v48  ;;  %v12143_v48 = vld [vmem:[#allocation39_spill] sm:$0xff] }
 0x239   :  { %1215 = vmatpush1.msra.mxu0 %v12108_v50  ;;  %1286 = vmatpush1.msra.mxu1 %v12109_v51  ;;  %v12144_v50 = vld [vmem:[#allocation40_spill] sm:$0xff]  ;;  %v12145_v51 = vld [vmem:[#allocation41_spill] sm:$0xff] }
 0x23a   :  { %1216 = vmatprep.subr.mxu0 %v12110_v52  ;;  %1287 = vmatprep.subr.mxu1 %v12111_v54  ;;  %v12146_v52 = vld [vmem:[#allocation42_spill] sm:$0xff]  ;;  %v12147_v54 = vld [vmem:[#allocation43_spill] sm:$0xff] }
 0x23b   :  { %1217 = vmatpush1.msra.mxu0 %v12112_v55  ;;  %1288 = vmatpush1.msra.mxu1 %v12113_v57  ;;  %v12148_v55 = vld [vmem:[#allocation44_spill] sm:$0xff]  ;;  %v12149_v57 = vld [vmem:[#allocation45_spill] sm:$0xff] }
 0x23c   :  { %1218 = vmatprep.subr.mxu0 %v12114_v58  ;;  %1289 = vmatprep.subr.mxu1 %v12115_v59  ;;  %v12150_v58 = vld [vmem:[#allocation46_spill] sm:$0xff]  ;;  %v12151_v59 = vld [vmem:[#allocation47_spill] sm:$0xff] }
 0x23d   :  { %1219 = vmatpush1.msra.mxu0 %v12116_v60  ;;  %1290 = vmatpush1.msra.mxu1 %v12117_v61  ;;  %v12152_v60 = vld [vmem:[#allocation48_spill] sm:$0xff]  ;;  %v12153_v61 = vld [vmem:[#allocation49_spill] sm:$0xff] }
 0x23e   :  { %1220 = vmatprep.subr.mxu0 %v12118_v63  ;;  %1291 = vmatprep.subr.mxu1 %v12119_v0  ;;  %v12154_v63 = vld [vmem:[#allocation50_spill] sm:$0xff]  ;;  %v12155_v0 = vld [vmem:[#allocation51_spill] sm:$0xff] }
 0x23f   :  { %1221 = vmatpush1.msra.mxu0 %v12120_v1  ;;  %1292 = vmatpush1.msra.mxu1 %v12121_v4  ;;  %v12156_v1 = vld [vmem:[#allocation52_spill] sm:$0xff]  ;;  %v12157_v4 = vld [vmem:[#allocation53_spill] sm:$0xff] }
 0x240   :  { %1222 = vmatprep.subr.mxu0 %v12122_v5  ;;  %1293 = vmatprep.subr.mxu1 %v12123_v6  ;;  %v12158_v5 = vld [vmem:[#allocation54_spill] sm:$0xff]  ;;  %v12159_v6 = vld [vmem:[#allocation55_spill] sm:$0xff] }
 0x241   :  { %1223 = vmatpush1.msra.mxu0 %v12124_v7  ;;  %1294 = vmatpush1.msra.mxu1 %v12125_v9  ;;  %v12160_v7 = vld [vmem:[#allocation56_spill] sm:$0xff]  ;;  %v12161_v9 = vld [vmem:[#allocation57_spill] sm:$0xff] }
 0x242   :  { %1224 = vmatprep.subr.mxu0 %v12126_v11  ;;  %1295 = vmatprep.subr.mxu1 %v12127_v12  ;;  %v12162_v11 = vld [vmem:[#allocation58_spill] sm:$0xff]  ;;  %v12163_v12 = vld [vmem:[#allocation59_spill] sm:$0xff] }
 0x243   :  { %1225 = vmatpush1.msra.mxu0 %v12128_v13  ;;  %1296 = vmatpush1.msra.mxu1 %v12129_v14  ;;  %v12164_v13 = vld [vmem:[#allocation60_spill] sm:$0xff]  ;;  %v12165_v14 = vld [vmem:[#allocation61_spill] sm:$0xff] }
 0x244   :  { %1226 = vmatprep.subr.mxu0 %v12130_v15  ;;  %1297 = vmatprep.subr.mxu1 %v12131_v16  ;;  %v12166_v15 = vld [vmem:[#allocation62_spill] sm:$0xff]  ;;  %v12167_v16 = vld [vmem:[#allocation63_spill] sm:$0xff] }
 0x245   :  { %1227 = vmatpush1.msra.mxu0 %v12132_v20  ;;  %1298 = vmatpush1.msra.mxu1 %v12133_v21  ;;  %v12168_v20 = vld [vmem:[#allocation64_spill] sm:$0xff]  ;;  %v12169_v21 = vld [vmem:[#allocation65_spill] sm:$0xff] }
 0x246   :  { %1228 = vmatprep.subr.mxu0 %v12134_v22  ;;  %1299 = vmatprep.subr.mxu1 %v12135_v23  ;;  %v12170_v22 = vld [vmem:[#allocation66_spill] sm:$0xff]  ;;  %v12171_v23 = vld [vmem:[#allocation67_spill] sm:$0xff] }
 0x247   :  { %1229 = vmatpush1.msra.mxu0 %v12136_v24  ;;  %1300 = vmatpush1.msra.mxu1 %v12137_v25  ;;  %v12172_v24 = vld [vmem:[#allocation68_spill] sm:$0xff]  ;;  %v12173_v25 = vld [vmem:[#allocation69_spill] sm:$0xff] }
 0x248   :  { %1230 = vmatprep.subr.mxu0 %v12138_v26  ;;  %1301 = vmatprep.subr.mxu1 %v12139_v28  ;;  %v12174_v26 = vld [vmem:[#allocation70_spill] sm:$0xff]  ;;  %v12175_v28 = vld [vmem:[#allocation71_spill] sm:$0xff] }
 0x249   :  { %1231 = vmatpush1.msra.mxu0 %v12140_v45  ;;  %1302 = vmatpush1.msra.mxu1 %v12141_v46  ;;  %v12176_v45 = vld [vmem:[#allocation72_spill] sm:$0xff]  ;;  %v12177_v46 = vld [vmem:[#allocation73_spill] sm:$0xff] }
 0x24a   :  { %1232 = vmatprep.subr.mxu0 %v12142_v47  ;;  %1303 = vmatprep.subr.mxu1 %v12143_v48  ;;  %v12178_v47 = vld [vmem:[#allocation74_spill] sm:$0xff]  ;;  %v12179_v48 = vld [vmem:[#allocation75_spill] sm:$0xff] }
 0x24b   :  { %1233 = vmatpush1.msra.mxu0 %v12144_v50  ;;  %1304 = vmatpush1.msra.mxu1 %v12145_v51  ;;  %v12181_v50 = vld [vmem:[#allocation77_spill] sm:$0xff]  ;;  %v12182_v51 = vld [vmem:[#allocation78_spill] sm:$0xff] }
 0x24c   :  { %1234 = vmatprep.subr.mxu0 %v12146_v52  ;;  %1305 = vmatprep.subr.mxu1 %v12147_v54  ;;  %v12183_v52 = vld [vmem:[#allocation79_spill] sm:$0xff]  ;;  %v12184_v54 = vld [vmem:[#allocation80_spill] sm:$0xff] }
 0x24d   :  { %1235 = vmatpush1.msra.mxu0 %v12148_v55  ;;  %1306 = vmatpush1.msra.mxu1 %v12149_v57  ;;  %v12185_v55 = vld [vmem:[#allocation81_spill] sm:$0xff]  ;;  %v12186_v57 = vld [vmem:[#allocation82_spill] sm:$0xff] }
 0x24e   :  { %1236 = vmatprep.subr.mxu0 %v12150_v58  ;;  %1307 = vmatprep.subr.mxu1 %v12151_v59  ;;  %v12187_v58 = vld [vmem:[#allocation83_spill] sm:$0xff]  ;;  %v12188_v59 = vld [vmem:[#allocation84_spill] sm:$0xff] }
 0x24f   :  { %1237 = vmatpush1.msra.mxu0 %v12152_v60  ;;  %1308 = vmatpush1.msra.mxu1 %v12153_v61  ;;  %v12189_v60 = vld [vmem:[#allocation85_spill] sm:$0xff]  ;;  %v12190_v61 = vld [vmem:[#allocation86_spill] sm:$0xff] }
 0x250   :  { %1238 = vmatprep.subr.mxu0 %v12154_v63  ;;  %1309 = vmatprep.subr.mxu1 %v12155_v0  ;;  %v12191_v63 = vld [vmem:[#allocation87_spill] sm:$0xff]  ;;  %v12192_v0 = vld [vmem:[#allocation88_spill] sm:$0xff] }
 0x251   :  { %1239 = vmatpush1.msra.mxu0 %v12156_v1  ;;  %1310 = vmatpush1.msra.mxu1 %v12157_v4  ;;  %v12193_v1 = vld [vmem:[#allocation89_spill] sm:$0xff]  ;;  %v12194_v4 = vld [vmem:[#allocation90_spill] sm:$0xff] }
 0x252   :  { %1240 = vmatprep.subr.mxu0 %v12158_v5  ;;  %1311 = vmatprep.subr.mxu1 %v12159_v6  ;;  %v12195_v5 = vld [vmem:[#allocation91_spill] sm:$0xff]  ;;  %v12196_v6 = vld [vmem:[#allocation92_spill] sm:$0xff] }
 0x253   :  { %1241 = vmatpush1.msra.mxu0 %v12160_v7  ;;  %1312 = vmatpush1.msra.mxu1 %v12161_v9  ;;  %v12197_v7 = vld [vmem:[#allocation93_spill] sm:$0xff]  ;;  %v12198_v9 = vld [vmem:[#allocation94_spill] sm:$0xff] }
 0x254   :  { %1242 = vmatprep.subr.mxu0 %v12162_v11  ;;  %1313 = vmatprep.subr.mxu1 %v12163_v12  ;;  %v12199_v11 = vld [vmem:[#allocation95_spill] sm:$0xff]  ;;  %v12200_v12 = vld [vmem:[#allocation96_spill] sm:$0xff] }
 0x255   :  { %1243 = vmatpush1.msra.mxu0 %v12164_v13  ;;  %1314 = vmatpush1.msra.mxu1 %v12165_v14  ;;  %v12201_v13 = vld [vmem:[#allocation97_spill] sm:$0xff]  ;;  %v12202_v14 = vld [vmem:[#allocation98_spill] sm:$0xff] }
 0x256   :  { %1244 = vmatprep.subr.mxu0 %v12166_v15  ;;  %1315 = vmatprep.subr.mxu1 %v12167_v16  ;;  %v12203_v15 = vld [vmem:[#allocation99_spill] sm:$0xff]  ;;  %v12204_v16 = vld [vmem:[#allocation100_spill] sm:$0xff] }
 0x257   :  { %1245 = vmatpush1.msra.mxu0 %v12168_v20  ;;  %1278 = vmatprep.mubr.f32.mxu0 %v11995_v53  ;;  %v12205_v20 = vld [vmem:[#allocation101_spill] sm:$0xff] }
 0x258   :  { %1316 = vmatpush1.msra.mxu1 %v12169_v21  ;;  %1349 = vmatprep.mubr.f32.mxu1 %v11995_v53  ;;  %v12206_v21 = vld [vmem:[#allocation102_spill] sm:$0xff] }
 0x259   :  { %1279 = vmatmul.mubr.f32.vlgmr.msra.gmra.mxu0 %v6732_v42  ;;  %1350 = vmatmul.mubr.f32.vlgmr.msra.gmra.mxu1 %v6732_v42  ;;  %v12180_v42 = vld [vmem:[#allocation76_spill] sm:$0xff] }
 0x25a   :  { %1378 = vmatprep.subr.mxu0 %v12170_v22  ;;  %1449 = vmatprep.subr.mxu1 %v12171_v23  ;;  %v12207_v22 = vld [vmem:[#allocation103_spill] sm:$0xff]  ;;  %v12208_v23 = vld [vmem:[#allocation104_spill] sm:$0xff] }
 0x25b   :  { %1379 = vmatpush1.msra.mxu0 %v12172_v24  ;;  %1450 = vmatpush1.msra.mxu1 %v12173_v25  ;;  %v12209_v24 = vld [vmem:[#allocation105_spill] sm:$0xff]  ;;  %v12210_v25 = vld [vmem:[#allocation106_spill] sm:$0xff] }
 0x25c   :  { %1380 = vmatprep.subr.mxu0 %v12174_v26  ;;  %1451 = vmatprep.subr.mxu1 %v12175_v28  ;;  %v12211_v26 = vld [vmem:[#allocation107_spill] sm:$0xff]  ;;  %v12212_v28 = vld [vmem:[#allocation108_spill] sm:$0xff] }
 0x25d   :  { %1381 = vmatpush1.msra.mxu0 %v12176_v45  ;;  %1452 = vmatpush1.msra.mxu1 %v12177_v46  ;;  %v12213_v45 = vld [vmem:[#allocation109_spill] sm:$0xff]  ;;  %v12214_v46 = vld [vmem:[#allocation110_spill] sm:$0xff] }
 0x25e   :  { %1382 = vmatprep.subr.mxu0 %v12178_v47  ;;  %1453 = vmatprep.subr.mxu1 %v12179_v48  ;;  %v12215_v47 = vld [vmem:[#allocation111_spill] sm:$0xff]  ;;  %v12216_v48 = vld [vmem:[#allocation112_spill] sm:$0xff] }
 0x25f   :  { %1383 = vmatpush1.msra.mxu0 %v12180_v42  ;;  %1454 = vmatpush1.msra.mxu1 %v12181_v50  ;;  %v12217_v42 = vld [vmem:[#allocation113_spill] sm:$0xff]  ;;  %v12218_v50 = vld [vmem:[#allocation114_spill] sm:$0xff] }
 0x260   :  { %1384 = vmatprep.subr.mxu0 %v12182_v51  ;;  %1455 = vmatprep.subr.mxu1 %v12183_v52  ;;  %v12219_v51 = vld [vmem:[#allocation115_spill] sm:$0xff]  ;;  %v12220_v52 = vld [vmem:[#allocation116_spill] sm:$0xff] }
 0x261   :  { %1385 = vmatpush1.msra.mxu0 %v12184_v54  ;;  %1456 = vmatpush1.msra.mxu1 %v12185_v55  ;;  %v12221_v54 = vld [vmem:[#allocation117_spill] sm:$0xff]  ;;  %v12222_v55 = vld [vmem:[#allocation118_spill] sm:$0xff] }
 0x262   :  { %1386 = vmatprep.subr.mxu0 %v12186_v57  ;;  %1457 = vmatprep.subr.mxu1 %v12187_v58  ;;  %v12223_v57 = vld [vmem:[#allocation119_spill] sm:$0xff]  ;;  %v12224_v58 = vld [vmem:[#allocation120_spill] sm:$0xff] }
 0x263   :  { %1387 = vmatpush1.msra.mxu0 %v12188_v59  ;;  %1458 = vmatpush1.msra.mxu1 %v12189_v60  ;;  %v12225_v59 = vld [vmem:[#allocation121_spill] sm:$0xff]  ;;  %v12226_v60 = vld [vmem:[#allocation122_spill] sm:$0xff] }
 0x264   :  { %1388 = vmatprep.subr.mxu0 %v12190_v61  ;;  %1459 = vmatprep.subr.mxu1 %v12191_v63  ;;  %v12227_v61 = vld [vmem:[#allocation123_spill] sm:$0xff]  ;;  %v12228_v63 = vld [vmem:[#allocation125_spill] sm:$0xff] }
 0x265   :  { %1389 = vmatpush1.msra.mxu0 %v12192_v0  ;;  %1460 = vmatpush1.msra.mxu1 %v12193_v1  ;;  %v12229_v0 = vld [vmem:[#allocation126_spill] sm:$0xff]  ;;  %v12230_v1 = vld [vmem:[#allocation127_spill] sm:$0xff] }
 0x266   :  { %1390 = vmatprep.subr.mxu0 %v12194_v4  ;;  %1461 = vmatprep.subr.mxu1 %v12195_v5  ;;  %v12231_v4 = vld [vmem:[#allocation128_spill] sm:$0xff]  ;;  %v12232_v5 = vld [vmem:[#allocation129_spill] sm:$0xff] }
 0x267   :  { %1391 = vmatpush1.msra.mxu0 %v12196_v6  ;;  %1462 = vmatpush1.msra.mxu1 %v12197_v7  ;;  %v12233_v6 = vld [vmem:[#allocation130_spill] sm:$0xff]  ;;  %v7077_v7 = vld [vmem:[%s11375_s5 + $0x1e8] sm:$0xff] }
 0x268   :  { %1392 = vmatprep.subr.mxu0 %v12198_v9  ;;  %1463 = vmatprep.subr.mxu1 %v12199_v11  ;;  %v7083_v9 = vld [vmem:[%s11375_s5 + $0x1f8] sm:$0xff] }
 0x269   :  { %1393 = vmatpush1.msra.mxu0 %v12200_v12  ;;  %1464 = vmatpush1.msra.mxu1 %v12201_v13 }
 0x26a   :  { %1394 = vmatprep.subr.mxu0 %v12202_v14  ;;  %1465 = vmatprep.subr.mxu1 %v12203_v15 }
 0x26b   :  { %1395 = vmatpush1.msra.mxu0 %v12204_v16  ;;  %1466 = vmatpush1.msra.mxu1 %v12205_v20  ;;  %v12234_v20 = vld [vmem:[#allocation131_spill] sm:$0xff] }
 0x26c   :  { %1396 = vmatprep.subr.mxu0 %v12206_v21  ;;  %1467 = vmatprep.subr.mxu1 %v12207_v22 }
 0x26d   :  { %1397 = vmatpush1.msra.mxu0 %v12208_v23  ;;  %1468 = vmatpush1.msra.mxu1 %v12209_v24 }
 0x26e   :  { %1398 = vmatprep.subr.mxu0 %v12210_v25  ;;  %1469 = vmatprep.subr.mxu1 %v12211_v26  ;;  %v12235_v25 = vld [vmem:[#allocation132_spill] sm:$0xff] }
 0x26f   :  { %1399 = vmatpush1.msra.mxu0 %v12212_v28  ;;  %1470 = vmatpush1.msra.mxu1 %v12213_v45  ;;  %v12236_v45 = vld [vmem:[#allocation134_spill] sm:$0xff] }
 0x270   :  { %1400 = vmatprep.subr.mxu0 %v12214_v46  ;;  %1471 = vmatprep.subr.mxu1 %v12215_v47  ;;  %v12237_v47 = vld [vmem:[#allocation133_spill] sm:$0xff] }
 0x271   :  { %1401 = vmatpush1.msra.mxu0 %v12216_v48  ;;  %1472 = vmatpush1.msra.mxu1 %v12217_v42 }
 0x272   :  { %1402 = vmatprep.subr.mxu0 %v12218_v50  ;;  %1473 = vmatprep.subr.mxu1 %v12219_v51 }
 0x273   :  { %1403 = vmatpush1.msra.mxu0 %v12220_v52  ;;  %1474 = vmatpush1.msra.mxu1 %v12221_v54 }
 0x274   :  { %1404 = vmatprep.subr.mxu0 %v12222_v55  ;;  %1475 = vmatprep.subr.mxu1 %v12223_v57 }
 0x275   :  { %1405 = vmatpush1.msra.mxu0 %v12224_v58  ;;  %1476 = vmatpush1.msra.mxu1 %v12225_v59 }
 0x276   :  { %1406 = vmatprep.subr.mxu0 %v12226_v60  ;;  %1477 = vmatprep.subr.mxu1 %v12227_v61 }
 0x277   :  { %1407 = vmatpush1.msra.mxu0 %v12228_v63  ;;  %1478 = vmatpush1.msra.mxu1 %v12229_v0 }
 0x278   :  { %1408 = vmatprep.subr.mxu0 %v12230_v1  ;;  %1479 = vmatprep.subr.mxu1 %v12231_v4 }
 0x279   :  { %1409 = vmatpush1.msra.mxu0 %v12232_v5  ;;  %1442 = vmatprep.mubr.f32.mxu0 %v11995_v53 }
 0x27a   :  { %1480 = vmatpush1.msra.mxu1 %v12233_v6  ;;  %1513 = vmatprep.mubr.f32.mxu1 %v11995_v53  ;;  %v7245_v6 = vld [vmem:[%s11375_s5 + $0xb0] sm:$0xff] }
 0x27b   :  { %1542 = vmatprep.subr.mxu0 %v7077_v7  ;;  %1613 = vmatprep.subr.mxu1 %v7083_v9 }
 0x2f8   :  { %v7086_v11 = vpop.f32.mrf.mxu0  ;;  %v7088_v12 = vpop.f32.mrf.mxu1 }
 0x2fa   :  { %v7090_v13 = vpop.f32.mrf.mxu0  ;;  %v7092_v14 = vpop.f32.mrf.mxu1 }
 0x319   :  { %v1280_v15 = vpop.f32.mrf.mxu0  ;;  %v1351_v16 = vpop.f32.mrf.mxu1 }
 0x31a   :  { %v1356_v21 = vadd.f32 %v1280_v15, %v12234_v20  ;;  %v1358_v48 = vadd.f32 %v1351_v16, %v12237_v47  ;;  %v7251_v15 = vld [vmem:[%s11375_s5 + $0x88] sm:$0xff]  ;;  %v7257_v16 = vld [vmem:[%s11375_s5 + $0x98] sm:$0xff]  ;;  %v7263_v20 = vld [vmem:[%s11375_s5 + $0x80] sm:$0xff] }
 0x31b   :  { %v1282_v22 = vpop.f32.mrf.mxu0  ;;  %v1353_v23 = vpop.f32.mrf.mxu1  ;;  %v7323_v47 = vld [vmem:[%s11375_s5 + $0x28] sm:$0xff] }
 0x31c   :  { %v1360_v24 = vmul.f32 0.5, %v1356_v21  ;;  %v1357_v26 = vadd.f32 %v1282_v22, %v12235_v25  ;;  %v1359_v46 = vadd.f32 %v1353_v23, %v12236_v45  ;;  %v1362_v42 = vmul.f32 0.5, %v1358_v48  ;;  %v7269_v21 = vld [vmem:[%s11375_s5 + $0x90] sm:$0xff]  ;;  %v7275_v22 = vld [vmem:[%s11375_s5 + $0x68] sm:$0xff]  ;;  %v7281_v23 = vld [vmem:[%s11375_s5 + $0x78] sm:$0xff] }
 0x31d   :  { %v7293_v25 = vld [vmem:[%s11375_s5 + $0x70] sm:$0xff]  ;;  %v7311_v45 = vld [vmem:[%s11375_s5 + $0x40] sm:$0xff]  ;;  %v7329_v48 = vld [vmem:[%s11375_s5 + $0x38] sm:$0xff] }
 0x31e   :  { %4604 = vtanh.f32 %v1360_v24  ;;  %v1361_v28 = vmul.f32 0.5, %v1357_v26  ;;  %v7287_v24 = vld [vmem:[%s11375_s5 + $0x60] sm:$0xff]  ;;  %v7299_v26 = vld [vmem:[%s11375_s5 + $0x48] sm:$0xff] }
 0x320   :  { %4606 = vtanh.f32 %v1361_v28  ;;  %v7305_v28 = vld [vmem:[%s11375_s5 + $0x58] sm:$0xff] }
 0x321   :  { %4608 = vtanh.f32 %v1359_v46  ;;  %v7317_v46 = vld [vmem:[%s11375_s5 + $0x50] sm:$0xff] }
 0x322   :  { %4610 = vtanh.f32 %v1362_v42  ;;  %v7335_v42 = vld [vmem:[%s11375_s5 + $0x20] sm:$0xff] }
 0x32b   :  { %v4605_v50 = vpop.eup %4604 }
 0x32c   :  { %v1366_v51 = vmul.f32 0.5, %v4605_v50  ;;  %v7341_v50 = vld [vmem:[%s11375_s5 + $0x30] sm:$0xff] }
 0x32d   :  { %v4607_v52 = vpop.eup %4606 }
 0x32e   :  { %v1369_v54 = vadd.f32 0.5, %v1366_v51  ;;  %v1367_v55 = vmul.f32 0.5, %v4607_v52  ;;  %v4609_v57 = vpop.eup %4608  ;;  %v7347_v51 = vld [vmem:[%s11375_s5 + $0x8] sm:$0xff]  ;;  %v7353_v52 = vld [vmem:[%s11375_s5 + $0x18] sm:$0xff] }
 0x32f   :  { %v4611_v63 = vpop.eup %4610  ;;  %12240 = vst [vmem:[#allocation159_spill] sm:$0xff] %v7347_v51  ;;  %12241 = vst [vmem:[#allocation161_spill] sm:$0xff] %v7353_v52 }
 0x330   :  { %v1370_v58 = vadd.f32 0.5, %v1367_v55  ;;  %v1374_v59 = vmul.f32 %v4609_v57, %v1369_v54  ;;  %v1368_v0 = vmul.f32 0.5, %v4611_v63  ;;  %v7359_v54 = vld [vmem:[%s11375_s5] sm:$0xff]  ;;  %v7365_v55 = vld [vmem:[%s11375_s5 + $0x10] sm:$0xff]  ;;  %v7373_v57 = vld [vmem:[%s11376_s2 + $0x1e8] sm:$0xff] }
 0x331   :  { %12242 = vst [vmem:[#allocation162_spill] sm:$0xff] %v7359_v54  ;;  %12243 = vst [vmem:[#allocation160_spill] sm:$0xff] %v7365_v55 }
 0x332   :  { %v1373_v60 = vmul.f32 %v1370_v58, %v6729_v40  ;;  %v1371_v1 = vadd.f32 0.5, %v1368_v0  ;;  %v12238_v40 = vld [vmem:[#allocation163_spill] sm:$0xff]  ;;  %12244 = vst [vmem:[#allocation4_spill] sm:$0xff] %v7373_v57  ;;  %v7379_v58 = vld [vmem:[%s11376_s2 + $0x1f8] sm:$0xff] }
 0x333   :  { %12245 = vst [vmem:[#allocation5_spill] sm:$0xff] %v7379_v58 }
 0x334   :  { %v7099_v61 = vadd.f32 %v1374_v59, %v1373_v60 }
 0x336   :  { %4612 = vtanh.f32 %v7099_v61 }
 0x343   :  { %v4613_v4 = vpop.eup %4612 }
 0x344   :  { %v7102_v5 = vmul.f32 %v4613_v4, %v1371_v1 }
 0x346   :  { %1443 = vmatmul.mubr.f32.vlgmr.msra.gmra.mxu0 %v7102_v5  ;;  %1514 = vmatmul.mubr.f32.vlgmr.msra.gmra.mxu1 %v7102_v5 }
 0x347   :  { %1543 = vmatpush1.msra.mxu0 %v6739_v29  ;;  %1614 = vmatpush1.msra.mxu1 %v6745_v31  ;;  %v12239_v29 = vld [vmem:[#allocation164_spill] sm:$0xff] }
 0x348   :  { %1544 = vmatprep.subr.mxu0 %v6751_v8  ;;  %1615 = vmatprep.subr.mxu1 %v6757_v30  ;;  %v7131_v31 = vld [vmem:[%s11375_s5 + $0x128] sm:$0xff]  ;;  %v7137_v8 = vld [vmem:[%s11375_s5 + $0x138] sm:$0xff]  ;;  %v7143_v30 = vld [vmem:[%s11375_s5 + $0x120] sm:$0xff] }
 0x349   :  { %1545 = vmatpush1.msra.mxu0 %v6763_v43  ;;  %1616 = vmatpush1.msra.mxu1 %v6769_v36  ;;  %v7149_v43 = vld [vmem:[%s11375_s5 + $0x130] sm:$0xff]  ;;  %v7155_v36 = vld [vmem:[%s11375_s5 + $0x108] sm:$0xff] }
 0x34a   :  { %1546 = vmatprep.subr.mxu0 %v6775_v37  ;;  %1617 = vmatprep.subr.mxu1 %v6781_v38  ;;  %v7161_v37 = vld [vmem:[%s11375_s5 + $0x118] sm:$0xff]  ;;  %v7167_v38 = vld [vmem:[%s11375_s5 + $0x100] sm:$0xff] }
 0x34b   :  { %1547 = vmatpush1.msra.mxu0 %v6787_v3  ;;  %1618 = vmatpush1.msra.mxu1 %v6793_v41  ;;  %v7173_v3 = vld [vmem:[%s11375_s5 + $0x110] sm:$0xff]  ;;  %v7179_v41 = vld [vmem:[%s11375_s5 + $0xe8] sm:$0xff] }
 0x34c   :  { %1548 = vmatprep.subr.mxu0 %v6799_v34  ;;  %1619 = vmatprep.subr.mxu1 %v6805_v32  ;;  %v7185_v34 = vld [vmem:[%s11375_s5 + $0xf8] sm:$0xff]  ;;  %v7191_v32 = vld [vmem:[%s11375_s5 + $0xe0] sm:$0xff] }
 0x34d   :  { %1549 = vmatpush1.msra.mxu0 %v6811_v44  ;;  %1620 = vmatpush1.msra.mxu1 %v6817_v19  ;;  %v7197_v44 = vld [vmem:[%s11375_s5 + $0xf0] sm:$0xff]  ;;  %v7203_v19 = vld [vmem:[%s11375_s5 + $0xc8] sm:$0xff] }
 0x34e   :  { %1550 = vmatprep.subr.mxu0 %v6823_v33  ;;  %1621 = vmatprep.subr.mxu1 %v6829_v17  ;;  %v7209_v33 = vld [vmem:[%s11375_s5 + $0xd8] sm:$0xff]  ;;  %v7215_v17 = vld [vmem:[%s11375_s5 + $0xc0] sm:$0xff] }
 0x34f   :  { %1551 = vmatpush1.msra.mxu0 %v12238_v40  ;;  %1622 = vmatpush1.msra.mxu1 %v12239_v29 }
 0x350   :  { %1552 = vmatprep.subr.mxu0 %v6847_v62  ;;  %1623 = vmatprep.subr.mxu1 %v6853_v18  ;;  %v7233_v62 = vld [vmem:[%s11375_s5 + $0xb8] sm:$0xff]  ;;  %v7239_v18 = vld [vmem:[%s11375_s5 + $0xa0] sm:$0xff] }
 0x351   :  { %1553 = vmatpush1.msra.mxu0 %v6859_v39  ;;  %1624 = vmatpush1.msra.mxu1 %v6865_v35  ;;  %v7221_v39 = vld [vmem:[%s11375_s5 + $0xd0] sm:$0xff]  ;;  %v7227_v35 = vld [vmem:[%s11375_s5 + $0xa8] sm:$0xff] }
 0x352   :  { %1554 = vmatprep.subr.mxu0 %v7131_v31  ;;  %1625 = vmatprep.subr.mxu1 %v7137_v8 }
 0x353   :  { %1555 = vmatpush1.msra.mxu0 %v7143_v30  ;;  %1626 = vmatpush1.msra.mxu1 %v7149_v43 }
 0x354   :  { %1556 = vmatprep.subr.mxu0 %v7155_v36  ;;  %1627 = vmatprep.subr.mxu1 %v7161_v37 }
 0x355   :  { %1557 = vmatpush1.msra.mxu0 %v7167_v38  ;;  %1628 = vmatpush1.msra.mxu1 %v7173_v3 }
 0x356   :  { %1558 = vmatprep.subr.mxu0 %v7179_v41  ;;  %1629 = vmatprep.subr.mxu1 %v7185_v34 }
 0x357   :  { %1559 = vmatpush1.msra.mxu0 %v7191_v32  ;;  %1630 = vmatpush1.msra.mxu1 %v7197_v44 }
 0x358   :  { %1560 = vmatprep.subr.mxu0 %v7203_v19  ;;  %1631 = vmatprep.subr.mxu1 %v7209_v33 }
 0x359   :  { %1561 = vmatpush1.msra.mxu0 %v7215_v17  ;;  %1632 = vmatpush1.msra.mxu1 %v7221_v39 }
 0x35a   :  { %1562 = vmatprep.subr.mxu0 %v7227_v35  ;;  %1633 = vmatprep.subr.mxu1 %v7233_v62 }
 0x35b   :  { %1563 = vmatpush1.msra.mxu0 %v7239_v18  ;;  %1634 = vmatpush1.msra.mxu1 %v7245_v6 }
 0x35c   :  { %1564 = vmatprep.subr.mxu0 %v7251_v15  ;;  %1635 = vmatprep.subr.mxu1 %v7257_v16 }
 0x35d   :  { %1565 = vmatpush1.msra.mxu0 %v7263_v20  ;;  %1636 = vmatpush1.msra.mxu1 %v7269_v21 }
 0x35e   :  { %1566 = vmatprep.subr.mxu0 %v7275_v22  ;;  %1637 = vmatprep.subr.mxu1 %v7281_v23 }
 0x35f   :  { %1567 = vmatpush1.msra.mxu0 %v7287_v24  ;;  %1638 = vmatpush1.msra.mxu1 %v7293_v25 }
 0x360   :  { %1568 = vmatprep.subr.mxu0 %v7299_v26  ;;  %1639 = vmatprep.subr.mxu1 %v7305_v28 }
 0x361   :  { %1569 = vmatpush1.msra.mxu0 %v7311_v45  ;;  %1640 = vmatpush1.msra.mxu1 %v7317_v46 }
 0x362   :  { %1570 = vmatprep.subr.mxu0 %v7323_v47  ;;  %1641 = vmatprep.subr.mxu1 %v7329_v48 }
 0x363   :  { %1571 = vmatpush1.msra.mxu0 %v7335_v42  ;;  %1642 = vmatpush1.msra.mxu1 %v7341_v50 }
 0x364   :  { %1572 = vmatprep.subr.mxu0 %v7347_v51  ;;  %1643 = vmatprep.subr.mxu1 %v7353_v52 }
 0x365   :  { %1573 = vmatpush1.msra.mxu0 %v7359_v54  ;;  %1644 = vmatpush1.msra.mxu1 %v7365_v55 }
 0x366   :  { %1606 = vmatprep.mubr.f32.mxu0 %v11995_v53  ;;  %1677 = vmatprep.mubr.f32.mxu1 %v11995_v53 }
 0x367   :  { %1691 = vmatprep.subr.mxu0 %v7373_v57  ;;  %1762 = vmatprep.subr.mxu1 %v7379_v58 }
 0x406   :  { %v1444_v59 = vpop.f32.mrf.mxu0  ;;  %v1515_v60 = vpop.f32.mrf.mxu1 }
 0x407   :  { %v1445_v63 = vadd.f32 %v1444_v59, %v7086_v11  ;;  %v1516_v52 = vadd.f32 %v1515_v60, %v7088_v12 }
 0x408   :  { %v1446_v0 = vpop.f32.mrf.mxu0  ;;  %v1517_v1 = vpop.f32.mrf.mxu1 }
 0x409   :  { %v1520_v4 = vadd.f32 %v1445_v63, %v6917_v49  ;;  %v1447_v40 = vadd.f32 %v1446_v0, %v7090_v13  ;;  %v1518_v55 = vadd.f32 %v1517_v1, %v7092_v14  ;;  %v1522_v11 = vadd.f32 %v1516_v52, %v6935_v10  ;;  %v7415_v1 = vld [vmem:[%s11376_s2 + $0x1d8] sm:$0xff] }
 0x40a   :  { %12250 = vst [vmem:[#allocation10_spill] sm:$0xff] %v7415_v1 }
 0x40b   :  { %v1524_v29 = vmul.f32 0.5, %v1520_v4  ;;  %v1521_v57 = vadd.f32 %v1447_v40, %v6922_v56  ;;  %v1523_v58 = vadd.f32 %v1518_v55, %v6929_v2  ;;  %v1526_v59 = vmul.f32 0.5, %v1522_v11  ;;  %v7427_v11 = vld [vmem:[%s11376_s2 + $0x1d0] sm:$0xff] }
 0x40c   :  { %12252 = vst [vmem:[#allocation12_spill] sm:$0xff] %v7427_v11 }
 0x40d   :  { %4614 = vtanh.f32 %v1524_v29  ;;  %v1525_v54 = vmul.f32 0.5, %v1521_v57  ;;  %v7421_v29 = vld [vmem:[%s11376_s2 + $0x1c0] sm:$0xff] }
 0x40e   :  { %12251 = vst [vmem:[#allocation11_spill] sm:$0xff] %v7421_v29 }
 0x40f   :  { %4616 = vtanh.f32 %v1525_v54 }
 0x410   :  { %4618 = vtanh.f32 %v1523_v58 }
 0x411   :  { %4620 = vtanh.f32 %v1526_v59  ;;  %v7433_v59 = vld [vmem:[%s11376_s2 + $0x1a8] sm:$0xff] }
 0x412   :  { %12253 = vst [vmem:[#allocation13_spill] sm:$0xff] %v7433_v59 }
 0x41a   :  { %v4615_v51 = vpop.eup %4614 }
 0x41b   :  { %v1530_v63 = vmul.f32 0.5, %v4615_v51  ;;  %v7409_v51 = vld [vmem:[%s11376_s2 + $0x1c8] sm:$0xff] }
 0x41c   :  { %v4617_v49 = vpop.eup %4616  ;;  %12249 = vst [vmem:[#allocation9_spill] sm:$0xff] %v7409_v51 }
 0x41d   :  { %v1533_v13 = vadd.f32 0.5, %v1530_v63  ;;  %v1531_v0 = vmul.f32 0.5, %v4617_v49  ;;  %v4619_v40 = vpop.eup %4618  ;;  %v7397_v49 = vld [vmem:[%s11376_s2 + $0x1e0] sm:$0xff]  ;;  %v7439_v63 = vld [vmem:[%s11376_s2 + $0x1b8] sm:$0xff] }
 0x41e   :  { %v4621_v12 = vpop.eup %4620  ;;  %12247 = vst [vmem:[#allocation7_spill] sm:$0xff] %v7397_v49  ;;  %12254 = vst [vmem:[#allocation14_spill] sm:$0xff] %v7439_v63 }
 0x41f   :  { %v1534_v4 = vadd.f32 0.5, %v1531_v0  ;;  %v1538_v57 = vmul.f32 %v4619_v40, %v1533_v13  ;;  %v1532_v55 = vmul.f32 0.5, %v4621_v12  ;;  %v7445_v13 = vld [vmem:[%s11376_s2 + $0x1a0] sm:$0xff]  ;;  %v7451_v0 = vld [vmem:[%s11376_s2 + $0x1b0] sm:$0xff]  ;;  %v7463_v40 = vld [vmem:[%s11376_s2 + $0x198] sm:$0xff] }
 0x420   :  { %12255 = vst [vmem:[#allocation15_spill] sm:$0xff] %v7445_v13  ;;  %12256 = vst [vmem:[#allocation16_spill] sm:$0xff] %v7451_v0  ;;  %v7481_v12 = vld [vmem:[%s11376_s2 + $0x168] sm:$0xff] }
 0x421   :  { %v1537_v14 = vmul.f32 %v1534_v4, %v6939_v27  ;;  %v1535_v58 = vadd.f32 0.5, %v1532_v55  ;;  %v7403_v27 = vld [vmem:[%s11376_s2 + $0x1f0] sm:$0xff]  ;;  %v7457_v4 = vld [vmem:[%s11376_s2 + $0x188] sm:$0xff]  ;;  %12258 = vst [vmem:[#allocation18_spill] sm:$0xff] %v7463_v40  ;;  %12261 = vst [vmem:[#allocation21_spill] sm:$0xff] %v7481_v12 }
 0x422   :  { %12248 = vst [vmem:[#allocation8_spill] sm:$0xff] %v7403_v27  ;;  %12257 = vst [vmem:[#allocation17_spill] sm:$0xff] %v7457_v4  ;;  %v7487_v55 = vld [vmem:[%s11376_s2 + $0x178] sm:$0xff] }
 0x423   :  { %v7391_v54 = vadd.f32 %v1538_v57, %v1537_v14  ;;  %v7469_v14 = vld [vmem:[%s11376_s2 + $0x180] sm:$0xff]  ;;  %v7475_v57 = vld [vmem:[%s11376_s2 + $0x190] sm:$0xff]  ;;  %12262 = vst [vmem:[#allocation22_spill] sm:$0xff] %v7487_v55 }
 0x424   :  { %12259 = vst [vmem:[#allocation19_spill] sm:$0xff] %v7469_v14  ;;  %12260 = vst [vmem:[#allocation20_spill] sm:$0xff] %v7475_v57 }
 0x425   :  { %12246 = vst [vmem:[#allocation6_spill] sm:$0xff] %v7391_v54  ;;  %4622 = vtanh.f32 %v7391_v54 }
 0x432   :  { %v4623_v52 = vpop.eup %4622 }
 0x433   :  { %v1541_v60 = vmul.f32 %v4623_v52, %v1535_v58  ;;  %v7493_v58 = vld [vmem:[%s11376_s2 + $0x160] sm:$0xff]  ;;  %v7499_v52 = vld [vmem:[%s11376_s2 + $0x170] sm:$0xff] }
 0x434   :  { %12263 = vst [vmem:[#allocation23_spill] sm:$0xff] %v7493_v58  ;;  %12264 = vst [vmem:[#allocation24_spill] sm:$0xff] %v7499_v52 }
 0x435   :  { %1607 = vmatmul.mubr.f32.vlgmr.msra.gmra.mxu0 %v1541_v60  ;;  %1678 = vmatmul.mubr.f32.vlgmr.msra.gmra.mxu1 %v1541_v60  ;;  %v7505_v60 = vld [vmem:[%s11376_s2 + $0x148] sm:$0xff] }
 0x436   :  { %1692 = vmatpush1.msra.mxu0 %v7397_v49  ;;  %1763 = vmatpush1.msra.mxu1 %v7403_v27  ;;  %12265 = vst [vmem:[#allocation25_spill] sm:$0xff] %v7505_v60 }
 0x437   :  { %1693 = vmatprep.subr.mxu0 %v7409_v51  ;;  %1764 = vmatprep.subr.mxu1 %v7415_v1 }
 0x438   :  { %1694 = vmatpush1.msra.mxu0 %v7421_v29  ;;  %1765 = vmatpush1.msra.mxu1 %v7427_v11  ;;  %v12376_v11 = vld [vmem:[#allocation137_spill] sm:$0xff] }
 0x439   :  { %1695 = vmatprep.subr.mxu0 %v7433_v59  ;;  %1766 = vmatprep.subr.mxu1 %v7439_v63 }
 0x43a   :  { %1696 = vmatpush1.msra.mxu0 %v7445_v13  ;;  %1767 = vmatpush1.msra.mxu1 %v7451_v0  ;;  %v12374_v13 = vld [vmem:[#allocation136_spill] sm:$0xff] }
 0x43b   :  { %1697 = vmatprep.subr.mxu0 %v7457_v4  ;;  %1768 = vmatprep.subr.mxu1 %v7463_v40 }
 0x43c   :  { %1698 = vmatpush1.msra.mxu0 %v7469_v14  ;;  %1769 = vmatpush1.msra.mxu1 %v7475_v57  ;;  %v12373_v14 = vld [vmem:[#allocation135_spill] sm:$0xff] }
 0x43d   :  { %1699 = vmatprep.subr.mxu0 %v7481_v12  ;;  %1770 = vmatprep.subr.mxu1 %v7487_v55  ;;  %v7511_v55 = vld [vmem:[%s11376_s2 + $0x158] sm:$0xff] }
 0x43e   :  { %1700 = vmatpush1.msra.mxu0 %v7493_v58  ;;  %1771 = vmatpush1.msra.mxu1 %v7499_v52  ;;  %12266 = vst [vmem:[#allocation26_spill] sm:$0xff] %v7511_v55  ;;  %v7517_v58 = vld [vmem:[%s11376_s2 + $0x140] sm:$0xff]  ;;  %v7523_v52 = vld [vmem:[%s11376_s2 + $0x150] sm:$0xff] }
 0x43f   :  { %1701 = vmatprep.subr.mxu0 %v7505_v60  ;;  %1772 = vmatprep.subr.mxu1 %v7511_v55  ;;  %12267 = vst [vmem:[#allocation27_spill] sm:$0xff] %v7517_v58  ;;  %12268 = vst [vmem:[#allocation28_spill] sm:$0xff] %v7523_v52  ;;  %v7529_v60 = vld [vmem:[%s11376_s2 + $0x128] sm:$0xff]  ;;  %v7535_v55 = vld [vmem:[%s11376_s2 + $0x138] sm:$0xff] }
 0x440   :  { %1702 = vmatpush1.msra.mxu0 %v7517_v58  ;;  %1773 = vmatpush1.msra.mxu1 %v7523_v52  ;;  %12269 = vst [vmem:[#allocation29_spill] sm:$0xff] %v7529_v60  ;;  %12270 = vst [vmem:[#allocation30_spill] sm:$0xff] %v7535_v55  ;;  %v7541_v58 = vld [vmem:[%s11376_s2 + $0x120] sm:$0xff]  ;;  %v7547_v52 = vld [vmem:[%s11376_s2 + $0x130] sm:$0xff] }
 0x441   :  { %1703 = vmatprep.subr.mxu0 %v7529_v60  ;;  %1774 = vmatprep.subr.mxu1 %v7535_v55  ;;  %12271 = vst [vmem:[#allocation31_spill] sm:$0xff] %v7541_v58  ;;  %12272 = vst [vmem:[#allocation32_spill] sm:$0xff] %v7547_v52  ;;  %v7553_v60 = vld [vmem:[%s11376_s2 + $0x108] sm:$0xff]  ;;  %v7559_v55 = vld [vmem:[%s11376_s2 + $0x118] sm:$0xff] }
 0x442   :  { %1704 = vmatpush1.msra.mxu0 %v7541_v58  ;;  %1775 = vmatpush1.msra.mxu1 %v7547_v52  ;;  %12273 = vst [vmem:[#allocation33_spill] sm:$0xff] %v7553_v60  ;;  %12274 = vst [vmem:[#allocation34_spill] sm:$0xff] %v7559_v55  ;;  %v7565_v58 = vld [vmem:[%s11376_s2 + $0x100] sm:$0xff]  ;;  %v7571_v52 = vld [vmem:[%s11376_s2 + $0x110] sm:$0xff] }
 0x443   :  { %1705 = vmatprep.subr.mxu0 %v7553_v60  ;;  %1776 = vmatprep.subr.mxu1 %v7559_v55  ;;  %12275 = vst [vmem:[#allocation35_spill] sm:$0xff] %v7565_v58  ;;  %12276 = vst [vmem:[#allocation36_spill] sm:$0xff] %v7571_v52  ;;  %v7577_v60 = vld [vmem:[%s11376_s2 + $0xe8] sm:$0xff]  ;;  %v7583_v55 = vld [vmem:[%s11376_s2 + $0xf8] sm:$0xff] }
 0x444   :  { %1706 = vmatpush1.msra.mxu0 %v7565_v58  ;;  %1777 = vmatpush1.msra.mxu1 %v7571_v52  ;;  %12277 = vst [vmem:[#allocation37_spill] sm:$0xff] %v7577_v60  ;;  %12278 = vst [vmem:[#allocation38_spill] sm:$0xff] %v7583_v55  ;;  %v7589_v58 = vld [vmem:[%s11376_s2 + $0xe0] sm:$0xff]  ;;  %v7595_v52 = vld [vmem:[%s11376_s2 + $0xf0] sm:$0xff] }
 0x445   :  { %1707 = vmatprep.subr.mxu0 %v7577_v60  ;;  %1778 = vmatprep.subr.mxu1 %v7583_v55  ;;  %12279 = vst [vmem:[#allocation39_spill] sm:$0xff] %v7589_v58  ;;  %12280 = vst [vmem:[#allocation40_spill] sm:$0xff] %v7595_v52  ;;  %v7601_v60 = vld [vmem:[%s11376_s2 + $0xc8] sm:$0xff]  ;;  %v7607_v55 = vld [vmem:[%s11376_s2 + $0xd8] sm:$0xff] }
 0x446   :  { %1708 = vmatpush1.msra.mxu0 %v7589_v58  ;;  %1779 = vmatpush1.msra.mxu1 %v7595_v52  ;;  %12281 = vst [vmem:[#allocation41_spill] sm:$0xff] %v7601_v60  ;;  %12282 = vst [vmem:[#allocation42_spill] sm:$0xff] %v7607_v55  ;;  %v7613_v58 = vld [vmem:[%s11376_s2 + $0xc0] sm:$0xff]  ;;  %v7619_v52 = vld [vmem:[%s11376_s2 + $0xd0] sm:$0xff] }
 0x447   :  { %1709 = vmatprep.subr.mxu0 %v7601_v60  ;;  %1780 = vmatprep.subr.mxu1 %v7607_v55  ;;  %12283 = vst [vmem:[#allocation43_spill] sm:$0xff] %v7613_v58  ;;  %12284 = vst [vmem:[#allocation44_spill] sm:$0xff] %v7619_v52  ;;  %v7625_v60 = vld [vmem:[%s11376_s2 + $0xa8] sm:$0xff]  ;;  %v7631_v55 = vld [vmem:[%s11376_s2 + $0xb8] sm:$0xff] }
 0x448   :  { %1710 = vmatpush1.msra.mxu0 %v7613_v58  ;;  %1781 = vmatpush1.msra.mxu1 %v7619_v52  ;;  %12285 = vst [vmem:[#allocation45_spill] sm:$0xff] %v7625_v60  ;;  %12286 = vst [vmem:[#allocation46_spill] sm:$0xff] %v7631_v55  ;;  %v7637_v58 = vld [vmem:[%s11376_s2 + $0xa0] sm:$0xff]  ;;  %v7643_v52 = vld [vmem:[%s11376_s2 + $0xb0] sm:$0xff] }
 0x449   :  { %1711 = vmatprep.subr.mxu0 %v7625_v60  ;;  %1782 = vmatprep.subr.mxu1 %v7631_v55  ;;  %12287 = vst [vmem:[#allocation47_spill] sm:$0xff] %v7637_v58  ;;  %12288 = vst [vmem:[#allocation48_spill] sm:$0xff] %v7643_v52  ;;  %v7649_v60 = vld [vmem:[%s11376_s2 + $0x88] sm:$0xff]  ;;  %v7655_v55 = vld [vmem:[%s11376_s2 + $0x98] sm:$0xff] }
 0x44a   :  { %1712 = vmatpush1.msra.mxu0 %v7637_v58  ;;  %1783 = vmatpush1.msra.mxu1 %v7643_v52  ;;  %12289 = vst [vmem:[#allocation49_spill] sm:$0xff] %v7649_v60  ;;  %12290 = vst [vmem:[#allocation50_spill] sm:$0xff] %v7655_v55  ;;  %v7661_v58 = vld [vmem:[%s11376_s2 + $0x80] sm:$0xff]  ;;  %v7667_v52 = vld [vmem:[%s11376_s2 + $0x90] sm:$0xff] }
 0x44b   :  { %1713 = vmatprep.subr.mxu0 %v7649_v60  ;;  %1784 = vmatprep.subr.mxu1 %v7655_v55  ;;  %12291 = vst [vmem:[#allocation51_spill] sm:$0xff] %v7661_v58  ;;  %12292 = vst [vmem:[#allocation52_spill] sm:$0xff] %v7667_v52  ;;  %v7673_v60 = vld [vmem:[%s11376_s2 + $0x68] sm:$0xff]  ;;  %v7679_v55 = vld [vmem:[%s11376_s2 + $0x78] sm:$0xff] }
 0x44c   :  { %1714 = vmatpush1.msra.mxu0 %v7661_v58  ;;  %1785 = vmatpush1.msra.mxu1 %v7667_v52  ;;  %12293 = vst [vmem:[#allocation53_spill] sm:$0xff] %v7673_v60  ;;  %12294 = vst [vmem:[#allocation54_spill] sm:$0xff] %v7679_v55  ;;  %v7685_v58 = vld [vmem:[%s11376_s2 + $0x60] sm:$0xff]  ;;  %v7691_v52 = vld [vmem:[%s11376_s2 + $0x70] sm:$0xff] }
 0x44d   :  { %1715 = vmatprep.subr.mxu0 %v7673_v60  ;;  %1786 = vmatprep.subr.mxu1 %v7679_v55  ;;  %12295 = vst [vmem:[#allocation55_spill] sm:$0xff] %v7685_v58  ;;  %12296 = vst [vmem:[#allocation56_spill] sm:$0xff] %v7691_v52  ;;  %v7697_v60 = vld [vmem:[%s11376_s2 + $0x48] sm:$0xff]  ;;  %v7703_v55 = vld [vmem:[%s11376_s2 + $0x58] sm:$0xff] }
 0x44e   :  { %1716 = vmatpush1.msra.mxu0 %v7685_v58  ;;  %1787 = vmatpush1.msra.mxu1 %v7691_v52  ;;  %12297 = vst [vmem:[#allocation57_spill] sm:$0xff] %v7697_v60  ;;  %12298 = vst [vmem:[#allocation58_spill] sm:$0xff] %v7703_v55  ;;  %v7709_v58 = vld [vmem:[%s11376_s2 + $0x40] sm:$0xff]  ;;  %v7715_v52 = vld [vmem:[%s11376_s2 + $0x50] sm:$0xff] }
 0x44f   :  { %1717 = vmatprep.subr.mxu0 %v7697_v60  ;;  %1788 = vmatprep.subr.mxu1 %v7703_v55  ;;  %12299 = vst [vmem:[#allocation59_spill] sm:$0xff] %v7709_v58  ;;  %12300 = vst [vmem:[#allocation60_spill] sm:$0xff] %v7715_v52  ;;  %v7721_v60 = vld [vmem:[%s11376_s2 + $0x28] sm:$0xff]  ;;  %v7727_v55 = vld [vmem:[%s11376_s2 + $0x38] sm:$0xff] }
 0x450   :  { %1718 = vmatpush1.msra.mxu0 %v7709_v58  ;;  %1789 = vmatpush1.msra.mxu1 %v7715_v52  ;;  %12301 = vst [vmem:[#allocation61_spill] sm:$0xff] %v7721_v60  ;;  %12302 = vst [vmem:[#allocation62_spill] sm:$0xff] %v7727_v55  ;;  %v7733_v58 = vld [vmem:[%s11376_s2 + $0x20] sm:$0xff]  ;;  %v7739_v52 = vld [vmem:[%s11376_s2 + $0x30] sm:$0xff] }
 0x451   :  { %1719 = vmatprep.subr.mxu0 %v7721_v60  ;;  %1790 = vmatprep.subr.mxu1 %v7727_v55  ;;  %12303 = vst [vmem:[#allocation63_spill] sm:$0xff] %v7733_v58  ;;  %12304 = vst [vmem:[#allocation64_spill] sm:$0xff] %v7739_v52  ;;  %v7745_v60 = vld [vmem:[%s11376_s2 + $0x8] sm:$0xff]  ;;  %v7751_v55 = vld [vmem:[%s11376_s2 + $0x18] sm:$0xff] }
 0x452   :  { %1720 = vmatpush1.msra.mxu0 %v7733_v58  ;;  %1791 = vmatpush1.msra.mxu1 %v7739_v52  ;;  %12305 = vst [vmem:[#allocation65_spill] sm:$0xff] %v7745_v60  ;;  %12306 = vst [vmem:[#allocation66_spill] sm:$0xff] %v7751_v55  ;;  %v7757_v58 = vld [vmem:[%s11376_s2] sm:$0xff] }
 0x453   :  { %1721 = vmatprep.subr.mxu0 %v7745_v60  ;;  %1792 = vmatprep.subr.mxu1 %v7751_v55  ;;  %12307 = vst [vmem:[#allocation67_spill] sm:$0xff] %v7757_v58  ;;  %v7764_v60 = vld [vmem:[%s11376_s2 + $0x10] sm:$0xff]  ;;  %v7773_v55 = vld [vmem:[%s11377_s4 + $0x1e8] sm:$0xff] }
 0x454   :  { %1722 = vmatpush1.msra.mxu0 %v7757_v58  ;;  %1755 = vmatprep.mubr.f32.mxu0 %v11995_v53  ;;  %12308 = vst [vmem:[#allocation68_spill] sm:$0xff] %v7764_v60  ;;  %12309 = vst [vmem:[#allocation69_spill] sm:$0xff] %v7773_v55  ;;  %v7779_v58 = vld [vmem:[%s11377_s4 + $0x1f8] sm:$0xff] }
 0x455   :  { %1793 = vmatpush1.msra.mxu1 %v7764_v60  ;;  %1826 = vmatprep.mubr.f32.mxu1 %v11995_v53  ;;  %12310 = vst [vmem:[#allocation70_spill] sm:$0xff] %v7779_v58  ;;  %v7785_v60 = vld [vmem:[%s11377_s4 + $0x1e0] sm:$0xff] }
 0x456   :  { %1756 = vmatmul.mubr.f32.vlgmr.msra.gmra.mxu0 %v7102_v5  ;;  %1827 = vmatmul.mubr.f32.vlgmr.msra.gmra.mxu1 %v7102_v5  ;;  %12311 = vst [vmem:[#allocation71_spill] sm:$0xff] %v7785_v60  ;;  %v7791_v5 = vld [vmem:[%s11377_s4 + $0x1f0] sm:$0xff] }
 0x457   :  { %1855 = vmatprep.subr.mxu0 %v7773_v55  ;;  %1926 = vmatprep.subr.mxu1 %v7779_v58  ;;  %12312 = vst [vmem:[#allocation72_spill] sm:$0xff] %v7791_v5  ;;  %v7797_v55 = vld [vmem:[%s11377_s4 + $0x1c8] sm:$0xff]  ;;  %v7803_v58 = vld [vmem:[%s11377_s4 + $0x1d8] sm:$0xff] }
 0x458   :  { %1856 = vmatpush1.msra.mxu0 %v7785_v60  ;;  %1927 = vmatpush1.msra.mxu1 %v7791_v5  ;;  %12313 = vst [vmem:[#allocation73_spill] sm:$0xff] %v7797_v55  ;;  %12314 = vst [vmem:[#allocation74_spill] sm:$0xff] %v7803_v58  ;;  %v7809_v60 = vld [vmem:[%s11377_s4 + $0x1c0] sm:$0xff]  ;;  %v7815_v5 = vld [vmem:[%s11377_s4 + $0x1d0] sm:$0xff] }
 0x459   :  { %1857 = vmatprep.subr.mxu0 %v7797_v55  ;;  %1928 = vmatprep.subr.mxu1 %v7803_v58  ;;  %12315 = vst [vmem:[#allocation75_spill] sm:$0xff] %v7809_v60  ;;  %12316 = vst [vmem:[#allocation76_spill] sm:$0xff] %v7815_v5  ;;  %v7821_v55 = vld [vmem:[%s11377_s4 + $0x1a8] sm:$0xff]  ;;  %v7827_v58 = vld [vmem:[%s11377_s4 + $0x1b8] sm:$0xff] }
 0x45a   :  { %1858 = vmatpush1.msra.mxu0 %v7809_v60  ;;  %1929 = vmatpush1.msra.mxu1 %v7815_v5  ;;  %12317 = vst [vmem:[#allocation77_spill] sm:$0xff] %v7821_v55  ;;  %12318 = vst [vmem:[#allocation78_spill] sm:$0xff] %v7827_v58  ;;  %v7833_v60 = vld [vmem:[%s11377_s4 + $0x1a0] sm:$0xff]  ;;  %v7839_v5 = vld [vmem:[%s11377_s4 + $0x1b0] sm:$0xff] }
 0x45b   :  { %1859 = vmatprep.subr.mxu0 %v7821_v55  ;;  %1930 = vmatprep.subr.mxu1 %v7827_v58  ;;  %12319 = vst [vmem:[#allocation79_spill] sm:$0xff] %v7833_v60  ;;  %12320 = vst [vmem:[#allocation80_spill] sm:$0xff] %v7839_v5  ;;  %v7845_v55 = vld [vmem:[%s11377_s4 + $0x188] sm:$0xff]  ;;  %v7851_v58 = vld [vmem:[%s11377_s4 + $0x198] sm:$0xff] }
 0x45c   :  { %1860 = vmatpush1.msra.mxu0 %v7833_v60  ;;  %1931 = vmatpush1.msra.mxu1 %v7839_v5  ;;  %12321 = vst [vmem:[#allocation81_spill] sm:$0xff] %v7845_v55  ;;  %12322 = vst [vmem:[#allocation82_spill] sm:$0xff] %v7851_v58  ;;  %v7857_v60 = vld [vmem:[%s11377_s4 + $0x180] sm:$0xff]  ;;  %v7863_v5 = vld [vmem:[%s11377_s4 + $0x190] sm:$0xff] }
 0x45d   :  { %1861 = vmatprep.subr.mxu0 %v7845_v55  ;;  %1932 = vmatprep.subr.mxu1 %v7851_v58  ;;  %12323 = vst [vmem:[#allocation83_spill] sm:$0xff] %v7857_v60  ;;  %12324 = vst [vmem:[#allocation84_spill] sm:$0xff] %v7863_v5  ;;  %v7869_v55 = vld [vmem:[%s11377_s4 + $0x168] sm:$0xff]  ;;  %v7875_v58 = vld [vmem:[%s11377_s4 + $0x178] sm:$0xff] }
 0x45e   :  { %1862 = vmatpush1.msra.mxu0 %v7857_v60  ;;  %1933 = vmatpush1.msra.mxu1 %v7863_v5  ;;  %12325 = vst [vmem:[#allocation85_spill] sm:$0xff] %v7869_v55  ;;  %12326 = vst [vmem:[#allocation86_spill] sm:$0xff] %v7875_v58  ;;  %v7881_v60 = vld [vmem:[%s11377_s4 + $0x160] sm:$0xff]  ;;  %v7887_v5 = vld [vmem:[%s11377_s4 + $0x170] sm:$0xff] }
 0x45f   :  { %1863 = vmatprep.subr.mxu0 %v7869_v55  ;;  %1934 = vmatprep.subr.mxu1 %v7875_v58  ;;  %12327 = vst [vmem:[#allocation87_spill] sm:$0xff] %v7881_v60  ;;  %12328 = vst [vmem:[#allocation88_spill] sm:$0xff] %v7887_v5  ;;  %v7893_v55 = vld [vmem:[%s11377_s4 + $0x148] sm:$0xff]  ;;  %v7899_v58 = vld [vmem:[%s11377_s4 + $0x158] sm:$0xff] }
 0x460   :  { %1864 = vmatpush1.msra.mxu0 %v7881_v60  ;;  %1935 = vmatpush1.msra.mxu1 %v7887_v5  ;;  %12329 = vst [vmem:[#allocation89_spill] sm:$0xff] %v7893_v55  ;;  %12330 = vst [vmem:[#allocation90_spill] sm:$0xff] %v7899_v58  ;;  %v7905_v60 = vld [vmem:[%s11377_s4 + $0x140] sm:$0xff]  ;;  %v7911_v5 = vld [vmem:[%s11377_s4 + $0x150] sm:$0xff] }
 0x461   :  { %1865 = vmatprep.subr.mxu0 %v7893_v55  ;;  %1936 = vmatprep.subr.mxu1 %v7899_v58  ;;  %12331 = vst [vmem:[#allocation91_spill] sm:$0xff] %v7905_v60  ;;  %12332 = vst [vmem:[#allocation92_spill] sm:$0xff] %v7911_v5  ;;  %v7917_v55 = vld [vmem:[%s11377_s4 + $0x128] sm:$0xff]  ;;  %v7923_v58 = vld [vmem:[%s11377_s4 + $0x138] sm:$0xff] }
 0x462   :  { %1866 = vmatpush1.msra.mxu0 %v7905_v60  ;;  %1937 = vmatpush1.msra.mxu1 %v7911_v5  ;;  %12333 = vst [vmem:[#allocation93_spill] sm:$0xff] %v7917_v55  ;;  %12334 = vst [vmem:[#allocation94_spill] sm:$0xff] %v7923_v58  ;;  %v7929_v60 = vld [vmem:[%s11377_s4 + $0x120] sm:$0xff]  ;;  %v7935_v5 = vld [vmem:[%s11377_s4 + $0x130] sm:$0xff] }
 0x463   :  { %1867 = vmatprep.subr.mxu0 %v7917_v55  ;;  %1938 = vmatprep.subr.mxu1 %v7923_v58  ;;  %12335 = vst [vmem:[#allocation95_spill] sm:$0xff] %v7929_v60  ;;  %12336 = vst [vmem:[#allocation96_spill] sm:$0xff] %v7935_v5  ;;  %v7941_v55 = vld [vmem:[%s11377_s4 + $0x108] sm:$0xff]  ;;  %v7947_v58 = vld [vmem:[%s11377_s4 + $0x118] sm:$0xff] }
 0x464   :  { %1868 = vmatpush1.msra.mxu0 %v7929_v60  ;;  %1939 = vmatpush1.msra.mxu1 %v7935_v5  ;;  %12337 = vst [vmem:[#allocation97_spill] sm:$0xff] %v7941_v55  ;;  %12338 = vst [vmem:[#allocation98_spill] sm:$0xff] %v7947_v58  ;;  %v7953_v60 = vld [vmem:[%s11377_s4 + $0x100] sm:$0xff]  ;;  %v7959_v5 = vld [vmem:[%s11377_s4 + $0x110] sm:$0xff] }
 0x465   :  { %1869 = vmatprep.subr.mxu0 %v7941_v55  ;;  %1940 = vmatprep.subr.mxu1 %v7947_v58  ;;  %12339 = vst [vmem:[#allocation99_spill] sm:$0xff] %v7953_v60  ;;  %12340 = vst [vmem:[#allocation100_spill] sm:$0xff] %v7959_v5  ;;  %v7965_v55 = vld [vmem:[%s11377_s4 + $0xe8] sm:$0xff]  ;;  %v7971_v58 = vld [vmem:[%s11377_s4 + $0xf8] sm:$0xff] }
 0x466   :  { %1870 = vmatpush1.msra.mxu0 %v7953_v60  ;;  %1941 = vmatpush1.msra.mxu1 %v7959_v5  ;;  %12341 = vst [vmem:[#allocation101_spill] sm:$0xff] %v7965_v55  ;;  %12342 = vst [vmem:[#allocation102_spill] sm:$0xff] %v7971_v58  ;;  %v7977_v60 = vld [vmem:[%s11377_s4 + $0xe0] sm:$0xff]  ;;  %v7983_v5 = vld [vmem:[%s11377_s4 + $0xf0] sm:$0xff] }
 0x467   :  { %1871 = vmatprep.subr.mxu0 %v7965_v55  ;;  %1942 = vmatprep.subr.mxu1 %v7971_v58  ;;  %12343 = vst [vmem:[#allocation103_spill] sm:$0xff] %v7977_v60  ;;  %12344 = vst [vmem:[#allocation104_spill] sm:$0xff] %v7983_v5  ;;  %v7989_v55 = vld [vmem:[%s11377_s4 + $0xc8] sm:$0xff]  ;;  %v7995_v58 = vld [vmem:[%s11377_s4 + $0xd8] sm:$0xff] }
 0x468   :  { %1872 = vmatpush1.msra.mxu0 %v7977_v60  ;;  %1943 = vmatpush1.msra.mxu1 %v7983_v5  ;;  %12345 = vst [vmem:[#allocation105_spill] sm:$0xff] %v7989_v55  ;;  %12346 = vst [vmem:[#allocation106_spill] sm:$0xff] %v7995_v58  ;;  %v8001_v60 = vld [vmem:[%s11377_s4 + $0xc0] sm:$0xff]  ;;  %v8007_v5 = vld [vmem:[%s11377_s4 + $0xd0] sm:$0xff] }
 0x469   :  { %1873 = vmatprep.subr.mxu0 %v7989_v55  ;;  %1944 = vmatprep.subr.mxu1 %v7995_v58  ;;  %12347 = vst [vmem:[#allocation107_spill] sm:$0xff] %v8001_v60  ;;  %12348 = vst [vmem:[#allocation108_spill] sm:$0xff] %v8007_v5  ;;  %v8013_v55 = vld [vmem:[%s11377_s4 + $0xa8] sm:$0xff]  ;;  %v8019_v58 = vld [vmem:[%s11377_s4 + $0xb8] sm:$0xff] }
 0x46a   :  { %1874 = vmatpush1.msra.mxu0 %v8001_v60  ;;  %1945 = vmatpush1.msra.mxu1 %v8007_v5  ;;  %12349 = vst [vmem:[#allocation109_spill] sm:$0xff] %v8013_v55  ;;  %12350 = vst [vmem:[#allocation110_spill] sm:$0xff] %v8019_v58  ;;  %v8025_v60 = vld [vmem:[%s11377_s4 + $0xa0] sm:$0xff]  ;;  %v8031_v5 = vld [vmem:[%s11377_s4 + $0xb0] sm:$0xff] }
 0x46b   :  { %1875 = vmatprep.subr.mxu0 %v8013_v55  ;;  %1946 = vmatprep.subr.mxu1 %v8019_v58  ;;  %12351 = vst [vmem:[#allocation111_spill] sm:$0xff] %v8025_v60  ;;  %12352 = vst [vmem:[#allocation112_spill] sm:$0xff] %v8031_v5  ;;  %v8037_v55 = vld [vmem:[%s11377_s4 + $0x88] sm:$0xff]  ;;  %v8043_v58 = vld [vmem:[%s11377_s4 + $0x98] sm:$0xff] }
 0x46c   :  { %1876 = vmatpush1.msra.mxu0 %v8025_v60  ;;  %1947 = vmatpush1.msra.mxu1 %v8031_v5  ;;  %12353 = vst [vmem:[#allocation113_spill] sm:$0xff] %v8037_v55  ;;  %12354 = vst [vmem:[#allocation114_spill] sm:$0xff] %v8043_v58  ;;  %v8049_v60 = vld [vmem:[%s11377_s4 + $0x80] sm:$0xff]  ;;  %v8055_v5 = vld [vmem:[%s11377_s4 + $0x90] sm:$0xff] }
 0x46d   :  { %1877 = vmatprep.subr.mxu0 %v8037_v55  ;;  %1948 = vmatprep.subr.mxu1 %v8043_v58  ;;  %12355 = vst [vmem:[#allocation115_spill] sm:$0xff] %v8049_v60  ;;  %12356 = vst [vmem:[#allocation116_spill] sm:$0xff] %v8055_v5  ;;  %v8061_v55 = vld [vmem:[%s11377_s4 + $0x68] sm:$0xff]  ;;  %v8067_v58 = vld [vmem:[%s11377_s4 + $0x78] sm:$0xff] }
 0x46e   :  { %1878 = vmatpush1.msra.mxu0 %v8049_v60  ;;  %1949 = vmatpush1.msra.mxu1 %v8055_v5  ;;  %12357 = vst [vmem:[#allocation117_spill] sm:$0xff] %v8061_v55  ;;  %12358 = vst [vmem:[#allocation118_spill] sm:$0xff] %v8067_v58  ;;  %v8073_v60 = vld [vmem:[%s11377_s4 + $0x60] sm:$0xff]  ;;  %v8079_v5 = vld [vmem:[%s11377_s4 + $0x70] sm:$0xff] }
 0x46f   :  { %1879 = vmatprep.subr.mxu0 %v8061_v55  ;;  %1950 = vmatprep.subr.mxu1 %v8067_v58  ;;  %12359 = vst [vmem:[#allocation119_spill] sm:$0xff] %v8073_v60  ;;  %12360 = vst [vmem:[#allocation120_spill] sm:$0xff] %v8079_v5  ;;  %v8085_v55 = vld [vmem:[%s11377_s4 + $0x48] sm:$0xff]  ;;  %v8091_v58 = vld [vmem:[%s11377_s4 + $0x58] sm:$0xff] }
 0x470   :  { %1880 = vmatpush1.msra.mxu0 %v8073_v60  ;;  %1951 = vmatpush1.msra.mxu1 %v8079_v5  ;;  %12361 = vst [vmem:[#allocation121_spill] sm:$0xff] %v8085_v55  ;;  %12362 = vst [vmem:[#allocation122_spill] sm:$0xff] %v8091_v58  ;;  %v8097_v60 = vld [vmem:[%s11377_s4 + $0x40] sm:$0xff]  ;;  %v8103_v5 = vld [vmem:[%s11377_s4 + $0x50] sm:$0xff] }
 0x471   :  { %1881 = vmatprep.subr.mxu0 %v8085_v55  ;;  %1952 = vmatprep.subr.mxu1 %v8091_v58  ;;  %12363 = vst [vmem:[#allocation123_spill] sm:$0xff] %v8097_v60  ;;  %12364 = vst [vmem:[#allocation125_spill] sm:$0xff] %v8103_v5  ;;  %v8109_v55 = vld [vmem:[%s11377_s4 + $0x28] sm:$0xff]  ;;  %v8115_v58 = vld [vmem:[%s11377_s4 + $0x38] sm:$0xff] }
 0x472   :  { %1882 = vmatpush1.msra.mxu0 %v8097_v60  ;;  %1953 = vmatpush1.msra.mxu1 %v8103_v5  ;;  %12365 = vst [vmem:[#allocation126_spill] sm:$0xff] %v8109_v55  ;;  %12366 = vst [vmem:[#allocation127_spill] sm:$0xff] %v8115_v58  ;;  %v8121_v60 = vld [vmem:[%s11377_s4 + $0x20] sm:$0xff]  ;;  %v8127_v5 = vld [vmem:[%s11377_s4 + $0x30] sm:$0xff] }
 0x473   :  { %1883 = vmatprep.subr.mxu0 %v8109_v55  ;;  %1954 = vmatprep.subr.mxu1 %v8115_v58  ;;  %12367 = vst [vmem:[#allocation128_spill] sm:$0xff] %v8121_v60  ;;  %12368 = vst [vmem:[#allocation129_spill] sm:$0xff] %v8127_v5  ;;  %v8133_v55 = vld [vmem:[%s11377_s4 + $0x8] sm:$0xff]  ;;  %v8139_v58 = vld [vmem:[%s11377_s4 + $0x18] sm:$0xff] }
 0x474   :  { %1884 = vmatpush1.msra.mxu0 %v8121_v60  ;;  %1955 = vmatpush1.msra.mxu1 %v8127_v5  ;;  %12369 = vst [vmem:[#allocation130_spill] sm:$0xff] %v8133_v55  ;;  %12370 = vst [vmem:[#allocation131_spill] sm:$0xff] %v8139_v58  ;;  %v8145_v60 = vld [vmem:[%s11377_s4] sm:$0xff] }
 0x475   :  { %1885 = vmatprep.subr.mxu0 %v8133_v55  ;;  %1956 = vmatprep.subr.mxu1 %v8139_v58  ;;  %12371 = vst [vmem:[#allocation132_spill] sm:$0xff] %v8145_v60  ;;  %v8152_v55 = vld [vmem:[%s11377_s4 + $0x10] sm:$0xff] }
 0x476   :  { %1886 = vmatpush1.msra.mxu0 %v8145_v60  ;;  %1919 = vmatprep.mubr.f32.mxu0 %v11995_v53  ;;  %12372 = vst [vmem:[#allocation134_spill] sm:$0xff] %v8152_v55 }
 0x477   :  { %1957 = vmatpush1.msra.mxu1 %v8152_v55  ;;  %1990 = vmatprep.mubr.f32.mxu1 %v11995_v53 }
 0x478   :  { %2019 = vmatprep.subr.mxu0 %v7077_v7  ;;  %2090 = vmatprep.subr.mxu1 %v7083_v9  ;;  %v12375_v9 = vld [vmem:[#allocation138_spill] sm:$0xff] }
 0x4f5   :  { %v8158_v58 = vpop.f32.mrf.mxu0  ;;  %v8160_v5 = vpop.f32.mrf.mxu1 }
 0x4f7   :  { %v8162_v60 = vpop.f32.mrf.mxu0  ;;  %v8164_v52 = vpop.f32.mrf.mxu1 }
 0x516   :  { %v1757_v12 = vpop.f32.mrf.mxu0  ;;  %v1828_v57 = vpop.f32.mrf.mxu1 }
 0x517   :  { %v1833_v40 = vadd.f32 %v1757_v12, %v12373_v14  ;;  %v1835_v29 = vadd.f32 %v1828_v57, %v12376_v11  ;;  %v8223_v57 = vld [vmem:[%s11375_s5 + $0x1b8] sm:$0xff] }
 0x518   :  { %v1759_v4 = vpop.f32.mrf.mxu0  ;;  %v1830_v55 = vpop.f32.mrf.mxu1 }
 0x519   :  { %v1837_v0 = vmul.f32 0.5, %v1833_v40  ;;  %v1834_v63 = vadd.f32 %v1759_v4, %v12374_v13  ;;  %v1836_v59 = vadd.f32 %v1830_v55, %v12375_v9  ;;  %v1839_v1 = vmul.f32 0.5, %v1835_v29  ;;  %v8229_v55 = vld [vmem:[%s11375_s5 + $0x1a0] sm:$0xff]  ;;  %v8241_v9 = vld [vmem:[%s11375_s5 + $0x188] sm:$0xff] }
 0x51b   :  { %4624 = vtanh.f32 %v1837_v0  ;;  %v1838_v7 = vmul.f32 0.5, %v1834_v63 }
 0x51d   :  { %4626 = vtanh.f32 %v1838_v7  ;;  %v8235_v7 = vld [vmem:[%s11375_s5 + $0x1b0] sm:$0xff] }
 0x51e   :  { %4628 = vtanh.f32 %v1836_v59 }
 0x51f   :  { %4630 = vtanh.f32 %v1839_v1  ;;  %v8217_v1 = vld [vmem:[%s11375_s5 + $0x1a8] sm:$0xff] }
 0x528   :  { %v4625_v51 = vpop.eup %4624 }
 0x529   :  { %v1843_v27 = vmul.f32 0.5, %v4625_v51  ;;  %v8211_v51 = vld [vmem:[%s11375_s5 + $0x1d0] sm:$0xff] }
 0x52a   :  { %v4627_v49 = vpop.eup %4626 }
 0x52b   :  { %v1846_v54 = vadd.f32 0.5, %v1843_v27  ;;  %v1844_v14 = vmul.f32 0.5, %v4627_v49  ;;  %v4629_v12 = vpop.eup %4628  ;;  %v8199_v49 = vld [vmem:[%s11375_s5 + $0x1d8] sm:$0xff]  ;;  %v8205_v27 = vld [vmem:[%s11375_s5 + $0x1c0] sm:$0xff] }
 0x52c   :  { %v4631_v63 = vpop.eup %4630 }
 0x52d   :  { %v1847_v10 = vadd.f32 0.5, %v1844_v14  ;;  %v1851_v40 = vmul.f32 %v4629_v12, %v1846_v54  ;;  %v1845_v59 = vmul.f32 0.5, %v4631_v63  ;;  %v8181_v54 = vld [vmem:[%s11375_s5 + $0x1e0] sm:$0xff]  ;;  %v8247_v14 = vld [vmem:[%s11375_s5 + $0x198] sm:$0xff] }
 0x52e   :  { %v8253_v12 = vld [vmem:[%s11375_s5 + $0x180] sm:$0xff]  ;;  %v8271_v63 = vld [vmem:[%s11375_s5 + $0x178] sm:$0xff] }
 0x52f   :  { %v1850_v13 = vmul.f32 %v1847_v10, %v7099_v61  ;;  %v1848_v4 = vadd.f32 0.5, %v1845_v59  ;;  %v8187_v10 = vld [vmem:[%s11375_s5 + $0x1f0] sm:$0xff]  ;;  %v8193_v61 = vld [vmem:[%s11375_s5 + $0x1c8] sm:$0xff]  ;;  %12377 = vst [vmem:[#allocation133_spill] sm:$0xff] %v8271_v63  ;;  %v8277_v59 = vld [vmem:[%s11375_s5 + $0x160] sm:$0xff] }
 0x530   :  { %12378 = vst [vmem:[#allocation163_spill] sm:$0xff] %v8277_v59 }
 0x531   :  { %v8171_v0 = vadd.f32 %v1851_v40, %v1850_v13  ;;  %v8259_v40 = vld [vmem:[%s11375_s5 + $0x190] sm:$0xff]  ;;  %v8265_v13 = vld [vmem:[%s11375_s5 + $0x168] sm:$0xff] }
 0x533   :  { %4632 = vtanh.f32 %v8171_v0 }
 0x540   :  { %v4633_v11 = vpop.eup %4632 }
 0x541   :  { %v8174_v29 = vmul.f32 %v4633_v11, %v1848_v4  ;;  %v8283_v4 = vld [vmem:[%s11375_s5 + $0x170] sm:$0xff]  ;;  %v8289_v11 = vld [vmem:[%s11375_s5 + $0x148] sm:$0xff] }
 0x542   :  { %12379 = vst [vmem:[#allocation164_spill] sm:$0xff] %v8283_v4 }
 0x543   :  { %1920 = vmatmul.mubr.f32.vlgmr.msra.gmra.mxu0 %v8174_v29  ;;  %1991 = vmatmul.mubr.f32.vlgmr.msra.gmra.mxu1 %v8174_v29 }
 0x544   :  { %2020 = vmatpush1.msra.mxu0 %v8181_v54  ;;  %2091 = vmatpush1.msra.mxu1 %v8187_v10 }
 0x545   :  { %2021 = vmatprep.subr.mxu0 %v8193_v61  ;;  %2092 = vmatprep.subr.mxu1 %v8199_v49 }
 0x546   :  { %2022 = vmatpush1.msra.mxu0 %v8205_v27  ;;  %2093 = vmatpush1.msra.mxu1 %v8211_v51 }
 0x547   :  { %2023 = vmatprep.subr.mxu0 %v8217_v1  ;;  %2094 = vmatprep.subr.mxu1 %v8223_v57 }
 0x548   :  { %2024 = vmatpush1.msra.mxu0 %v8229_v55  ;;  %2095 = vmatpush1.msra.mxu1 %v8235_v7 }
 0x549   :  { %2025 = vmatprep.subr.mxu0 %v8241_v9  ;;  %2096 = vmatprep.subr.mxu1 %v8247_v14 }
 0x54a   :  { %2026 = vmatpush1.msra.mxu0 %v8253_v12  ;;  %2097 = vmatpush1.msra.mxu1 %v8259_v40 }
 0x54b   :  { %2027 = vmatprep.subr.mxu0 %v8265_v13  ;;  %2098 = vmatprep.subr.mxu1 %v8271_v63  ;;  %v8295_v63 = vld [vmem:[%s11375_s5 + $0x158] sm:$0xff] }
 0x54c   :  { %2028 = vmatpush1.msra.mxu0 %v8277_v59  ;;  %2099 = vmatpush1.msra.mxu1 %v8283_v4  ;;  %v8301_v59 = vld [vmem:[%s11375_s5 + $0x140] sm:$0xff]  ;;  %v8307_v4 = vld [vmem:[%s11375_s5 + $0x150] sm:$0xff] }
 0x54d   :  { %2029 = vmatprep.subr.mxu0 %v8289_v11  ;;  %2100 = vmatprep.subr.mxu1 %v8295_v63 }
 0x54e   :  { %2030 = vmatpush1.msra.mxu0 %v8301_v59  ;;  %2101 = vmatpush1.msra.mxu1 %v8307_v4 }
 0x54f   :  { %2031 = vmatprep.subr.mxu0 %v7131_v31  ;;  %2102 = vmatprep.subr.mxu1 %v7137_v8  ;;  %v12380_v31 = vld [vmem:[#allocation159_spill] sm:$0xff]  ;;  %v12381_v8 = vld [vmem:[#allocation161_spill] sm:$0xff] }
 0x550   :  { %2032 = vmatpush1.msra.mxu0 %v7143_v30  ;;  %2103 = vmatpush1.msra.mxu1 %v7149_v43  ;;  %v12382_v30 = vld [vmem:[#allocation162_spill] sm:$0xff]  ;;  %v12383_v43 = vld [vmem:[#allocation160_spill] sm:$0xff] }
 0x551   :  { %2033 = vmatprep.subr.mxu0 %v7155_v36  ;;  %2104 = vmatprep.subr.mxu1 %v7161_v37  ;;  %v12384_v36 = vld [vmem:[#allocation4_spill] sm:$0xff]  ;;  %v12385_v37 = vld [vmem:[#allocation5_spill] sm:$0xff] }
 0x552   :  { %2034 = vmatpush1.msra.mxu0 %v7167_v38  ;;  %2105 = vmatpush1.msra.mxu1 %v7173_v3 }
 0x553   :  { %2035 = vmatprep.subr.mxu0 %v7179_v41  ;;  %2106 = vmatprep.subr.mxu1 %v7185_v34 }
 0x554   :  { %2036 = vmatpush1.msra.mxu0 %v7191_v32  ;;  %2107 = vmatpush1.msra.mxu1 %v7197_v44  ;;  %v12386_v44 = vld [vmem:[#allocation3_spill] sm:$0xff] }
 0x555   :  { %2037 = vmatprep.subr.mxu0 %v7203_v19  ;;  %2108 = vmatprep.subr.mxu1 %v7209_v33 }
 0x556   :  { %2038 = vmatpush1.msra.mxu0 %v7215_v17  ;;  %2109 = vmatpush1.msra.mxu1 %v7221_v39 }
 0x557   :  { %2039 = vmatprep.subr.mxu0 %v7227_v35  ;;  %2110 = vmatprep.subr.mxu1 %v7233_v62 }
 0x558   :  { %2040 = vmatpush1.msra.mxu0 %v7239_v18  ;;  %2111 = vmatpush1.msra.mxu1 %v7245_v6 }
 0x559   :  { %2041 = vmatprep.subr.mxu0 %v7251_v15  ;;  %2112 = vmatprep.subr.mxu1 %v7257_v16  ;;  %v12387_v15 = vld [vmem:[#allocation124_spill] sm:$0xff] }
 0x55a   :  { %2042 = vmatpush1.msra.mxu0 %v7263_v20  ;;  %2113 = vmatpush1.msra.mxu1 %v7269_v21 }
 0x55b   :  { %2043 = vmatprep.subr.mxu0 %v7275_v22  ;;  %2114 = vmatprep.subr.mxu1 %v7281_v23 }
 0x55c   :  { %2044 = vmatpush1.msra.mxu0 %v7287_v24  ;;  %2115 = vmatpush1.msra.mxu1 %v7293_v25 }
 0x55d   :  { %2045 = vmatprep.subr.mxu0 %v7299_v26  ;;  %2116 = vmatprep.subr.mxu1 %v7305_v28 }
 0x55e   :  { %2046 = vmatpush1.msra.mxu0 %v7311_v45  ;;  %2117 = vmatpush1.msra.mxu1 %v7317_v46  ;;  %v12388_v45 = vld [vmem:[#allocation6_spill] sm:$0xff] }
 0x55f   :  { %2047 = vmatprep.subr.mxu0 %v7323_v47  ;;  %2118 = vmatprep.subr.mxu1 %v7329_v48 }
 0x560   :  { %2048 = vmatpush1.msra.mxu0 %v7335_v42  ;;  %2119 = vmatpush1.msra.mxu1 %v7341_v50 }
 0x561   :  { %2049 = vmatprep.subr.mxu0 %v12380_v31  ;;  %2120 = vmatprep.subr.mxu1 %v12381_v8  ;;  %v12390_v31 = vld [vmem:[#allocation8_spill] sm:$0xff]  ;;  %v12391_v8 = vld [vmem:[#allocation9_spill] sm:$0xff] }
 0x562   :  { %2050 = vmatpush1.msra.mxu0 %v12382_v30  ;;  %2121 = vmatpush1.msra.mxu1 %v12383_v43  ;;  %v12392_v30 = vld [vmem:[#allocation10_spill] sm:$0xff]  ;;  %v12393_v43 = vld [vmem:[#allocation11_spill] sm:$0xff] }
 0x563   :  { %2083 = vmatprep.mubr.f32.mxu0 %v11995_v53  ;;  %2154 = vmatprep.mubr.f32.mxu1 %v11995_v53 }
 0x564   :  { %2168 = vmatprep.subr.mxu0 %v12384_v36  ;;  %2239 = vmatprep.subr.mxu1 %v12385_v37  ;;  %v12394_v36 = vld [vmem:[#allocation12_spill] sm:$0xff]  ;;  %v12395_v37 = vld [vmem:[#allocation13_spill] sm:$0xff] }
 0x603   :  { %v1921_v38 = vpop.f32.mrf.mxu0  ;;  %v1992_v3 = vpop.f32.mrf.mxu1 }
 0x604   :  { %v1922_v41 = vadd.f32 %v1921_v38, %v8158_v58  ;;  %v1993_v6 = vadd.f32 %v1992_v3, %v8160_v5  ;;  %v12389_v5 = vld [vmem:[#allocation7_spill] sm:$0xff]  ;;  %v12396_v38 = vld [vmem:[#allocation14_spill] sm:$0xff] }
 0x605   :  { %v1923_v34 = vpop.f32.mrf.mxu0  ;;  %v1994_v32 = vpop.f32.mrf.mxu1  ;;  %v12397_v3 = vld [vmem:[#allocation15_spill] sm:$0xff] }
 0x606   :  { %v1997_v19 = vadd.f32 %v1922_v41, %v12386_v44  ;;  %v1924_v33 = vadd.f32 %v1923_v34, %v8162_v60  ;;  %v1995_v35 = vadd.f32 %v1994_v32, %v8164_v52  ;;  %v1999_v16 = vadd.f32 %v1993_v6, %v12387_v15  ;;  %v12398_v41 = vld [vmem:[#allocation16_spill] sm:$0xff]  ;;  %v12399_v34 = vld [vmem:[#allocation17_spill] sm:$0xff]  ;;  %v12400_v32 = vld [vmem:[#allocation18_spill] sm:$0xff] }
 0x607   :  { %v12408_v6 = vld [vmem:[#allocation26_spill] sm:$0xff] }
 0x608   :  { %v2001_v17 = vmul.f32 0.5, %v1997_v19  ;;  %v1998_v39 = vadd.f32 %v1924_v33, %v6922_v56  ;;  %v2000_v18 = vadd.f32 %v1995_v35, %v6929_v2  ;;  %v2003_v20 = vmul.f32 0.5, %v1999_v16  ;;  %v12401_v19 = vld [vmem:[#allocation19_spill] sm:$0xff]  ;;  %v12402_v33 = vld [vmem:[#allocation20_spill] sm:$0xff] }
 0x609   :  { %v12405_v35 = vld [vmem:[#allocation23_spill] sm:$0xff] }
 0x60a   :  { %4634 = vtanh.f32 %v2001_v17  ;;  %v2002_v62 = vmul.f32 0.5, %v1998_v39  ;;  %v12403_v17 = vld [vmem:[#allocation21_spill] sm:$0xff]  ;;  %v12404_v39 = vld [vmem:[#allocation22_spill] sm:$0xff]  ;;  %v12409_v16 = vld [vmem:[#allocation27_spill] sm:$0xff] }
 0x60c   :  { %4636 = vtanh.f32 %v2002_v62  ;;  %v12406_v62 = vld [vmem:[#allocation24_spill] sm:$0xff] }
 0x60d   :  { %4638 = vtanh.f32 %v2000_v18  ;;  %v12407_v18 = vld [vmem:[#allocation25_spill] sm:$0xff] }
 0x60e   :  { %4640 = vtanh.f32 %v2003_v20  ;;  %v12410_v20 = vld [vmem:[#allocation28_spill] sm:$0xff] }
 0x617   :  { %v4635_v21 = vpop.eup %4634 }
 0x618   :  { %v2007_v22 = vmul.f32 0.5, %v4635_v21  ;;  %v12411_v21 = vld [vmem:[#allocation29_spill] sm:$0xff] }
 0x619   :  { %v4637_v23 = vpop.eup %4636 }
 0x61a   :  { %v2010_v24 = vadd.f32 0.5, %v2007_v22  ;;  %v2008_v25 = vmul.f32 0.5, %v4637_v23  ;;  %v4639_v28 = vpop.eup %4638  ;;  %v12412_v22 = vld [vmem:[#allocation30_spill] sm:$0xff]  ;;  %v12413_v23 = vld [vmem:[#allocation31_spill] sm:$0xff] }
 0x61b   :  { %v4641_v42 = vpop.eup %4640 }
 0x61c   :  { %v2011_v26 = vadd.f32 0.5, %v2008_v25  ;;  %v2015_v47 = vmul.f32 %v4639_v28, %v2010_v24  ;;  %v2009_v50 = vmul.f32 0.5, %v4641_v42  ;;  %v12414_v24 = vld [vmem:[#allocation32_spill] sm:$0xff]  ;;  %v12415_v25 = vld [vmem:[#allocation33_spill] sm:$0xff]  ;;  %v12417_v28 = vld [vmem:[#allocation35_spill] sm:$0xff] }
 0x61d   :  { %v12421_v42 = vld [vmem:[#allocation39_spill] sm:$0xff] }
 0x61e   :  { %v2014_v46 = vmul.f32 %v2011_v26, %v12388_v45  ;;  %v2012_v58 = vadd.f32 0.5, %v2009_v50  ;;  %v12416_v26 = vld [vmem:[#allocation34_spill] sm:$0xff]  ;;  %v12418_v45 = vld [vmem:[#allocation36_spill] sm:$0xff] }
 0x61f   :  { %v12422_v50 = vld [vmem:[#allocation40_spill] sm:$0xff] }
 0x620   :  { %v8363_v48 = vadd.f32 %v2015_v47, %v2014_v46  ;;  %v12419_v46 = vld [vmem:[#allocation37_spill] sm:$0xff]  ;;  %v12420_v47 = vld [vmem:[#allocation38_spill] sm:$0xff] }
 0x622   :  { %4642 = vtanh.f32 %v8363_v48 }
 0x62f   :  { %v4643_v52 = vpop.eup %4642 }
 0x630   :  { %v2018_v60 = vmul.f32 %v4643_v52, %v2012_v58  ;;  %v12423_v58 = vld [vmem:[#allocation41_spill] sm:$0xff]  ;;  %v12424_v52 = vld [vmem:[#allocation42_spill] sm:$0xff] }
 0x632   :  { %2084 = vmatmul.mubr.f32.vlgmr.msra.gmra.mxu0 %v2018_v60  ;;  %2155 = vmatmul.mubr.f32.vlgmr.msra.gmra.mxu1 %v2018_v60  ;;  %v12425_v60 = vld [vmem:[#allocation43_spill] sm:$0xff] }
 0x633   :  { %2169 = vmatpush1.msra.mxu0 %v12389_v5  ;;  %2240 = vmatpush1.msra.mxu1 %v12390_v31  ;;  %v12426_v5 = vld [vmem:[#allocation44_spill] sm:$0xff]  ;;  %v12427_v31 = vld [vmem:[#allocation45_spill] sm:$0xff] }
 0x634   :  { %2170 = vmatprep.subr.mxu0 %v12391_v8  ;;  %2241 = vmatprep.subr.mxu1 %v12392_v30  ;;  %v12428_v8 = vld [vmem:[#allocation46_spill] sm:$0xff]  ;;  %v12429_v30 = vld [vmem:[#allocation47_spill] sm:$0xff] }
 0x635   :  { %2171 = vmatpush1.msra.mxu0 %v12393_v43  ;;  %2242 = vmatpush1.msra.mxu1 %v12394_v36  ;;  %v12430_v43 = vld [vmem:[#allocation48_spill] sm:$0xff]  ;;  %v12431_v36 = vld [vmem:[#allocation49_spill] sm:$0xff] }
 0x636   :  { %2172 = vmatprep.subr.mxu0 %v12395_v37  ;;  %2243 = vmatprep.subr.mxu1 %v12396_v38  ;;  %v12432_v37 = vld [vmem:[#allocation50_spill] sm:$0xff]  ;;  %v12433_v38 = vld [vmem:[#allocation51_spill] sm:$0xff] }
 0x637   :  { %2173 = vmatpush1.msra.mxu0 %v12397_v3  ;;  %2244 = vmatpush1.msra.mxu1 %v12398_v41  ;;  %v12434_v3 = vld [vmem:[#allocation52_spill] sm:$0xff]  ;;  %v12435_v41 = vld [vmem:[#allocation53_spill] sm:$0xff] }
 0x638   :  { %2174 = vmatprep.subr.mxu0 %v12399_v34  ;;  %2245 = vmatprep.subr.mxu1 %v12400_v32  ;;  %v12436_v34 = vld [vmem:[#allocation54_spill] sm:$0xff]  ;;  %v12437_v32 = vld [vmem:[#allocation55_spill] sm:$0xff] }
 0x639   :  { %2175 = vmatpush1.msra.mxu0 %v12401_v19  ;;  %2246 = vmatpush1.msra.mxu1 %v12402_v33  ;;  %v12438_v19 = vld [vmem:[#allocation56_spill] sm:$0xff]  ;;  %v12439_v33 = vld [vmem:[#allocation57_spill] sm:$0xff] }
 0x63a   :  { %2176 = vmatprep.subr.mxu0 %v12403_v17  ;;  %2247 = vmatprep.subr.mxu1 %v12404_v39  ;;  %v12440_v17 = vld [vmem:[#allocation58_spill] sm:$0xff]  ;;  %v12441_v39 = vld [vmem:[#allocation59_spill] sm:$0xff] }
 0x63b   :  { %2177 = vmatpush1.msra.mxu0 %v12405_v35  ;;  %2248 = vmatpush1.msra.mxu1 %v12406_v62  ;;  %v12442_v35 = vld [vmem:[#allocation60_spill] sm:$0xff]  ;;  %v12443_v62 = vld [vmem:[#allocation61_spill] sm:$0xff] }
 0x63c   :  { %2178 = vmatprep.subr.mxu0 %v12407_v18  ;;  %2249 = vmatprep.subr.mxu1 %v12408_v6  ;;  %v12444_v18 = vld [vmem:[#allocation62_spill] sm:$0xff]  ;;  %v12445_v6 = vld [vmem:[#allocation63_spill] sm:$0xff] }
 0x63d   :  { %2179 = vmatpush1.msra.mxu0 %v12409_v16  ;;  %2250 = vmatpush1.msra.mxu1 %v12410_v20  ;;  %v12446_v16 = vld [vmem:[#allocation64_spill] sm:$0xff]  ;;  %v12447_v20 = vld [vmem:[#allocation65_spill] sm:$0xff] }
 0x63e   :  { %2180 = vmatprep.subr.mxu0 %v12411_v21  ;;  %2251 = vmatprep.subr.mxu1 %v12412_v22  ;;  %v12448_v21 = vld [vmem:[#allocation66_spill] sm:$0xff]  ;;  %v12449_v22 = vld [vmem:[#allocation67_spill] sm:$0xff] }
 0x63f   :  { %2181 = vmatpush1.msra.mxu0 %v12413_v23  ;;  %2252 = vmatpush1.msra.mxu1 %v12414_v24  ;;  %v12450_v23 = vld [vmem:[#allocation68_spill] sm:$0xff]  ;;  %v12451_v24 = vld [vmem:[#allocation69_spill] sm:$0xff] }
 0x640   :  { %2182 = vmatprep.subr.mxu0 %v12415_v25  ;;  %2253 = vmatprep.subr.mxu1 %v12416_v26  ;;  %v12452_v25 = vld [vmem:[#allocation70_spill] sm:$0xff]  ;;  %v12453_v26 = vld [vmem:[#allocation71_spill] sm:$0xff] }
 0x641   :  { %2183 = vmatpush1.msra.mxu0 %v12417_v28  ;;  %2254 = vmatpush1.msra.mxu1 %v12418_v45  ;;  %v12454_v28 = vld [vmem:[#allocation72_spill] sm:$0xff]  ;;  %v12455_v45 = vld [vmem:[#allocation73_spill] sm:$0xff] }
 0x642   :  { %2184 = vmatprep.subr.mxu0 %v12419_v46  ;;  %2255 = vmatprep.subr.mxu1 %v12420_v47  ;;  %v12456_v46 = vld [vmem:[#allocation74_spill] sm:$0xff]  ;;  %v12457_v47 = vld [vmem:[#allocation75_spill] sm:$0xff] }
 0x643   :  { %2185 = vmatpush1.msra.mxu0 %v12421_v42  ;;  %2256 = vmatpush1.msra.mxu1 %v12422_v50  ;;  %v12458_v42 = vld [vmem:[#allocation76_spill] sm:$0xff]  ;;  %v12459_v50 = vld [vmem:[#allocation77_spill] sm:$0xff] }
 0x644   :  { %2186 = vmatprep.subr.mxu0 %v12423_v58  ;;  %2257 = vmatprep.subr.mxu1 %v12424_v52  ;;  %v12460_v58 = vld [vmem:[#allocation78_spill] sm:$0xff]  ;;  %v12462_v52 = vld [vmem:[#allocation80_spill] sm:$0xff] }
 0x645   :  { %2187 = vmatpush1.msra.mxu0 %v12425_v60  ;;  %2258 = vmatpush1.msra.mxu1 %v12426_v5  ;;  %v12463_v60 = vld [vmem:[#allocation81_spill] sm:$0xff]  ;;  %v12464_v5 = vld [vmem:[#allocation82_spill] sm:$0xff] }
 0x646   :  { %2188 = vmatprep.subr.mxu0 %v12427_v31  ;;  %2259 = vmatprep.subr.mxu1 %v12428_v8  ;;  %v12465_v31 = vld [vmem:[#allocation83_spill] sm:$0xff]  ;;  %v12466_v8 = vld [vmem:[#allocation84_spill] sm:$0xff] }
 0x647   :  { %2189 = vmatpush1.msra.mxu0 %v12429_v30  ;;  %2260 = vmatpush1.msra.mxu1 %v12430_v43  ;;  %v12467_v30 = vld [vmem:[#allocation85_spill] sm:$0xff]  ;;  %v12468_v43 = vld [vmem:[#allocation86_spill] sm:$0xff] }
 0x648   :  { %2190 = vmatprep.subr.mxu0 %v12431_v36  ;;  %2261 = vmatprep.subr.mxu1 %v12432_v37  ;;  %v12469_v36 = vld [vmem:[#allocation87_spill] sm:$0xff]  ;;  %v12470_v37 = vld [vmem:[#allocation88_spill] sm:$0xff] }
 0x649   :  { %2191 = vmatpush1.msra.mxu0 %v12433_v38  ;;  %2262 = vmatpush1.msra.mxu1 %v12434_v3  ;;  %v12471_v38 = vld [vmem:[#allocation89_spill] sm:$0xff]  ;;  %v12472_v3 = vld [vmem:[#allocation90_spill] sm:$0xff] }
 0x64a   :  { %2192 = vmatprep.subr.mxu0 %v12435_v41  ;;  %2263 = vmatprep.subr.mxu1 %v12436_v34  ;;  %v12473_v41 = vld [vmem:[#allocation91_spill] sm:$0xff]  ;;  %v12474_v34 = vld [vmem:[#allocation92_spill] sm:$0xff] }
 0x64b   :  { %2193 = vmatpush1.msra.mxu0 %v12437_v32  ;;  %2264 = vmatpush1.msra.mxu1 %v12438_v19  ;;  %v12475_v32 = vld [vmem:[#allocation93_spill] sm:$0xff]  ;;  %v12476_v19 = vld [vmem:[#allocation94_spill] sm:$0xff] }
 0x64c   :  { %2194 = vmatprep.subr.mxu0 %v12439_v33  ;;  %2265 = vmatprep.subr.mxu1 %v12440_v17  ;;  %v12477_v33 = vld [vmem:[#allocation95_spill] sm:$0xff]  ;;  %v12478_v17 = vld [vmem:[#allocation96_spill] sm:$0xff] }
 0x64d   :  { %2195 = vmatpush1.msra.mxu0 %v12441_v39  ;;  %2266 = vmatpush1.msra.mxu1 %v12442_v35  ;;  %v12479_v39 = vld [vmem:[#allocation97_spill] sm:$0xff]  ;;  %v12480_v35 = vld [vmem:[#allocation98_spill] sm:$0xff] }
 0x64e   :  { %2196 = vmatprep.subr.mxu0 %v12443_v62  ;;  %2267 = vmatprep.subr.mxu1 %v12444_v18  ;;  %v12481_v62 = vld [vmem:[#allocation99_spill] sm:$0xff]  ;;  %v12482_v18 = vld [vmem:[#allocation100_spill] sm:$0xff] }
 0x64f   :  { %2197 = vmatpush1.msra.mxu0 %v12445_v6  ;;  %2268 = vmatpush1.msra.mxu1 %v12446_v16  ;;  %v12483_v6 = vld [vmem:[#allocation101_spill] sm:$0xff]  ;;  %v12484_v16 = vld [vmem:[#allocation102_spill] sm:$0xff] }
 0x650   :  { %2198 = vmatprep.subr.mxu0 %v12447_v20  ;;  %2269 = vmatprep.subr.mxu1 %v12448_v21  ;;  %v12485_v20 = vld [vmem:[#allocation103_spill] sm:$0xff]  ;;  %v12486_v21 = vld [vmem:[#allocation104_spill] sm:$0xff] }
 0x651   :  { %2199 = vmatpush1.msra.mxu0 %v12449_v22  ;;  %2232 = vmatprep.mubr.f32.mxu0 %v11995_v53  ;;  %v12487_v22 = vld [vmem:[#allocation105_spill] sm:$0xff] }
 0x652   :  { %2270 = vmatpush1.msra.mxu1 %v12450_v23  ;;  %2303 = vmatprep.mubr.f32.mxu1 %v11995_v53  ;;  %v12488_v23 = vld [vmem:[#allocation106_spill] sm:$0xff] }
 0x653   :  { %2233 = vmatmul.mubr.f32.vlgmr.msra.gmra.mxu0 %v8174_v29  ;;  %2304 = vmatmul.mubr.f32.vlgmr.msra.gmra.mxu1 %v8174_v29  ;;  %v12461_v29 = vld [vmem:[#allocation79_spill] sm:$0xff] }
 0x654   :  { %2332 = vmatprep.subr.mxu0 %v12451_v24  ;;  %2403 = vmatprep.subr.mxu1 %v12452_v25  ;;  %v12489_v24 = vld [vmem:[#allocation107_spill] sm:$0xff]  ;;  %v12490_v25 = vld [vmem:[#allocation108_spill] sm:$0xff] }
 0x655   :  { %2333 = vmatpush1.msra.mxu0 %v12453_v26  ;;  %2404 = vmatpush1.msra.mxu1 %v12454_v28  ;;  %v12491_v26 = vld [vmem:[#allocation109_spill] sm:$0xff]  ;;  %v12492_v28 = vld [vmem:[#allocation110_spill] sm:$0xff] }
 0x656   :  { %2334 = vmatprep.subr.mxu0 %v12455_v45  ;;  %2405 = vmatprep.subr.mxu1 %v12456_v46  ;;  %v12493_v45 = vld [vmem:[#allocation111_spill] sm:$0xff]  ;;  %v12494_v46 = vld [vmem:[#allocation112_spill] sm:$0xff] }
 0x657   :  { %2335 = vmatpush1.msra.mxu0 %v12457_v47  ;;  %2406 = vmatpush1.msra.mxu1 %v12458_v42  ;;  %v12495_v47 = vld [vmem:[#allocation113_spill] sm:$0xff]  ;;  %v12496_v42 = vld [vmem:[#allocation114_spill] sm:$0xff] }
 0x658   :  { %2336 = vmatprep.subr.mxu0 %v12459_v50  ;;  %2407 = vmatprep.subr.mxu1 %v12460_v58  ;;  %v12497_v50 = vld [vmem:[#allocation115_spill] sm:$0xff]  ;;  %v12498_v58 = vld [vmem:[#allocation116_spill] sm:$0xff] }
 0x659   :  { %2337 = vmatpush1.msra.mxu0 %v12461_v29  ;;  %2408 = vmatpush1.msra.mxu1 %v12462_v52  ;;  %v12499_v29 = vld [vmem:[#allocation117_spill] sm:$0xff]  ;;  %v12500_v52 = vld [vmem:[#allocation118_spill] sm:$0xff] }
 0x65a   :  { %2338 = vmatprep.subr.mxu0 %v12463_v60  ;;  %2409 = vmatprep.subr.mxu1 %v12464_v5  ;;  %v12501_v60 = vld [vmem:[#allocation119_spill] sm:$0xff]  ;;  %v12502_v5 = vld [vmem:[#allocation120_spill] sm:$0xff] }
 0x65b   :  { %2339 = vmatpush1.msra.mxu0 %v12465_v31  ;;  %2410 = vmatpush1.msra.mxu1 %v12466_v8  ;;  %v12503_v31 = vld [vmem:[#allocation121_spill] sm:$0xff]  ;;  %v12504_v8 = vld [vmem:[#allocation122_spill] sm:$0xff] }
 0x65c   :  { %2340 = vmatprep.subr.mxu0 %v12467_v30  ;;  %2411 = vmatprep.subr.mxu1 %v12468_v43  ;;  %v12505_v30 = vld [vmem:[#allocation123_spill] sm:$0xff]  ;;  %v12506_v43 = vld [vmem:[#allocation125_spill] sm:$0xff] }
 0x65d   :  { %2341 = vmatpush1.msra.mxu0 %v12469_v36  ;;  %2412 = vmatpush1.msra.mxu1 %v12470_v37  ;;  %v12507_v36 = vld [vmem:[#allocation126_spill] sm:$0xff]  ;;  %v12508_v37 = vld [vmem:[#allocation127_spill] sm:$0xff] }
 0x65e   :  { %2342 = vmatprep.subr.mxu0 %v12471_v38  ;;  %2413 = vmatprep.subr.mxu1 %v12472_v3  ;;  %v12509_v38 = vld [vmem:[#allocation128_spill] sm:$0xff]  ;;  %v12510_v3 = vld [vmem:[#allocation129_spill] sm:$0xff] }
 0x65f   :  { %2343 = vmatpush1.msra.mxu0 %v12473_v41  ;;  %2414 = vmatpush1.msra.mxu1 %v12474_v34  ;;  %v12511_v41 = vld [vmem:[#allocation130_spill] sm:$0xff]  ;;  %v12512_v34 = vld [vmem:[#allocation131_spill] sm:$0xff] }
 0x660   :  { %2344 = vmatprep.subr.mxu0 %v12475_v32  ;;  %2415 = vmatprep.subr.mxu1 %v12476_v19  ;;  %v12513_v32 = vld [vmem:[#allocation132_spill] sm:$0xff]  ;;  %v12514_v19 = vld [vmem:[#allocation134_spill] sm:$0xff] }
 0x661   :  { %2345 = vmatpush1.msra.mxu0 %v12477_v33  ;;  %2416 = vmatpush1.msra.mxu1 %v12478_v17  ;;  %v8501_v33 = vld [vmem:[%s11375_s5 + $0x1e8] sm:$0xff]  ;;  %v8507_v17 = vld [vmem:[%s11375_s5 + $0x1f8] sm:$0xff] }
 0x662   :  { %2346 = vmatprep.subr.mxu0 %v12479_v39  ;;  %2417 = vmatprep.subr.mxu1 %v12480_v35 }
 0x663   :  { %2347 = vmatpush1.msra.mxu0 %v12481_v62  ;;  %2418 = vmatpush1.msra.mxu1 %v12482_v18 }
 0x664   :  { %2348 = vmatprep.subr.mxu0 %v12483_v6  ;;  %2419 = vmatprep.subr.mxu1 %v12484_v16 }
 0x665   :  { %2349 = vmatpush1.msra.mxu0 %v12485_v20  ;;  %2420 = vmatpush1.msra.mxu1 %v12486_v21  ;;  %v12515_v20 = vld [vmem:[#allocation139_spill] sm:$0xff] }
 0x666   :  { %2350 = vmatprep.subr.mxu0 %v12487_v22  ;;  %2421 = vmatprep.subr.mxu1 %v12488_v23 }
 0x667   :  { %2351 = vmatpush1.msra.mxu0 %v12489_v24  ;;  %2422 = vmatpush1.msra.mxu1 %v12490_v25  ;;  %v12516_v25 = vld [vmem:[#allocation140_spill] sm:$0xff] }
 0x668   :  { %2352 = vmatprep.subr.mxu0 %v12491_v26  ;;  %2423 = vmatprep.subr.mxu1 %v12492_v28 }
 0x669   :  { %2353 = vmatpush1.msra.mxu0 %v12493_v45  ;;  %2424 = vmatpush1.msra.mxu1 %v12494_v46  ;;  %v12517_v45 = vld [vmem:[#allocation142_spill] sm:$0xff] }
 0x66a   :  { %2354 = vmatprep.subr.mxu0 %v12495_v47  ;;  %2425 = vmatprep.subr.mxu1 %v12496_v42  ;;  %v12518_v47 = vld [vmem:[#allocation141_spill] sm:$0xff] }
 0x66b   :  { %2355 = vmatpush1.msra.mxu0 %v12497_v50  ;;  %2426 = vmatpush1.msra.mxu1 %v12498_v58 }
 0x66c   :  { %2356 = vmatprep.subr.mxu0 %v12499_v29  ;;  %2427 = vmatprep.subr.mxu1 %v12500_v52 }
 0x66d   :  { %2357 = vmatpush1.msra.mxu0 %v12501_v60  ;;  %2428 = vmatpush1.msra.mxu1 %v12502_v5 }
 0x66e   :  { %2358 = vmatprep.subr.mxu0 %v12503_v31  ;;  %2429 = vmatprep.subr.mxu1 %v12504_v8 }
 0x66f   :  { %2359 = vmatpush1.msra.mxu0 %v12505_v30  ;;  %2430 = vmatpush1.msra.mxu1 %v12506_v43 }
 0x670   :  { %2360 = vmatprep.subr.mxu0 %v12507_v36  ;;  %2431 = vmatprep.subr.mxu1 %v12508_v37 }
 0x671   :  { %2361 = vmatpush1.msra.mxu0 %v12509_v38  ;;  %2432 = vmatpush1.msra.mxu1 %v12510_v3 }
 0x672   :  { %2362 = vmatprep.subr.mxu0 %v12511_v41  ;;  %2433 = vmatprep.subr.mxu1 %v12512_v34 }
 0x673   :  { %2363 = vmatpush1.msra.mxu0 %v12513_v32  ;;  %2396 = vmatprep.mubr.f32.mxu0 %v11995_v53  ;;  %v8657_v32 = vld [vmem:[%s11375_s5 + $0xb8] sm:$0xff] }
 0x674   :  { %2434 = vmatpush1.msra.mxu1 %v12514_v19  ;;  %2467 = vmatprep.mubr.f32.mxu1 %v11995_v53  ;;  %v8663_v19 = vld [vmem:[%s11375_s5 + $0xa0] sm:$0xff] }
 0x675   :  { %2496 = vmatprep.subr.mxu0 %v8501_v33  ;;  %2567 = vmatprep.subr.mxu1 %v8507_v17 }
 0x6f2   :  { %v8510_v39 = vpop.f32.mrf.mxu0  ;;  %v8512_v35 = vpop.f32.mrf.mxu1 }
 0x6f4   :  { %v8514_v62 = vpop.f32.mrf.mxu0  ;;  %v8516_v18 = vpop.f32.mrf.mxu1 }
 0x713   :  { %v2234_v6 = vpop.f32.mrf.mxu0  ;;  %v2305_v16 = vpop.f32.mrf.mxu1 }
 0x714   :  { %v2310_v21 = vadd.f32 %v2234_v6, %v12515_v20  ;;  %v2312_v42 = vadd.f32 %v2305_v16, %v12518_v47  ;;  %v8669_v6 = vld [vmem:[%s11375_s5 + $0xb0] sm:$0xff]  ;;  %v8675_v16 = vld [vmem:[%s11375_s5 + $0x88] sm:$0xff]  ;;  %v8681_v20 = vld [vmem:[%s11375_s5 + $0x98] sm:$0xff] }
 0x715   :  { %v2236_v22 = vpop.f32.mrf.mxu0  ;;  %v2307_v23 = vpop.f32.mrf.mxu1  ;;  %v8741_v47 = vld [vmem:[%s11375_s5 + $0x50] sm:$0xff] }
 0x716   :  { %v2314_v24 = vmul.f32 0.5, %v2310_v21  ;;  %v2311_v26 = vadd.f32 %v2236_v22, %v12516_v25  ;;  %v2313_v46 = vadd.f32 %v2307_v23, %v12517_v45  ;;  %v2316_v50 = vmul.f32 0.5, %v2312_v42  ;;  %v8687_v21 = vld [vmem:[%s11375_s5 + $0x80] sm:$0xff]  ;;  %v8693_v22 = vld [vmem:[%s11375_s5 + $0x90] sm:$0xff]  ;;  %v8699_v23 = vld [vmem:[%s11375_s5 + $0x68] sm:$0xff] }
 0x717   :  { %v8711_v25 = vld [vmem:[%s11375_s5 + $0x60] sm:$0xff]  ;;  %v8729_v45 = vld [vmem:[%s11375_s5 + $0x58] sm:$0xff]  ;;  %v8747_v42 = vld [vmem:[%s11375_s5 + $0x28] sm:$0xff] }
 0x718   :  { %4644 = vtanh.f32 %v2314_v24  ;;  %v2315_v28 = vmul.f32 0.5, %v2311_v26  ;;  %v8705_v24 = vld [vmem:[%s11375_s5 + $0x78] sm:$0xff]  ;;  %v8717_v26 = vld [vmem:[%s11375_s5 + $0x70] sm:$0xff] }
 0x71a   :  { %4646 = vtanh.f32 %v2315_v28  ;;  %v8723_v28 = vld [vmem:[%s11375_s5 + $0x48] sm:$0xff] }
 0x71b   :  { %4648 = vtanh.f32 %v2313_v46  ;;  %v8735_v46 = vld [vmem:[%s11375_s5 + $0x40] sm:$0xff] }
 0x71c   :  { %4650 = vtanh.f32 %v2316_v50  ;;  %v8753_v50 = vld [vmem:[%s11375_s5 + $0x38] sm:$0xff] }
 0x725   :  { %v4645_v58 = vpop.eup %4644 }
 0x726   :  { %v2320_v29 = vmul.f32 0.5, %v4645_v58  ;;  %v8759_v58 = vld [vmem:[%s11375_s5 + $0x20] sm:$0xff] }
 0x727   :  { %v4647_v52 = vpop.eup %4646 }
 0x728   :  { %v2323_v60 = vadd.f32 0.5, %v2320_v29  ;;  %v2321_v5 = vmul.f32 0.5, %v4647_v52  ;;  %v4649_v31 = vpop.eup %4648  ;;  %v8765_v29 = vld [vmem:[%s11375_s5 + $0x30] sm:$0xff]  ;;  %v8771_v52 = vld [vmem:[%s11375_s5 + $0x8] sm:$0xff] }
 0x729   :  { %v4651_v37 = vpop.eup %4650  ;;  %12522 = vst [vmem:[#allocation135_spill] sm:$0xff] %v8771_v52 }
 0x72a   :  { %v2324_v8 = vadd.f32 0.5, %v2321_v5  ;;  %v2328_v30 = vmul.f32 %v4649_v31, %v2323_v60  ;;  %v2322_v38 = vmul.f32 0.5, %v4651_v37  ;;  %v8777_v60 = vld [vmem:[%s11375_s5 + $0x18] sm:$0xff]  ;;  %v8783_v5 = vld [vmem:[%s11375_s5] sm:$0xff]  ;;  %v8789_v31 = vld [vmem:[%s11375_s5 + $0x10] sm:$0xff] }
 0x72b   :  { %12523 = vst [vmem:[#allocation136_spill] sm:$0xff] %v8777_v60  ;;  %12524 = vst [vmem:[#allocation138_spill] sm:$0xff] %v8783_v5 }
 0x72c   :  { %v2327_v43 = vmul.f32 %v2324_v8, %v8171_v0  ;;  %v2325_v3 = vadd.f32 0.5, %v2322_v38  ;;  %v12519_v0 = vld [vmem:[#allocation133_spill] sm:$0xff]  ;;  %12525 = vst [vmem:[#allocation137_spill] sm:$0xff] %v8789_v31  ;;  %v8797_v8 = vld [vmem:[%s11376_s2 + $0x1e8] sm:$0xff] }
 0x72d   :  { %12526 = vst [vmem:[#allocation159_spill] sm:$0xff] %v8797_v8 }
 0x72e   :  { %v8523_v36 = vadd.f32 %v2328_v30, %v2327_v43  ;;  %v8803_v30 = vld [vmem:[%s11376_s2 + $0x1f8] sm:$0xff] }
 0x72f   :  { %12527 = vst [vmem:[#allocation161_spill] sm:$0xff] %v8803_v30 }
 0x730   :  { %4652 = vtanh.f32 %v8523_v36 }
 0x73d   :  { %v4653_v41 = vpop.eup %4652 }
 0x73e   :  { %v8526_v34 = vmul.f32 %v4653_v41, %v2325_v3 }
 0x740   :  { %2397 = vmatmul.mubr.f32.vlgmr.msra.gmra.mxu0 %v8526_v34  ;;  %2468 = vmatmul.mubr.f32.vlgmr.msra.gmra.mxu1 %v8526_v34 }
 0x741   :  { %2497 = vmatpush1.msra.mxu0 %v8181_v54  ;;  %2568 = vmatpush1.msra.mxu1 %v8187_v10  ;;  %v12520_v54 = vld [vmem:[#allocation163_spill] sm:$0xff]  ;;  %v12521_v10 = vld [vmem:[#allocation164_spill] sm:$0xff] }
 0x742   :  { %2498 = vmatprep.subr.mxu0 %v8193_v61  ;;  %2569 = vmatprep.subr.mxu1 %v8199_v49  ;;  %v8555_v61 = vld [vmem:[%s11375_s5 + $0x128] sm:$0xff]  ;;  %v8561_v49 = vld [vmem:[%s11375_s5 + $0x138] sm:$0xff] }
 0x743   :  { %2499 = vmatpush1.msra.mxu0 %v8205_v27  ;;  %2570 = vmatpush1.msra.mxu1 %v8211_v51  ;;  %v8567_v27 = vld [vmem:[%s11375_s5 + $0x120] sm:$0xff]  ;;  %v8573_v51 = vld [vmem:[%s11375_s5 + $0x130] sm:$0xff] }
 0x744   :  { %2500 = vmatprep.subr.mxu0 %v8217_v1  ;;  %2571 = vmatprep.subr.mxu1 %v8223_v57  ;;  %v8579_v1 = vld [vmem:[%s11375_s5 + $0x108] sm:$0xff]  ;;  %v8585_v57 = vld [vmem:[%s11375_s5 + $0x118] sm:$0xff] }
 0x745   :  { %2501 = vmatpush1.msra.mxu0 %v8229_v55  ;;  %2572 = vmatpush1.msra.mxu1 %v8235_v7  ;;  %v8591_v55 = vld [vmem:[%s11375_s5 + $0x100] sm:$0xff]  ;;  %v8597_v7 = vld [vmem:[%s11375_s5 + $0x110] sm:$0xff] }
 0x746   :  { %2502 = vmatprep.subr.mxu0 %v8241_v9  ;;  %2573 = vmatprep.subr.mxu1 %v8247_v14  ;;  %v8603_v9 = vld [vmem:[%s11375_s5 + $0xe8] sm:$0xff]  ;;  %v8609_v14 = vld [vmem:[%s11375_s5 + $0xf8] sm:$0xff] }
 0x747   :  { %2503 = vmatpush1.msra.mxu0 %v8253_v12  ;;  %2574 = vmatpush1.msra.mxu1 %v8259_v40  ;;  %v8615_v12 = vld [vmem:[%s11375_s5 + $0xe0] sm:$0xff]  ;;  %v8621_v40 = vld [vmem:[%s11375_s5 + $0xf0] sm:$0xff] }
 0x748   :  { %2504 = vmatprep.subr.mxu0 %v8265_v13  ;;  %2575 = vmatprep.subr.mxu1 %v12519_v0  ;;  %v8627_v13 = vld [vmem:[%s11375_s5 + $0xc8] sm:$0xff] }
 0x749   :  { %2505 = vmatpush1.msra.mxu0 %v12520_v54  ;;  %2576 = vmatpush1.msra.mxu1 %v12521_v10 }
 0x74a   :  { %2506 = vmatprep.subr.mxu0 %v8289_v11  ;;  %2577 = vmatprep.subr.mxu1 %v8295_v63  ;;  %v8633_v63 = vld [vmem:[%s11375_s5 + $0xd8] sm:$0xff]  ;;  %v8651_v11 = vld [vmem:[%s11375_s5 + $0xa8] sm:$0xff] }
 0x74b   :  { %2507 = vmatpush1.msra.mxu0 %v8301_v59  ;;  %2578 = vmatpush1.msra.mxu1 %v8307_v4  ;;  %v8639_v59 = vld [vmem:[%s11375_s5 + $0xc0] sm:$0xff]  ;;  %v8645_v4 = vld [vmem:[%s11375_s5 + $0xd0] sm:$0xff] }
 0x74c   :  { %2508 = vmatprep.subr.mxu0 %v8555_v61  ;;  %2579 = vmatprep.subr.mxu1 %v8561_v49 }
 0x74d   :  { %2509 = vmatpush1.msra.mxu0 %v8567_v27  ;;  %2580 = vmatpush1.msra.mxu1 %v8573_v51 }
 0x74e   :  { %2510 = vmatprep.subr.mxu0 %v8579_v1  ;;  %2581 = vmatprep.subr.mxu1 %v8585_v57 }
 0x74f   :  { %2511 = vmatpush1.msra.mxu0 %v8591_v55  ;;  %2582 = vmatpush1.msra.mxu1 %v8597_v7 }
 0x750   :  { %2512 = vmatprep.subr.mxu0 %v8603_v9  ;;  %2583 = vmatprep.subr.mxu1 %v8609_v14 }
 0x751   :  { %2513 = vmatpush1.msra.mxu0 %v8615_v12  ;;  %2584 = vmatpush1.msra.mxu1 %v8621_v40 }
 0x752   :  { %2514 = vmatprep.subr.mxu0 %v8627_v13  ;;  %2585 = vmatprep.subr.mxu1 %v8633_v63 }
 0x753   :  { %2515 = vmatpush1.msra.mxu0 %v8639_v59  ;;  %2586 = vmatpush1.msra.mxu1 %v8645_v4 }
 0x754   :  { %2516 = vmatprep.subr.mxu0 %v8651_v11  ;;  %2587 = vmatprep.subr.mxu1 %v8657_v32 }
 0x755   :  { %2517 = vmatpush1.msra.mxu0 %v8663_v19  ;;  %2588 = vmatpush1.msra.mxu1 %v8669_v6 }
 0x756   :  { %2518 = vmatprep.subr.mxu0 %v8675_v16  ;;  %2589 = vmatprep.subr.mxu1 %v8681_v20 }
 0x757   :  { %2519 = vmatpush1.msra.mxu0 %v8687_v21  ;;  %2590 = vmatpush1.msra.mxu1 %v8693_v22 }
 0x758   :  { %2520 = vmatprep.subr.mxu0 %v8699_v23  ;;  %2591 = vmatprep.subr.mxu1 %v8705_v24 }
 0x759   :  { %2521 = vmatpush1.msra.mxu0 %v8711_v25  ;;  %2592 = vmatpush1.msra.mxu1 %v8717_v26 }
 0x75a   :  { %2522 = vmatprep.subr.mxu0 %v8723_v28  ;;  %2593 = vmatprep.subr.mxu1 %v8729_v45 }
 0x75b   :  { %2523 = vmatpush1.msra.mxu0 %v8735_v46  ;;  %2594 = vmatpush1.msra.mxu1 %v8741_v47 }
 0x75c   :  { %2524 = vmatprep.subr.mxu0 %v8747_v42  ;;  %2595 = vmatprep.subr.mxu1 %v8753_v50 }
 0x75d   :  { %2525 = vmatpush1.msra.mxu0 %v8759_v58  ;;  %2596 = vmatpush1.msra.mxu1 %v8765_v29 }
 0x75e   :  { %2526 = vmatprep.subr.mxu0 %v8771_v52  ;;  %2597 = vmatprep.subr.mxu1 %v8777_v60 }
 0x75f   :  { %2527 = vmatpush1.msra.mxu0 %v8783_v5  ;;  %2598 = vmatpush1.msra.mxu1 %v8789_v31 }
 0x760   :  { %2560 = vmatprep.mubr.f32.mxu0 %v11995_v53  ;;  %2631 = vmatprep.mubr.f32.mxu1 %v11995_v53 }
 0x761   :  { %2645 = vmatprep.subr.mxu0 %v8797_v8  ;;  %2716 = vmatprep.subr.mxu1 %v8803_v30 }
 0x800   :  { %v2398_v43 = vpop.f32.mrf.mxu0  ;;  %v2469_v37 = vpop.f32.mrf.mxu1 }
 0x801   :  { %v2399_v38 = vadd.f32 %v2398_v43, %v8510_v39  ;;  %v2470_v60 = vadd.f32 %v2469_v37, %v8512_v35 }
 0x802   :  { %v2400_v3 = vpop.f32.mrf.mxu0  ;;  %v2471_v41 = vpop.f32.mrf.mxu1 }
 0x803   :  { %v2474_v0 = vadd.f32 %v2399_v38, %v12386_v44  ;;  %v2401_v54 = vadd.f32 %v2400_v3, %v8514_v62  ;;  %v2472_v31 = vadd.f32 %v2471_v41, %v8516_v18  ;;  %v2476_v39 = vadd.f32 %v2470_v60, %v12387_v15  ;;  %v8839_v41 = vld [vmem:[%s11376_s2 + $0x1d8] sm:$0xff] }
 0x804   :  { %12532 = vst [vmem:[#allocation6_spill] sm:$0xff] %v8839_v41 }
 0x805   :  { %v2478_v10 = vmul.f32 0.5, %v2474_v0  ;;  %v2475_v8 = vadd.f32 %v2401_v54, %v6922_v56  ;;  %v2477_v30 = vadd.f32 %v2472_v31, %v6929_v2  ;;  %v2480_v43 = vmul.f32 0.5, %v2476_v39  ;;  %v8851_v39 = vld [vmem:[%s11376_s2 + $0x1d0] sm:$0xff] }
 0x806   :  { %12534 = vst [vmem:[#allocation8_spill] sm:$0xff] %v8851_v39 }
 0x807   :  { %4654 = vtanh.f32 %v2478_v10  ;;  %v2479_v5 = vmul.f32 0.5, %v2475_v8  ;;  %v8845_v10 = vld [vmem:[%s11376_s2 + $0x1c0] sm:$0xff] }
 0x808   :  { %12533 = vst [vmem:[#allocation7_spill] sm:$0xff] %v8845_v10 }
 0x809   :  { %4656 = vtanh.f32 %v2479_v5 }
 0x80a   :  { %4658 = vtanh.f32 %v2477_v30 }
 0x80b   :  { %4660 = vtanh.f32 %v2480_v43  ;;  %v8857_v43 = vld [vmem:[%s11376_s2 + $0x1a8] sm:$0xff] }
 0x80c   :  { %12535 = vst [vmem:[#allocation9_spill] sm:$0xff] %v8857_v43 }
 0x814   :  { %v4655_v52 = vpop.eup %4654 }
 0x815   :  { %v2484_v38 = vmul.f32 0.5, %v4655_v52  ;;  %v8833_v52 = vld [vmem:[%s11376_s2 + $0x1c8] sm:$0xff] }
 0x816   :  { %v4657_v44 = vpop.eup %4656  ;;  %12531 = vst [vmem:[#allocation5_spill] sm:$0xff] %v8833_v52 }
 0x817   :  { %v2487_v62 = vadd.f32 0.5, %v2484_v38  ;;  %v2485_v3 = vmul.f32 0.5, %v4657_v44  ;;  %v4659_v54 = vpop.eup %4658  ;;  %v8821_v44 = vld [vmem:[%s11376_s2 + $0x1e0] sm:$0xff]  ;;  %v8863_v38 = vld [vmem:[%s11376_s2 + $0x1b8] sm:$0xff] }
 0x818   :  { %v4661_v35 = vpop.eup %4660  ;;  %12529 = vst [vmem:[#allocation160_spill] sm:$0xff] %v8821_v44  ;;  %12536 = vst [vmem:[#allocation10_spill] sm:$0xff] %v8863_v38 }
 0x819   :  { %v2488_v0 = vadd.f32 0.5, %v2485_v3  ;;  %v2492_v8 = vmul.f32 %v4659_v54, %v2487_v62  ;;  %v2486_v31 = vmul.f32 0.5, %v4661_v35  ;;  %v8869_v62 = vld [vmem:[%s11376_s2 + $0x1a0] sm:$0xff]  ;;  %v8875_v3 = vld [vmem:[%s11376_s2 + $0x1b0] sm:$0xff]  ;;  %v8887_v54 = vld [vmem:[%s11376_s2 + $0x198] sm:$0xff] }
 0x81a   :  { %12537 = vst [vmem:[#allocation11_spill] sm:$0xff] %v8869_v62  ;;  %12538 = vst [vmem:[#allocation12_spill] sm:$0xff] %v8875_v3  ;;  %v8905_v35 = vld [vmem:[%s11376_s2 + $0x168] sm:$0xff] }
 0x81b   :  { %v2491_v18 = vmul.f32 %v2488_v0, %v8363_v48  ;;  %v2489_v30 = vadd.f32 0.5, %v2486_v31  ;;  %v8827_v48 = vld [vmem:[%s11376_s2 + $0x1f0] sm:$0xff]  ;;  %v8881_v0 = vld [vmem:[%s11376_s2 + $0x188] sm:$0xff]  ;;  %12540 = vst [vmem:[#allocation14_spill] sm:$0xff] %v8887_v54  ;;  %12543 = vst [vmem:[#allocation17_spill] sm:$0xff] %v8905_v35 }
 0x81c   :  { %12530 = vst [vmem:[#allocation4_spill] sm:$0xff] %v8827_v48  ;;  %12539 = vst [vmem:[#allocation13_spill] sm:$0xff] %v8881_v0  ;;  %v8911_v31 = vld [vmem:[%s11376_s2 + $0x178] sm:$0xff] }
 0x81d   :  { %v8815_v5 = vadd.f32 %v2492_v8, %v2491_v18  ;;  %v8893_v18 = vld [vmem:[%s11376_s2 + $0x180] sm:$0xff]  ;;  %v8899_v8 = vld [vmem:[%s11376_s2 + $0x190] sm:$0xff]  ;;  %12544 = vst [vmem:[#allocation18_spill] sm:$0xff] %v8911_v31 }
 0x81e   :  { %12541 = vst [vmem:[#allocation15_spill] sm:$0xff] %v8893_v18  ;;  %12542 = vst [vmem:[#allocation16_spill] sm:$0xff] %v8899_v8 }
 0x81f   :  { %12528 = vst [vmem:[#allocation162_spill] sm:$0xff] %v8815_v5  ;;  %4662 = vtanh.f32 %v8815_v5 }
 0x82c   :  { %v4663_v60 = vpop.eup %4662 }
 0x82d   :  { %v2495_v37 = vmul.f32 %v4663_v60, %v2489_v30  ;;  %v8917_v30 = vld [vmem:[%s11376_s2 + $0x160] sm:$0xff]  ;;  %v8923_v60 = vld [vmem:[%s11376_s2 + $0x170] sm:$0xff] }
 0x82e   :  { %12545 = vst [vmem:[#allocation19_spill] sm:$0xff] %v8917_v30  ;;  %12546 = vst [vmem:[#allocation20_spill] sm:$0xff] %v8923_v60 }
 0x82f   :  { %2561 = vmatmul.mubr.f32.vlgmr.msra.gmra.mxu0 %v2495_v37  ;;  %2632 = vmatmul.mubr.f32.vlgmr.msra.gmra.mxu1 %v2495_v37  ;;  %v8929_v37 = vld [vmem:[%s11376_s2 + $0x148] sm:$0xff] }
 0x830   :  { %2646 = vmatpush1.msra.mxu0 %v8821_v44  ;;  %2717 = vmatpush1.msra.mxu1 %v8827_v48  ;;  %12547 = vst [vmem:[#allocation21_spill] sm:$0xff] %v8929_v37 }
 0x831   :  { %2647 = vmatprep.subr.mxu0 %v8833_v52  ;;  %2718 = vmatprep.subr.mxu1 %v8839_v41 }
 0x832   :  { %2648 = vmatpush1.msra.mxu0 %v8845_v10  ;;  %2719 = vmatpush1.msra.mxu1 %v8851_v39  ;;  %v12658_v39 = vld [vmem:[#allocation145_spill] sm:$0xff] }
 0x833   :  { %2649 = vmatprep.subr.mxu0 %v8857_v43  ;;  %2720 = vmatprep.subr.mxu1 %v8863_v38 }
 0x834   :  { %2650 = vmatpush1.msra.mxu0 %v8869_v62  ;;  %2721 = vmatpush1.msra.mxu1 %v8875_v3  ;;  %v12656_v62 = vld [vmem:[#allocation144_spill] sm:$0xff] }
 0x835   :  { %2651 = vmatprep.subr.mxu0 %v8881_v0  ;;  %2722 = vmatprep.subr.mxu1 %v8887_v54 }
 0x836   :  { %2652 = vmatpush1.msra.mxu0 %v8893_v18  ;;  %2723 = vmatpush1.msra.mxu1 %v8899_v8  ;;  %v12655_v18 = vld [vmem:[#allocation143_spill] sm:$0xff] }
 0x837   :  { %2653 = vmatprep.subr.mxu0 %v8905_v35  ;;  %2724 = vmatprep.subr.mxu1 %v8911_v31  ;;  %v8935_v31 = vld [vmem:[%s11376_s2 + $0x158] sm:$0xff] }
 0x838   :  { %2654 = vmatpush1.msra.mxu0 %v8917_v30  ;;  %2725 = vmatpush1.msra.mxu1 %v8923_v60  ;;  %12548 = vst [vmem:[#allocation22_spill] sm:$0xff] %v8935_v31  ;;  %v8941_v30 = vld [vmem:[%s11376_s2 + $0x140] sm:$0xff]  ;;  %v8947_v60 = vld [vmem:[%s11376_s2 + $0x150] sm:$0xff] }
 0x839   :  { %2655 = vmatprep.subr.mxu0 %v8929_v37  ;;  %2726 = vmatprep.subr.mxu1 %v8935_v31  ;;  %12549 = vst [vmem:[#allocation23_spill] sm:$0xff] %v8941_v30  ;;  %12550 = vst [vmem:[#allocation24_spill] sm:$0xff] %v8947_v60  ;;  %v8953_v37 = vld [vmem:[%s11376_s2 + $0x128] sm:$0xff]  ;;  %v8959_v31 = vld [vmem:[%s11376_s2 + $0x138] sm:$0xff] }
 0x83a   :  { %2656 = vmatpush1.msra.mxu0 %v8941_v30  ;;  %2727 = vmatpush1.msra.mxu1 %v8947_v60  ;;  %12551 = vst [vmem:[#allocation25_spill] sm:$0xff] %v8953_v37  ;;  %12552 = vst [vmem:[#allocation26_spill] sm:$0xff] %v8959_v31  ;;  %v8965_v30 = vld [vmem:[%s11376_s2 + $0x120] sm:$0xff]  ;;  %v8971_v60 = vld [vmem:[%s11376_s2 + $0x130] sm:$0xff] }
 0x83b   :  { %2657 = vmatprep.subr.mxu0 %v8953_v37  ;;  %2728 = vmatprep.subr.mxu1 %v8959_v31  ;;  %12553 = vst [vmem:[#allocation27_spill] sm:$0xff] %v8965_v30  ;;  %12554 = vst [vmem:[#allocation28_spill] sm:$0xff] %v8971_v60  ;;  %v8977_v37 = vld [vmem:[%s11376_s2 + $0x108] sm:$0xff]  ;;  %v8983_v31 = vld [vmem:[%s11376_s2 + $0x118] sm:$0xff] }
 0x83c   :  { %2658 = vmatpush1.msra.mxu0 %v8965_v30  ;;  %2729 = vmatpush1.msra.mxu1 %v8971_v60  ;;  %12555 = vst [vmem:[#allocation29_spill] sm:$0xff] %v8977_v37  ;;  %12556 = vst [vmem:[#allocation30_spill] sm:$0xff] %v8983_v31  ;;  %v8989_v30 = vld [vmem:[%s11376_s2 + $0x100] sm:$0xff]  ;;  %v8995_v60 = vld [vmem:[%s11376_s2 + $0x110] sm:$0xff] }
 0x83d   :  { %2659 = vmatprep.subr.mxu0 %v8977_v37  ;;  %2730 = vmatprep.subr.mxu1 %v8983_v31  ;;  %12557 = vst [vmem:[#allocation31_spill] sm:$0xff] %v8989_v30  ;;  %12558 = vst [vmem:[#allocation32_spill] sm:$0xff] %v8995_v60  ;;  %v9001_v37 = vld [vmem:[%s11376_s2 + $0xe8] sm:$0xff]  ;;  %v9007_v31 = vld [vmem:[%s11376_s2 + $0xf8] sm:$0xff] }
 0x83e   :  { %2660 = vmatpush1.msra.mxu0 %v8989_v30  ;;  %2731 = vmatpush1.msra.mxu1 %v8995_v60  ;;  %12559 = vst [vmem:[#allocation33_spill] sm:$0xff] %v9001_v37  ;;  %12560 = vst [vmem:[#allocation34_spill] sm:$0xff] %v9007_v31  ;;  %v9013_v30 = vld [vmem:[%s11376_s2 + $0xe0] sm:$0xff]  ;;  %v9019_v60 = vld [vmem:[%s11376_s2 + $0xf0] sm:$0xff] }
 0x83f   :  { %2661 = vmatprep.subr.mxu0 %v9001_v37  ;;  %2732 = vmatprep.subr.mxu1 %v9007_v31  ;;  %12561 = vst [vmem:[#allocation35_spill] sm:$0xff] %v9013_v30  ;;  %12562 = vst [vmem:[#allocation36_spill] sm:$0xff] %v9019_v60  ;;  %v9025_v37 = vld [vmem:[%s11376_s2 + $0xc8] sm:$0xff]  ;;  %v9031_v31 = vld [vmem:[%s11376_s2 + $0xd8] sm:$0xff] }
 0x840   :  { %2662 = vmatpush1.msra.mxu0 %v9013_v30  ;;  %2733 = vmatpush1.msra.mxu1 %v9019_v60  ;;  %12563 = vst [vmem:[#allocation37_spill] sm:$0xff] %v9025_v37  ;;  %12564 = vst [vmem:[#allocation38_spill] sm:$0xff] %v9031_v31  ;;  %v9037_v30 = vld [vmem:[%s11376_s2 + $0xc0] sm:$0xff]  ;;  %v9043_v60 = vld [vmem:[%s11376_s2 + $0xd0] sm:$0xff] }
 0x841   :  { %2663 = vmatprep.subr.mxu0 %v9025_v37  ;;  %2734 = vmatprep.subr.mxu1 %v9031_v31  ;;  %12565 = vst [vmem:[#allocation39_spill] sm:$0xff] %v9037_v30  ;;  %12566 = vst [vmem:[#allocation40_spill] sm:$0xff] %v9043_v60  ;;  %v9049_v37 = vld [vmem:[%s11376_s2 + $0xa8] sm:$0xff]  ;;  %v9055_v31 = vld [vmem:[%s11376_s2 + $0xb8] sm:$0xff] }
 0x842   :  { %2664 = vmatpush1.msra.mxu0 %v9037_v30  ;;  %2735 = vmatpush1.msra.mxu1 %v9043_v60  ;;  %12567 = vst [vmem:[#allocation41_spill] sm:$0xff] %v9049_v37  ;;  %12568 = vst [vmem:[#allocation42_spill] sm:$0xff] %v9055_v31  ;;  %v9061_v30 = vld [vmem:[%s11376_s2 + $0xa0] sm:$0xff]  ;;  %v9067_v60 = vld [vmem:[%s11376_s2 + $0xb0] sm:$0xff] }
 0x843   :  { %2665 = vmatprep.subr.mxu0 %v9049_v37  ;;  %2736 = vmatprep.subr.mxu1 %v9055_v31  ;;  %12569 = vst [vmem:[#allocation43_spill] sm:$0xff] %v9061_v30  ;;  %12570 = vst [vmem:[#allocation44_spill] sm:$0xff] %v9067_v60  ;;  %v9073_v37 = vld [vmem:[%s11376_s2 + $0x88] sm:$0xff]  ;;  %v9079_v31 = vld [vmem:[%s11376_s2 + $0x98] sm:$0xff] }
 0x844   :  { %2666 = vmatpush1.msra.mxu0 %v9061_v30  ;;  %2737 = vmatpush1.msra.mxu1 %v9067_v60  ;;  %12571 = vst [vmem:[#allocation45_spill] sm:$0xff] %v9073_v37  ;;  %12572 = vst [vmem:[#allocation46_spill] sm:$0xff] %v9079_v31  ;;  %v9085_v30 = vld [vmem:[%s11376_s2 + $0x80] sm:$0xff]  ;;  %v9091_v60 = vld [vmem:[%s11376_s2 + $0x90] sm:$0xff] }
 0x845   :  { %2667 = vmatprep.subr.mxu0 %v9073_v37  ;;  %2738 = vmatprep.subr.mxu1 %v9079_v31  ;;  %12573 = vst [vmem:[#allocation47_spill] sm:$0xff] %v9085_v30  ;;  %12574 = vst [vmem:[#allocation48_spill] sm:$0xff] %v9091_v60  ;;  %v9097_v37 = vld [vmem:[%s11376_s2 + $0x68] sm:$0xff]  ;;  %v9103_v31 = vld [vmem:[%s11376_s2 + $0x78] sm:$0xff] }
 0x846   :  { %2668 = vmatpush1.msra.mxu0 %v9085_v30  ;;  %2739 = vmatpush1.msra.mxu1 %v9091_v60  ;;  %12575 = vst [vmem:[#allocation49_spill] sm:$0xff] %v9097_v37  ;;  %12576 = vst [vmem:[#allocation50_spill] sm:$0xff] %v9103_v31  ;;  %v9109_v30 = vld [vmem:[%s11376_s2 + $0x60] sm:$0xff]  ;;  %v9115_v60 = vld [vmem:[%s11376_s2 + $0x70] sm:$0xff] }
 0x847   :  { %2669 = vmatprep.subr.mxu0 %v9097_v37  ;;  %2740 = vmatprep.subr.mxu1 %v9103_v31  ;;  %12577 = vst [vmem:[#allocation51_spill] sm:$0xff] %v9109_v30  ;;  %12578 = vst [vmem:[#allocation52_spill] sm:$0xff] %v9115_v60  ;;  %v9121_v37 = vld [vmem:[%s11376_s2 + $0x48] sm:$0xff]  ;;  %v9127_v31 = vld [vmem:[%s11376_s2 + $0x58] sm:$0xff] }
 0x848   :  { %2670 = vmatpush1.msra.mxu0 %v9109_v30  ;;  %2741 = vmatpush1.msra.mxu1 %v9115_v60  ;;  %12579 = vst [vmem:[#allocation53_spill] sm:$0xff] %v9121_v37  ;;  %12580 = vst [vmem:[#allocation54_spill] sm:$0xff] %v9127_v31  ;;  %v9133_v30 = vld [vmem:[%s11376_s2 + $0x40] sm:$0xff]  ;;  %v9139_v60 = vld [vmem:[%s11376_s2 + $0x50] sm:$0xff] }
 0x849   :  { %2671 = vmatprep.subr.mxu0 %v9121_v37  ;;  %2742 = vmatprep.subr.mxu1 %v9127_v31  ;;  %12581 = vst [vmem:[#allocation55_spill] sm:$0xff] %v9133_v30  ;;  %12582 = vst [vmem:[#allocation56_spill] sm:$0xff] %v9139_v60  ;;  %v9145_v37 = vld [vmem:[%s11376_s2 + $0x28] sm:$0xff]  ;;  %v9151_v31 = vld [vmem:[%s11376_s2 + $0x38] sm:$0xff] }
 0x84a   :  { %2672 = vmatpush1.msra.mxu0 %v9133_v30  ;;  %2743 = vmatpush1.msra.mxu1 %v9139_v60  ;;  %12583 = vst [vmem:[#allocation57_spill] sm:$0xff] %v9145_v37  ;;  %12584 = vst [vmem:[#allocation58_spill] sm:$0xff] %v9151_v31  ;;  %v9157_v30 = vld [vmem:[%s11376_s2 + $0x20] sm:$0xff]  ;;  %v9163_v60 = vld [vmem:[%s11376_s2 + $0x30] sm:$0xff] }
 0x84b   :  { %2673 = vmatprep.subr.mxu0 %v9145_v37  ;;  %2744 = vmatprep.subr.mxu1 %v9151_v31  ;;  %12585 = vst [vmem:[#allocation59_spill] sm:$0xff] %v9157_v30  ;;  %12586 = vst [vmem:[#allocation60_spill] sm:$0xff] %v9163_v60  ;;  %v9169_v37 = vld [vmem:[%s11376_s2 + $0x8] sm:$0xff]  ;;  %v9175_v31 = vld [vmem:[%s11376_s2 + $0x18] sm:$0xff] }
 0x84c   :  { %2674 = vmatpush1.msra.mxu0 %v9157_v30  ;;  %2745 = vmatpush1.msra.mxu1 %v9163_v60  ;;  %12587 = vst [vmem:[#allocation61_spill] sm:$0xff] %v9169_v37  ;;  %12588 = vst [vmem:[#allocation62_spill] sm:$0xff] %v9175_v31  ;;  %v9181_v30 = vld [vmem:[%s11376_s2] sm:$0xff] }
 0x84d   :  { %2675 = vmatprep.subr.mxu0 %v9169_v37  ;;  %2746 = vmatprep.subr.mxu1 %v9175_v31  ;;  %12589 = vst [vmem:[#allocation63_spill] sm:$0xff] %v9181_v30  ;;  %v9188_v37 = vld [vmem:[%s11376_s2 + $0x10] sm:$0xff]  ;;  %v9197_v31 = vld [vmem:[%s11377_s4 + $0x1e8] sm:$0xff] }
 0x84e   :  { %2676 = vmatpush1.msra.mxu0 %v9181_v30  ;;  %2709 = vmatprep.mubr.f32.mxu0 %v11995_v53  ;;  %12590 = vst [vmem:[#allocation64_spill] sm:$0xff] %v9188_v37  ;;  %12591 = vst [vmem:[#allocation65_spill] sm:$0xff] %v9197_v31  ;;  %v9203_v30 = vld [vmem:[%s11377_s4 + $0x1f8] sm:$0xff] }
 0x84f   :  { %2747 = vmatpush1.msra.mxu1 %v9188_v37  ;;  %2780 = vmatprep.mubr.f32.mxu1 %v11995_v53  ;;  %12592 = vst [vmem:[#allocation66_spill] sm:$0xff] %v9203_v30  ;;  %v9209_v37 = vld [vmem:[%s11377_s4 + $0x1e0] sm:$0xff] }
 0x850   :  { %2710 = vmatmul.mubr.f32.vlgmr.msra.gmra.mxu0 %v8526_v34  ;;  %2781 = vmatmul.mubr.f32.vlgmr.msra.gmra.mxu1 %v8526_v34  ;;  %12593 = vst [vmem:[#allocation67_spill] sm:$0xff] %v9209_v37  ;;  %v9215_v34 = vld [vmem:[%s11377_s4 + $0x1f0] sm:$0xff] }
 0x851   :  { %2809 = vmatprep.subr.mxu0 %v9197_v31  ;;  %2880 = vmatprep.subr.mxu1 %v9203_v30  ;;  %12594 = vst [vmem:[#allocation68_spill] sm:$0xff] %v9215_v34  ;;  %v9221_v31 = vld [vmem:[%s11377_s4 + $0x1c8] sm:$0xff]  ;;  %v9227_v30 = vld [vmem:[%s11377_s4 + $0x1d8] sm:$0xff] }
 0x852   :  { %2810 = vmatpush1.msra.mxu0 %v9209_v37  ;;  %2881 = vmatpush1.msra.mxu1 %v9215_v34  ;;  %12595 = vst [vmem:[#allocation69_spill] sm:$0xff] %v9221_v31  ;;  %12596 = vst [vmem:[#allocation70_spill] sm:$0xff] %v9227_v30  ;;  %v9233_v37 = vld [vmem:[%s11377_s4 + $0x1c0] sm:$0xff]  ;;  %v9239_v34 = vld [vmem:[%s11377_s4 + $0x1d0] sm:$0xff] }
 0x853   :  { %2811 = vmatprep.subr.mxu0 %v9221_v31  ;;  %2882 = vmatprep.subr.mxu1 %v9227_v30  ;;  %12597 = vst [vmem:[#allocation71_spill] sm:$0xff] %v9233_v37  ;;  %12598 = vst [vmem:[#allocation72_spill] sm:$0xff] %v9239_v34  ;;  %v9245_v31 = vld [vmem:[%s11377_s4 + $0x1a8] sm:$0xff]  ;;  %v9251_v30 = vld [vmem:[%s11377_s4 + $0x1b8] sm:$0xff] }
 0x854   :  { %2812 = vmatpush1.msra.mxu0 %v9233_v37  ;;  %2883 = vmatpush1.msra.mxu1 %v9239_v34  ;;  %12599 = vst [vmem:[#allocation73_spill] sm:$0xff] %v9245_v31  ;;  %12600 = vst [vmem:[#allocation74_spill] sm:$0xff] %v9251_v30  ;;  %v9257_v37 = vld [vmem:[%s11377_s4 + $0x1a0] sm:$0xff]  ;;  %v9263_v34 = vld [vmem:[%s11377_s4 + $0x1b0] sm:$0xff] }
 0x855   :  { %2813 = vmatprep.subr.mxu0 %v9245_v31  ;;  %2884 = vmatprep.subr.mxu1 %v9251_v30  ;;  %12601 = vst [vmem:[#allocation75_spill] sm:$0xff] %v9257_v37  ;;  %12602 = vst [vmem:[#allocation76_spill] sm:$0xff] %v9263_v34  ;;  %v9269_v31 = vld [vmem:[%s11377_s4 + $0x188] sm:$0xff]  ;;  %v9275_v30 = vld [vmem:[%s11377_s4 + $0x198] sm:$0xff] }
 0x856   :  { %2814 = vmatpush1.msra.mxu0 %v9257_v37  ;;  %2885 = vmatpush1.msra.mxu1 %v9263_v34  ;;  %12603 = vst [vmem:[#allocation77_spill] sm:$0xff] %v9269_v31  ;;  %12604 = vst [vmem:[#allocation78_spill] sm:$0xff] %v9275_v30  ;;  %v9281_v37 = vld [vmem:[%s11377_s4 + $0x180] sm:$0xff]  ;;  %v9287_v34 = vld [vmem:[%s11377_s4 + $0x190] sm:$0xff] }
 0x857   :  { %2815 = vmatprep.subr.mxu0 %v9269_v31  ;;  %2886 = vmatprep.subr.mxu1 %v9275_v30  ;;  %12605 = vst [vmem:[#allocation79_spill] sm:$0xff] %v9281_v37  ;;  %12606 = vst [vmem:[#allocation80_spill] sm:$0xff] %v9287_v34  ;;  %v9293_v31 = vld [vmem:[%s11377_s4 + $0x168] sm:$0xff]  ;;  %v9299_v30 = vld [vmem:[%s11377_s4 + $0x178] sm:$0xff] }
 0x858   :  { %2816 = vmatpush1.msra.mxu0 %v9281_v37  ;;  %2887 = vmatpush1.msra.mxu1 %v9287_v34  ;;  %12607 = vst [vmem:[#allocation81_spill] sm:$0xff] %v9293_v31  ;;  %12608 = vst [vmem:[#allocation82_spill] sm:$0xff] %v9299_v30  ;;  %v9305_v37 = vld [vmem:[%s11377_s4 + $0x160] sm:$0xff]  ;;  %v9311_v34 = vld [vmem:[%s11377_s4 + $0x170] sm:$0xff] }
 0x859   :  { %2817 = vmatprep.subr.mxu0 %v9293_v31  ;;  %2888 = vmatprep.subr.mxu1 %v9299_v30  ;;  %12609 = vst [vmem:[#allocation83_spill] sm:$0xff] %v9305_v37  ;;  %12610 = vst [vmem:[#allocation84_spill] sm:$0xff] %v9311_v34  ;;  %v9317_v31 = vld [vmem:[%s11377_s4 + $0x148] sm:$0xff]  ;;  %v9323_v30 = vld [vmem:[%s11377_s4 + $0x158] sm:$0xff] }
 0x85a   :  { %2818 = vmatpush1.msra.mxu0 %v9305_v37  ;;  %2889 = vmatpush1.msra.mxu1 %v9311_v34  ;;  %12611 = vst [vmem:[#allocation85_spill] sm:$0xff] %v9317_v31  ;;  %12612 = vst [vmem:[#allocation86_spill] sm:$0xff] %v9323_v30  ;;  %v9329_v37 = vld [vmem:[%s11377_s4 + $0x140] sm:$0xff]  ;;  %v9335_v34 = vld [vmem:[%s11377_s4 + $0x150] sm:$0xff] }
 0x85b   :  { %2819 = vmatprep.subr.mxu0 %v9317_v31  ;;  %2890 = vmatprep.subr.mxu1 %v9323_v30  ;;  %12613 = vst [vmem:[#allocation87_spill] sm:$0xff] %v9329_v37  ;;  %12614 = vst [vmem:[#allocation88_spill] sm:$0xff] %v9335_v34  ;;  %v9341_v31 = vld [vmem:[%s11377_s4 + $0x128] sm:$0xff]  ;;  %v9347_v30 = vld [vmem:[%s11377_s4 + $0x138] sm:$0xff] }
 0x85c   :  { %2820 = vmatpush1.msra.mxu0 %v9329_v37  ;;  %2891 = vmatpush1.msra.mxu1 %v9335_v34  ;;  %12615 = vst [vmem:[#allocation89_spill] sm:$0xff] %v9341_v31  ;;  %12616 = vst [vmem:[#allocation90_spill] sm:$0xff] %v9347_v30  ;;  %v9353_v37 = vld [vmem:[%s11377_s4 + $0x120] sm:$0xff]  ;;  %v9359_v34 = vld [vmem:[%s11377_s4 + $0x130] sm:$0xff] }
 0x85d   :  { %2821 = vmatprep.subr.mxu0 %v9341_v31  ;;  %2892 = vmatprep.subr.mxu1 %v9347_v30  ;;  %12617 = vst [vmem:[#allocation91_spill] sm:$0xff] %v9353_v37  ;;  %12618 = vst [vmem:[#allocation92_spill] sm:$0xff] %v9359_v34  ;;  %v9365_v31 = vld [vmem:[%s11377_s4 + $0x108] sm:$0xff]  ;;  %v9371_v30 = vld [vmem:[%s11377_s4 + $0x118] sm:$0xff] }
 0x85e   :  { %2822 = vmatpush1.msra.mxu0 %v9353_v37  ;;  %2893 = vmatpush1.msra.mxu1 %v9359_v34  ;;  %12619 = vst [vmem:[#allocation93_spill] sm:$0xff] %v9365_v31  ;;  %12620 = vst [vmem:[#allocation94_spill] sm:$0xff] %v9371_v30  ;;  %v9377_v37 = vld [vmem:[%s11377_s4 + $0x100] sm:$0xff]  ;;  %v9383_v34 = vld [vmem:[%s11377_s4 + $0x110] sm:$0xff] }
 0x85f   :  { %2823 = vmatprep.subr.mxu0 %v9365_v31  ;;  %2894 = vmatprep.subr.mxu1 %v9371_v30  ;;  %12621 = vst [vmem:[#allocation95_spill] sm:$0xff] %v9377_v37  ;;  %12622 = vst [vmem:[#allocation96_spill] sm:$0xff] %v9383_v34  ;;  %v9389_v31 = vld [vmem:[%s11377_s4 + $0xe8] sm:$0xff]  ;;  %v9395_v30 = vld [vmem:[%s11377_s4 + $0xf8] sm:$0xff] }
 0x860   :  { %2824 = vmatpush1.msra.mxu0 %v9377_v37  ;;  %2895 = vmatpush1.msra.mxu1 %v9383_v34  ;;  %12623 = vst [vmem:[#allocation97_spill] sm:$0xff] %v9389_v31  ;;  %12624 = vst [vmem:[#allocation98_spill] sm:$0xff] %v9395_v30  ;;  %v9401_v37 = vld [vmem:[%s11377_s4 + $0xe0] sm:$0xff]  ;;  %v9407_v34 = vld [vmem:[%s11377_s4 + $0xf0] sm:$0xff] }
 0x861   :  { %2825 = vmatprep.subr.mxu0 %v9389_v31  ;;  %2896 = vmatprep.subr.mxu1 %v9395_v30  ;;  %12625 = vst [vmem:[#allocation99_spill] sm:$0xff] %v9401_v37  ;;  %12626 = vst [vmem:[#allocation100_spill] sm:$0xff] %v9407_v34  ;;  %v9413_v31 = vld [vmem:[%s11377_s4 + $0xc8] sm:$0xff]  ;;  %v9419_v30 = vld [vmem:[%s11377_s4 + $0xd8] sm:$0xff] }
 0x862   :  { %2826 = vmatpush1.msra.mxu0 %v9401_v37  ;;  %2897 = vmatpush1.msra.mxu1 %v9407_v34  ;;  %12627 = vst [vmem:[#allocation101_spill] sm:$0xff] %v9413_v31  ;;  %12628 = vst [vmem:[#allocation102_spill] sm:$0xff] %v9419_v30  ;;  %v9425_v37 = vld [vmem:[%s11377_s4 + $0xc0] sm:$0xff]  ;;  %v9431_v34 = vld [vmem:[%s11377_s4 + $0xd0] sm:$0xff] }
 0x863   :  { %2827 = vmatprep.subr.mxu0 %v9413_v31  ;;  %2898 = vmatprep.subr.mxu1 %v9419_v30  ;;  %12629 = vst [vmem:[#allocation103_spill] sm:$0xff] %v9425_v37  ;;  %12630 = vst [vmem:[#allocation104_spill] sm:$0xff] %v9431_v34  ;;  %v9437_v31 = vld [vmem:[%s11377_s4 + $0xa8] sm:$0xff]  ;;  %v9443_v30 = vld [vmem:[%s11377_s4 + $0xb8] sm:$0xff] }
 0x864   :  { %2828 = vmatpush1.msra.mxu0 %v9425_v37  ;;  %2899 = vmatpush1.msra.mxu1 %v9431_v34  ;;  %12631 = vst [vmem:[#allocation105_spill] sm:$0xff] %v9437_v31  ;;  %12632 = vst [vmem:[#allocation106_spill] sm:$0xff] %v9443_v30  ;;  %v9449_v37 = vld [vmem:[%s11377_s4 + $0xa0] sm:$0xff]  ;;  %v9455_v34 = vld [vmem:[%s11377_s4 + $0xb0] sm:$0xff] }
 0x865   :  { %2829 = vmatprep.subr.mxu0 %v9437_v31  ;;  %2900 = vmatprep.subr.mxu1 %v9443_v30  ;;  %12633 = vst [vmem:[#allocation107_spill] sm:$0xff] %v9449_v37  ;;  %12634 = vst [vmem:[#allocation108_spill] sm:$0xff] %v9455_v34  ;;  %v9461_v31 = vld [vmem:[%s11377_s4 + $0x88] sm:$0xff]  ;;  %v9467_v30 = vld [vmem:[%s11377_s4 + $0x98] sm:$0xff] }
 0x866   :  { %2830 = vmatpush1.msra.mxu0 %v9449_v37  ;;  %2901 = vmatpush1.msra.mxu1 %v9455_v34  ;;  %12635 = vst [vmem:[#allocation109_spill] sm:$0xff] %v9461_v31  ;;  %12636 = vst [vmem:[#allocation110_spill] sm:$0xff] %v9467_v30  ;;  %v9473_v37 = vld [vmem:[%s11377_s4 + $0x80] sm:$0xff]  ;;  %v9479_v34 = vld [vmem:[%s11377_s4 + $0x90] sm:$0xff] }
 0x867   :  { %2831 = vmatprep.subr.mxu0 %v9461_v31  ;;  %2902 = vmatprep.subr.mxu1 %v9467_v30  ;;  %12637 = vst [vmem:[#allocation111_spill] sm:$0xff] %v9473_v37  ;;  %12638 = vst [vmem:[#allocation112_spill] sm:$0xff] %v9479_v34  ;;  %v9485_v31 = vld [vmem:[%s11377_s4 + $0x68] sm:$0xff]  ;;  %v9491_v30 = vld [vmem:[%s11377_s4 + $0x78] sm:$0xff] }
 0x868   :  { %2832 = vmatpush1.msra.mxu0 %v9473_v37  ;;  %2903 = vmatpush1.msra.mxu1 %v9479_v34  ;;  %12639 = vst [vmem:[#allocation113_spill] sm:$0xff] %v9485_v31  ;;  %12640 = vst [vmem:[#allocation114_spill] sm:$0xff] %v9491_v30  ;;  %v9497_v37 = vld [vmem:[%s11377_s4 + $0x60] sm:$0xff]  ;;  %v9503_v34 = vld [vmem:[%s11377_s4 + $0x70] sm:$0xff] }
 0x869   :  { %2833 = vmatprep.subr.mxu0 %v9485_v31  ;;  %2904 = vmatprep.subr.mxu1 %v9491_v30  ;;  %12641 = vst [vmem:[#allocation115_spill] sm:$0xff] %v9497_v37  ;;  %12642 = vst [vmem:[#allocation116_spill] sm:$0xff] %v9503_v34  ;;  %v9509_v31 = vld [vmem:[%s11377_s4 + $0x48] sm:$0xff]  ;;  %v9515_v30 = vld [vmem:[%s11377_s4 + $0x58] sm:$0xff] }
 0x86a   :  { %2834 = vmatpush1.msra.mxu0 %v9497_v37  ;;  %2905 = vmatpush1.msra.mxu1 %v9503_v34  ;;  %12643 = vst [vmem:[#allocation117_spill] sm:$0xff] %v9509_v31  ;;  %12644 = vst [vmem:[#allocation118_spill] sm:$0xff] %v9515_v30  ;;  %v9521_v37 = vld [vmem:[%s11377_s4 + $0x40] sm:$0xff]  ;;  %v9527_v34 = vld [vmem:[%s11377_s4 + $0x50] sm:$0xff] }
 0x86b   :  { %2835 = vmatprep.subr.mxu0 %v9509_v31  ;;  %2906 = vmatprep.subr.mxu1 %v9515_v30  ;;  %12645 = vst [vmem:[#allocation119_spill] sm:$0xff] %v9521_v37  ;;  %12646 = vst [vmem:[#allocation120_spill] sm:$0xff] %v9527_v34  ;;  %v9533_v31 = vld [vmem:[%s11377_s4 + $0x28] sm:$0xff]  ;;  %v9539_v30 = vld [vmem:[%s11377_s4 + $0x38] sm:$0xff] }
 0x86c   :  { %2836 = vmatpush1.msra.mxu0 %v9521_v37  ;;  %2907 = vmatpush1.msra.mxu1 %v9527_v34  ;;  %12647 = vst [vmem:[#allocation121_spill] sm:$0xff] %v9533_v31  ;;  %12648 = vst [vmem:[#allocation122_spill] sm:$0xff] %v9539_v30  ;;  %v9545_v37 = vld [vmem:[%s11377_s4 + $0x20] sm:$0xff]  ;;  %v9551_v34 = vld [vmem:[%s11377_s4 + $0x30] sm:$0xff] }
 0x86d   :  { %2837 = vmatprep.subr.mxu0 %v9533_v31  ;;  %2908 = vmatprep.subr.mxu1 %v9539_v30  ;;  %12649 = vst [vmem:[#allocation123_spill] sm:$0xff] %v9545_v37  ;;  %12650 = vst [vmem:[#allocation125_spill] sm:$0xff] %v9551_v34  ;;  %v9557_v31 = vld [vmem:[%s11377_s4 + $0x8] sm:$0xff]  ;;  %v9563_v30 = vld [vmem:[%s11377_s4 + $0x18] sm:$0xff] }
 0x86e   :  { %2838 = vmatpush1.msra.mxu0 %v9545_v37  ;;  %2909 = vmatpush1.msra.mxu1 %v9551_v34  ;;  %12651 = vst [vmem:[#allocation126_spill] sm:$0xff] %v9557_v31  ;;  %12652 = vst [vmem:[#allocation127_spill] sm:$0xff] %v9563_v30  ;;  %v9569_v37 = vld [vmem:[%s11377_s4] sm:$0xff] }
 0x86f   :  { %2839 = vmatprep.subr.mxu0 %v9557_v31  ;;  %2910 = vmatprep.subr.mxu1 %v9563_v30  ;;  %12653 = vst [vmem:[#allocation128_spill] sm:$0xff] %v9569_v37  ;;  %v9576_v31 = vld [vmem:[%s11377_s4 + $0x10] sm:$0xff] }
 0x870   :  { %2840 = vmatpush1.msra.mxu0 %v9569_v37  ;;  %2873 = vmatprep.mubr.f32.mxu0 %v11995_v53  ;;  %12654 = vst [vmem:[#allocation129_spill] sm:$0xff] %v9576_v31 }
 0x871   :  { %2911 = vmatpush1.msra.mxu1 %v9576_v31  ;;  %2944 = vmatprep.mubr.f32.mxu1 %v11995_v53 }
 0x872   :  { %2973 = vmatprep.subr.mxu0 %v8501_v33  ;;  %3044 = vmatprep.subr.mxu1 %v8507_v17  ;;  %v12657_v17 = vld [vmem:[#allocation146_spill] sm:$0xff] }
 0x8ef   :  { %v9582_v30 = vpop.f32.mrf.mxu0  ;;  %v9584_v34 = vpop.f32.mrf.mxu1 }
 0x8f1   :  { %v9586_v37 = vpop.f32.mrf.mxu0  ;;  %v9588_v60 = vpop.f32.mrf.mxu1 }
 0x910   :  { %v2711_v35 = vpop.f32.mrf.mxu0  ;;  %v2782_v8 = vpop.f32.mrf.mxu1 }
 0x911   :  { %v2787_v54 = vadd.f32 %v2711_v35, %v12655_v18  ;;  %v2789_v10 = vadd.f32 %v2782_v8, %v12658_v39  ;;  %v9647_v8 = vld [vmem:[%s11375_s5 + $0x1b8] sm:$0xff] }
 0x912   :  { %v2713_v0 = vpop.f32.mrf.mxu0  ;;  %v2784_v31 = vpop.f32.mrf.mxu1 }
 0x913   :  { %v2791_v3 = vmul.f32 0.5, %v2787_v54  ;;  %v2788_v38 = vadd.f32 %v2713_v0, %v12656_v62  ;;  %v2790_v43 = vadd.f32 %v2784_v31, %v12657_v17  ;;  %v2793_v41 = vmul.f32 0.5, %v2789_v10  ;;  %v9653_v31 = vld [vmem:[%s11375_s5 + $0x1a0] sm:$0xff]  ;;  %v9665_v17 = vld [vmem:[%s11375_s5 + $0x188] sm:$0xff] }
 0x915   :  { %4664 = vtanh.f32 %v2791_v3  ;;  %v2792_v33 = vmul.f32 0.5, %v2788_v38 }
 0x917   :  { %4666 = vtanh.f32 %v2792_v33  ;;  %v9659_v33 = vld [vmem:[%s11375_s5 + $0x1b0] sm:$0xff] }
 0x918   :  { %4668 = vtanh.f32 %v2790_v43 }
 0x919   :  { %4670 = vtanh.f32 %v2793_v41  ;;  %v9641_v41 = vld [vmem:[%s11375_s5 + $0x1a8] sm:$0xff] }
 0x922   :  { %v4665_v52 = vpop.eup %4664 }
 0x923   :  { %v2797_v48 = vmul.f32 0.5, %v4665_v52  ;;  %v9635_v52 = vld [vmem:[%s11375_s5 + $0x1d0] sm:$0xff] }
 0x924   :  { %v4667_v44 = vpop.eup %4666 }
 0x925   :  { %v2800_v5 = vadd.f32 0.5, %v2797_v48  ;;  %v2798_v18 = vmul.f32 0.5, %v4667_v44  ;;  %v4669_v35 = vpop.eup %4668  ;;  %v9623_v44 = vld [vmem:[%s11375_s5 + $0x1d8] sm:$0xff]  ;;  %v9629_v48 = vld [vmem:[%s11375_s5 + $0x1c0] sm:$0xff] }
 0x926   :  { %v4671_v38 = vpop.eup %4670 }
 0x927   :  { %v2801_v15 = vadd.f32 0.5, %v2798_v18  ;;  %v2805_v54 = vmul.f32 %v4669_v35, %v2800_v5  ;;  %v2799_v43 = vmul.f32 0.5, %v4671_v38  ;;  %v9605_v5 = vld [vmem:[%s11375_s5 + $0x1e0] sm:$0xff]  ;;  %v9671_v18 = vld [vmem:[%s11375_s5 + $0x198] sm:$0xff] }
 0x928   :  { %v9677_v35 = vld [vmem:[%s11375_s5 + $0x180] sm:$0xff]  ;;  %v9695_v38 = vld [vmem:[%s11375_s5 + $0x178] sm:$0xff] }
 0x929   :  { %v2804_v62 = vmul.f32 %v2801_v15, %v8523_v36  ;;  %v2802_v0 = vadd.f32 0.5, %v2799_v43  ;;  %v9611_v15 = vld [vmem:[%s11375_s5 + $0x1f0] sm:$0xff]  ;;  %v9617_v36 = vld [vmem:[%s11375_s5 + $0x1c8] sm:$0xff]  ;;  %12659 = vst [vmem:[#allocation130_spill] sm:$0xff] %v9695_v38  ;;  %v9701_v43 = vld [vmem:[%s11375_s5 + $0x160] sm:$0xff] }
 0x92a   :  { %12660 = vst [vmem:[#allocation131_spill] sm:$0xff] %v9701_v43 }
 0x92b   :  { %v9595_v3 = vadd.f32 %v2805_v54, %v2804_v62  ;;  %v9683_v54 = vld [vmem:[%s11375_s5 + $0x190] sm:$0xff]  ;;  %v9689_v62 = vld [vmem:[%s11375_s5 + $0x168] sm:$0xff] }
 0x92d   :  { %4672 = vtanh.f32 %v9595_v3 }
 0x93a   :  { %v4673_v39 = vpop.eup %4672 }
 0x93b   :  { %v9598_v10 = vmul.f32 %v4673_v39, %v2802_v0  ;;  %v9707_v0 = vld [vmem:[%s11375_s5 + $0x170] sm:$0xff]  ;;  %v9713_v39 = vld [vmem:[%s11375_s5 + $0x148] sm:$0xff] }
 0x93c   :  { %12661 = vst [vmem:[#allocation132_spill] sm:$0xff] %v9707_v0 }
 0x93d   :  { %2874 = vmatmul.mubr.f32.vlgmr.msra.gmra.mxu0 %v9598_v10  ;;  %2945 = vmatmul.mubr.f32.vlgmr.msra.gmra.mxu1 %v9598_v10 }
 0x93e   :  { %2974 = vmatpush1.msra.mxu0 %v9605_v5  ;;  %3045 = vmatpush1.msra.mxu1 %v9611_v15 }
 0x93f   :  { %2975 = vmatprep.subr.mxu0 %v9617_v36  ;;  %3046 = vmatprep.subr.mxu1 %v9623_v44 }
 0x940   :  { %2976 = vmatpush1.msra.mxu0 %v9629_v48  ;;  %3047 = vmatpush1.msra.mxu1 %v9635_v52 }
 0x941   :  { %2977 = vmatprep.subr.mxu0 %v9641_v41  ;;  %3048 = vmatprep.subr.mxu1 %v9647_v8 }
 0x942   :  { %2978 = vmatpush1.msra.mxu0 %v9653_v31  ;;  %3049 = vmatpush1.msra.mxu1 %v9659_v33 }
 0x943   :  { %2979 = vmatprep.subr.mxu0 %v9665_v17  ;;  %3050 = vmatprep.subr.mxu1 %v9671_v18 }
 0x944   :  { %2980 = vmatpush1.msra.mxu0 %v9677_v35  ;;  %3051 = vmatpush1.msra.mxu1 %v9683_v54 }
 0x945   :  { %2981 = vmatprep.subr.mxu0 %v9689_v62  ;;  %3052 = vmatprep.subr.mxu1 %v9695_v38  ;;  %v9719_v38 = vld [vmem:[%s11375_s5 + $0x158] sm:$0xff] }
 0x946   :  { %2982 = vmatpush1.msra.mxu0 %v9701_v43  ;;  %3053 = vmatpush1.msra.mxu1 %v9707_v0  ;;  %v9725_v43 = vld [vmem:[%s11375_s5 + $0x140] sm:$0xff]  ;;  %v9731_v0 = vld [vmem:[%s11375_s5 + $0x150] sm:$0xff] }
 0x947   :  { %2983 = vmatprep.subr.mxu0 %v9713_v39  ;;  %3054 = vmatprep.subr.mxu1 %v9719_v38 }
 0x948   :  { %2984 = vmatpush1.msra.mxu0 %v9725_v43  ;;  %3055 = vmatpush1.msra.mxu1 %v9731_v0 }
 0x949   :  { %2985 = vmatprep.subr.mxu0 %v8555_v61  ;;  %3056 = vmatprep.subr.mxu1 %v8561_v49  ;;  %v12662_v61 = vld [vmem:[#allocation135_spill] sm:$0xff]  ;;  %v12663_v49 = vld [vmem:[#allocation136_spill] sm:$0xff] }
 0x94a   :  { %2986 = vmatpush1.msra.mxu0 %v8567_v27  ;;  %3057 = vmatpush1.msra.mxu1 %v8573_v51  ;;  %v12664_v27 = vld [vmem:[#allocation138_spill] sm:$0xff]  ;;  %v12665_v51 = vld [vmem:[#allocation137_spill] sm:$0xff] }
 0x94b   :  { %2987 = vmatprep.subr.mxu0 %v8579_v1  ;;  %3058 = vmatprep.subr.mxu1 %v8585_v57  ;;  %v12666_v1 = vld [vmem:[#allocation159_spill] sm:$0xff]  ;;  %v12667_v57 = vld [vmem:[#allocation161_spill] sm:$0xff] }
 0x94c   :  { %2988 = vmatpush1.msra.mxu0 %v8591_v55  ;;  %3059 = vmatpush1.msra.mxu1 %v8597_v7 }
 0x94d   :  { %2989 = vmatprep.subr.mxu0 %v8603_v9  ;;  %3060 = vmatprep.subr.mxu1 %v8609_v14 }
 0x94e   :  { %2990 = vmatpush1.msra.mxu0 %v8615_v12  ;;  %3061 = vmatpush1.msra.mxu1 %v8621_v40  ;;  %v12668_v40 = vld [vmem:[#allocation3_spill] sm:$0xff] }
 0x94f   :  { %2991 = vmatprep.subr.mxu0 %v8627_v13  ;;  %3062 = vmatprep.subr.mxu1 %v8633_v63 }
 0x950   :  { %2992 = vmatpush1.msra.mxu0 %v8639_v59  ;;  %3063 = vmatpush1.msra.mxu1 %v8645_v4 }
 0x951   :  { %2993 = vmatprep.subr.mxu0 %v8651_v11  ;;  %3064 = vmatprep.subr.mxu1 %v8657_v32 }
 0x952   :  { %2994 = vmatpush1.msra.mxu0 %v8663_v19  ;;  %3065 = vmatpush1.msra.mxu1 %v8669_v6 }
 0x953   :  { %2995 = vmatprep.subr.mxu0 %v8675_v16  ;;  %3066 = vmatprep.subr.mxu1 %v8681_v20  ;;  %v12669_v16 = vld [vmem:[#allocation124_spill] sm:$0xff] }
 0x954   :  { %2996 = vmatpush1.msra.mxu0 %v8687_v21  ;;  %3067 = vmatpush1.msra.mxu1 %v8693_v22 }
 0x955   :  { %2997 = vmatprep.subr.mxu0 %v8699_v23  ;;  %3068 = vmatprep.subr.mxu1 %v8705_v24 }
 0x956   :  { %2998 = vmatpush1.msra.mxu0 %v8711_v25  ;;  %3069 = vmatpush1.msra.mxu1 %v8717_v26 }
 0x957   :  { %2999 = vmatprep.subr.mxu0 %v8723_v28  ;;  %3070 = vmatprep.subr.mxu1 %v8729_v45 }
 0x958   :  { %3000 = vmatpush1.msra.mxu0 %v8735_v46  ;;  %3071 = vmatpush1.msra.mxu1 %v8741_v47  ;;  %v12670_v46 = vld [vmem:[#allocation162_spill] sm:$0xff] }
 0x959   :  { %3001 = vmatprep.subr.mxu0 %v8747_v42  ;;  %3072 = vmatprep.subr.mxu1 %v8753_v50 }
 0x95a   :  { %3002 = vmatpush1.msra.mxu0 %v8759_v58  ;;  %3073 = vmatpush1.msra.mxu1 %v8765_v29 }
 0x95b   :  { %3003 = vmatprep.subr.mxu0 %v12662_v61  ;;  %3074 = vmatprep.subr.mxu1 %v12663_v49  ;;  %v12672_v61 = vld [vmem:[#allocation4_spill] sm:$0xff]  ;;  %v12673_v49 = vld [vmem:[#allocation5_spill] sm:$0xff] }
 0x95c   :  { %3004 = vmatpush1.msra.mxu0 %v12664_v27  ;;  %3075 = vmatpush1.msra.mxu1 %v12665_v51  ;;  %v12674_v27 = vld [vmem:[#allocation6_spill] sm:$0xff]  ;;  %v12675_v51 = vld [vmem:[#allocation7_spill] sm:$0xff] }
 0x95d   :  { %3037 = vmatprep.mubr.f32.mxu0 %v11995_v53  ;;  %3108 = vmatprep.mubr.f32.mxu1 %v11995_v53 }
 0x95e   :  { %3122 = vmatprep.subr.mxu0 %v12666_v1  ;;  %3193 = vmatprep.subr.mxu1 %v12667_v57  ;;  %v12676_v1 = vld [vmem:[#allocation8_spill] sm:$0xff]  ;;  %v12677_v57 = vld [vmem:[#allocation9_spill] sm:$0xff] }
 0x9fd   :  { %v2875_v55 = vpop.f32.mrf.mxu0  ;;  %v2946_v7 = vpop.f32.mrf.mxu1 }
 0x9fe   :  { %v2876_v9 = vadd.f32 %v2875_v55, %v9582_v30  ;;  %v2947_v6 = vadd.f32 %v2946_v7, %v9584_v34  ;;  %v12671_v34 = vld [vmem:[#allocation160_spill] sm:$0xff]  ;;  %v12678_v55 = vld [vmem:[#allocation10_spill] sm:$0xff]  ;;  %v12679_v7 = vld [vmem:[#allocation11_spill] sm:$0xff] }
 0x9ff   :  { %v2877_v14 = vpop.f32.mrf.mxu0  ;;  %v2948_v12 = vpop.f32.mrf.mxu1 }
 0xa00   :  { %v2951_v13 = vadd.f32 %v2876_v9, %v12668_v40  ;;  %v2878_v63 = vadd.f32 %v2877_v14, %v9586_v37  ;;  %v2949_v11 = vadd.f32 %v2948_v12, %v9588_v60  ;;  %v2953_v20 = vadd.f32 %v2947_v6, %v12669_v16  ;;  %v12680_v9 = vld [vmem:[#allocation12_spill] sm:$0xff]  ;;  %v12681_v14 = vld [vmem:[#allocation13_spill] sm:$0xff]  ;;  %v12682_v12 = vld [vmem:[#allocation14_spill] sm:$0xff] }
 0xa01   :  { %v12690_v6 = vld [vmem:[#allocation22_spill] sm:$0xff] }
 0xa02   :  { %v2955_v59 = vmul.f32 0.5, %v2951_v13  ;;  %v2952_v4 = vadd.f32 %v2878_v63, %v6922_v56  ;;  %v2954_v19 = vadd.f32 %v2949_v11, %v6929_v2  ;;  %v2957_v21 = vmul.f32 0.5, %v2953_v20  ;;  %v12683_v13 = vld [vmem:[#allocation15_spill] sm:$0xff]  ;;  %v12684_v63 = vld [vmem:[#allocation16_spill] sm:$0xff] }
 0xa03   :  { %v12687_v11 = vld [vmem:[#allocation19_spill] sm:$0xff] }
 0xa04   :  { %4674 = vtanh.f32 %v2955_v59  ;;  %v2956_v32 = vmul.f32 0.5, %v2952_v4  ;;  %v12685_v59 = vld [vmem:[#allocation17_spill] sm:$0xff]  ;;  %v12686_v4 = vld [vmem:[#allocation18_spill] sm:$0xff]  ;;  %v12691_v20 = vld [vmem:[#allocation23_spill] sm:$0xff] }
 0xa06   :  { %4676 = vtanh.f32 %v2956_v32  ;;  %v12688_v32 = vld [vmem:[#allocation20_spill] sm:$0xff] }
 0xa07   :  { %4678 = vtanh.f32 %v2954_v19  ;;  %v12689_v19 = vld [vmem:[#allocation21_spill] sm:$0xff] }
 0xa08   :  { %4680 = vtanh.f32 %v2957_v21  ;;  %v12692_v21 = vld [vmem:[#allocation24_spill] sm:$0xff] }
 0xa11   :  { %v4675_v22 = vpop.eup %4674 }
 0xa12   :  { %v2961_v23 = vmul.f32 0.5, %v4675_v22  ;;  %v12693_v22 = vld [vmem:[#allocation25_spill] sm:$0xff] }
 0xa13   :  { %v4677_v24 = vpop.eup %4676 }
 0xa14   :  { %v2964_v25 = vadd.f32 0.5, %v2961_v23  ;;  %v2962_v26 = vmul.f32 0.5, %v4677_v24  ;;  %v4679_v45 = vpop.eup %4678  ;;  %v12694_v23 = vld [vmem:[#allocation26_spill] sm:$0xff]  ;;  %v12695_v24 = vld [vmem:[#allocation27_spill] sm:$0xff] }
 0xa15   :  { %v4681_v58 = vpop.eup %4680 }
 0xa16   :  { %v2965_v28 = vadd.f32 0.5, %v2962_v26  ;;  %v2969_v42 = vmul.f32 %v4679_v45, %v2964_v25  ;;  %v2963_v29 = vmul.f32 0.5, %v4681_v58  ;;  %v12696_v25 = vld [vmem:[#allocation28_spill] sm:$0xff]  ;;  %v12697_v26 = vld [vmem:[#allocation29_spill] sm:$0xff]  ;;  %v12699_v45 = vld [vmem:[#allocation31_spill] sm:$0xff] }
 0xa17   :  { %v12703_v58 = vld [vmem:[#allocation35_spill] sm:$0xff] }
 0xa18   :  { %v2968_v47 = vmul.f32 %v2965_v28, %v12670_v46  ;;  %v2966_v30 = vadd.f32 0.5, %v2963_v29  ;;  %v12698_v28 = vld [vmem:[#allocation30_spill] sm:$0xff]  ;;  %v12700_v46 = vld [vmem:[#allocation32_spill] sm:$0xff] }
 0xa19   :  { %v12704_v29 = vld [vmem:[#allocation36_spill] sm:$0xff] }
 0xa1a   :  { %v9787_v50 = vadd.f32 %v2969_v42, %v2968_v47  ;;  %v12701_v47 = vld [vmem:[#allocation33_spill] sm:$0xff]  ;;  %v12702_v42 = vld [vmem:[#allocation34_spill] sm:$0xff] }
 0xa1c   :  { %4682 = vtanh.f32 %v9787_v50 }
 0xa29   :  { %v4683_v60 = vpop.eup %4682 }
 0xa2a   :  { %v2972_v37 = vmul.f32 %v4683_v60, %v2966_v30  ;;  %v12705_v30 = vld [vmem:[#allocation37_spill] sm:$0xff]  ;;  %v12706_v60 = vld [vmem:[#allocation38_spill] sm:$0xff] }
 0xa2c   :  { %3038 = vmatmul.mubr.f32.vlgmr.msra.gmra.mxu0 %v2972_v37  ;;  %3109 = vmatmul.mubr.f32.vlgmr.msra.gmra.mxu1 %v2972_v37  ;;  %v12707_v37 = vld [vmem:[#allocation39_spill] sm:$0xff] }
 0xa2d   :  { %3123 = vmatpush1.msra.mxu0 %v12671_v34  ;;  %3194 = vmatpush1.msra.mxu1 %v12672_v61  ;;  %v12708_v34 = vld [vmem:[#allocation40_spill] sm:$0xff]  ;;  %v12709_v61 = vld [vmem:[#allocation41_spill] sm:$0xff] }
 0xa2e   :  { %3124 = vmatprep.subr.mxu0 %v12673_v49  ;;  %3195 = vmatprep.subr.mxu1 %v12674_v27  ;;  %v12710_v49 = vld [vmem:[#allocation42_spill] sm:$0xff]  ;;  %v12711_v27 = vld [vmem:[#allocation43_spill] sm:$0xff] }
 0xa2f   :  { %3125 = vmatpush1.msra.mxu0 %v12675_v51  ;;  %3196 = vmatpush1.msra.mxu1 %v12676_v1  ;;  %v12712_v51 = vld [vmem:[#allocation44_spill] sm:$0xff]  ;;  %v12713_v1 = vld [vmem:[#allocation45_spill] sm:$0xff] }
 0xa30   :  { %3126 = vmatprep.subr.mxu0 %v12677_v57  ;;  %3197 = vmatprep.subr.mxu1 %v12678_v55  ;;  %v12714_v57 = vld [vmem:[#allocation46_spill] sm:$0xff]  ;;  %v12715_v55 = vld [vmem:[#allocation47_spill] sm:$0xff] }
 0xa31   :  { %3127 = vmatpush1.msra.mxu0 %v12679_v7  ;;  %3198 = vmatpush1.msra.mxu1 %v12680_v9  ;;  %v12716_v7 = vld [vmem:[#allocation48_spill] sm:$0xff]  ;;  %v12717_v9 = vld [vmem:[#allocation49_spill] sm:$0xff] }
 0xa32   :  { %3128 = vmatprep.subr.mxu0 %v12681_v14  ;;  %3199 = vmatprep.subr.mxu1 %v12682_v12  ;;  %v12718_v14 = vld [vmem:[#allocation50_spill] sm:$0xff]  ;;  %v12719_v12 = vld [vmem:[#allocation51_spill] sm:$0xff] }
 0xa33   :  { %3129 = vmatpush1.msra.mxu0 %v12683_v13  ;;  %3200 = vmatpush1.msra.mxu1 %v12684_v63  ;;  %v12720_v13 = vld [vmem:[#allocation52_spill] sm:$0xff]  ;;  %v12721_v63 = vld [vmem:[#allocation53_spill] sm:$0xff] }
 0xa34   :  { %3130 = vmatprep.subr.mxu0 %v12685_v59  ;;  %3201 = vmatprep.subr.mxu1 %v12686_v4  ;;  %v12722_v59 = vld [vmem:[#allocation54_spill] sm:$0xff]  ;;  %v12723_v4 = vld [vmem:[#allocation55_spill] sm:$0xff] }
 0xa35   :  { %3131 = vmatpush1.msra.mxu0 %v12687_v11  ;;  %3202 = vmatpush1.msra.mxu1 %v12688_v32  ;;  %v12724_v11 = vld [vmem:[#allocation56_spill] sm:$0xff]  ;;  %v12725_v32 = vld [vmem:[#allocation57_spill] sm:$0xff] }
 0xa36   :  { %3132 = vmatprep.subr.mxu0 %v12689_v19  ;;  %3203 = vmatprep.subr.mxu1 %v12690_v6  ;;  %v12726_v19 = vld [vmem:[#allocation58_spill] sm:$0xff]  ;;  %v12727_v6 = vld [vmem:[#allocation59_spill] sm:$0xff] }
 0xa37   :  { %3133 = vmatpush1.msra.mxu0 %v12691_v20  ;;  %3204 = vmatpush1.msra.mxu1 %v12692_v21  ;;  %v12728_v20 = vld [vmem:[#allocation60_spill] sm:$0xff]  ;;  %v12729_v21 = vld [vmem:[#allocation61_spill] sm:$0xff] }
 0xa38   :  { %3134 = vmatprep.subr.mxu0 %v12693_v22  ;;  %3205 = vmatprep.subr.mxu1 %v12694_v23  ;;  %v12730_v22 = vld [vmem:[#allocation62_spill] sm:$0xff]  ;;  %v12731_v23 = vld [vmem:[#allocation63_spill] sm:$0xff] }
 0xa39   :  { %3135 = vmatpush1.msra.mxu0 %v12695_v24  ;;  %3206 = vmatpush1.msra.mxu1 %v12696_v25  ;;  %v12732_v24 = vld [vmem:[#allocation64_spill] sm:$0xff]  ;;  %v12733_v25 = vld [vmem:[#allocation65_spill] sm:$0xff] }
 0xa3a   :  { %3136 = vmatprep.subr.mxu0 %v12697_v26  ;;  %3207 = vmatprep.subr.mxu1 %v12698_v28  ;;  %v12734_v26 = vld [vmem:[#allocation66_spill] sm:$0xff]  ;;  %v12735_v28 = vld [vmem:[#allocation67_spill] sm:$0xff] }
 0xa3b   :  { %3137 = vmatpush1.msra.mxu0 %v12699_v45  ;;  %3208 = vmatpush1.msra.mxu1 %v12700_v46  ;;  %v12736_v45 = vld [vmem:[#allocation68_spill] sm:$0xff]  ;;  %v12737_v46 = vld [vmem:[#allocation69_spill] sm:$0xff] }
 0xa3c   :  { %3138 = vmatprep.subr.mxu0 %v12701_v47  ;;  %3209 = vmatprep.subr.mxu1 %v12702_v42  ;;  %v12738_v47 = vld [vmem:[#allocation70_spill] sm:$0xff]  ;;  %v12739_v42 = vld [vmem:[#allocation71_spill] sm:$0xff] }
 0xa3d   :  { %3139 = vmatpush1.msra.mxu0 %v12703_v58  ;;  %3210 = vmatpush1.msra.mxu1 %v12704_v29  ;;  %v12740_v58 = vld [vmem:[#allocation72_spill] sm:$0xff]  ;;  %v12741_v29 = vld [vmem:[#allocation73_spill] sm:$0xff] }
 0xa3e   :  { %3140 = vmatprep.subr.mxu0 %v12705_v30  ;;  %3211 = vmatprep.subr.mxu1 %v12706_v60  ;;  %v12742_v30 = vld [vmem:[#allocation74_spill] sm:$0xff]  ;;  %v12744_v60 = vld [vmem:[#allocation76_spill] sm:$0xff] }
 0xa3f   :  { %3141 = vmatpush1.msra.mxu0 %v12707_v37  ;;  %3212 = vmatpush1.msra.mxu1 %v12708_v34  ;;  %v12745_v37 = vld [vmem:[#allocation77_spill] sm:$0xff]  ;;  %v12746_v34 = vld [vmem:[#allocation78_spill] sm:$0xff] }
 0xa40   :  { %3142 = vmatprep.subr.mxu0 %v12709_v61  ;;  %3213 = vmatprep.subr.mxu1 %v12710_v49  ;;  %v12747_v61 = vld [vmem:[#allocation79_spill] sm:$0xff]  ;;  %v12748_v49 = vld [vmem:[#allocation80_spill] sm:$0xff] }
 0xa41   :  { %3143 = vmatpush1.msra.mxu0 %v12711_v27  ;;  %3214 = vmatpush1.msra.mxu1 %v12712_v51  ;;  %v12749_v27 = vld [vmem:[#allocation81_spill] sm:$0xff]  ;;  %v12750_v51 = vld [vmem:[#allocation82_spill] sm:$0xff] }
 0xa42   :  { %3144 = vmatprep.subr.mxu0 %v12713_v1  ;;  %3215 = vmatprep.subr.mxu1 %v12714_v57  ;;  %v12751_v1 = vld [vmem:[#allocation83_spill] sm:$0xff]  ;;  %v12752_v57 = vld [vmem:[#allocation84_spill] sm:$0xff] }
 0xa43   :  { %3145 = vmatpush1.msra.mxu0 %v12715_v55  ;;  %3216 = vmatpush1.msra.mxu1 %v12716_v7  ;;  %v12753_v55 = vld [vmem:[#allocation85_spill] sm:$0xff]  ;;  %v12754_v7 = vld [vmem:[#allocation86_spill] sm:$0xff] }
 0xa44   :  { %3146 = vmatprep.subr.mxu0 %v12717_v9  ;;  %3217 = vmatprep.subr.mxu1 %v12718_v14  ;;  %v12755_v9 = vld [vmem:[#allocation87_spill] sm:$0xff]  ;;  %v12756_v14 = vld [vmem:[#allocation88_spill] sm:$0xff] }
 0xa45   :  { %3147 = vmatpush1.msra.mxu0 %v12719_v12  ;;  %3218 = vmatpush1.msra.mxu1 %v12720_v13  ;;  %v12757_v12 = vld [vmem:[#allocation89_spill] sm:$0xff]  ;;  %v12758_v13 = vld [vmem:[#allocation90_spill] sm:$0xff] }
 0xa46   :  { %3148 = vmatprep.subr.mxu0 %v12721_v63  ;;  %3219 = vmatprep.subr.mxu1 %v12722_v59  ;;  %v12759_v63 = vld [vmem:[#allocation91_spill] sm:$0xff]  ;;  %v12760_v59 = vld [vmem:[#allocation92_spill] sm:$0xff] }
 0xa47   :  { %3149 = vmatpush1.msra.mxu0 %v12723_v4  ;;  %3220 = vmatpush1.msra.mxu1 %v12724_v11  ;;  %v12761_v4 = vld [vmem:[#allocation93_spill] sm:$0xff]  ;;  %v12762_v11 = vld [vmem:[#allocation94_spill] sm:$0xff] }
 0xa48   :  { %3150 = vmatprep.subr.mxu0 %v12725_v32  ;;  %3221 = vmatprep.subr.mxu1 %v12726_v19  ;;  %v12763_v32 = vld [vmem:[#allocation95_spill] sm:$0xff]  ;;  %v12764_v19 = vld [vmem:[#allocation96_spill] sm:$0xff] }
 0xa49   :  { %3151 = vmatpush1.msra.mxu0 %v12727_v6  ;;  %3222 = vmatpush1.msra.mxu1 %v12728_v20  ;;  %v12765_v6 = vld [vmem:[#allocation97_spill] sm:$0xff]  ;;  %v12766_v20 = vld [vmem:[#allocation98_spill] sm:$0xff] }
 0xa4a   :  { %3152 = vmatprep.subr.mxu0 %v12729_v21  ;;  %3223 = vmatprep.subr.mxu1 %v12730_v22  ;;  %v12767_v21 = vld [vmem:[#allocation99_spill] sm:$0xff]  ;;  %v12768_v22 = vld [vmem:[#allocation100_spill] sm:$0xff] }
 0xa4b   :  { %3153 = vmatpush1.msra.mxu0 %v12731_v23  ;;  %3186 = vmatprep.mubr.f32.mxu0 %v11995_v53  ;;  %v12769_v23 = vld [vmem:[#allocation101_spill] sm:$0xff] }
 0xa4c   :  { %3224 = vmatpush1.msra.mxu1 %v12732_v24  ;;  %3257 = vmatprep.mubr.f32.mxu1 %v11995_v53  ;;  %v12770_v24 = vld [vmem:[#allocation102_spill] sm:$0xff] }
 0xa4d   :  { %3187 = vmatmul.mubr.f32.vlgmr.msra.gmra.mxu0 %v9598_v10  ;;  %3258 = vmatmul.mubr.f32.vlgmr.msra.gmra.mxu1 %v9598_v10  ;;  %v12743_v10 = vld [vmem:[#allocation75_spill] sm:$0xff] }
 0xa4e   :  { %3286 = vmatprep.subr.mxu0 %v12733_v25  ;;  %3357 = vmatprep.subr.mxu1 %v12734_v26  ;;  %v12771_v25 = vld [vmem:[#allocation103_spill] sm:$0xff]  ;;  %v12772_v26 = vld [vmem:[#allocation104_spill] sm:$0xff] }
 0xa4f   :  { %3287 = vmatpush1.msra.mxu0 %v12735_v28  ;;  %3358 = vmatpush1.msra.mxu1 %v12736_v45  ;;  %v12773_v28 = vld [vmem:[#allocation105_spill] sm:$0xff]  ;;  %v12774_v45 = vld [vmem:[#allocation106_spill] sm:$0xff] }
 0xa50   :  { %3288 = vmatprep.subr.mxu0 %v12737_v46  ;;  %3359 = vmatprep.subr.mxu1 %v12738_v47  ;;  %v12775_v46 = vld [vmem:[#allocation107_spill] sm:$0xff]  ;;  %v12776_v47 = vld [vmem:[#allocation108_spill] sm:$0xff] }
 0xa51   :  { %3289 = vmatpush1.msra.mxu0 %v12739_v42  ;;  %3360 = vmatpush1.msra.mxu1 %v12740_v58  ;;  %v12777_v42 = vld [vmem:[#allocation109_spill] sm:$0xff]  ;;  %v12778_v58 = vld [vmem:[#allocation110_spill] sm:$0xff] }
 0xa52   :  { %3290 = vmatprep.subr.mxu0 %v12741_v29  ;;  %3361 = vmatprep.subr.mxu1 %v12742_v30  ;;  %v12779_v29 = vld [vmem:[#allocation111_spill] sm:$0xff]  ;;  %v12780_v30 = vld [vmem:[#allocation112_spill] sm:$0xff] }
 0xa53   :  { %3291 = vmatpush1.msra.mxu0 %v12743_v10  ;;  %3362 = vmatpush1.msra.mxu1 %v12744_v60  ;;  %v12781_v10 = vld [vmem:[#allocation113_spill] sm:$0xff]  ;;  %v12782_v60 = vld [vmem:[#allocation114_spill] sm:$0xff] }
 0xa54   :  { %3292 = vmatprep.subr.mxu0 %v12745_v37  ;;  %3363 = vmatprep.subr.mxu1 %v12746_v34  ;;  %v12783_v37 = vld [vmem:[#allocation115_spill] sm:$0xff]  ;;  %v12784_v34 = vld [vmem:[#allocation116_spill] sm:$0xff] }
 0xa55   :  { %3293 = vmatpush1.msra.mxu0 %v12747_v61  ;;  %3364 = vmatpush1.msra.mxu1 %v12748_v49  ;;  %v12785_v61 = vld [vmem:[#allocation117_spill] sm:$0xff]  ;;  %v12786_v49 = vld [vmem:[#allocation118_spill] sm:$0xff] }
 0xa56   :  { %3294 = vmatprep.subr.mxu0 %v12749_v27  ;;  %3365 = vmatprep.subr.mxu1 %v12750_v51  ;;  %v12787_v27 = vld [vmem:[#allocation119_spill] sm:$0xff]  ;;  %v12788_v51 = vld [vmem:[#allocation120_spill] sm:$0xff] }
 0xa57   :  { %3295 = vmatpush1.msra.mxu0 %v12751_v1  ;;  %3366 = vmatpush1.msra.mxu1 %v12752_v57  ;;  %v12789_v1 = vld [vmem:[#allocation121_spill] sm:$0xff]  ;;  %v12790_v57 = vld [vmem:[#allocation122_spill] sm:$0xff] }
 0xa58   :  { %3296 = vmatprep.subr.mxu0 %v12753_v55  ;;  %3367 = vmatprep.subr.mxu1 %v12754_v7  ;;  %v12791_v55 = vld [vmem:[#allocation123_spill] sm:$0xff]  ;;  %v12792_v7 = vld [vmem:[#allocation125_spill] sm:$0xff] }
 0xa59   :  { %3297 = vmatpush1.msra.mxu0 %v12755_v9  ;;  %3368 = vmatpush1.msra.mxu1 %v12756_v14  ;;  %v12793_v9 = vld [vmem:[#allocation126_spill] sm:$0xff]  ;;  %v12794_v14 = vld [vmem:[#allocation127_spill] sm:$0xff] }
 0xa5a   :  { %3298 = vmatprep.subr.mxu0 %v12757_v12  ;;  %3369 = vmatprep.subr.mxu1 %v12758_v13  ;;  %v12795_v12 = vld [vmem:[#allocation128_spill] sm:$0xff]  ;;  %v12796_v13 = vld [vmem:[#allocation129_spill] sm:$0xff] }
 0xa5b   :  { %3299 = vmatpush1.msra.mxu0 %v12759_v63  ;;  %3370 = vmatpush1.msra.mxu1 %v12760_v59  ;;  %v9925_v63 = vld [vmem:[%s11375_s5 + $0x1e8] sm:$0xff]  ;;  %v9931_v59 = vld [vmem:[%s11375_s5 + $0x1f8] sm:$0xff] }
 0xa5c   :  { %3300 = vmatprep.subr.mxu0 %v12761_v4  ;;  %3371 = vmatprep.subr.mxu1 %v12762_v11 }
 0xa5d   :  { %3301 = vmatpush1.msra.mxu0 %v12763_v32  ;;  %3372 = vmatpush1.msra.mxu1 %v12764_v19 }
 0xa5e   :  { %3302 = vmatprep.subr.mxu0 %v12765_v6  ;;  %3373 = vmatprep.subr.mxu1 %v12766_v20 }
 0xa5f   :  { %3303 = vmatpush1.msra.mxu0 %v12767_v21  ;;  %3374 = vmatpush1.msra.mxu1 %v12768_v22  ;;  %v12797_v21 = vld [vmem:[#allocation147_spill] sm:$0xff] }
 0xa60   :  { %3304 = vmatprep.subr.mxu0 %v12769_v23  ;;  %3375 = vmatprep.subr.mxu1 %v12770_v24 }
 0xa61   :  { %3305 = vmatpush1.msra.mxu0 %v12771_v25  ;;  %3376 = vmatpush1.msra.mxu1 %v12772_v26  ;;  %v12798_v26 = vld [vmem:[#allocation148_spill] sm:$0xff] }
 0xa62   :  { %3306 = vmatprep.subr.mxu0 %v12773_v28  ;;  %3377 = vmatprep.subr.mxu1 %v12774_v45 }
 0xa63   :  { %3307 = vmatpush1.msra.mxu0 %v12775_v46  ;;  %3378 = vmatpush1.msra.mxu1 %v12776_v47  ;;  %v12799_v46 = vld [vmem:[#allocation150_spill] sm:$0xff] }
 0xa64   :  { %3308 = vmatprep.subr.mxu0 %v12777_v42  ;;  %3379 = vmatprep.subr.mxu1 %v12778_v58  ;;  %v12800_v42 = vld [vmem:[#allocation149_spill] sm:$0xff] }
 0xa65   :  { %3309 = vmatpush1.msra.mxu0 %v12779_v29  ;;  %3380 = vmatpush1.msra.mxu1 %v12780_v30 }
 0xa66   :  { %3310 = vmatprep.subr.mxu0 %v12781_v10  ;;  %3381 = vmatprep.subr.mxu1 %v12782_v60 }
 0xa67   :  { %3311 = vmatpush1.msra.mxu0 %v12783_v37  ;;  %3382 = vmatpush1.msra.mxu1 %v12784_v34 }
 0xa68   :  { %3312 = vmatprep.subr.mxu0 %v12785_v61  ;;  %3383 = vmatprep.subr.mxu1 %v12786_v49 }
 0xa69   :  { %3313 = vmatpush1.msra.mxu0 %v12787_v27  ;;  %3384 = vmatpush1.msra.mxu1 %v12788_v51 }
 0xa6a   :  { %3314 = vmatprep.subr.mxu0 %v12789_v1  ;;  %3385 = vmatprep.subr.mxu1 %v12790_v57 }
 0xa6b   :  { %3315 = vmatpush1.msra.mxu0 %v12791_v55  ;;  %3386 = vmatpush1.msra.mxu1 %v12792_v7 }
 0xa6c   :  { %3316 = vmatprep.subr.mxu0 %v12793_v9  ;;  %3387 = vmatprep.subr.mxu1 %v12794_v14 }
 0xa6d   :  { %3317 = vmatpush1.msra.mxu0 %v12795_v12  ;;  %3350 = vmatprep.mubr.f32.mxu0 %v11995_v53  ;;  %v10081_v12 = vld [vmem:[%s11375_s5 + $0xb8] sm:$0xff] }
 0xa6e   :  { %3388 = vmatpush1.msra.mxu1 %v12796_v13  ;;  %3421 = vmatprep.mubr.f32.mxu1 %v11995_v53  ;;  %v10087_v13 = vld [vmem:[%s11375_s5 + $0xa0] sm:$0xff] }
 0xa6f   :  { %3450 = vmatprep.subr.mxu0 %v9925_v63  ;;  %3521 = vmatprep.subr.mxu1 %v9931_v59 }
 0xaec   :  { %v9934_v4 = vpop.f32.mrf.mxu0  ;;  %v9936_v11 = vpop.f32.mrf.mxu1 }
 0xaee   :  { %v9938_v32 = vpop.f32.mrf.mxu0  ;;  %v9940_v19 = vpop.f32.mrf.mxu1 }
 0xb0d   :  { %v3188_v6 = vpop.f32.mrf.mxu0  ;;  %v3259_v20 = vpop.f32.mrf.mxu1 }
 0xb0e   :  { %v3264_v22 = vadd.f32 %v3188_v6, %v12797_v21  ;;  %v3266_v58 = vadd.f32 %v3259_v20, %v12800_v42  ;;  %v10093_v6 = vld [vmem:[%s11375_s5 + $0xb0] sm:$0xff]  ;;  %v10099_v20 = vld [vmem:[%s11375_s5 + $0x88] sm:$0xff]  ;;  %v10105_v21 = vld [vmem:[%s11375_s5 + $0x98] sm:$0xff] }
 0xb0f   :  { %v3190_v23 = vpop.f32.mrf.mxu0  ;;  %v3261_v24 = vpop.f32.mrf.mxu1  ;;  %v10165_v42 = vld [vmem:[%s11375_s5 + $0x50] sm:$0xff] }
 0xb10   :  { %v3268_v25 = vmul.f32 0.5, %v3264_v22  ;;  %v3265_v28 = vadd.f32 %v3190_v23, %v12798_v26  ;;  %v3267_v47 = vadd.f32 %v3261_v24, %v12799_v46  ;;  %v3270_v29 = vmul.f32 0.5, %v3266_v58  ;;  %v10111_v22 = vld [vmem:[%s11375_s5 + $0x80] sm:$0xff]  ;;  %v10117_v23 = vld [vmem:[%s11375_s5 + $0x90] sm:$0xff]  ;;  %v10123_v24 = vld [vmem:[%s11375_s5 + $0x68] sm:$0xff] }
 0xb11   :  { %v10135_v26 = vld [vmem:[%s11375_s5 + $0x60] sm:$0xff]  ;;  %v10153_v46 = vld [vmem:[%s11375_s5 + $0x58] sm:$0xff]  ;;  %v10171_v58 = vld [vmem:[%s11375_s5 + $0x28] sm:$0xff] }
 0xb12   :  { %4684 = vtanh.f32 %v3268_v25  ;;  %v3269_v45 = vmul.f32 0.5, %v3265_v28  ;;  %v10129_v25 = vld [vmem:[%s11375_s5 + $0x78] sm:$0xff]  ;;  %v10141_v28 = vld [vmem:[%s11375_s5 + $0x70] sm:$0xff] }
 0xb14   :  { %4686 = vtanh.f32 %v3269_v45  ;;  %v10147_v45 = vld [vmem:[%s11375_s5 + $0x48] sm:$0xff] }
 0xb15   :  { %4688 = vtanh.f32 %v3267_v47  ;;  %v10159_v47 = vld [vmem:[%s11375_s5 + $0x40] sm:$0xff] }
 0xb16   :  { %4690 = vtanh.f32 %v3270_v29  ;;  %v10177_v29 = vld [vmem:[%s11375_s5 + $0x38] sm:$0xff] }
 0xb1f   :  { %v4685_v30 = vpop.eup %4684 }
 0xb20   :  { %v3274_v10 = vmul.f32 0.5, %v4685_v30  ;;  %v10183_v30 = vld [vmem:[%s11375_s5 + $0x20] sm:$0xff] }
 0xb21   :  { %v4687_v60 = vpop.eup %4686 }
 0xb22   :  { %v3277_v37 = vadd.f32 0.5, %v3274_v10  ;;  %v3275_v34 = vmul.f32 0.5, %v4687_v60  ;;  %v4689_v61 = vpop.eup %4688  ;;  %v10189_v10 = vld [vmem:[%s11375_s5 + $0x30] sm:$0xff]  ;;  %v10195_v60 = vld [vmem:[%s11375_s5 + $0x8] sm:$0xff] }
 0xb23   :  { %v4691_v57 = vpop.eup %4690  ;;  %12804 = vst [vmem:[#allocation134_spill] sm:$0xff] %v10195_v60 }
 0xb24   :  { %v3278_v49 = vadd.f32 0.5, %v3275_v34  ;;  %v3282_v27 = vmul.f32 %v4689_v61, %v3277_v37  ;;  %v3276_v55 = vmul.f32 0.5, %v4691_v57  ;;  %v10201_v37 = vld [vmem:[%s11375_s5 + $0x18] sm:$0xff]  ;;  %v10207_v34 = vld [vmem:[%s11375_s5] sm:$0xff]  ;;  %v10213_v61 = vld [vmem:[%s11375_s5 + $0x10] sm:$0xff] }
 0xb25   :  { %12805 = vst [vmem:[#allocation139_spill] sm:$0xff] %v10201_v37  ;;  %12806 = vst [vmem:[#allocation140_spill] sm:$0xff] %v10207_v34 }
 0xb26   :  { %v3281_v51 = vmul.f32 %v3278_v49, %v9595_v3  ;;  %v3279_v7 = vadd.f32 0.5, %v3276_v55  ;;  %v12801_v3 = vld [vmem:[#allocation130_spill] sm:$0xff]  ;;  %12807 = vst [vmem:[#allocation142_spill] sm:$0xff] %v10213_v61  ;;  %v10221_v49 = vld [vmem:[%s11376_s2 + $0x1e8] sm:$0xff] }
 0xb27   :  { %12808 = vst [vmem:[#allocation141_spill] sm:$0xff] %v10221_v49 }
 0xb28   :  { %v9947_v1 = vadd.f32 %v3282_v27, %v3281_v51  ;;  %v10227_v27 = vld [vmem:[%s11376_s2 + $0x1f8] sm:$0xff] }
 0xb29   :  { %12809 = vst [vmem:[#allocation133_spill] sm:$0xff] %v10227_v27 }
 0xb2a   :  { %4692 = vtanh.f32 %v9947_v1 }
 0xb37   :  { %v4693_v9 = vpop.eup %4692 }
 0xb38   :  { %v9950_v14 = vmul.f32 %v4693_v9, %v3279_v7 }
 0xb3a   :  { %3351 = vmatmul.mubr.f32.vlgmr.msra.gmra.mxu0 %v9950_v14  ;;  %3422 = vmatmul.mubr.f32.vlgmr.msra.gmra.mxu1 %v9950_v14 }
 0xb3b   :  { %3451 = vmatpush1.msra.mxu0 %v9605_v5  ;;  %3522 = vmatpush1.msra.mxu1 %v9611_v15  ;;  %v12802_v5 = vld [vmem:[#allocation131_spill] sm:$0xff]  ;;  %v12803_v15 = vld [vmem:[#allocation132_spill] sm:$0xff] }
 0xb3c   :  { %3452 = vmatprep.subr.mxu0 %v9617_v36  ;;  %3523 = vmatprep.subr.mxu1 %v9623_v44  ;;  %v9979_v36 = vld [vmem:[%s11375_s5 + $0x128] sm:$0xff]  ;;  %v9985_v44 = vld [vmem:[%s11375_s5 + $0x138] sm:$0xff] }
 0xb3d   :  { %3453 = vmatpush1.msra.mxu0 %v9629_v48  ;;  %3524 = vmatpush1.msra.mxu1 %v9635_v52  ;;  %v9991_v48 = vld [vmem:[%s11375_s5 + $0x120] sm:$0xff]  ;;  %v9997_v52 = vld [vmem:[%s11375_s5 + $0x130] sm:$0xff] }
 0xb3e   :  { %3454 = vmatprep.subr.mxu0 %v9641_v41  ;;  %3525 = vmatprep.subr.mxu1 %v9647_v8  ;;  %v10003_v41 = vld [vmem:[%s11375_s5 + $0x108] sm:$0xff]  ;;  %v10009_v8 = vld [vmem:[%s11375_s5 + $0x118] sm:$0xff] }
 0xb3f   :  { %3455 = vmatpush1.msra.mxu0 %v9653_v31  ;;  %3526 = vmatpush1.msra.mxu1 %v9659_v33  ;;  %v10015_v31 = vld [vmem:[%s11375_s5 + $0x100] sm:$0xff]  ;;  %v10021_v33 = vld [vmem:[%s11375_s5 + $0x110] sm:$0xff] }
 0xb40   :  { %3456 = vmatprep.subr.mxu0 %v9665_v17  ;;  %3527 = vmatprep.subr.mxu1 %v9671_v18  ;;  %v10027_v17 = vld [vmem:[%s11375_s5 + $0xe8] sm:$0xff]  ;;  %v10033_v18 = vld [vmem:[%s11375_s5 + $0xf8] sm:$0xff] }
 0xb41   :  { %3457 = vmatpush1.msra.mxu0 %v9677_v35  ;;  %3528 = vmatpush1.msra.mxu1 %v9683_v54  ;;  %v10039_v35 = vld [vmem:[%s11375_s5 + $0xe0] sm:$0xff]  ;;  %v10045_v54 = vld [vmem:[%s11375_s5 + $0xf0] sm:$0xff] }
 0xb42   :  { %3458 = vmatprep.subr.mxu0 %v9689_v62  ;;  %3529 = vmatprep.subr.mxu1 %v12801_v3  ;;  %v10051_v62 = vld [vmem:[%s11375_s5 + $0xc8] sm:$0xff] }
 0xb43   :  { %3459 = vmatpush1.msra.mxu0 %v12802_v5  ;;  %3530 = vmatpush1.msra.mxu1 %v12803_v15 }
 0xb44   :  { %3460 = vmatprep.subr.mxu0 %v9713_v39  ;;  %3531 = vmatprep.subr.mxu1 %v9719_v38  ;;  %v10057_v38 = vld [vmem:[%s11375_s5 + $0xd8] sm:$0xff]  ;;  %v10075_v39 = vld [vmem:[%s11375_s5 + $0xa8] sm:$0xff] }
 0xb45   :  { %3461 = vmatpush1.msra.mxu0 %v9725_v43  ;;  %3532 = vmatpush1.msra.mxu1 %v9731_v0  ;;  %v10063_v43 = vld [vmem:[%s11375_s5 + $0xc0] sm:$0xff]  ;;  %v10069_v0 = vld [vmem:[%s11375_s5 + $0xd0] sm:$0xff] }
 0xb46   :  { %3462 = vmatprep.subr.mxu0 %v9979_v36  ;;  %3533 = vmatprep.subr.mxu1 %v9985_v44 }
 0xb47   :  { %3463 = vmatpush1.msra.mxu0 %v9991_v48  ;;  %3534 = vmatpush1.msra.mxu1 %v9997_v52 }
 0xb48   :  { %3464 = vmatprep.subr.mxu0 %v10003_v41  ;;  %3535 = vmatprep.subr.mxu1 %v10009_v8 }
 0xb49   :  { %3465 = vmatpush1.msra.mxu0 %v10015_v31  ;;  %3536 = vmatpush1.msra.mxu1 %v10021_v33 }
 0xb4a   :  { %3466 = vmatprep.subr.mxu0 %v10027_v17  ;;  %3537 = vmatprep.subr.mxu1 %v10033_v18 }
 0xb4b   :  { %3467 = vmatpush1.msra.mxu0 %v10039_v35  ;;  %3538 = vmatpush1.msra.mxu1 %v10045_v54 }
 0xb4c   :  { %3468 = vmatprep.subr.mxu0 %v10051_v62  ;;  %3539 = vmatprep.subr.mxu1 %v10057_v38 }
 0xb4d   :  { %3469 = vmatpush1.msra.mxu0 %v10063_v43  ;;  %3540 = vmatpush1.msra.mxu1 %v10069_v0 }
 0xb4e   :  { %3470 = vmatprep.subr.mxu0 %v10075_v39  ;;  %3541 = vmatprep.subr.mxu1 %v10081_v12 }
 0xb4f   :  { %3471 = vmatpush1.msra.mxu0 %v10087_v13  ;;  %3542 = vmatpush1.msra.mxu1 %v10093_v6 }
 0xb50   :  { %3472 = vmatprep.subr.mxu0 %v10099_v20  ;;  %3543 = vmatprep.subr.mxu1 %v10105_v21 }
 0xb51   :  { %3473 = vmatpush1.msra.mxu0 %v10111_v22  ;;  %3544 = vmatpush1.msra.mxu1 %v10117_v23 }
 0xb52   :  { %3474 = vmatprep.subr.mxu0 %v10123_v24  ;;  %3545 = vmatprep.subr.mxu1 %v10129_v25 }
 0xb53   :  { %3475 = vmatpush1.msra.mxu0 %v10135_v26  ;;  %3546 = vmatpush1.msra.mxu1 %v10141_v28 }
 0xb54   :  { %3476 = vmatprep.subr.mxu0 %v10147_v45  ;;  %3547 = vmatprep.subr.mxu1 %v10153_v46 }
 0xb55   :  { %3477 = vmatpush1.msra.mxu0 %v10159_v47  ;;  %3548 = vmatpush1.msra.mxu1 %v10165_v42 }
 0xb56   :  { %3478 = vmatprep.subr.mxu0 %v10171_v58  ;;  %3549 = vmatprep.subr.mxu1 %v10177_v29 }
 0xb57   :  { %3479 = vmatpush1.msra.mxu0 %v10183_v30  ;;  %3550 = vmatpush1.msra.mxu1 %v10189_v10 }
 0xb58   :  { %3480 = vmatprep.subr.mxu0 %v10195_v60  ;;  %3551 = vmatprep.subr.mxu1 %v10201_v37 }
 0xb59   :  { %3481 = vmatpush1.msra.mxu0 %v10207_v34  ;;  %3552 = vmatpush1.msra.mxu1 %v10213_v61 }
 0xb5a   :  { %3514 = vmatprep.mubr.f32.mxu0 %v11995_v53  ;;  %3585 = vmatprep.mubr.f32.mxu1 %v11995_v53 }
 0xb5b   :  { %3599 = vmatprep.subr.mxu0 %v10221_v49  ;;  %3670 = vmatprep.subr.mxu1 %v10227_v27 }
 0xbfa   :  { %v3352_v51 = vpop.f32.mrf.mxu0  ;;  %v3423_v57 = vpop.f32.mrf.mxu1 }
 0xbfb   :  { %v3353_v55 = vadd.f32 %v3352_v51, %v9934_v4  ;;  %v3424_v37 = vadd.f32 %v3423_v57, %v9936_v11 }
 0xbfc   :  { %v3354_v7 = vpop.f32.mrf.mxu0  ;;  %v3425_v9 = vpop.f32.mrf.mxu1 }
 0xbfd   :  { %v3428_v3 = vadd.f32 %v3353_v55, %v12668_v40  ;;  %v3355_v5 = vadd.f32 %v3354_v7, %v9938_v32  ;;  %v3426_v61 = vadd.f32 %v3425_v9, %v9940_v19  ;;  %v3430_v4 = vadd.f32 %v3424_v37, %v12669_v16  ;;  %v10263_v9 = vld [vmem:[%s11376_s2 + $0x1d8] sm:$0xff] }
 0xbfe   :  { %12814 = vst [vmem:[#allocation146_spill] sm:$0xff] %v10263_v9 }
 0xbff   :  { %v3432_v15 = vmul.f32 0.5, %v3428_v3  ;;  %v3429_v49 = vadd.f32 %v3355_v5, %v6922_v56  ;;  %v3431_v27 = vadd.f32 %v3426_v61, %v6929_v2  ;;  %v3434_v51 = vmul.f32 0.5, %v3430_v4  ;;  %v10275_v4 = vld [vmem:[%s11376_s2 + $0x1d0] sm:$0xff] }
 0xc00   :  { %12816 = vst [vmem:[#allocation135_spill] sm:$0xff] %v10275_v4 }
 0xc01   :  { %4694 = vtanh.f32 %v3432_v15  ;;  %v3433_v34 = vmul.f32 0.5, %v3429_v49  ;;  %v10269_v15 = vld [vmem:[%s11376_s2 + $0x1c0] sm:$0xff] }
 0xc02   :  { %12815 = vst [vmem:[#allocation145_spill] sm:$0xff] %v10269_v15 }
 0xc03   :  { %4696 = vtanh.f32 %v3433_v34 }
 0xc04   :  { %4698 = vtanh.f32 %v3431_v27 }
 0xc05   :  { %4700 = vtanh.f32 %v3434_v51  ;;  %v10281_v51 = vld [vmem:[%s11376_s2 + $0x1a8] sm:$0xff] }
 0xc06   :  { %12817 = vst [vmem:[#allocation136_spill] sm:$0xff] %v10281_v51 }
 0xc0e   :  { %v4695_v60 = vpop.eup %4694 }
 0xc0f   :  { %v3438_v55 = vmul.f32 0.5, %v4695_v60  ;;  %v10257_v60 = vld [vmem:[%s11376_s2 + $0x1c8] sm:$0xff] }
 0xc10   :  { %v4697_v40 = vpop.eup %4696  ;;  %12813 = vst [vmem:[#allocation144_spill] sm:$0xff] %v10257_v60 }
 0xc11   :  { %v3441_v32 = vadd.f32 0.5, %v3438_v55  ;;  %v3439_v7 = vmul.f32 0.5, %v4697_v40  ;;  %v4699_v5 = vpop.eup %4698  ;;  %v10245_v40 = vld [vmem:[%s11376_s2 + $0x1e0] sm:$0xff]  ;;  %v10287_v55 = vld [vmem:[%s11376_s2 + $0x1b8] sm:$0xff] }
 0xc12   :  { %v4701_v11 = vpop.eup %4700  ;;  %12811 = vst [vmem:[#allocation164_spill] sm:$0xff] %v10245_v40  ;;  %12818 = vst [vmem:[#allocation138_spill] sm:$0xff] %v10287_v55 }
 0xc13   :  { %v3442_v3 = vadd.f32 0.5, %v3439_v7  ;;  %v3446_v49 = vmul.f32 %v4699_v5, %v3441_v32  ;;  %v3440_v61 = vmul.f32 0.5, %v4701_v11  ;;  %v10293_v32 = vld [vmem:[%s11376_s2 + $0x1a0] sm:$0xff]  ;;  %v10299_v7 = vld [vmem:[%s11376_s2 + $0x1b0] sm:$0xff]  ;;  %v10311_v5 = vld [vmem:[%s11376_s2 + $0x198] sm:$0xff] }
 0xc14   :  { %12819 = vst [vmem:[#allocation137_spill] sm:$0xff] %v10293_v32  ;;  %12820 = vst [vmem:[#allocation159_spill] sm:$0xff] %v10299_v7  ;;  %v10329_v11 = vld [vmem:[%s11376_s2 + $0x168] sm:$0xff] }
 0xc15   :  { %v3445_v19 = vmul.f32 %v3442_v3, %v9787_v50  ;;  %v3443_v27 = vadd.f32 0.5, %v3440_v61  ;;  %v10251_v50 = vld [vmem:[%s11376_s2 + $0x1f0] sm:$0xff]  ;;  %v10305_v3 = vld [vmem:[%s11376_s2 + $0x188] sm:$0xff]  ;;  %12822 = vst [vmem:[#allocation162_spill] sm:$0xff] %v10311_v5  ;;  %12825 = vst [vmem:[#allocation5_spill] sm:$0xff] %v10329_v11 }
 0xc16   :  { %12812 = vst [vmem:[#allocation143_spill] sm:$0xff] %v10251_v50  ;;  %12821 = vst [vmem:[#allocation161_spill] sm:$0xff] %v10305_v3  ;;  %v10335_v61 = vld [vmem:[%s11376_s2 + $0x178] sm:$0xff] }
 0xc17   :  { %v10239_v34 = vadd.f32 %v3446_v49, %v3445_v19  ;;  %v10317_v19 = vld [vmem:[%s11376_s2 + $0x180] sm:$0xff]  ;;  %v10323_v49 = vld [vmem:[%s11376_s2 + $0x190] sm:$0xff]  ;;  %12826 = vst [vmem:[#allocation6_spill] sm:$0xff] %v10335_v61 }
 0xc18   :  { %12823 = vst [vmem:[#allocation160_spill] sm:$0xff] %v10317_v19  ;;  %12824 = vst [vmem:[#allocation4_spill] sm:$0xff] %v10323_v49 }
 0xc19   :  { %12810 = vst [vmem:[#allocation163_spill] sm:$0xff] %v10239_v34  ;;  %4702 = vtanh.f32 %v10239_v34 }
 0xc26   :  { %v4703_v37 = vpop.eup %4702 }
 0xc27   :  { %v3449_v57 = vmul.f32 %v4703_v37, %v3443_v27  ;;  %v10341_v27 = vld [vmem:[%s11376_s2 + $0x160] sm:$0xff]  ;;  %v10347_v37 = vld [vmem:[%s11376_s2 + $0x170] sm:$0xff] }
 0xc28   :  { %12827 = vst [vmem:[#allocation7_spill] sm:$0xff] %v10341_v27  ;;  %12828 = vst [vmem:[#allocation8_spill] sm:$0xff] %v10347_v37 }
 0xc29   :  { %3515 = vmatmul.mubr.f32.vlgmr.msra.gmra.mxu0 %v3449_v57  ;;  %3586 = vmatmul.mubr.f32.vlgmr.msra.gmra.mxu1 %v3449_v57  ;;  %v10353_v57 = vld [vmem:[%s11376_s2 + $0x148] sm:$0xff] }
 0xc2a   :  { %3600 = vmatpush1.msra.mxu0 %v10245_v40  ;;  %3671 = vmatpush1.msra.mxu1 %v10251_v50  ;;  %12829 = vst [vmem:[#allocation9_spill] sm:$0xff] %v10353_v57 }
 0xc2b   :  { %3601 = vmatprep.subr.mxu0 %v10257_v60  ;;  %3672 = vmatprep.subr.mxu1 %v10263_v9 }
 0xc2c   :  { %3602 = vmatpush1.msra.mxu0 %v10269_v15  ;;  %3673 = vmatpush1.msra.mxu1 %v10275_v4  ;;  %v12940_v4 = vld [vmem:[#allocation153_spill] sm:$0xff] }
 0xc2d   :  { %3603 = vmatprep.subr.mxu0 %v10281_v51  ;;  %3674 = vmatprep.subr.mxu1 %v10287_v55 }
 0xc2e   :  { %3604 = vmatpush1.msra.mxu0 %v10293_v32  ;;  %3675 = vmatpush1.msra.mxu1 %v10299_v7  ;;  %v12938_v32 = vld [vmem:[#allocation152_spill] sm:$0xff] }
 0xc2f   :  { %3605 = vmatprep.subr.mxu0 %v10305_v3  ;;  %3676 = vmatprep.subr.mxu1 %v10311_v5 }
 0xc30   :  { %3606 = vmatpush1.msra.mxu0 %v10317_v19  ;;  %3677 = vmatpush1.msra.mxu1 %v10323_v49  ;;  %v12937_v19 = vld [vmem:[#allocation151_spill] sm:$0xff] }
 0xc31   :  { %3607 = vmatprep.subr.mxu0 %v10329_v11  ;;  %3678 = vmatprep.subr.mxu1 %v10335_v61  ;;  %v10359_v61 = vld [vmem:[%s11376_s2 + $0x158] sm:$0xff] }
 0xc32   :  { %3608 = vmatpush1.msra.mxu0 %v10341_v27  ;;  %3679 = vmatpush1.msra.mxu1 %v10347_v37  ;;  %12830 = vst [vmem:[#allocation10_spill] sm:$0xff] %v10359_v61  ;;  %v10365_v27 = vld [vmem:[%s11376_s2 + $0x140] sm:$0xff]  ;;  %v10371_v37 = vld [vmem:[%s11376_s2 + $0x150] sm:$0xff] }
 0xc33   :  { %3609 = vmatprep.subr.mxu0 %v10353_v57  ;;  %3680 = vmatprep.subr.mxu1 %v10359_v61  ;;  %12831 = vst [vmem:[#allocation11_spill] sm:$0xff] %v10365_v27  ;;  %12832 = vst [vmem:[#allocation12_spill] sm:$0xff] %v10371_v37  ;;  %v10377_v57 = vld [vmem:[%s11376_s2 + $0x128] sm:$0xff]  ;;  %v10383_v61 = vld [vmem:[%s11376_s2 + $0x138] sm:$0xff] }
 0xc34   :  { %3610 = vmatpush1.msra.mxu0 %v10365_v27  ;;  %3681 = vmatpush1.msra.mxu1 %v10371_v37  ;;  %12833 = vst [vmem:[#allocation13_spill] sm:$0xff] %v10377_v57  ;;  %12834 = vst [vmem:[#allocation14_spill] sm:$0xff] %v10383_v61  ;;  %v10389_v27 = vld [vmem:[%s11376_s2 + $0x120] sm:$0xff]  ;;  %v10395_v37 = vld [vmem:[%s11376_s2 + $0x130] sm:$0xff] }
 0xc35   :  { %3611 = vmatprep.subr.mxu0 %v10377_v57  ;;  %3682 = vmatprep.subr.mxu1 %v10383_v61  ;;  %12835 = vst [vmem:[#allocation15_spill] sm:$0xff] %v10389_v27  ;;  %12836 = vst [vmem:[#allocation16_spill] sm:$0xff] %v10395_v37  ;;  %v10401_v57 = vld [vmem:[%s11376_s2 + $0x108] sm:$0xff]  ;;  %v10407_v61 = vld [vmem:[%s11376_s2 + $0x118] sm:$0xff] }
 0xc36   :  { %3612 = vmatpush1.msra.mxu0 %v10389_v27  ;;  %3683 = vmatpush1.msra.mxu1 %v10395_v37  ;;  %12837 = vst [vmem:[#allocation17_spill] sm:$0xff] %v10401_v57  ;;  %12838 = vst [vmem:[#allocation18_spill] sm:$0xff] %v10407_v61  ;;  %v10413_v27 = vld [vmem:[%s11376_s2 + $0x100] sm:$0xff]  ;;  %v10419_v37 = vld [vmem:[%s11376_s2 + $0x110] sm:$0xff] }
 0xc37   :  { %3613 = vmatprep.subr.mxu0 %v10401_v57  ;;  %3684 = vmatprep.subr.mxu1 %v10407_v61  ;;  %12839 = vst [vmem:[#allocation19_spill] sm:$0xff] %v10413_v27  ;;  %12840 = vst [vmem:[#allocation20_spill] sm:$0xff] %v10419_v37  ;;  %v10425_v57 = vld [vmem:[%s11376_s2 + $0xe8] sm:$0xff]  ;;  %v10431_v61 = vld [vmem:[%s11376_s2 + $0xf8] sm:$0xff] }
 0xc38   :  { %3614 = vmatpush1.msra.mxu0 %v10413_v27  ;;  %3685 = vmatpush1.msra.mxu1 %v10419_v37  ;;  %12841 = vst [vmem:[#allocation21_spill] sm:$0xff] %v10425_v57  ;;  %12842 = vst [vmem:[#allocation22_spill] sm:$0xff] %v10431_v61  ;;  %v10437_v27 = vld [vmem:[%s11376_s2 + $0xe0] sm:$0xff]  ;;  %v10443_v37 = vld [vmem:[%s11376_s2 + $0xf0] sm:$0xff] }
 0xc39   :  { %3615 = vmatprep.subr.mxu0 %v10425_v57  ;;  %3686 = vmatprep.subr.mxu1 %v10431_v61  ;;  %12843 = vst [vmem:[#allocation23_spill] sm:$0xff] %v10437_v27  ;;  %12844 = vst [vmem:[#allocation24_spill] sm:$0xff] %v10443_v37  ;;  %v10449_v57 = vld [vmem:[%s11376_s2 + $0xc8] sm:$0xff]  ;;  %v10455_v61 = vld [vmem:[%s11376_s2 + $0xd8] sm:$0xff] }
 0xc3a   :  { %3616 = vmatpush1.msra.mxu0 %v10437_v27  ;;  %3687 = vmatpush1.msra.mxu1 %v10443_v37  ;;  %12845 = vst [vmem:[#allocation25_spill] sm:$0xff] %v10449_v57  ;;  %12846 = vst [vmem:[#allocation26_spill] sm:$0xff] %v10455_v61  ;;  %v10461_v27 = vld [vmem:[%s11376_s2 + $0xc0] sm:$0xff]  ;;  %v10467_v37 = vld [vmem:[%s11376_s2 + $0xd0] sm:$0xff] }
 0xc3b   :  { %3617 = vmatprep.subr.mxu0 %v10449_v57  ;;  %3688 = vmatprep.subr.mxu1 %v10455_v61  ;;  %12847 = vst [vmem:[#allocation27_spill] sm:$0xff] %v10461_v27  ;;  %12848 = vst [vmem:[#allocation28_spill] sm:$0xff] %v10467_v37  ;;  %v10473_v57 = vld [vmem:[%s11376_s2 + $0xa8] sm:$0xff]  ;;  %v10479_v61 = vld [vmem:[%s11376_s2 + $0xb8] sm:$0xff] }
 0xc3c   :  { %3618 = vmatpush1.msra.mxu0 %v10461_v27  ;;  %3689 = vmatpush1.msra.mxu1 %v10467_v37  ;;  %12849 = vst [vmem:[#allocation29_spill] sm:$0xff] %v10473_v57  ;;  %12850 = vst [vmem:[#allocation30_spill] sm:$0xff] %v10479_v61  ;;  %v10485_v27 = vld [vmem:[%s11376_s2 + $0xa0] sm:$0xff]  ;;  %v10491_v37 = vld [vmem:[%s11376_s2 + $0xb0] sm:$0xff] }
 0xc3d   :  { %3619 = vmatprep.subr.mxu0 %v10473_v57  ;;  %3690 = vmatprep.subr.mxu1 %v10479_v61  ;;  %12851 = vst [vmem:[#allocation31_spill] sm:$0xff] %v10485_v27  ;;  %12852 = vst [vmem:[#allocation32_spill] sm:$0xff] %v10491_v37  ;;  %v10497_v57 = vld [vmem:[%s11376_s2 + $0x88] sm:$0xff]  ;;  %v10503_v61 = vld [vmem:[%s11376_s2 + $0x98] sm:$0xff] }
 0xc3e   :  { %3620 = vmatpush1.msra.mxu0 %v10485_v27  ;;  %3691 = vmatpush1.msra.mxu1 %v10491_v37  ;;  %12853 = vst [vmem:[#allocation33_spill] sm:$0xff] %v10497_v57  ;;  %12854 = vst [vmem:[#allocation34_spill] sm:$0xff] %v10503_v61  ;;  %v10509_v27 = vld [vmem:[%s11376_s2 + $0x80] sm:$0xff]  ;;  %v10515_v37 = vld [vmem:[%s11376_s2 + $0x90] sm:$0xff] }
 0xc3f   :  { %3621 = vmatprep.subr.mxu0 %v10497_v57  ;;  %3692 = vmatprep.subr.mxu1 %v10503_v61  ;;  %12855 = vst [vmem:[#allocation35_spill] sm:$0xff] %v10509_v27  ;;  %12856 = vst [vmem:[#allocation36_spill] sm:$0xff] %v10515_v37  ;;  %v10521_v57 = vld [vmem:[%s11376_s2 + $0x68] sm:$0xff]  ;;  %v10527_v61 = vld [vmem:[%s11376_s2 + $0x78] sm:$0xff] }
 0xc40   :  { %3622 = vmatpush1.msra.mxu0 %v10509_v27  ;;  %3693 = vmatpush1.msra.mxu1 %v10515_v37  ;;  %12857 = vst [vmem:[#allocation37_spill] sm:$0xff] %v10521_v57  ;;  %12858 = vst [vmem:[#allocation38_spill] sm:$0xff] %v10527_v61  ;;  %v10533_v27 = vld [vmem:[%s11376_s2 + $0x60] sm:$0xff]  ;;  %v10539_v37 = vld [vmem:[%s11376_s2 + $0x70] sm:$0xff] }
 0xc41   :  { %3623 = vmatprep.subr.mxu0 %v10521_v57  ;;  %3694 = vmatprep.subr.mxu1 %v10527_v61  ;;  %12859 = vst [vmem:[#allocation39_spill] sm:$0xff] %v10533_v27  ;;  %12860 = vst [vmem:[#allocation40_spill] sm:$0xff] %v10539_v37  ;;  %v10545_v57 = vld [vmem:[%s11376_s2 + $0x48] sm:$0xff]  ;;  %v10551_v61 = vld [vmem:[%s11376_s2 + $0x58] sm:$0xff] }
 0xc42   :  { %3624 = vmatpush1.msra.mxu0 %v10533_v27  ;;  %3695 = vmatpush1.msra.mxu1 %v10539_v37  ;;  %12861 = vst [vmem:[#allocation41_spill] sm:$0xff] %v10545_v57  ;;  %12862 = vst [vmem:[#allocation42_spill] sm:$0xff] %v10551_v61  ;;  %v10557_v27 = vld [vmem:[%s11376_s2 + $0x40] sm:$0xff]  ;;  %v10563_v37 = vld [vmem:[%s11376_s2 + $0x50] sm:$0xff] }
 0xc43   :  { %3625 = vmatprep.subr.mxu0 %v10545_v57  ;;  %3696 = vmatprep.subr.mxu1 %v10551_v61  ;;  %12863 = vst [vmem:[#allocation43_spill] sm:$0xff] %v10557_v27  ;;  %12864 = vst [vmem:[#allocation44_spill] sm:$0xff] %v10563_v37  ;;  %v10569_v57 = vld [vmem:[%s11376_s2 + $0x28] sm:$0xff]  ;;  %v10575_v61 = vld [vmem:[%s11376_s2 + $0x38] sm:$0xff] }
 0xc44   :  { %3626 = vmatpush1.msra.mxu0 %v10557_v27  ;;  %3697 = vmatpush1.msra.mxu1 %v10563_v37  ;;  %12865 = vst [vmem:[#allocation45_spill] sm:$0xff] %v10569_v57  ;;  %12866 = vst [vmem:[#allocation46_spill] sm:$0xff] %v10575_v61  ;;  %v10581_v27 = vld [vmem:[%s11376_s2 + $0x20] sm:$0xff]  ;;  %v10587_v37 = vld [vmem:[%s11376_s2 + $0x30] sm:$0xff] }
 0xc45   :  { %3627 = vmatprep.subr.mxu0 %v10569_v57  ;;  %3698 = vmatprep.subr.mxu1 %v10575_v61  ;;  %12867 = vst [vmem:[#allocation47_spill] sm:$0xff] %v10581_v27  ;;  %12868 = vst [vmem:[#allocation48_spill] sm:$0xff] %v10587_v37  ;;  %v10593_v57 = vld [vmem:[%s11376_s2 + $0x8] sm:$0xff]  ;;  %v10599_v61 = vld [vmem:[%s11376_s2 + $0x18] sm:$0xff] }
 0xc46   :  { %3628 = vmatpush1.msra.mxu0 %v10581_v27  ;;  %3699 = vmatpush1.msra.mxu1 %v10587_v37  ;;  %12869 = vst [vmem:[#allocation49_spill] sm:$0xff] %v10593_v57  ;;  %12870 = vst [vmem:[#allocation50_spill] sm:$0xff] %v10599_v61  ;;  %v10605_v27 = vld [vmem:[%s11376_s2] sm:$0xff] }
 0xc47   :  { %3629 = vmatprep.subr.mxu0 %v10593_v57  ;;  %3700 = vmatprep.subr.mxu1 %v10599_v61  ;;  %12871 = vst [vmem:[#allocation51_spill] sm:$0xff] %v10605_v27  ;;  %v10612_v57 = vld [vmem:[%s11376_s2 + $0x10] sm:$0xff]  ;;  %v10621_v61 = vld [vmem:[%s11377_s4 + $0x1e8] sm:$0xff] }
 0xc48   :  { %3630 = vmatpush1.msra.mxu0 %v10605_v27  ;;  %3663 = vmatprep.mubr.f32.mxu0 %v11995_v53  ;;  %12872 = vst [vmem:[#allocation52_spill] sm:$0xff] %v10612_v57  ;;  %12873 = vst [vmem:[#allocation53_spill] sm:$0xff] %v10621_v61  ;;  %v10627_v27 = vld [vmem:[%s11377_s4 + $0x1f8] sm:$0xff] }
 0xc49   :  { %3701 = vmatpush1.msra.mxu1 %v10612_v57  ;;  %3734 = vmatprep.mubr.f32.mxu1 %v11995_v53  ;;  %12874 = vst [vmem:[#allocation54_spill] sm:$0xff] %v10627_v27  ;;  %v10633_v57 = vld [vmem:[%s11377_s4 + $0x1e0] sm:$0xff] }
 0xc4a   :  { %3664 = vmatmul.mubr.f32.vlgmr.msra.gmra.mxu0 %v9950_v14  ;;  %3735 = vmatmul.mubr.f32.vlgmr.msra.gmra.mxu1 %v9950_v14  ;;  %12875 = vst [vmem:[#allocation55_spill] sm:$0xff] %v10633_v57  ;;  %v10639_v14 = vld [vmem:[%s11377_s4 + $0x1f0] sm:$0xff] }
 0xc4b   :  { %3763 = vmatprep.subr.mxu0 %v10621_v61  ;;  %3834 = vmatprep.subr.mxu1 %v10627_v27  ;;  %12876 = vst [vmem:[#allocation56_spill] sm:$0xff] %v10639_v14  ;;  %v10645_v61 = vld [vmem:[%s11377_s4 + $0x1c8] sm:$0xff]  ;;  %v10651_v27 = vld [vmem:[%s11377_s4 + $0x1d8] sm:$0xff] }
 0xc4c   :  { %3764 = vmatpush1.msra.mxu0 %v10633_v57  ;;  %3835 = vmatpush1.msra.mxu1 %v10639_v14  ;;  %12877 = vst [vmem:[#allocation57_spill] sm:$0xff] %v10645_v61  ;;  %12878 = vst [vmem:[#allocation58_spill] sm:$0xff] %v10651_v27  ;;  %v10657_v57 = vld [vmem:[%s11377_s4 + $0x1c0] sm:$0xff]  ;;  %v10663_v14 = vld [vmem:[%s11377_s4 + $0x1d0] sm:$0xff] }
 0xc4d   :  { %3765 = vmatprep.subr.mxu0 %v10645_v61  ;;  %3836 = vmatprep.subr.mxu1 %v10651_v27  ;;  %12879 = vst [vmem:[#allocation59_spill] sm:$0xff] %v10657_v57  ;;  %12880 = vst [vmem:[#allocation60_spill] sm:$0xff] %v10663_v14  ;;  %v10669_v61 = vld [vmem:[%s11377_s4 + $0x1a8] sm:$0xff]  ;;  %v10675_v27 = vld [vmem:[%s11377_s4 + $0x1b8] sm:$0xff] }
 0xc4e   :  { %3766 = vmatpush1.msra.mxu0 %v10657_v57  ;;  %3837 = vmatpush1.msra.mxu1 %v10663_v14  ;;  %12881 = vst [vmem:[#allocation61_spill] sm:$0xff] %v10669_v61  ;;  %12882 = vst [vmem:[#allocation62_spill] sm:$0xff] %v10675_v27  ;;  %v10681_v57 = vld [vmem:[%s11377_s4 + $0x1a0] sm:$0xff]  ;;  %v10687_v14 = vld [vmem:[%s11377_s4 + $0x1b0] sm:$0xff] }
 0xc4f   :  { %3767 = vmatprep.subr.mxu0 %v10669_v61  ;;  %3838 = vmatprep.subr.mxu1 %v10675_v27  ;;  %12883 = vst [vmem:[#allocation63_spill] sm:$0xff] %v10681_v57  ;;  %12884 = vst [vmem:[#allocation64_spill] sm:$0xff] %v10687_v14  ;;  %v10693_v61 = vld [vmem:[%s11377_s4 + $0x188] sm:$0xff]  ;;  %v10699_v27 = vld [vmem:[%s11377_s4 + $0x198] sm:$0xff] }
 0xc50   :  { %3768 = vmatpush1.msra.mxu0 %v10681_v57  ;;  %3839 = vmatpush1.msra.mxu1 %v10687_v14  ;;  %12885 = vst [vmem:[#allocation65_spill] sm:$0xff] %v10693_v61  ;;  %12886 = vst [vmem:[#allocation66_spill] sm:$0xff] %v10699_v27  ;;  %v10705_v57 = vld [vmem:[%s11377_s4 + $0x180] sm:$0xff]  ;;  %v10711_v14 = vld [vmem:[%s11377_s4 + $0x190] sm:$0xff] }
 0xc51   :  { %3769 = vmatprep.subr.mxu0 %v10693_v61  ;;  %3840 = vmatprep.subr.mxu1 %v10699_v27  ;;  %12887 = vst [vmem:[#allocation67_spill] sm:$0xff] %v10705_v57  ;;  %12888 = vst [vmem:[#allocation68_spill] sm:$0xff] %v10711_v14  ;;  %v10717_v61 = vld [vmem:[%s11377_s4 + $0x168] sm:$0xff]  ;;  %v10723_v27 = vld [vmem:[%s11377_s4 + $0x178] sm:$0xff] }
 0xc52   :  { %3770 = vmatpush1.msra.mxu0 %v10705_v57  ;;  %3841 = vmatpush1.msra.mxu1 %v10711_v14  ;;  %12889 = vst [vmem:[#allocation69_spill] sm:$0xff] %v10717_v61  ;;  %12890 = vst [vmem:[#allocation70_spill] sm:$0xff] %v10723_v27  ;;  %v10729_v57 = vld [vmem:[%s11377_s4 + $0x160] sm:$0xff]  ;;  %v10735_v14 = vld [vmem:[%s11377_s4 + $0x170] sm:$0xff] }
 0xc53   :  { %3771 = vmatprep.subr.mxu0 %v10717_v61  ;;  %3842 = vmatprep.subr.mxu1 %v10723_v27  ;;  %12891 = vst [vmem:[#allocation71_spill] sm:$0xff] %v10729_v57  ;;  %12892 = vst [vmem:[#allocation72_spill] sm:$0xff] %v10735_v14  ;;  %v10741_v61 = vld [vmem:[%s11377_s4 + $0x148] sm:$0xff]  ;;  %v10747_v27 = vld [vmem:[%s11377_s4 + $0x158] sm:$0xff] }
 0xc54   :  { %3772 = vmatpush1.msra.mxu0 %v10729_v57  ;;  %3843 = vmatpush1.msra.mxu1 %v10735_v14  ;;  %12893 = vst [vmem:[#allocation73_spill] sm:$0xff] %v10741_v61  ;;  %12894 = vst [vmem:[#allocation74_spill] sm:$0xff] %v10747_v27  ;;  %v10753_v57 = vld [vmem:[%s11377_s4 + $0x140] sm:$0xff]  ;;  %v10759_v14 = vld [vmem:[%s11377_s4 + $0x150] sm:$0xff] }
 0xc55   :  { %3773 = vmatprep.subr.mxu0 %v10741_v61  ;;  %3844 = vmatprep.subr.mxu1 %v10747_v27  ;;  %12895 = vst [vmem:[#allocation75_spill] sm:$0xff] %v10753_v57  ;;  %12896 = vst [vmem:[#allocation76_spill] sm:$0xff] %v10759_v14  ;;  %v10765_v61 = vld [vmem:[%s11377_s4 + $0x128] sm:$0xff]  ;;  %v10771_v27 = vld [vmem:[%s11377_s4 + $0x138] sm:$0xff] }
 0xc56   :  { %3774 = vmatpush1.msra.mxu0 %v10753_v57  ;;  %3845 = vmatpush1.msra.mxu1 %v10759_v14  ;;  %12897 = vst [vmem:[#allocation77_spill] sm:$0xff] %v10765_v61  ;;  %12898 = vst [vmem:[#allocation78_spill] sm:$0xff] %v10771_v27  ;;  %v10777_v57 = vld [vmem:[%s11377_s4 + $0x120] sm:$0xff]  ;;  %v10783_v14 = vld [vmem:[%s11377_s4 + $0x130] sm:$0xff] }
 0xc57   :  { %3775 = vmatprep.subr.mxu0 %v10765_v61  ;;  %3846 = vmatprep.subr.mxu1 %v10771_v27  ;;  %12899 = vst [vmem:[#allocation79_spill] sm:$0xff] %v10777_v57  ;;  %12900 = vst [vmem:[#allocation80_spill] sm:$0xff] %v10783_v14  ;;  %v10789_v61 = vld [vmem:[%s11377_s4 + $0x108] sm:$0xff]  ;;  %v10795_v27 = vld [vmem:[%s11377_s4 + $0x118] sm:$0xff] }
 0xc58   :  { %3776 = vmatpush1.msra.mxu0 %v10777_v57  ;;  %3847 = vmatpush1.msra.mxu1 %v10783_v14  ;;  %12901 = vst [vmem:[#allocation81_spill] sm:$0xff] %v10789_v61  ;;  %12902 = vst [vmem:[#allocation82_spill] sm:$0xff] %v10795_v27  ;;  %v10801_v57 = vld [vmem:[%s11377_s4 + $0x100] sm:$0xff]  ;;  %v10807_v14 = vld [vmem:[%s11377_s4 + $0x110] sm:$0xff] }
 0xc59   :  { %3777 = vmatprep.subr.mxu0 %v10789_v61  ;;  %3848 = vmatprep.subr.mxu1 %v10795_v27  ;;  %12903 = vst [vmem:[#allocation83_spill] sm:$0xff] %v10801_v57  ;;  %12904 = vst [vmem:[#allocation84_spill] sm:$0xff] %v10807_v14  ;;  %v10813_v61 = vld [vmem:[%s11377_s4 + $0xe8] sm:$0xff]  ;;  %v10819_v27 = vld [vmem:[%s11377_s4 + $0xf8] sm:$0xff] }
 0xc5a   :  { %3778 = vmatpush1.msra.mxu0 %v10801_v57  ;;  %3849 = vmatpush1.msra.mxu1 %v10807_v14  ;;  %12905 = vst [vmem:[#allocation85_spill] sm:$0xff] %v10813_v61  ;;  %12906 = vst [vmem:[#allocation86_spill] sm:$0xff] %v10819_v27  ;;  %v10825_v57 = vld [vmem:[%s11377_s4 + $0xe0] sm:$0xff]  ;;  %v10831_v14 = vld [vmem:[%s11377_s4 + $0xf0] sm:$0xff] }
 0xc5b   :  { %3779 = vmatprep.subr.mxu0 %v10813_v61  ;;  %3850 = vmatprep.subr.mxu1 %v10819_v27  ;;  %12907 = vst [vmem:[#allocation87_spill] sm:$0xff] %v10825_v57  ;;  %12908 = vst [vmem:[#allocation88_spill] sm:$0xff] %v10831_v14  ;;  %v10837_v61 = vld [vmem:[%s11377_s4 + $0xc8] sm:$0xff]  ;;  %v10843_v27 = vld [vmem:[%s11377_s4 + $0xd8] sm:$0xff] }
 0xc5c   :  { %3780 = vmatpush1.msra.mxu0 %v10825_v57  ;;  %3851 = vmatpush1.msra.mxu1 %v10831_v14  ;;  %12909 = vst [vmem:[#allocation89_spill] sm:$0xff] %v10837_v61  ;;  %12910 = vst [vmem:[#allocation90_spill] sm:$0xff] %v10843_v27  ;;  %v10849_v57 = vld [vmem:[%s11377_s4 + $0xc0] sm:$0xff]  ;;  %v10855_v14 = vld [vmem:[%s11377_s4 + $0xd0] sm:$0xff] }
 0xc5d   :  { %3781 = vmatprep.subr.mxu0 %v10837_v61  ;;  %3852 = vmatprep.subr.mxu1 %v10843_v27  ;;  %12911 = vst [vmem:[#allocation91_spill] sm:$0xff] %v10849_v57  ;;  %12912 = vst [vmem:[#allocation92_spill] sm:$0xff] %v10855_v14  ;;  %v10861_v61 = vld [vmem:[%s11377_s4 + $0xa8] sm:$0xff]  ;;  %v10867_v27 = vld [vmem:[%s11377_s4 + $0xb8] sm:$0xff] }
 0xc5e   :  { %3782 = vmatpush1.msra.mxu0 %v10849_v57  ;;  %3853 = vmatpush1.msra.mxu1 %v10855_v14  ;;  %12913 = vst [vmem:[#allocation93_spill] sm:$0xff] %v10861_v61  ;;  %12914 = vst [vmem:[#allocation94_spill] sm:$0xff] %v10867_v27  ;;  %v10873_v57 = vld [vmem:[%s11377_s4 + $0xa0] sm:$0xff]  ;;  %v10879_v14 = vld [vmem:[%s11377_s4 + $0xb0] sm:$0xff] }
 0xc5f   :  { %3783 = vmatprep.subr.mxu0 %v10861_v61  ;;  %3854 = vmatprep.subr.mxu1 %v10867_v27  ;;  %12915 = vst [vmem:[#allocation95_spill] sm:$0xff] %v10873_v57  ;;  %12916 = vst [vmem:[#allocation96_spill] sm:$0xff] %v10879_v14  ;;  %v10885_v61 = vld [vmem:[%s11377_s4 + $0x88] sm:$0xff]  ;;  %v10891_v27 = vld [vmem:[%s11377_s4 + $0x98] sm:$0xff] }
 0xc60   :  { %3784 = vmatpush1.msra.mxu0 %v10873_v57  ;;  %3855 = vmatpush1.msra.mxu1 %v10879_v14  ;;  %12917 = vst [vmem:[#allocation97_spill] sm:$0xff] %v10885_v61  ;;  %12918 = vst [vmem:[#allocation98_spill] sm:$0xff] %v10891_v27  ;;  %v10897_v57 = vld [vmem:[%s11377_s4 + $0x80] sm:$0xff]  ;;  %v10903_v14 = vld [vmem:[%s11377_s4 + $0x90] sm:$0xff] }
 0xc61   :  { %3785 = vmatprep.subr.mxu0 %v10885_v61  ;;  %3856 = vmatprep.subr.mxu1 %v10891_v27  ;;  %12919 = vst [vmem:[#allocation99_spill] sm:$0xff] %v10897_v57  ;;  %12920 = vst [vmem:[#allocation100_spill] sm:$0xff] %v10903_v14  ;;  %v10909_v61 = vld [vmem:[%s11377_s4 + $0x68] sm:$0xff]  ;;  %v10915_v27 = vld [vmem:[%s11377_s4 + $0x78] sm:$0xff] }
 0xc62   :  { %3786 = vmatpush1.msra.mxu0 %v10897_v57  ;;  %3857 = vmatpush1.msra.mxu1 %v10903_v14  ;;  %12921 = vst [vmem:[#allocation101_spill] sm:$0xff] %v10909_v61  ;;  %12922 = vst [vmem:[#allocation102_spill] sm:$0xff] %v10915_v27  ;;  %v10921_v57 = vld [vmem:[%s11377_s4 + $0x60] sm:$0xff]  ;;  %v10927_v14 = vld [vmem:[%s11377_s4 + $0x70] sm:$0xff] }
 0xc63   :  { %3787 = vmatprep.subr.mxu0 %v10909_v61  ;;  %3858 = vmatprep.subr.mxu1 %v10915_v27  ;;  %12923 = vst [vmem:[#allocation103_spill] sm:$0xff] %v10921_v57  ;;  %12924 = vst [vmem:[#allocation104_spill] sm:$0xff] %v10927_v14  ;;  %v10933_v61 = vld [vmem:[%s11377_s4 + $0x48] sm:$0xff]  ;;  %v10939_v27 = vld [vmem:[%s11377_s4 + $0x58] sm:$0xff] }
 0xc64   :  { %3788 = vmatpush1.msra.mxu0 %v10921_v57  ;;  %3859 = vmatpush1.msra.mxu1 %v10927_v14  ;;  %12925 = vst [vmem:[#allocation105_spill] sm:$0xff] %v10933_v61  ;;  %12926 = vst [vmem:[#allocation106_spill] sm:$0xff] %v10939_v27  ;;  %v10945_v57 = vld [vmem:[%s11377_s4 + $0x40] sm:$0xff]  ;;  %v10951_v14 = vld [vmem:[%s11377_s4 + $0x50] sm:$0xff] }
 0xc65   :  { %3789 = vmatprep.subr.mxu0 %v10933_v61  ;;  %3860 = vmatprep.subr.mxu1 %v10939_v27  ;;  %12927 = vst [vmem:[#allocation107_spill] sm:$0xff] %v10945_v57  ;;  %12928 = vst [vmem:[#allocation108_spill] sm:$0xff] %v10951_v14  ;;  %v10957_v61 = vld [vmem:[%s11377_s4 + $0x28] sm:$0xff]  ;;  %v10963_v27 = vld [vmem:[%s11377_s4 + $0x38] sm:$0xff] }
 0xc66   :  { %3790 = vmatpush1.msra.mxu0 %v10945_v57  ;;  %3861 = vmatpush1.msra.mxu1 %v10951_v14  ;;  %12929 = vst [vmem:[#allocation109_spill] sm:$0xff] %v10957_v61  ;;  %12930 = vst [vmem:[#allocation110_spill] sm:$0xff] %v10963_v27  ;;  %v10969_v57 = vld [vmem:[%s11377_s4 + $0x20] sm:$0xff]  ;;  %v10975_v14 = vld [vmem:[%s11377_s4 + $0x30] sm:$0xff] }
 0xc67   :  { %3791 = vmatprep.subr.mxu0 %v10957_v61  ;;  %3862 = vmatprep.subr.mxu1 %v10963_v27  ;;  %12931 = vst [vmem:[#allocation111_spill] sm:$0xff] %v10969_v57  ;;  %12932 = vst [vmem:[#allocation112_spill] sm:$0xff] %v10975_v14  ;;  %v10981_v61 = vld [vmem:[%s11377_s4 + $0x8] sm:$0xff]  ;;  %v10987_v27 = vld [vmem:[%s11377_s4 + $0x18] sm:$0xff] }
 0xc68   :  { %3792 = vmatpush1.msra.mxu0 %v10969_v57  ;;  %3863 = vmatpush1.msra.mxu1 %v10975_v14  ;;  %12933 = vst [vmem:[#allocation113_spill] sm:$0xff] %v10981_v61  ;;  %12934 = vst [vmem:[#allocation114_spill] sm:$0xff] %v10987_v27  ;;  %v10993_v57 = vld [vmem:[%s11377_s4] sm:$0xff] }
 0xc69   :  { %3793 = vmatprep.subr.mxu0 %v10981_v61  ;;  %3864 = vmatprep.subr.mxu1 %v10987_v27  ;;  %12935 = vst [vmem:[#allocation115_spill] sm:$0xff] %v10993_v57  ;;  %v11000_v61 = vld [vmem:[%s11377_s4 + $0x10] sm:$0xff] }
 0xc6a   :  { %3794 = vmatpush1.msra.mxu0 %v10993_v57  ;;  %3827 = vmatprep.mubr.f32.mxu0 %v11995_v53  ;;  %12936 = vst [vmem:[#allocation116_spill] sm:$0xff] %v11000_v61 }
 0xc6b   :  { %3865 = vmatpush1.msra.mxu1 %v11000_v61  ;;  %3898 = vmatprep.mubr.f32.mxu1 %v11995_v53 }
 0xc6c   :  { %3927 = vmatprep.subr.mxu0 %v9925_v63  ;;  %3998 = vmatprep.subr.mxu1 %v9931_v59  ;;  %v12939_v59 = vld [vmem:[#allocation154_spill] sm:$0xff] }
 0xce9   :  { %v11006_v27 = vpop.f32.mrf.mxu0  ;;  %v11008_v14 = vpop.f32.mrf.mxu1 }
 0xceb   :  { %v11010_v57 = vpop.f32.mrf.mxu0  ;;  %v11012_v37 = vpop.f32.mrf.mxu1 }
 0xd0a   :  { %v3665_v11 = vpop.f32.mrf.mxu0  ;;  %v3736_v49 = vpop.f32.mrf.mxu1 }
 0xd0b   :  { %v3741_v5 = vadd.f32 %v3665_v11, %v12937_v19  ;;  %v3743_v15 = vadd.f32 %v3736_v49, %v12940_v4  ;;  %v5327_v49 = vld [vmem:[%s11375_s5 + $0x1b8] sm:$0xff] }
 0xd0c   :  { %v3667_v3 = vpop.f32.mrf.mxu0  ;;  %v3738_v61 = vpop.f32.mrf.mxu1 }
 0xd0d   :  { %v3745_v7 = vmul.f32 0.5, %v3741_v5  ;;  %v3742_v55 = vadd.f32 %v3667_v3, %v12938_v32  ;;  %v3744_v51 = vadd.f32 %v3738_v61, %v12939_v59  ;;  %v3747_v9 = vmul.f32 0.5, %v3743_v15  ;;  %v5328_v61 = vld [vmem:[%s11375_s5 + $0x1a0] sm:$0xff]  ;;  %v5330_v59 = vld [vmem:[%s11375_s5 + $0x188] sm:$0xff] }
 0xd0f   :  { %4704 = vtanh.f32 %v3745_v7  ;;  %v3746_v63 = vmul.f32 0.5, %v3742_v55 }
 0xd11   :  { %4706 = vtanh.f32 %v3746_v63  ;;  %v5329_v63 = vld [vmem:[%s11375_s5 + $0x1b0] sm:$0xff] }
 0xd12   :  { %4708 = vtanh.f32 %v3744_v51 }
 0xd13   :  { %4710 = vtanh.f32 %v3747_v9  ;;  %v5326_v9 = vld [vmem:[%s11375_s5 + $0x1a8] sm:$0xff] }
 0xd1c   :  { %v4705_v60 = vpop.eup %4704 }
 0xd1d   :  { %v3751_v50 = vmul.f32 0.5, %v4705_v60  ;;  %v5325_v60 = vld [vmem:[%s11375_s5 + $0x1d0] sm:$0xff] }
 0xd1e   :  { %v4707_v40 = vpop.eup %4706 }
 0xd1f   :  { %v3754_v34 = vadd.f32 0.5, %v3751_v50  ;;  %v3752_v19 = vmul.f32 0.5, %v4707_v40  ;;  %v4709_v11 = vpop.eup %4708  ;;  %v5323_v40 = vld [vmem:[%s11375_s5 + $0x1d8] sm:$0xff]  ;;  %v5324_v50 = vld [vmem:[%s11375_s5 + $0x1c0] sm:$0xff] }
 0xd20   :  { %v4711_v55 = vpop.eup %4710 }
 0xd21   :  { %v3755_v16 = vadd.f32 0.5, %v3752_v19  ;;  %v3759_v5 = vmul.f32 %v4709_v11, %v3754_v34  ;;  %v3753_v51 = vmul.f32 0.5, %v4711_v55  ;;  %v5320_v34 = vld [vmem:[%s11375_s5 + $0x1e0] sm:$0xff]  ;;  %v5331_v19 = vld [vmem:[%s11375_s5 + $0x198] sm:$0xff] }
 0xd22   :  { %v5332_v11 = vld [vmem:[%s11375_s5 + $0x180] sm:$0xff]  ;;  %v5335_v55 = vld [vmem:[%s11375_s5 + $0x178] sm:$0xff] }
 0xd23   :  { %v3758_v32 = vmul.f32 %v3755_v16, %v9947_v1  ;;  %v3756_v3 = vadd.f32 0.5, %v3753_v51  ;;  %v5321_v16 = vld [vmem:[%s11375_s5 + $0x1f0] sm:$0xff]  ;;  %v5322_v1 = vld [vmem:[%s11375_s5 + $0x1c8] sm:$0xff]  ;;  %v5336_v51 = vld [vmem:[%s11375_s5 + $0x160] sm:$0xff] }
 0xd25   :  { %v11019_v7 = vadd.f32 %v3759_v5, %v3758_v32  ;;  %v5333_v5 = vld [vmem:[%s11375_s5 + $0x190] sm:$0xff]  ;;  %v5334_v32 = vld [vmem:[%s11375_s5 + $0x168] sm:$0xff] }
 0xd27   :  { %4712 = vtanh.f32 %v11019_v7 }
 0xd34   :  { %v4713_v4 = vpop.eup %4712 }
 0xd35   :  { %v11022_v15 = vmul.f32 %v4713_v4, %v3756_v3  ;;  %v5337_v3 = vld [vmem:[%s11375_s5 + $0x170] sm:$0xff]  ;;  %v5338_v4 = vld [vmem:[%s11375_s5 + $0x148] sm:$0xff] }
 0xd37   :  { %3828 = vmatmul.mubr.f32.vlgmr.msra.gmra.mxu0 %v11022_v15  ;;  %3899 = vmatmul.mubr.f32.vlgmr.msra.gmra.mxu1 %v11022_v15 }
 0xd38   :  { %3928 = vmatpush1.msra.mxu0 %v5320_v34  ;;  %3999 = vmatpush1.msra.mxu1 %v5321_v16  ;;  %v5339_v34 = vld [vmem:[%s11375_s5 + $0x158] sm:$0xff]  ;;  %v5340_v16 = vld [vmem:[%s11375_s5 + $0x140] sm:$0xff] }
 0xd39   :  { %3929 = vmatprep.subr.mxu0 %v5322_v1  ;;  %4000 = vmatprep.subr.mxu1 %v5323_v40  ;;  %v5341_v1 = vld [vmem:[%s11375_s5 + $0x150] sm:$0xff]  ;;  %v12951_v40 = vld [vmem:[#allocation143_spill] sm:$0xff] }
 0xd3a   :  { %3930 = vmatpush1.msra.mxu0 %v5324_v50  ;;  %4001 = vmatpush1.msra.mxu1 %v5325_v60  ;;  %v12952_v50 = vld [vmem:[#allocation144_spill] sm:$0xff]  ;;  %v12953_v60 = vld [vmem:[#allocation146_spill] sm:$0xff] }
 0xd3b   :  { %3931 = vmatprep.subr.mxu0 %v5326_v9  ;;  %4002 = vmatprep.subr.mxu1 %v5327_v49  ;;  %v12954_v9 = vld [vmem:[#allocation145_spill] sm:$0xff]  ;;  %v12955_v49 = vld [vmem:[#allocation135_spill] sm:$0xff] }
 0xd3c   :  { %3932 = vmatpush1.msra.mxu0 %v5328_v61  ;;  %4003 = vmatpush1.msra.mxu1 %v5329_v63  ;;  %v12956_v61 = vld [vmem:[#allocation136_spill] sm:$0xff]  ;;  %v12957_v63 = vld [vmem:[#allocation138_spill] sm:$0xff] }
 0xd3d   :  { %3933 = vmatprep.subr.mxu0 %v5330_v59  ;;  %4004 = vmatprep.subr.mxu1 %v5331_v19  ;;  %v12958_v59 = vld [vmem:[#allocation137_spill] sm:$0xff]  ;;  %v12959_v19 = vld [vmem:[#allocation159_spill] sm:$0xff] }
 0xd3e   :  { %3934 = vmatpush1.msra.mxu0 %v5332_v11  ;;  %4005 = vmatpush1.msra.mxu1 %v5333_v5  ;;  %v12960_v11 = vld [vmem:[#allocation161_spill] sm:$0xff]  ;;  %v12961_v5 = vld [vmem:[#allocation162_spill] sm:$0xff] }
 0xd3f   :  { %3935 = vmatprep.subr.mxu0 %v5334_v32  ;;  %4006 = vmatprep.subr.mxu1 %v5335_v55  ;;  %v12962_v32 = vld [vmem:[#allocation160_spill] sm:$0xff] }
 0xd40   :  { %3936 = vmatpush1.msra.mxu0 %v5336_v51  ;;  %4007 = vmatpush1.msra.mxu1 %v5337_v3  ;;  %v12963_v55 = vld [vmem:[#allocation4_spill] sm:$0xff]  ;;  %v12964_v51 = vld [vmem:[#allocation5_spill] sm:$0xff]  ;;  %v12965_v3 = vld [vmem:[#allocation6_spill] sm:$0xff] }
 0xd41   :  { %3937 = vmatprep.subr.mxu0 %v5338_v4  ;;  %4008 = vmatprep.subr.mxu1 %v5339_v34  ;;  %v12966_v4 = vld [vmem:[#allocation7_spill] sm:$0xff]  ;;  %v12967_v34 = vld [vmem:[#allocation8_spill] sm:$0xff] }
 0xd42   :  { %3938 = vmatpush1.msra.mxu0 %v5340_v16  ;;  %4009 = vmatpush1.msra.mxu1 %v5341_v1  ;;  %v12968_v16 = vld [vmem:[#allocation9_spill] sm:$0xff]  ;;  %v12969_v1 = vld [vmem:[#allocation10_spill] sm:$0xff] }
 0xd43   :  { %3939 = vmatprep.subr.mxu0 %v9979_v36  ;;  %4010 = vmatprep.subr.mxu1 %v9985_v44  ;;  %v12941_v36 = vld [vmem:[#allocation134_spill] sm:$0xff]  ;;  %v12942_v44 = vld [vmem:[#allocation139_spill] sm:$0xff] }
 0xd44   :  { %3940 = vmatpush1.msra.mxu0 %v9991_v48  ;;  %4011 = vmatpush1.msra.mxu1 %v9997_v52  ;;  %v12943_v48 = vld [vmem:[#allocation140_spill] sm:$0xff]  ;;  %v12944_v52 = vld [vmem:[#allocation142_spill] sm:$0xff] }
 0xd45   :  { %3941 = vmatprep.subr.mxu0 %v10003_v41  ;;  %4012 = vmatprep.subr.mxu1 %v10009_v8  ;;  %v12945_v41 = vld [vmem:[#allocation141_spill] sm:$0xff] }
 0xd46   :  { %3942 = vmatpush1.msra.mxu0 %v10015_v31  ;;  %4013 = vmatpush1.msra.mxu1 %v10021_v33  ;;  %v12946_v8 = vld [vmem:[#allocation133_spill] sm:$0xff] }
 0xd47   :  { %3943 = vmatprep.subr.mxu0 %v10027_v17  ;;  %4014 = vmatprep.subr.mxu1 %v10033_v18 }
 0xd48   :  { %3944 = vmatpush1.msra.mxu0 %v10039_v35  ;;  %4015 = vmatpush1.msra.mxu1 %v10045_v54  ;;  %v12947_v54 = vld [vmem:[#allocation3_spill] sm:$0xff] }
 0xd49   :  { %3945 = vmatprep.subr.mxu0 %v10051_v62  ;;  %4016 = vmatprep.subr.mxu1 %v10057_v38 }
 0xd4a   :  { %3946 = vmatpush1.msra.mxu0 %v10063_v43  ;;  %4017 = vmatpush1.msra.mxu1 %v10069_v0 }
 0xd4b   :  { %3947 = vmatprep.subr.mxu0 %v10075_v39  ;;  %4018 = vmatprep.subr.mxu1 %v10081_v12 }
 0xd4c   :  { %3948 = vmatpush1.msra.mxu0 %v10087_v13  ;;  %4019 = vmatpush1.msra.mxu1 %v10093_v6 }
 0xd4d   :  { %3949 = vmatprep.subr.mxu0 %v10099_v20  ;;  %4020 = vmatprep.subr.mxu1 %v10105_v21  ;;  %v12948_v20 = vld [vmem:[#allocation124_spill] sm:$0xff] }
 0xd4e   :  { %3950 = vmatpush1.msra.mxu0 %v10111_v22  ;;  %4021 = vmatpush1.msra.mxu1 %v10117_v23 }
 0xd4f   :  { %3951 = vmatprep.subr.mxu0 %v10123_v24  ;;  %4022 = vmatprep.subr.mxu1 %v10129_v25 }
 0xd50   :  { %3952 = vmatpush1.msra.mxu0 %v10135_v26  ;;  %4023 = vmatpush1.msra.mxu1 %v10141_v28 }
 0xd51   :  { %3953 = vmatprep.subr.mxu0 %v10147_v45  ;;  %4024 = vmatprep.subr.mxu1 %v10153_v46 }
 0xd52   :  { %3954 = vmatpush1.msra.mxu0 %v10159_v47  ;;  %4025 = vmatpush1.msra.mxu1 %v10165_v42  ;;  %v12949_v47 = vld [vmem:[#allocation163_spill] sm:$0xff] }
 0xd53   :  { %3955 = vmatprep.subr.mxu0 %v10171_v58  ;;  %4026 = vmatprep.subr.mxu1 %v10177_v29 }
 0xd54   :  { %3956 = vmatpush1.msra.mxu0 %v10183_v30  ;;  %4027 = vmatpush1.msra.mxu1 %v10189_v10 }
 0xd55   :  { %3957 = vmatprep.subr.mxu0 %v12941_v36  ;;  %4028 = vmatprep.subr.mxu1 %v12942_v44  ;;  %v12970_v36 = vld [vmem:[#allocation11_spill] sm:$0xff]  ;;  %v12971_v44 = vld [vmem:[#allocation12_spill] sm:$0xff] }
 0xd56   :  { %3958 = vmatpush1.msra.mxu0 %v12943_v48  ;;  %4029 = vmatpush1.msra.mxu1 %v12944_v52  ;;  %v12972_v48 = vld [vmem:[#allocation13_spill] sm:$0xff]  ;;  %v12973_v52 = vld [vmem:[#allocation14_spill] sm:$0xff] }
 0xd57   :  { %3991 = vmatprep.mubr.f32.mxu0 %v11995_v53  ;;  %4062 = vmatprep.mubr.f32.mxu1 %v11995_v53 }
 0xd58   :  { %4076 = vmatprep.subr.mxu0 %v12945_v41  ;;  %4147 = vmatprep.subr.mxu1 %v12946_v8  ;;  %v12974_v41 = vld [vmem:[#allocation15_spill] sm:$0xff]  ;;  %v12975_v8 = vld [vmem:[#allocation16_spill] sm:$0xff] }
 0xdf7   :  { %v3829_v31 = vpop.f32.mrf.mxu0  ;;  %v3900_v33 = vpop.f32.mrf.mxu1 }
 0xdf8   :  { %v3830_v17 = vadd.f32 %v3829_v31, %v11006_v27  ;;  %v3901_v6 = vadd.f32 %v3900_v33, %v11008_v14  ;;  %v12950_v14 = vld [vmem:[#allocation164_spill] sm:$0xff]  ;;  %v12976_v31 = vld [vmem:[#allocation17_spill] sm:$0xff]  ;;  %v12977_v33 = vld [vmem:[#allocation18_spill] sm:$0xff] }
 0xdf9   :  { %v3831_v18 = vpop.f32.mrf.mxu0  ;;  %v3902_v35 = vpop.f32.mrf.mxu1 }
 0xdfa   :  { %v3905_v62 = vadd.f32 %v3830_v17, %v12947_v54  ;;  %v3832_v38 = vadd.f32 %v3831_v18, %v11010_v57  ;;  %v3903_v39 = vadd.f32 %v3902_v35, %v11012_v37  ;;  %v3907_v21 = vadd.f32 %v3901_v6, %v12948_v20  ;;  %v12978_v17 = vld [vmem:[#allocation19_spill] sm:$0xff]  ;;  %v12979_v18 = vld [vmem:[#allocation20_spill] sm:$0xff]  ;;  %v12980_v35 = vld [vmem:[#allocation21_spill] sm:$0xff] }
 0xdfb   :  { %v12988_v6 = vld [vmem:[#allocation29_spill] sm:$0xff] }
 0xdfc   :  { %v3909_v43 = vmul.f32 0.5, %v3905_v62  ;;  %v3906_v0 = vadd.f32 %v3832_v38, %v6922_v56  ;;  %v3908_v13 = vadd.f32 %v3903_v39, %v6929_v2  ;;  %v3911_v22 = vmul.f32 0.5, %v3907_v21  ;;  %v12981_v62 = vld [vmem:[#allocation22_spill] sm:$0xff]  ;;  %v12982_v38 = vld [vmem:[#allocation23_spill] sm:$0xff] }
 0xdfd   :  { %v12985_v39 = vld [vmem:[#allocation26_spill] sm:$0xff] }
 0xdfe   :  { %4714 = vtanh.f32 %v3909_v43  ;;  %v3910_v12 = vmul.f32 0.5, %v3906_v0  ;;  %v12983_v43 = vld [vmem:[#allocation24_spill] sm:$0xff]  ;;  %v12984_v0 = vld [vmem:[#allocation25_spill] sm:$0xff]  ;;  %v12989_v21 = vld [vmem:[#allocation30_spill] sm:$0xff] }
 0xe00   :  { %4716 = vtanh.f32 %v3910_v12  ;;  %v12986_v12 = vld [vmem:[#allocation27_spill] sm:$0xff] }
 0xe01   :  { %4718 = vtanh.f32 %v3908_v13  ;;  %v12987_v13 = vld [vmem:[#allocation28_spill] sm:$0xff] }
 0xe02   :  { %4720 = vtanh.f32 %v3911_v22  ;;  %v12990_v22 = vld [vmem:[#allocation31_spill] sm:$0xff] }
 0xe0b   :  { %v4715_v23 = vpop.eup %4714 }
 0xe0c   :  { %v3915_v24 = vmul.f32 0.5, %v4715_v23  ;;  %v12991_v23 = vld [vmem:[#allocation32_spill] sm:$0xff] }
 0xe0d   :  { %v4717_v25 = vpop.eup %4716 }
 0xe0e   :  { %v3918_v26 = vadd.f32 0.5, %v3915_v24  ;;  %v3916_v28 = vmul.f32 0.5, %v4717_v25  ;;  %v4719_v46 = vpop.eup %4718  ;;  %v12992_v24 = vld [vmem:[#allocation33_spill] sm:$0xff]  ;;  %v12993_v25 = vld [vmem:[#allocation34_spill] sm:$0xff] }
 0xe0f   :  { %v4721_v30 = vpop.eup %4720 }
 0xe10   :  { %v3919_v45 = vadd.f32 0.5, %v3916_v28  ;;  %v3923_v58 = vmul.f32 %v4719_v46, %v3918_v26  ;;  %v3917_v10 = vmul.f32 0.5, %v4721_v30  ;;  %v12994_v26 = vld [vmem:[#allocation35_spill] sm:$0xff]  ;;  %v12995_v28 = vld [vmem:[#allocation36_spill] sm:$0xff]  ;;  %v12997_v46 = vld [vmem:[#allocation38_spill] sm:$0xff] }
 0xe11   :  { %v13001_v30 = vld [vmem:[#allocation42_spill] sm:$0xff] }
 0xe12   :  { %v3922_v42 = vmul.f32 %v3919_v45, %v12949_v47  ;;  %v3920_v27 = vadd.f32 0.5, %v3917_v10  ;;  %v12996_v45 = vld [vmem:[#allocation37_spill] sm:$0xff]  ;;  %v12998_v47 = vld [vmem:[#allocation39_spill] sm:$0xff] }
 0xe13   :  { %v13002_v10 = vld [vmem:[#allocation43_spill] sm:$0xff] }
 0xe14   :  { %v11145_v29 = vadd.f32 %v3923_v58, %v3922_v42  ;;  %v12999_v42 = vld [vmem:[#allocation40_spill] sm:$0xff]  ;;  %v13000_v58 = vld [vmem:[#allocation41_spill] sm:$0xff] }
 0xe16   :  { %4722 = vtanh.f32 %v11145_v29 }
 0xe23   :  { %v4723_v37 = vpop.eup %4722 }
 0xe24   :  { %v3926_v57 = vmul.f32 %v4723_v37, %v3920_v27  ;;  %v13003_v27 = vld [vmem:[#allocation44_spill] sm:$0xff]  ;;  %v13004_v37 = vld [vmem:[#allocation45_spill] sm:$0xff] }
 0xe26   :  { %3992 = vmatmul.mubr.f32.vlgmr.msra.gmra.mxu0 %v3926_v57  ;;  %4063 = vmatmul.mubr.f32.vlgmr.msra.gmra.mxu1 %v3926_v57  ;;  %v13005_v57 = vld [vmem:[#allocation46_spill] sm:$0xff] }
 0xe27   :  { %4077 = vmatpush1.msra.mxu0 %v12950_v14  ;;  %4148 = vmatpush1.msra.mxu1 %v12951_v40  ;;  %v13006_v14 = vld [vmem:[#allocation47_spill] sm:$0xff]  ;;  %v13007_v40 = vld [vmem:[#allocation48_spill] sm:$0xff] }
 0xe28   :  { %4078 = vmatprep.subr.mxu0 %v12952_v50  ;;  %4149 = vmatprep.subr.mxu1 %v12953_v60  ;;  %v13008_v50 = vld [vmem:[#allocation49_spill] sm:$0xff]  ;;  %v13009_v60 = vld [vmem:[#allocation50_spill] sm:$0xff] }
 0xe29   :  { %4079 = vmatpush1.msra.mxu0 %v12954_v9  ;;  %4150 = vmatpush1.msra.mxu1 %v12955_v49  ;;  %v13010_v9 = vld [vmem:[#allocation51_spill] sm:$0xff]  ;;  %v13011_v49 = vld [vmem:[#allocation52_spill] sm:$0xff] }
 0xe2a   :  { %4080 = vmatprep.subr.mxu0 %v12956_v61  ;;  %4151 = vmatprep.subr.mxu1 %v12957_v63  ;;  %v13012_v61 = vld [vmem:[#allocation53_spill] sm:$0xff]  ;;  %v13013_v63 = vld [vmem:[#allocation54_spill] sm:$0xff] }
 0xe2b   :  { %4081 = vmatpush1.msra.mxu0 %v12958_v59  ;;  %4152 = vmatpush1.msra.mxu1 %v12959_v19  ;;  %v13014_v59 = vld [vmem:[#allocation55_spill] sm:$0xff]  ;;  %v13015_v19 = vld [vmem:[#allocation56_spill] sm:$0xff] }
 0xe2c   :  { %4082 = vmatprep.subr.mxu0 %v12960_v11  ;;  %4153 = vmatprep.subr.mxu1 %v12961_v5  ;;  %v13016_v11 = vld [vmem:[#allocation57_spill] sm:$0xff]  ;;  %v13017_v5 = vld [vmem:[#allocation58_spill] sm:$0xff] }
 0xe2d   :  { %4083 = vmatpush1.msra.mxu0 %v12962_v32  ;;  %4154 = vmatpush1.msra.mxu1 %v12963_v55  ;;  %v13018_v32 = vld [vmem:[#allocation59_spill] sm:$0xff]  ;;  %v13019_v55 = vld [vmem:[#allocation60_spill] sm:$0xff] }
 0xe2e   :  { %4084 = vmatprep.subr.mxu0 %v12964_v51  ;;  %4155 = vmatprep.subr.mxu1 %v12965_v3  ;;  %v13020_v51 = vld [vmem:[#allocation61_spill] sm:$0xff]  ;;  %v13021_v3 = vld [vmem:[#allocation62_spill] sm:$0xff] }
 0xe2f   :  { %4085 = vmatpush1.msra.mxu0 %v12966_v4  ;;  %4156 = vmatpush1.msra.mxu1 %v12967_v34  ;;  %v13023_v4 = vld [vmem:[#allocation64_spill] sm:$0xff]  ;;  %v13024_v34 = vld [vmem:[#allocation65_spill] sm:$0xff] }
 0xe30   :  { %4086 = vmatprep.subr.mxu0 %v12968_v16  ;;  %4157 = vmatprep.subr.mxu1 %v12969_v1  ;;  %v13025_v16 = vld [vmem:[#allocation66_spill] sm:$0xff]  ;;  %v13026_v1 = vld [vmem:[#allocation67_spill] sm:$0xff] }
 0xe31   :  { %4087 = vmatpush1.msra.mxu0 %v12970_v36  ;;  %4158 = vmatpush1.msra.mxu1 %v12971_v44  ;;  %v13027_v36 = vld [vmem:[#allocation68_spill] sm:$0xff]  ;;  %v13028_v44 = vld [vmem:[#allocation69_spill] sm:$0xff] }
 0xe32   :  { %4088 = vmatprep.subr.mxu0 %v12972_v48  ;;  %4159 = vmatprep.subr.mxu1 %v12973_v52  ;;  %v13029_v48 = vld [vmem:[#allocation70_spill] sm:$0xff]  ;;  %v13030_v52 = vld [vmem:[#allocation71_spill] sm:$0xff] }
 0xe33   :  { %4089 = vmatpush1.msra.mxu0 %v12974_v41  ;;  %4160 = vmatpush1.msra.mxu1 %v12975_v8  ;;  %v13031_v41 = vld [vmem:[#allocation72_spill] sm:$0xff]  ;;  %v13032_v8 = vld [vmem:[#allocation73_spill] sm:$0xff] }
 0xe34   :  { %4090 = vmatprep.subr.mxu0 %v12976_v31  ;;  %4161 = vmatprep.subr.mxu1 %v12977_v33  ;;  %v13033_v31 = vld [vmem:[#allocation74_spill] sm:$0xff]  ;;  %v13034_v33 = vld [vmem:[#allocation75_spill] sm:$0xff] }
 0xe35   :  { %4091 = vmatpush1.msra.mxu0 %v12978_v17  ;;  %4162 = vmatpush1.msra.mxu1 %v12979_v18  ;;  %v13035_v17 = vld [vmem:[#allocation76_spill] sm:$0xff]  ;;  %v13036_v18 = vld [vmem:[#allocation77_spill] sm:$0xff] }
 0xe36   :  { %4092 = vmatprep.subr.mxu0 %v12980_v35  ;;  %4163 = vmatprep.subr.mxu1 %v12981_v62  ;;  %v13037_v35 = vld [vmem:[#allocation78_spill] sm:$0xff]  ;;  %v13038_v62 = vld [vmem:[#allocation79_spill] sm:$0xff] }
 0xe37   :  { %4093 = vmatpush1.msra.mxu0 %v12982_v38  ;;  %4164 = vmatpush1.msra.mxu1 %v12983_v43  ;;  %v13039_v38 = vld [vmem:[#allocation80_spill] sm:$0xff]  ;;  %v13040_v43 = vld [vmem:[#allocation81_spill] sm:$0xff] }
 0xe38   :  { %4094 = vmatprep.subr.mxu0 %v12984_v0  ;;  %4165 = vmatprep.subr.mxu1 %v12985_v39  ;;  %v13041_v0 = vld [vmem:[#allocation82_spill] sm:$0xff]  ;;  %v13042_v39 = vld [vmem:[#allocation83_spill] sm:$0xff] }
 0xe39   :  { %4095 = vmatpush1.msra.mxu0 %v12986_v12  ;;  %4166 = vmatpush1.msra.mxu1 %v12987_v13  ;;  %v13043_v12 = vld [vmem:[#allocation84_spill] sm:$0xff]  ;;  %v13044_v13 = vld [vmem:[#allocation85_spill] sm:$0xff] }
 0xe3a   :  { %4096 = vmatprep.subr.mxu0 %v12988_v6  ;;  %4167 = vmatprep.subr.mxu1 %v12989_v21  ;;  %v13045_v6 = vld [vmem:[#allocation86_spill] sm:$0xff]  ;;  %v13046_v21 = vld [vmem:[#allocation87_spill] sm:$0xff] }
 0xe3b   :  { %4097 = vmatpush1.msra.mxu0 %v12990_v22  ;;  %4168 = vmatpush1.msra.mxu1 %v12991_v23  ;;  %v13047_v22 = vld [vmem:[#allocation88_spill] sm:$0xff]  ;;  %v13048_v23 = vld [vmem:[#allocation89_spill] sm:$0xff] }
 0xe3c   :  { %4098 = vmatprep.subr.mxu0 %v12992_v24  ;;  %4169 = vmatprep.subr.mxu1 %v12993_v25  ;;  %v13049_v24 = vld [vmem:[#allocation90_spill] sm:$0xff]  ;;  %v13050_v25 = vld [vmem:[#allocation91_spill] sm:$0xff] }
 0xe3d   :  { %4099 = vmatpush1.msra.mxu0 %v12994_v26  ;;  %4170 = vmatpush1.msra.mxu1 %v12995_v28  ;;  %v13051_v26 = vld [vmem:[#allocation92_spill] sm:$0xff]  ;;  %v13052_v28 = vld [vmem:[#allocation93_spill] sm:$0xff] }
 0xe3e   :  { %4100 = vmatprep.subr.mxu0 %v12996_v45  ;;  %4171 = vmatprep.subr.mxu1 %v12997_v46  ;;  %v13053_v45 = vld [vmem:[#allocation94_spill] sm:$0xff]  ;;  %v13054_v46 = vld [vmem:[#allocation95_spill] sm:$0xff] }
 0xe3f   :  { %4101 = vmatpush1.msra.mxu0 %v12998_v47  ;;  %4172 = vmatpush1.msra.mxu1 %v12999_v42  ;;  %v13055_v47 = vld [vmem:[#allocation96_spill] sm:$0xff]  ;;  %v13056_v42 = vld [vmem:[#allocation97_spill] sm:$0xff] }
 0xe40   :  { %4102 = vmatprep.subr.mxu0 %v13000_v58  ;;  %4173 = vmatprep.subr.mxu1 %v13001_v30  ;;  %v13057_v58 = vld [vmem:[#allocation98_spill] sm:$0xff]  ;;  %v13058_v30 = vld [vmem:[#allocation99_spill] sm:$0xff] }
 0xe41   :  { %4103 = vmatpush1.msra.mxu0 %v13002_v10  ;;  %4174 = vmatpush1.msra.mxu1 %v13003_v27  ;;  %v13059_v10 = vld [vmem:[#allocation100_spill] sm:$0xff]  ;;  %v13060_v27 = vld [vmem:[#allocation101_spill] sm:$0xff] }
 0xe42   :  { %4104 = vmatprep.subr.mxu0 %v13004_v37  ;;  %4175 = vmatprep.subr.mxu1 %v13005_v57  ;;  %v13061_v37 = vld [vmem:[#allocation102_spill] sm:$0xff]  ;;  %v13062_v57 = vld [vmem:[#allocation103_spill] sm:$0xff] }
 0xe43   :  { %4105 = vmatpush1.msra.mxu0 %v13006_v14  ;;  %4176 = vmatpush1.msra.mxu1 %v13007_v40  ;;  %v13063_v14 = vld [vmem:[#allocation104_spill] sm:$0xff]  ;;  %v13064_v40 = vld [vmem:[#allocation105_spill] sm:$0xff] }
 0xe44   :  { %4106 = vmatprep.subr.mxu0 %v13008_v50  ;;  %4177 = vmatprep.subr.mxu1 %v13009_v60  ;;  %v13065_v50 = vld [vmem:[#allocation106_spill] sm:$0xff]  ;;  %v13066_v60 = vld [vmem:[#allocation107_spill] sm:$0xff] }
 0xe45   :  { %4107 = vmatpush1.msra.mxu0 %v13010_v9  ;;  %4140 = vmatprep.mubr.f32.mxu0 %v11995_v53  ;;  %v13067_v9 = vld [vmem:[#allocation108_spill] sm:$0xff] }
 0xe46   :  { %4178 = vmatpush1.msra.mxu1 %v13011_v49  ;;  %4211 = vmatprep.mubr.f32.mxu1 %v11995_v53  ;;  %v13068_v49 = vld [vmem:[#allocation109_spill] sm:$0xff] }
 0xe47   :  { %4141 = vmatmul.mubr.f32.vlgmr.msra.gmra.mxu0 %v11022_v15  ;;  %4212 = vmatmul.mubr.f32.vlgmr.msra.gmra.mxu1 %v11022_v15  ;;  %v13022_v15 = vld [vmem:[#allocation63_spill] sm:$0xff] }
 0xe48   :  { %4240 = vmatprep.subr.mxu0 %v13012_v61  ;;  %4311 = vmatprep.subr.mxu1 %v13013_v63  ;;  %v13069_v61 = vld [vmem:[#allocation110_spill] sm:$0xff]  ;;  %v13070_v63 = vld [vmem:[#allocation111_spill] sm:$0xff] }
 0xe49   :  { %4241 = vmatpush1.msra.mxu0 %v13014_v59  ;;  %4312 = vmatpush1.msra.mxu1 %v13015_v19  ;;  %v13071_v59 = vld [vmem:[#allocation112_spill] sm:$0xff]  ;;  %v13072_v19 = vld [vmem:[#allocation113_spill] sm:$0xff] }
 0xe4a   :  { %4242 = vmatprep.subr.mxu0 %v13016_v11  ;;  %4313 = vmatprep.subr.mxu1 %v13017_v5  ;;  %v13073_v11 = vld [vmem:[#allocation114_spill] sm:$0xff]  ;;  %v13074_v5 = vld [vmem:[#allocation115_spill] sm:$0xff] }
 0xe4b   :  { %4243 = vmatpush1.msra.mxu0 %v13018_v32  ;;  %4314 = vmatpush1.msra.mxu1 %v13019_v55  ;;  %v13075_v32 = vld [vmem:[#allocation116_spill] sm:$0xff] }
 0xe4c   :  { %4244 = vmatprep.subr.mxu0 %v13020_v51  ;;  %4315 = vmatprep.subr.mxu1 %v13021_v3 }
 0xe4d   :  { %4245 = vmatpush1.msra.mxu0 %v13022_v15  ;;  %4316 = vmatpush1.msra.mxu1 %v13023_v4 }
 0xe4e   :  { %4246 = vmatprep.subr.mxu0 %v13024_v34  ;;  %4317 = vmatprep.subr.mxu1 %v13025_v16  ;;  %v13076_v16 = vld [vmem:[#allocation155_spill] sm:$0xff] }
 0xe4f   :  { %4247 = vmatpush1.msra.mxu0 %v13026_v1  ;;  %4318 = vmatpush1.msra.mxu1 %v13027_v36 }
 0xe50   :  { %4248 = vmatprep.subr.mxu0 %v13028_v44  ;;  %4319 = vmatprep.subr.mxu1 %v13029_v48 }
 0xe51   :  { %4249 = vmatpush1.msra.mxu0 %v13030_v52  ;;  %4320 = vmatpush1.msra.mxu1 %v13031_v41  ;;  %v13077_v52 = vld [vmem:[#allocation156_spill] sm:$0xff] }
 0xe52   :  { %4250 = vmatprep.subr.mxu0 %v13032_v8  ;;  %4321 = vmatprep.subr.mxu1 %v13033_v31  ;;  %v13078_v31 = vld [vmem:[#allocation158_spill] sm:$0xff] }
 0xe53   :  { %4251 = vmatpush1.msra.mxu0 %v13034_v33  ;;  %4322 = vmatpush1.msra.mxu1 %v13035_v17  ;;  %v13079_v17 = vld [vmem:[#allocation157_spill] sm:$0xff] }
 0xe54   :  { %4252 = vmatprep.subr.mxu0 %v13036_v18  ;;  %4323 = vmatprep.subr.mxu1 %v13037_v35 }
 0xe55   :  { %4253 = vmatpush1.msra.mxu0 %v13038_v62  ;;  %4324 = vmatpush1.msra.mxu1 %v13039_v38 }
 0xe56   :  { %4254 = vmatprep.subr.mxu0 %v13040_v43  ;;  %4325 = vmatprep.subr.mxu1 %v13041_v0 }
 0xe57   :  { %4255 = vmatpush1.msra.mxu0 %v13042_v39  ;;  %4326 = vmatpush1.msra.mxu1 %v13043_v12 }
 0xe58   :  { %4256 = vmatprep.subr.mxu0 %v13044_v13  ;;  %4327 = vmatprep.subr.mxu1 %v13045_v6 }
 0xe59   :  { %4257 = vmatpush1.msra.mxu0 %v13046_v21  ;;  %4328 = vmatpush1.msra.mxu1 %v13047_v22 }
 0xe5a   :  { %4258 = vmatprep.subr.mxu0 %v13048_v23  ;;  %4329 = vmatprep.subr.mxu1 %v13049_v24 }
 0xe5b   :  { %4259 = vmatpush1.msra.mxu0 %v13050_v25  ;;  %4330 = vmatpush1.msra.mxu1 %v13051_v26 }
 0xe5c   :  { %4260 = vmatprep.subr.mxu0 %v13052_v28  ;;  %4331 = vmatprep.subr.mxu1 %v13053_v45  ;;  %v4419_v45 = vld [vmem:[%s11380_s7 + $0x78] sm:$0xff] }
 0xe5d   :  { %4261 = vmatpush1.msra.mxu0 %v13054_v46  ;;  %4332 = vmatpush1.msra.mxu1 %v13055_v47  ;;  %v4417_v46 = vld [vmem:[%s11380_s7 + $0x68] sm:$0xff]  ;;  %v4416_v47 = vld [vmem:[%s11380_s7 + $0x60] sm:$0xff] }
 0xe5e   :  { %4262 = vmatprep.subr.mxu0 %v13056_v42  ;;  %4333 = vmatprep.subr.mxu1 %v13057_v58  ;;  %v4415_v42 = vld [vmem:[%s11380_s7 + $0x58] sm:$0xff]  ;;  %v4414_v58 = vld [vmem:[%s11380_s7 + $0x50] sm:$0xff] }
 0xe5f   :  { %4263 = vmatpush1.msra.mxu0 %v13058_v30  ;;  %4334 = vmatpush1.msra.mxu1 %v13059_v10  ;;  %v4413_v30 = vld [vmem:[%s11380_s7 + $0x48] sm:$0xff]  ;;  %v4412_v10 = vld [vmem:[%s11380_s7 + $0x40] sm:$0xff] }
 0xe60   :  { %4264 = vmatprep.subr.mxu0 %v13060_v27  ;;  %4335 = vmatprep.subr.mxu1 %v13061_v37  ;;  %v4411_v27 = vld [vmem:[%s11380_s7 + $0x38] sm:$0xff]  ;;  %v4410_v37 = vld [vmem:[%s11380_s7 + $0x30] sm:$0xff] }
 0xe61   :  { %4265 = vmatpush1.msra.mxu0 %v13062_v57  ;;  %4336 = vmatpush1.msra.mxu1 %v13063_v14  ;;  %v4409_v57 = vld [vmem:[%s11380_s7 + $0x28] sm:$0xff]  ;;  %v4408_v14 = vld [vmem:[%s11380_s7 + $0x20] sm:$0xff] }
 0xe62   :  { %4266 = vmatprep.subr.mxu0 %v13064_v40  ;;  %4337 = vmatprep.subr.mxu1 %v13065_v50  ;;  %v4407_v40 = vld [vmem:[%s11380_s7 + $0x18] sm:$0xff]  ;;  %v4406_v50 = vld [vmem:[%s11380_s7 + $0x10] sm:$0xff] }
 0xe63   :  { %4267 = vmatpush1.msra.mxu0 %v13066_v60  ;;  %4338 = vmatpush1.msra.mxu1 %v13067_v9  ;;  %v4405_v60 = vld [vmem:[%s11380_s7 + $0x8] sm:$0xff]  ;;  %v4404_v9 = vld [vmem:[%s11380_s7] sm:$0xff] }
 0xe64   :  { %4268 = vmatprep.subr.mxu0 %v13068_v49  ;;  %4339 = vmatprep.subr.mxu1 %v13069_v61 }
 0xe65   :  { %4269 = vmatpush1.msra.mxu0 %v13070_v63  ;;  %4340 = vmatpush1.msra.mxu1 %v13071_v59 }
 0xe66   :  { %4270 = vmatprep.subr.mxu0 %v13072_v19  ;;  %4341 = vmatprep.subr.mxu1 %v13073_v11 }
 0xe67   :  { %4271 = vmatpush1.msra.mxu0 %v13074_v5  ;;  %4304 = vmatprep.mubr.f32.mxu0 %v11995_v53 }
 0xe68   :  { %4342 = vmatpush1.msra.mxu1 %v13075_v32  ;;  %4375 = vmatprep.mubr.f32.mxu1 %v11995_v53 }
 0xe69   :  { %4547 = vmatprep.subr.mxu0 %v11995_v53 }
 0xee6   :  { %v11281_v55 = vpop.f32.mrf.mxu0  ;;  %v11283_v51 = vpop.f32.mrf.mxu1 }
 0xee8   :  { %v11285_v3 = vpop.f32.mrf.mxu0  ;;  %v11287_v15 = vpop.f32.mrf.mxu1 }
 0xf07   :  { %v4142_v4 = vpop.f32.mrf.mxu0  ;;  %v4213_v34 = vpop.f32.mrf.mxu1 }
 0xf08   :  { %v4218_v1 = vadd.f32 %v4142_v4, %v13076_v16  ;;  %v4220_v18 = vadd.f32 %v4213_v34, %v13079_v17 }
 0xf09   :  { %v4144_v36 = vpop.f32.mrf.mxu0  ;;  %v4215_v44 = vpop.f32.mrf.mxu1 }
 0xf0a   :  { %v4222_v48 = vmul.f32 0.5, %v4218_v1  ;;  %v4219_v41 = vadd.f32 %v4144_v36, %v13077_v52  ;;  %v4221_v33 = vadd.f32 %v4215_v44, %v13078_v31  ;;  %v4224_v35 = vmul.f32 0.5, %v4220_v18 }
 0xf0c   :  { %4724 = vtanh.f32 %v4222_v48  ;;  %v4223_v8 = vmul.f32 0.5, %v4219_v41 }
 0xf0e   :  { %4726 = vtanh.f32 %v4223_v8 }
 0xf0f   :  { %4728 = vtanh.f32 %v4221_v33 }
 0xf10   :  { %4730 = vtanh.f32 %v4224_v35 }
 0xf19   :  { %v4725_v62 = vpop.eup %4724 }
 0xf1a   :  { %v4228_v38 = vmul.f32 0.5, %v4725_v62 }
 0xf1b   :  { %v4727_v43 = vpop.eup %4726 }
 0xf1c   :  { %v4231_v0 = vadd.f32 0.5, %v4228_v38  ;;  %v4229_v39 = vmul.f32 0.5, %v4727_v43  ;;  %v4729_v12 = vpop.eup %4728 }
 0xf1d   :  { %v4731_v23 = vpop.eup %4730 }
 0xf1e   :  { %v4232_v13 = vadd.f32 0.5, %v4229_v39  ;;  %v4236_v6 = vmul.f32 %v4729_v12, %v4231_v0  ;;  %v4230_v24 = vmul.f32 0.5, %v4731_v23 }
 0xf20   :  { %v4235_v21 = vmul.f32 %v4232_v13, %v11019_v7  ;;  %v4233_v25 = vadd.f32 0.5, %v4230_v24  ;;  %v4418_v7 = vld [vmem:[%s11380_s7 + $0x70] sm:$0xff] }
 0xf22   :  { %v4237_v22 = vadd.f32 %v4236_v6, %v4235_v21 }
 0xf24   :  { %4732 = vtanh.f32 %v4237_v22 }
 0xf31   :  { %v4733_v26 = vpop.eup %4732 }
 0xf32   :  { %v4239_v28 = vmul.f32 %v4733_v26, %v4233_v25 }
 0xf34   :  { %4305 = vmatmul.mubr.f32.vlgmr.msra.gmra.mxu0 %v4239_v28  ;;  %4376 = vmatmul.mubr.f32.vlgmr.msra.gmra.mxu1 %v4239_v28 }
 0xf35   :  { %4548 = vmatpush3.msra.mxu0 %v4419_v45  ;;  %4579 = vmatprep.mubr.msk.f32.mxu0 %vm5343_vm2, %v11995_v53 }
 0xf36   :  { %4549 = vmatprep.subr.mxu0 %v11995_v53 }
 0xf37   :  { %4550 = vmatpush3.msra.mxu0 %v4418_v7 }
 0xf38   :  { %4551 = vmatprep.subr.mxu0 %v11995_v53 }
 0xf39   :  { %4552 = vmatpush3.msra.mxu0 %v4417_v46 }
 0xf3a   :  { %4553 = vmatprep.subr.mxu0 %v11995_v53 }
 0xf3b   :  { %4554 = vmatpush3.msra.mxu0 %v4416_v47 }
 0xf3c   :  { %4555 = vmatprep.subr.mxu0 %v11995_v53 }
 0xf3d   :  { %4556 = vmatpush3.msra.mxu0 %v4415_v42 }
 0xf3e   :  { %4557 = vmatprep.subr.mxu0 %v11995_v53 }
 0xf3f   :  { %4558 = vmatpush3.msra.mxu0 %v4414_v58 }
 0xf40   :  { %4559 = vmatprep.subr.mxu0 %v11995_v53 }
 0xf41   :  { %4560 = vmatpush3.msra.mxu0 %v4413_v30 }
 0xf42   :  { %4561 = vmatprep.subr.mxu0 %v11995_v53 }
 0xf43   :  { %4562 = vmatpush3.msra.mxu0 %v4412_v10 }
 0xf44   :  { %4563 = vmatprep.subr.mxu0 %v11995_v53 }
 0xf45   :  { %4564 = vmatpush3.msra.mxu0 %v4411_v27 }
 0xf46   :  { %4565 = vmatprep.subr.mxu0 %v11995_v53 }
 0xf47   :  { %4566 = vmatpush3.msra.mxu0 %v4410_v37 }
 0xf48   :  { %4567 = vmatprep.subr.mxu0 %v11995_v53 }
 0xf49   :  { %4568 = vmatpush3.msra.mxu0 %v4409_v57 }
 0xf4a   :  { %4569 = vmatprep.subr.mxu0 %v11995_v53 }
 0xf4b   :  { %4570 = vmatpush3.msra.mxu0 %v4408_v14 }
 0xf4c   :  { %4571 = vmatprep.subr.mxu0 %v11995_v53 }
 0xf4d   :  { %4572 = vmatpush3.msra.mxu0 %v4407_v40 }
 0xf4e   :  { %4573 = vmatprep.subr.mxu0 %v11995_v53 }
 0xf4f   :  { %4574 = vmatpush3.msra.mxu0 %v4406_v50 }
 0xf50   :  { %4575 = vmatprep.subr.mxu0 %v11995_v53 }
 0xf51   :  { %4576 = vmatpush3.msra.mxu0 %v4405_v60 }
 0xf52   :  { %4577 = vmatprep.subr.mxu0 %v11995_v53 }
 0xf53   :  { %4578 = vmatpush3.msra.mxu0 %v4404_v9 }
 0xff4   :  { %v4306_v49 = vpop.f32.mrf.mxu0  ;;  %v4377_v61 = vpop.f32.mrf.mxu1 }
 0xff5   :  { %v4307_v63 = vadd.f32 %v4306_v49, %v11281_v55  ;;  %v4378_v1 = vadd.f32 %v4377_v61, %v11283_v51 }
 0xff6   :  { %v4308_v59 = vpop.f32.mrf.mxu0  ;;  %v4379_v19 = vpop.f32.mrf.mxu1 }
 0xff7   :  { %v4382_v11 = vadd.f32 %v4307_v63, %v12947_v54  ;;  %v4309_v5 = vadd.f32 %v4308_v59, %v11285_v3  ;;  %v4380_v34 = vadd.f32 %v4379_v19, %v11287_v15  ;;  %v4384_v55 = vadd.f32 %v4378_v1, %v12948_v20  ;;  %v4529_v20 = vld [vmem:[%s11381_s8] ss:$0 sm:$0xff] }
 0xff9   :  { %v4386_v32 = vmul.f32 0.5, %v4382_v11  ;;  %v4383_v4 = vadd.f32 %v4309_v5, %v6922_v56  ;;  %v4385_v53 = vadd.f32 %v4380_v34, %v6929_v2  ;;  %v4388_v36 = vmul.f32 0.5, %v4384_v55 }
 0xffb   :  { %4734 = vtanh.f32 %v4386_v32  ;;  %v4387_v16 = vmul.f32 0.5, %v4383_v4 }
 0xffd   :  { %4736 = vtanh.f32 %v4387_v16 }
 0xffe   :  { %4738 = vtanh.f32 %v4385_v53 }
 0xfff   :  { %4740 = vtanh.f32 %v4388_v36 }
0x1008   :  { %v4735_v44 = vpop.eup %4734 }
0x1009   :  { %v4392_v54 = vmul.f32 0.5, %v4735_v44 }
0x100a   :  { %v4737_v48 = vpop.eup %4736 }
0x100b   :  { %v4395_v3 = vadd.f32 0.5, %v4392_v54  ;;  %v4393_v52 = vmul.f32 0.5, %v4737_v48  ;;  %v4739_v41 = vpop.eup %4738 }
0x100c   :  { %v4741_v2 = vpop.eup %4740 }
0x100d   :  { %v4396_v56 = vadd.f32 0.5, %v4393_v52  ;;  %v4400_v8 = vmul.f32 %v4739_v41, %v4395_v3  ;;  %v4394_v33 = vmul.f32 0.5, %v4741_v2 }
0x100f   :  { %v4399_v15 = vmul.f32 %v4396_v56, %v11145_v29  ;;  %v4397_v51 = vadd.f32 0.5, %v4394_v33 }
0x1011   :  { %v4401_v31 = vadd.f32 %v4400_v8, %v4399_v15 }
0x1013   :  { %4742 = vtanh.f32 %v4401_v31 }
0x1020   :  { %v4743_v17 = vpop.eup %4742 }
0x1021   :  { %v4403_v18 = vmul.f32 %v4743_v17, %v4397_v51 }
0x1023   :  { %4580 = vmatmul.mubr.f32.vlgmr.msra.gmra.mxu0 %v4403_v18 }
0x10e3   :  { %v4493_v35 = vpop.f32.mrf.mxu0 }
0x10e4   :  { %v4494_v62 = vadd.f32 %v4529_v20, %v4493_v35 }
0x10e5   :  { %v4581_v38 = vpop.f32.mrf.mxu0 }
0x10e6   :  { %4497 = vst [vmem:[%s11382_s9] sm:$0xff] %v4494_v62 }

</bundles_post_ra>
